<compile_context>
chip_gen: v7x
topology: tpu7x:2x2x1
jax: 0.10.0
libtpu: 0.0.40
codegen_flags: <defaults>
</compile_context>

<pallas_src>
import functools

import jax
import jax.numpy as jnp
from jax.experimental import pallas as pl
from jax.experimental.pallas import tpu as pltpu


def _fused_base_model_kernel(x_ref, w_ref, b_ref, out_ref, mid_ref,
                             buf0, buf1, col_ref):
    """One batch element, all `depth` conv3x3+bias+ReLU layers fused.

    x_ref   : (1, H, W, C)        channel-padded NHWC input (compute dtype)
    w_ref   : (depth, 9*C, C)     packed im2col weights (compute dtype)
    b_ref   : (depth, 1, C)       biases, f32
    out_ref : (1, H, W, C)        final activation, f32
    mid_ref : (1, H, W, C)        activation after layer depth//2, f32
    buf0/1  : (H+2, W+2, C)       VMEM ping-pong activation buffers (halo = 1)
    col_ref : (H*W, 9*C)          VMEM im2col scratch
    """
    _, H, W, C = x_ref.shape
    depth = w_ref.shape[0]
    mid_idx = depth // 2

    # Zero both buffers once per grid step (establishes the zero halo; the
    # interiors are fully overwritten every layer).
    buf0[...] = jnp.zeros_like(buf0)
    buf1[...] = jnp.zeros_like(buf1)
    buf0[1:H + 1, 1:W + 1, :] = x_ref[0]

    bufs = (buf0, buf1)
    for i in range(depth):                      # static, unrolled layer loop
        src = bufs[i % 2]
        dst = bufs[(i + 1) % 2]

        # Build the im2col matrix once: 9 shifted (H, W, C) windows of the
        # padded activation, packed lane-aligned into (H*W, 9*C).
        for dy in range(3):
            for dx in range(3):
                tap = dy * 3 + dx
                col_ref[:, tap * C:(tap + 1) * C] = (
                    src[dy:dy + H, dx:dx + W, :].reshape(H * W, C))

        # One lane-dense MXU matmul per layer, f32 accumulation.
        acc = jnp.dot(col_ref[...], w_ref[i],
                      preferred_element_type=jnp.float32)
        y = jnp.maximum(acc + b_ref[i], 0.0)     # bias + ReLU in f32 (VPU)

        if i == mid_idx:
            mid_ref[0] = y.reshape(H, W, C).astype(mid_ref.dtype)
        if i == depth - 1:
            out_ref[0] = y.reshape(H, W, C).astype(out_ref.dtype)
        else:
            dst[1:H + 1, 1:W + 1, :] = y.reshape(H, W, C).astype(dst.dtype)


def _pack_params(params, cpad, compute_dtype):
    """Pack per-layer (3,3,in_c,out_c) weights + biases into lane-dense,
    channel-padded im2col form: (depth, 9*cpad, cpad) and (depth, 1, cpad).
    Padded rows/columns/bias entries are zero so padded channels stay zero."""
    depth = len(params)
    w_all = jnp.zeros((depth, 9 * cpad, cpad), compute_dtype)
    b_all = jnp.zeros((depth, 1, cpad), jnp.float32)
    for i, (w, b) in enumerate(params):
        in_c, out_c = w.shape[2], w.shape[3]
        w_tap = w.reshape(9, in_c, out_c).astype(compute_dtype)
        w_tap = jnp.pad(w_tap, ((0, 0), (0, cpad - in_c), (0, cpad - out_c)))
        w_all = w_all.at[i].set(w_tap.reshape(9 * cpad, cpad))
        b_all = b_all.at[i, 0, :out_c].set(b.astype(jnp.float32))
    return w_all, b_all


@functools.partial(jax.jit,
                   static_argnames=("depth", "return_mid_feature",
                                    "compute_dtype"))
def base_model_forward(x_nchw, params, depth, return_mid_feature=False,
                       compute_dtype=jnp.bfloat16):
    """Full fused forward pass.  x_nchw: (N, C, H, W) float32."""
    N, c_in, H, W = x_nchw.shape
    chans = [c_in] + [w.shape[-1] for w, _ in params]
    cpad = ((max(chans) + 127) // 128) * 128          # lane-dense channel pad

    # NCHW -> NHWC, zero-pad channels to cpad, cast matmul inputs.
    x = jnp.transpose(x_nchw, (0, 2, 3, 1))
    x = jnp.pad(x, ((0, 0), (0, 0), (0, 0), (0, cpad - c_in)))
    x = x.astype(compute_dtype)

    w_all, b_all = _pack_params(params, cpad, compute_dtype)

    out, mid = pl.pallas_call(
        _fused_base_model_kernel,
        out_shape=(jax.ShapeDtypeStruct((N, H, W, cpad), jnp.float32),
                   jax.ShapeDtypeStruct((N, H, W, cpad), jnp.float32)),
        grid_spec=pltpu.PrefetchScalarGridSpec(
            num_scalar_prefetch=0,
            grid=(N,),
            in_specs=[
                pl.BlockSpec((1, H, W, cpad), lambda n: (n, 0, 0, 0)),
                pl.BlockSpec((depth, 9 * cpad, cpad), lambda n: (0, 0, 0)),
                pl.BlockSpec((depth, 1, cpad), lambda n: (0, 0, 0)),
            ],
            out_specs=[
                pl.BlockSpec((1, H, W, cpad), lambda n: (n, 0, 0, 0)),
                pl.BlockSpec((1, H, W, cpad), lambda n: (n, 0, 0, 0)),
            ],
            scratch_shapes=[
                pltpu.VMEM((H + 2, W + 2, cpad), compute_dtype),   # ping
                pltpu.VMEM((H + 2, W + 2, cpad), compute_dtype),   # pong
                pltpu.VMEM((H * W, 9 * cpad), compute_dtype),      # im2col
            ],
        ),
        compiler_params=pltpu.CompilerParams(
            dimension_semantics=("parallel",)),      # 2 TCs on v7x share batch
    )(x, w_all, b_all)

    out_c = params[-1][0].shape[-1]
    mid_c = params[depth // 2][0].shape[-1]
    out_nchw = jnp.transpose(out[..., :out_c], (0, 3, 1, 2))
    if return_mid_feature:
        mid_nchw = jnp.transpose(mid[..., :mid_c], (0, 3, 1, 2))
        return out_nchw, mid_nchw
    return out_nchw


def init_base_model_params(key, in_channels, mid_channels, out_channels, depth):
    """Deterministic init matching _initialize_weights (kaiming_normal fan_out,
    relu; bias = 0).  Returns list of (w_hwio, bias) per layer."""
    assert depth > 2
    params = []
    in_c = in_channels
    for i in range(depth):
        if i < depth // 2:
            out_c = in_c
        elif i == depth // 2:
            out_c = mid_channels
        else:
            out_c = out_channels
        key, wk = jax.random.split(key)
        fan_out = out_c * 3 * 3
        std = (2.0 / fan_out) ** 0.5
        w = jax.random.normal(wk, (3, 3, in_c, out_c), jnp.float32) * std
        b = jnp.zeros((out_c,), jnp.float32)
        params.append((w, b))
        in_c = out_c
    return params


def _reference_forward(x_nchw, params, depth, compute_dtype=jnp.float32):
    """Pure-JAX reference (lax.conv) mirroring the kernel's dtype policy:
    matmul inputs in `compute_dtype`, f32 accumulation, bias+ReLU in f32."""
    x = jnp.transpose(x_nchw, (0, 2, 3, 1)).astype(jnp.float32)
    mid = None
    for i, (w, b) in enumerate(params):
        y = jax.lax.conv_general_dilated(
            x.astype(compute_dtype), w.astype(compute_dtype),
            window_strides=(1, 1), padding="SAME",
            dimension_numbers=("NHWC", "HWIO", "NHWC"),
            preferred_element_type=jnp.float32,
            precision=jax.lax.Precision.HIGHEST)
        x = jnp.maximum(y + b[None, None, None, :].astype(jnp.float32), 0.0)
        if i == depth // 2:
            mid = x
    return (jnp.transpose(x, (0, 3, 1, 2)),
            jnp.transpose(mid, (0, 3, 1, 2)))


if __name__ == "__main__":
    key = jax.random.PRNGKey(0)
    k_x, k_p = jax.random.split(key)

    # Small shapes consistent with the module (mid_channels < in_channels,
    # depth > 2).
    N, IN_C, MID_C, OUT_C, H, W, DEPTH = 2, 8, 4, 8, 16, 16, 4

    x = jax.random.normal(k_x, (N, IN_C, H, W), jnp.float32)
    params = init_base_model_params(k_p, IN_C, MID_C, OUT_C, DEPTH)

    # --- f32 compute path: strict check against the full-precision reference.
    out32, mid32 = base_model_forward(x, params, DEPTH, return_mid_feature=True,
                                      compute_dtype=jnp.float32)
    out32 = jax.block_until_ready(out32)
    mid32 = jax.block_until_ready(mid32)
    assert out32.shape == (N, OUT_C, H, W), out32.shape
    assert mid32.shape == (N, MID_C, H, W), mid32.shape
    ref_out32, ref_mid32 = _reference_forward(x, params, DEPTH, jnp.float32)
    assert jnp.allclose(out32, ref_out32, atol=1e-3, rtol=1e-3)
    assert jnp.allclose(mid32, ref_mid32, atol=1e-3, rtol=1e-3)

    # --- bf16 compute path (performance default): check against a reference
    #     that applies the same bf16 casts with f32 accumulation.
    out16, mid16 = base_model_forward(x, params, DEPTH, return_mid_feature=True)
    out16 = jax.block_until_ready(out16)
    mid16 = jax.block_until_ready(mid16)
    assert out16.shape == (N, OUT_C, H, W), out16.shape
    assert mid16.shape == (N, MID_C, H, W), mid16.shape
    ref_out16, ref_mid16 = _reference_forward(x, params, DEPTH, jnp.bfloat16)
    assert jnp.allclose(out16, ref_out16, atol=1e-2, rtol=1e-2)
    assert jnp.allclose(mid16, ref_mid16, atol=1e-2, rtol=1e-2)

    print("KERNEL_OK")
</pallas_src>

<mosaic_0001>
module attributes {stable_mosaic.version = 11 : i64} {
  func.func @_fused_base_model_kernel(%arg0: i32, %arg1: memref<1x16x16x128xf32, #tpu.memory_space<vmem>>, %arg2: memref<4x1152x128xf32, #tpu.memory_space<vmem>>, %arg3: memref<4x1x128xf32, #tpu.memory_space<vmem>>, %arg4: memref<1x16x16x128xf32, #tpu.memory_space<vmem>>, %arg5: memref<1x16x16x128xf32, #tpu.memory_space<vmem>>, %arg6: memref<18x18x128xf32, #tpu.memory_space<vmem>>, %arg7: memref<18x18x128xf32, #tpu.memory_space<vmem>>, %arg8: memref<256x1152xf32, #tpu.memory_space<vmem>>) attributes {dimension_semantics = [#tpu.dimension_semantics<parallel>], iteration_bounds = array<i64: 2>, scalar_prefetch = 0 : i64, scratch_operands = 3 : i64, tpu.core_type = #tpu.core_type<tc>, window_params = [{transform_indices = @transform_0, window_bounds = array<i64: 1, 16, 16, 128>}, {pipeline_mode = #tpu.pipeline_mode<synchronous>, transform_indices = @transform_1, window_bounds = array<i64: 4, 1152, 128>}, {pipeline_mode = #tpu.pipeline_mode<synchronous>, transform_indices = @transform_2, window_bounds = array<i64: 4, 1, 128>}, {transform_indices = @transform_3, window_bounds = array<i64: 1, 16, 16, 128>}, {transform_indices = @transform_4, window_bounds = array<i64: 1, 16, 16, 128>}]} {
    %cst = arith.constant 0.000000e+00 : f32
    %0 = vector.broadcast %cst : f32 to vector<18x18x128xf32>
    %c0 = arith.constant 0 : index
    %c0_0 = arith.constant 0 : index
    %c0_1 = arith.constant 0 : index
    %1 = vector.load %arg6[%c0, %c0_0, %c0_1] : memref<18x18x128xf32, #tpu.memory_space<vmem>>, vector<18x18x128xf32>
    tpu.vector_store %arg6[%c0, %c0_0, %c0_1], %0 {strides = array<i32>} : memref<18x18x128xf32, #tpu.memory_space<vmem>>, vector<18x18x128xf32>,
    %cst_2 = arith.constant 0.000000e+00 : f32
    %2 = vector.broadcast %cst_2 : f32 to vector<18x18x128xf32>
    %c0_3 = arith.constant 0 : index
    %c0_4 = arith.constant 0 : index
    %c0_5 = arith.constant 0 : index
    %3 = vector.load %arg7[%c0_3, %c0_4, %c0_5] : memref<18x18x128xf32, #tpu.memory_space<vmem>>, vector<18x18x128xf32>
    tpu.vector_store %arg7[%c0_3, %c0_4, %c0_5], %2 {strides = array<i32>} : memref<18x18x128xf32, #tpu.memory_space<vmem>>, vector<18x18x128xf32>,
    %c0_6 = arith.constant 0 : index
    %c0_7 = arith.constant 0 : index
    %c0_8 = arith.constant 0 : index
    %c0_9 = arith.constant 0 : index
    %4 = vector.load %arg1[%c0_6, %c0_7, %c0_8, %c0_9] : memref<1x16x16x128xf32, #tpu.memory_space<vmem>>, vector<1x16x16x128xf32>
    %5 = vector.shape_cast %4 : vector<1x16x16x128xf32> to vector<16x16x128xf32>
    %c1 = arith.constant 1 : index
    %c1_10 = arith.constant 1 : index
    %c0_11 = arith.constant 0 : index
    %6 = vector.load %arg6[%c1, %c1_10, %c0_11] : memref<18x18x128xf32, #tpu.memory_space<vmem>>, vector<16x16x128xf32>
    tpu.vector_store %arg6[%c1, %c1_10, %c0_11], %5 {strides = array<i32>} : memref<18x18x128xf32, #tpu.memory_space<vmem>>, vector<16x16x128xf32>,
    %c0_12 = arith.constant 0 : index
    %c0_13 = arith.constant 0 : index
    %c0_14 = arith.constant 0 : index
    %7 = vector.load %arg6[%c0_12, %c0_13, %c0_14] : memref<18x18x128xf32, #tpu.memory_space<vmem>>, vector<16x16x128xf32>
    %8 = vector.shape_cast %7 : vector<16x16x128xf32> to vector<256x128xf32>
    %c0_15 = arith.constant 0 : index
    %c0_16 = arith.constant 0 : index
    %9 = vector.load %arg8[%c0_15, %c0_16] : memref<256x1152xf32, #tpu.memory_space<vmem>>, vector<256x128xf32>
    tpu.vector_store %arg8[%c0_15, %c0_16], %8 {strides = array<i32>} : memref<256x1152xf32, #tpu.memory_space<vmem>>, vector<256x128xf32>,
    %c0_17 = arith.constant 0 : index
    %c1_18 = arith.constant 1 : index
    %c0_19 = arith.constant 0 : index
    %10 = vector.load %arg6[%c0_17, %c1_18, %c0_19] : memref<18x18x128xf32, #tpu.memory_space<vmem>>, vector<16x16x128xf32>
    %11 = vector.shape_cast %10 : vector<16x16x128xf32> to vector<256x128xf32>
    %c0_20 = arith.constant 0 : index
    %c128 = arith.constant 128 : index
    %12 = vector.load %arg8[%c0_20, %c128] : memref<256x1152xf32, #tpu.memory_space<vmem>>, vector<256x128xf32>
    tpu.vector_store %arg8[%c0_20, %c128], %11 {strides = array<i32>} : memref<256x1152xf32, #tpu.memory_space<vmem>>, vector<256x128xf32>,
    %c0_21 = arith.constant 0 : index
    %c2 = arith.constant 2 : index
    %c0_22 = arith.constant 0 : index
    %13 = vector.load %arg6[%c0_21, %c2, %c0_22] : memref<18x18x128xf32, #tpu.memory_space<vmem>>, vector<16x16x128xf32>
    %14 = vector.shape_cast %13 : vector<16x16x128xf32> to vector<256x128xf32>
    %c0_23 = arith.constant 0 : index
    %c256 = arith.constant 256 : index
    %15 = vector.load %arg8[%c0_23, %c256] : memref<256x1152xf32, #tpu.memory_space<vmem>>, vector<256x128xf32>
    tpu.vector_store %arg8[%c0_23, %c256], %14 {strides = array<i32>} : memref<256x1152xf32, #tpu.memory_space<vmem>>, vector<256x128xf32>,
    %c1_24 = arith.constant 1 : index
    %c0_25 = arith.constant 0 : index
    %c0_26 = arith.constant 0 : index
    %16 = vector.load %arg6[%c1_24, %c0_25, %c0_26] : memref<18x18x128xf32, #tpu.memory_space<vmem>>, vector<16x16x128xf32>
    %17 = vector.shape_cast %16 : vector<16x16x128xf32> to vector<256x128xf32>
    %c0_27 = arith.constant 0 : index
    %c384 = arith.constant 384 : index
    %18 = vector.load %arg8[%c0_27, %c384] : memref<256x1152xf32, #tpu.memory_space<vmem>>, vector<256x128xf32>
    tpu.vector_store %arg8[%c0_27, %c384], %17 {strides = array<i32>} : memref<256x1152xf32, #tpu.memory_space<vmem>>, vector<256x128xf32>,
    %c1_28 = arith.constant 1 : index
    %c1_29 = arith.constant 1 : index
    %c0_30 = arith.constant 0 : index
    %19 = vector.load %arg6[%c1_28, %c1_29, %c0_30] : memref<18x18x128xf32, #tpu.memory_space<vmem>>, vector<16x16x128xf32>
    %20 = vector.shape_cast %19 : vector<16x16x128xf32> to vector<256x128xf32>
    %c0_31 = arith.constant 0 : index
    %c512 = arith.constant 512 : index
    %21 = vector.load %arg8[%c0_31, %c512] : memref<256x1152xf32, #tpu.memory_space<vmem>>, vector<256x128xf32>
    tpu.vector_store %arg8[%c0_31, %c512], %20 {strides = array<i32>} : memref<256x1152xf32, #tpu.memory_space<vmem>>, vector<256x128xf32>,
    %c1_32 = arith.constant 1 : index
    %c2_33 = arith.constant 2 : index
    %c0_34 = arith.constant 0 : index
    %22 = vector.load %arg6[%c1_32, %c2_33, %c0_34] : memref<18x18x128xf32, #tpu.memory_space<vmem>>, vector<16x16x128xf32>
    %23 = vector.shape_cast %22 : vector<16x16x128xf32> to vector<256x128xf32>
    %c0_35 = arith.constant 0 : index
    %c640 = arith.constant 640 : index
    %24 = vector.load %arg8[%c0_35, %c640] : memref<256x1152xf32, #tpu.memory_space<vmem>>, vector<256x128xf32>
    tpu.vector_store %arg8[%c0_35, %c640], %23 {strides = array<i32>} : memref<256x1152xf32, #tpu.memory_space<vmem>>, vector<256x128xf32>,
    %c2_36 = arith.constant 2 : index
    %c0_37 = arith.constant 0 : index
    %c0_38 = arith.constant 0 : index
    %25 = vector.load %arg6[%c2_36, %c0_37, %c0_38] : memref<18x18x128xf32, #tpu.memory_space<vmem>>, vector<16x16x128xf32>
    %26 = vector.shape_cast %25 : vector<16x16x128xf32> to vector<256x128xf32>
    %c0_39 = arith.constant 0 : index
    %c768 = arith.constant 768 : index
    %27 = vector.load %arg8[%c0_39, %c768] : memref<256x1152xf32, #tpu.memory_space<vmem>>, vector<256x128xf32>
    tpu.vector_store %arg8[%c0_39, %c768], %26 {strides = array<i32>} : memref<256x1152xf32, #tpu.memory_space<vmem>>, vector<256x128xf32>,
    %c2_40 = arith.constant 2 : index
    %c1_41 = arith.constant 1 : index
    %c0_42 = arith.constant 0 : index
    %28 = vector.load %arg6[%c2_40, %c1_41, %c0_42] : memref<18x18x128xf32, #tpu.memory_space<vmem>>, vector<16x16x128xf32>
    %29 = vector.shape_cast %28 : vector<16x16x128xf32> to vector<256x128xf32>
    %c0_43 = arith.constant 0 : index
    %c896 = arith.constant 896 : index
    %30 = vector.load %arg8[%c0_43, %c896] : memref<256x1152xf32, #tpu.memory_space<vmem>>, vector<256x128xf32>
    tpu.vector_store %arg8[%c0_43, %c896], %29 {strides = array<i32>} : memref<256x1152xf32, #tpu.memory_space<vmem>>, vector<256x128xf32>,
    %c2_44 = arith.constant 2 : index
    %c2_45 = arith.constant 2 : index
    %c0_46 = arith.constant 0 : index
    %31 = vector.load %arg6[%c2_44, %c2_45, %c0_46] : memref<18x18x128xf32, #tpu.memory_space<vmem>>, vector<16x16x128xf32>
    %32 = vector.shape_cast %31 : vector<16x16x128xf32> to vector<256x128xf32>
    %c0_47 = arith.constant 0 : index
    %c1024 = arith.constant 1024 : index
    %33 = vector.load %arg8[%c0_47, %c1024] : memref<256x1152xf32, #tpu.memory_space<vmem>>, vector<256x128xf32>
    tpu.vector_store %arg8[%c0_47, %c1024], %32 {strides = array<i32>} : memref<256x1152xf32, #tpu.memory_space<vmem>>, vector<256x128xf32>,
    %c0_48 = arith.constant 0 : index
    %c0_49 = arith.constant 0 : index
    %34 = vector.load %arg8[%c0_48, %c0_49] : memref<256x1152xf32, #tpu.memory_space<vmem>>, vector<256x1152xf32>
    %c0_50 = arith.constant 0 : index
    %c0_51 = arith.constant 0 : index
    %c0_52 = arith.constant 0 : index
    %35 = vector.load %arg2[%c0_50, %c0_51, %c0_52] : memref<4x1152x128xf32, #tpu.memory_space<vmem>>, vector<1x1152x128xf32>
    %36 = vector.shape_cast %35 : vector<1x1152x128xf32> to vector<1152x128xf32>
    %cst_53 = arith.constant dense<0.000000e+00> : vector<256x128xf32>
    %37 = tpu.matmul %34, %36, %cst_53 {dimension_numbers = #tpu.dot_dimension_numbers<[1], [0], [0], [1], [0, 0, 1, 1], [], []>} : vector<256x1152xf32>, vector<1152x128xf32>, vector<256x128xf32> -> vector<256x128xf32>
    %c0_54 = arith.constant 0 : index
    %c0_55 = arith.constant 0 : index
    %c0_56 = arith.constant 0 : index
    %38 = vector.load %arg3[%c0_54, %c0_55, %c0_56] : memref<4x1x128xf32, #tpu.memory_space<vmem>>, vector<1x1x128xf32>
    %39 = vector.shape_cast %38 : vector<1x1x128xf32> to vector<1x128xf32>
    %40 = vector.broadcast %39 : vector<1x128xf32> to vector<256x128xf32>
    %41 = arith.addf %37, %40 : vector<256x128xf32>
    %cst_57 = arith.constant 0.000000e+00 : f32
    %42 = vector.broadcast %cst_57 : f32 to vector<256x128xf32>
    %43 = arith.maximumf %41, %42 : vector<256x128xf32>
    %44 = vector.shape_cast %43 : vector<256x128xf32> to vector<16x16x128xf32>
    %c1_58 = arith.constant 1 : index
    %c1_59 = arith.constant 1 : index
    %c0_60 = arith.constant 0 : index
    %45 = vector.load %arg7[%c1_58, %c1_59, %c0_60] : memref<18x18x128xf32, #tpu.memory_space<vmem>>, vector<16x16x128xf32>
    tpu.vector_store %arg7[%c1_58, %c1_59, %c0_60], %44 {strides = array<i32>} : memref<18x18x128xf32, #tpu.memory_space<vmem>>, vector<16x16x128xf32>,
    %c0_61 = arith.constant 0 : index
    %c0_62 = arith.constant 0 : index
    %c0_63 = arith.constant 0 : index
    %46 = vector.load %arg7[%c0_61, %c0_62, %c0_63] : memref<18x18x128xf32, #tpu.memory_space<vmem>>, vector<16x16x128xf32>
    %47 = vector.shape_cast %46 : vector<16x16x128xf32> to vector<256x128xf32>
    %c0_64 = arith.constant 0 : index
    %c0_65 = arith.constant 0 : index
    %48 = vector.load %arg8[%c0_64, %c0_65] : memref<256x1152xf32, #tpu.memory_space<vmem>>, vector<256x128xf32>
    tpu.vector_store %arg8[%c0_64, %c0_65], %47 {strides = array<i32>} : memref<256x1152xf32, #tpu.memory_space<vmem>>, vector<256x128xf32>,
    %c0_66 = arith.constant 0 : index
    %c1_67 = arith.constant 1 : index
    %c0_68 = arith.constant 0 : index
    %49 = vector.load %arg7[%c0_66, %c1_67, %c0_68] : memref<18x18x128xf32, #tpu.memory_space<vmem>>, vector<16x16x128xf32>
    %50 = vector.shape_cast %49 : vector<16x16x128xf32> to vector<256x128xf32>
    %c0_69 = arith.constant 0 : index
    %c128_70 = arith.constant 128 : index
    %51 = vector.load %arg8[%c0_69, %c128_70] : memref<256x1152xf32, #tpu.memory_space<vmem>>, vector<256x128xf32>
    tpu.vector_store %arg8[%c0_69, %c128_70], %50 {strides = array<i32>} : memref<256x1152xf32, #tpu.memory_space<vmem>>, vector<256x128xf32>,
    %c0_71 = arith.constant 0 : index
    %c2_72 = arith.constant 2 : index
    %c0_73 = arith.constant 0 : index
    %52 = vector.load %arg7[%c0_71, %c2_72, %c0_73] : memref<18x18x128xf32, #tpu.memory_space<vmem>>, vector<16x16x128xf32>
    %53 = vector.shape_cast %52 : vector<16x16x128xf32> to vector<256x128xf32>
    %c0_74 = arith.constant 0 : index
    %c256_75 = arith.constant 256 : index
    %54 = vector.load %arg8[%c0_74, %c256_75] : memref<256x1152xf32, #tpu.memory_space<vmem>>, vector<256x128xf32>
    tpu.vector_store %arg8[%c0_74, %c256_75], %53 {strides = array<i32>} : memref<256x1152xf32, #tpu.memory_space<vmem>>, vector<256x128xf32>,
    %c1_76 = arith.constant 1 : index
    %c0_77 = arith.constant 0 : index
    %c0_78 = arith.constant 0 : index
    %55 = vector.load %arg7[%c1_76, %c0_77, %c0_78] : memref<18x18x128xf32, #tpu.memory_space<vmem>>, vector<16x16x128xf32>
    %56 = vector.shape_cast %55 : vector<16x16x128xf32> to vector<256x128xf32>
    %c0_79 = arith.constant 0 : index
    %c384_80 = arith.constant 384 : index
    %57 = vector.load %arg8[%c0_79, %c384_80] : memref<256x1152xf32, #tpu.memory_space<vmem>>, vector<256x128xf32>
    tpu.vector_store %arg8[%c0_79, %c384_80], %56 {strides = array<i32>} : memref<256x1152xf32, #tpu.memory_space<vmem>>, vector<256x128xf32>,
    %c1_81 = arith.constant 1 : index
    %c1_82 = arith.constant 1 : index
    %c0_83 = arith.constant 0 : index
    %58 = vector.load %arg7[%c1_81, %c1_82, %c0_83] : memref<18x18x128xf32, #tpu.memory_space<vmem>>, vector<16x16x128xf32>
    %59 = vector.shape_cast %58 : vector<16x16x128xf32> to vector<256x128xf32>
    %c0_84 = arith.constant 0 : index
    %c512_85 = arith.constant 512 : index
    %60 = vector.load %arg8[%c0_84, %c512_85] : memref<256x1152xf32, #tpu.memory_space<vmem>>, vector<256x128xf32>
    tpu.vector_store %arg8[%c0_84, %c512_85], %59 {strides = array<i32>} : memref<256x1152xf32, #tpu.memory_space<vmem>>, vector<256x128xf32>,
    %c1_86 = arith.constant 1 : index
    %c2_87 = arith.constant 2 : index
    %c0_88 = arith.constant 0 : index
    %61 = vector.load %arg7[%c1_86, %c2_87, %c0_88] : memref<18x18x128xf32, #tpu.memory_space<vmem>>, vector<16x16x128xf32>
    %62 = vector.shape_cast %61 : vector<16x16x128xf32> to vector<256x128xf32>
    %c0_89 = arith.constant 0 : index
    %c640_90 = arith.constant 640 : index
    %63 = vector.load %arg8[%c0_89, %c640_90] : memref<256x1152xf32, #tpu.memory_space<vmem>>, vector<256x128xf32>
    tpu.vector_store %arg8[%c0_89, %c640_90], %62 {strides = array<i32>} : memref<256x1152xf32, #tpu.memory_space<vmem>>, vector<256x128xf32>,
    %c2_91 = arith.constant 2 : index
    %c0_92 = arith.constant 0 : index
    %c0_93 = arith.constant 0 : index
    %64 = vector.load %arg7[%c2_91, %c0_92, %c0_93] : memref<18x18x128xf32, #tpu.memory_space<vmem>>, vector<16x16x128xf32>
    %65 = vector.shape_cast %64 : vector<16x16x128xf32> to vector<256x128xf32>
    %c0_94 = arith.constant 0 : index
    %c768_95 = arith.constant 768 : index
    %66 = vector.load %arg8[%c0_94, %c768_95] : memref<256x1152xf32, #tpu.memory_space<vmem>>, vector<256x128xf32>
    tpu.vector_store %arg8[%c0_94, %c768_95], %65 {strides = array<i32>} : memref<256x1152xf32, #tpu.memory_space<vmem>>, vector<256x128xf32>,
    %c2_96 = arith.constant 2 : index
    %c1_97 = arith.constant 1 : index
    %c0_98 = arith.constant 0 : index
    %67 = vector.load %arg7[%c2_96, %c1_97, %c0_98] : memref<18x18x128xf32, #tpu.memory_space<vmem>>, vector<16x16x128xf32>
    %68 = vector.shape_cast %67 : vector<16x16x128xf32> to vector<256x128xf32>
    %c0_99 = arith.constant 0 : index
    %c896_100 = arith.constant 896 : index
    %69 = vector.load %arg8[%c0_99, %c896_100] : memref<256x1152xf32, #tpu.memory_space<vmem>>, vector<256x128xf32>
    tpu.vector_store %arg8[%c0_99, %c896_100], %68 {strides = array<i32>} : memref<256x1152xf32, #tpu.memory_space<vmem>>, vector<256x128xf32>,
    %c2_101 = arith.constant 2 : index
    %c2_102 = arith.constant 2 : index
    %c0_103 = arith.constant 0 : index
    %70 = vector.load %arg7[%c2_101, %c2_102, %c0_103] : memref<18x18x128xf32, #tpu.memory_space<vmem>>, vector<16x16x128xf32>
    %71 = vector.shape_cast %70 : vector<16x16x128xf32> to vector<256x128xf32>
    %c0_104 = arith.constant 0 : index
    %c1024_105 = arith.constant 1024 : index
    %72 = vector.load %arg8[%c0_104, %c1024_105] : memref<256x1152xf32, #tpu.memory_space<vmem>>, vector<256x128xf32>
    tpu.vector_store %arg8[%c0_104, %c1024_105], %71 {strides = array<i32>} : memref<256x1152xf32, #tpu.memory_space<vmem>>, vector<256x128xf32>,
    %c0_106 = arith.constant 0 : index
    %c0_107 = arith.constant 0 : index
    %73 = vector.load %arg8[%c0_106, %c0_107] : memref<256x1152xf32, #tpu.memory_space<vmem>>, vector<256x1152xf32>
    %c1_108 = arith.constant 1 : index
    %c0_109 = arith.constant 0 : index
    %c0_110 = arith.constant 0 : index
    %74 = vector.load %arg2[%c1_108, %c0_109, %c0_110] : memref<4x1152x128xf32, #tpu.memory_space<vmem>>, vector<1x1152x128xf32>
    %75 = vector.shape_cast %74 : vector<1x1152x128xf32> to vector<1152x128xf32>
    %cst_111 = arith.constant dense<0.000000e+00> : vector<256x128xf32>
    %76 = tpu.matmul %73, %75, %cst_111 {dimension_numbers = #tpu.dot_dimension_numbers<[1], [0], [0], [1], [0, 0, 1, 1], [], []>} : vector<256x1152xf32>, vector<1152x128xf32>, vector<256x128xf32> -> vector<256x128xf32>
    %c1_112 = arith.constant 1 : index
    %c0_113 = arith.constant 0 : index
    %c0_114 = arith.constant 0 : index
    %77 = vector.load %arg3[%c1_112, %c0_113, %c0_114] : memref<4x1x128xf32, #tpu.memory_space<vmem>>, vector<1x1x128xf32>
    %78 = vector.shape_cast %77 : vector<1x1x128xf32> to vector<1x128xf32>
    %79 = vector.broadcast %78 : vector<1x128xf32> to vector<256x128xf32>
    %80 = arith.addf %76, %79 : vector<256x128xf32>
    %cst_115 = arith.constant 0.000000e+00 : f32
    %81 = vector.broadcast %cst_115 : f32 to vector<256x128xf32>
    %82 = arith.maximumf %80, %81 : vector<256x128xf32>
    %83 = vector.shape_cast %82 : vector<256x128xf32> to vector<16x16x128xf32>
    %c1_116 = arith.constant 1 : index
    %c1_117 = arith.constant 1 : index
    %c0_118 = arith.constant 0 : index
    %84 = vector.load %arg6[%c1_116, %c1_117, %c0_118] : memref<18x18x128xf32, #tpu.memory_space<vmem>>, vector<16x16x128xf32>
    tpu.vector_store %arg6[%c1_116, %c1_117, %c0_118], %83 {strides = array<i32>} : memref<18x18x128xf32, #tpu.memory_space<vmem>>, vector<16x16x128xf32>,
    %c0_119 = arith.constant 0 : index
    %c0_120 = arith.constant 0 : index
    %c0_121 = arith.constant 0 : index
    %85 = vector.load %arg6[%c0_119, %c0_120, %c0_121] : memref<18x18x128xf32, #tpu.memory_space<vmem>>, vector<16x16x128xf32>
    %86 = vector.shape_cast %85 : vector<16x16x128xf32> to vector<256x128xf32>
    %c0_122 = arith.constant 0 : index
    %c0_123 = arith.constant 0 : index
    %87 = vector.load %arg8[%c0_122, %c0_123] : memref<256x1152xf32, #tpu.memory_space<vmem>>, vector<256x128xf32>
    tpu.vector_store %arg8[%c0_122, %c0_123], %86 {strides = array<i32>} : memref<256x1152xf32, #tpu.memory_space<vmem>>, vector<256x128xf32>,
    %c0_124 = arith.constant 0 : index
    %c1_125 = arith.constant 1 : index
    %c0_126 = arith.constant 0 : index
    %88 = vector.load %arg6[%c0_124, %c1_125, %c0_126] : memref<18x18x128xf32, #tpu.memory_space<vmem>>, vector<16x16x128xf32>
    %89 = vector.shape_cast %88 : vector<16x16x128xf32> to vector<256x128xf32>
    %c0_127 = arith.constant 0 : index
    %c128_128 = arith.constant 128 : index
    %90 = vector.load %arg8[%c0_127, %c128_128] : memref<256x1152xf32, #tpu.memory_space<vmem>>, vector<256x128xf32>
    tpu.vector_store %arg8[%c0_127, %c128_128], %89 {strides = array<i32>} : memref<256x1152xf32, #tpu.memory_space<vmem>>, vector<256x128xf32>,
    %c0_129 = arith.constant 0 : index
    %c2_130 = arith.constant 2 : index
    %c0_131 = arith.constant 0 : index
    %91 = vector.load %arg6[%c0_129, %c2_130, %c0_131] : memref<18x18x128xf32, #tpu.memory_space<vmem>>, vector<16x16x128xf32>
    %92 = vector.shape_cast %91 : vector<16x16x128xf32> to vector<256x128xf32>
    %c0_132 = arith.constant 0 : index
    %c256_133 = arith.constant 256 : index
    %93 = vector.load %arg8[%c0_132, %c256_133] : memref<256x1152xf32, #tpu.memory_space<vmem>>, vector<256x128xf32>
    tpu.vector_store %arg8[%c0_132, %c256_133], %92 {strides = array<i32>} : memref<256x1152xf32, #tpu.memory_space<vmem>>, vector<256x128xf32>,
    %c1_134 = arith.constant 1 : index
    %c0_135 = arith.constant 0 : index
    %c0_136 = arith.constant 0 : index
    %94 = vector.load %arg6[%c1_134, %c0_135, %c0_136] : memref<18x18x128xf32, #tpu.memory_space<vmem>>, vector<16x16x128xf32>
    %95 = vector.shape_cast %94 : vector<16x16x128xf32> to vector<256x128xf32>
    %c0_137 = arith.constant 0 : index
    %c384_138 = arith.constant 384 : index
    %96 = vector.load %arg8[%c0_137, %c384_138] : memref<256x1152xf32, #tpu.memory_space<vmem>>, vector<256x128xf32>
    tpu.vector_store %arg8[%c0_137, %c384_138], %95 {strides = array<i32>} : memref<256x1152xf32, #tpu.memory_space<vmem>>, vector<256x128xf32>,
    %c1_139 = arith.constant 1 : index
    %c1_140 = arith.constant 1 : index
    %c0_141 = arith.constant 0 : index
    %97 = vector.load %arg6[%c1_139, %c1_140, %c0_141] : memref<18x18x128xf32, #tpu.memory_space<vmem>>, vector<16x16x128xf32>
    %98 = vector.shape_cast %97 : vector<16x16x128xf32> to vector<256x128xf32>
    %c0_142 = arith.constant 0 : index
    %c512_143 = arith.constant 512 : index
    %99 = vector.load %arg8[%c0_142, %c512_143] : memref<256x1152xf32, #tpu.memory_space<vmem>>, vector<256x128xf32>
    tpu.vector_store %arg8[%c0_142, %c512_143], %98 {strides = array<i32>} : memref<256x1152xf32, #tpu.memory_space<vmem>>, vector<256x128xf32>,
    %c1_144 = arith.constant 1 : index
    %c2_145 = arith.constant 2 : index
    %c0_146 = arith.constant 0 : index
    %100 = vector.load %arg6[%c1_144, %c2_145, %c0_146] : memref<18x18x128xf32, #tpu.memory_space<vmem>>, vector<16x16x128xf32>
    %101 = vector.shape_cast %100 : vector<16x16x128xf32> to vector<256x128xf32>
    %c0_147 = arith.constant 0 : index
    %c640_148 = arith.constant 640 : index
    %102 = vector.load %arg8[%c0_147, %c640_148] : memref<256x1152xf32, #tpu.memory_space<vmem>>, vector<256x128xf32>
    tpu.vector_store %arg8[%c0_147, %c640_148], %101 {strides = array<i32>} : memref<256x1152xf32, #tpu.memory_space<vmem>>, vector<256x128xf32>,
    %c2_149 = arith.constant 2 : index
    %c0_150 = arith.constant 0 : index
    %c0_151 = arith.constant 0 : index
    %103 = vector.load %arg6[%c2_149, %c0_150, %c0_151] : memref<18x18x128xf32, #tpu.memory_space<vmem>>, vector<16x16x128xf32>
    %104 = vector.shape_cast %103 : vector<16x16x128xf32> to vector<256x128xf32>
    %c0_152 = arith.constant 0 : index
    %c768_153 = arith.constant 768 : index
    %105 = vector.load %arg8[%c0_152, %c768_153] : memref<256x1152xf32, #tpu.memory_space<vmem>>, vector<256x128xf32>
    tpu.vector_store %arg8[%c0_152, %c768_153], %104 {strides = array<i32>} : memref<256x1152xf32, #tpu.memory_space<vmem>>, vector<256x128xf32>,
    %c2_154 = arith.constant 2 : index
    %c1_155 = arith.constant 1 : index
    %c0_156 = arith.constant 0 : index
    %106 = vector.load %arg6[%c2_154, %c1_155, %c0_156] : memref<18x18x128xf32, #tpu.memory_space<vmem>>, vector<16x16x128xf32>
    %107 = vector.shape_cast %106 : vector<16x16x128xf32> to vector<256x128xf32>
    %c0_157 = arith.constant 0 : index
    %c896_158 = arith.constant 896 : index
    %108 = vector.load %arg8[%c0_157, %c896_158] : memref<256x1152xf32, #tpu.memory_space<vmem>>, vector<256x128xf32>
    tpu.vector_store %arg8[%c0_157, %c896_158], %107 {strides = array<i32>} : memref<256x1152xf32, #tpu.memory_space<vmem>>, vector<256x128xf32>,
    %c2_159 = arith.constant 2 : index
    %c2_160 = arith.constant 2 : index
    %c0_161 = arith.constant 0 : index
    %109 = vector.load %arg6[%c2_159, %c2_160, %c0_161] : memref<18x18x128xf32, #tpu.memory_space<vmem>>, vector<16x16x128xf32>
    %110 = vector.shape_cast %109 : vector<16x16x128xf32> to vector<256x128xf32>
    %c0_162 = arith.constant 0 : index
    %c1024_163 = arith.constant 1024 : index
    %111 = vector.load %arg8[%c0_162, %c1024_163] : memref<256x1152xf32, #tpu.memory_space<vmem>>, vector<256x128xf32>
    tpu.vector_store %arg8[%c0_162, %c1024_163], %110 {strides = array<i32>} : memref<256x1152xf32, #tpu.memory_space<vmem>>, vector<256x128xf32>,
    %c0_164 = arith.constant 0 : index
    %c0_165 = arith.constant 0 : index
    %112 = vector.load %arg8[%c0_164, %c0_165] : memref<256x1152xf32, #tpu.memory_space<vmem>>, vector<256x1152xf32>
    %c2_166 = arith.constant 2 : index
    %c0_167 = arith.constant 0 : index
    %c0_168 = arith.constant 0 : index
    %113 = vector.load %arg2[%c2_166, %c0_167, %c0_168] : memref<4x1152x128xf32, #tpu.memory_space<vmem>>, vector<1x1152x128xf32>
    %114 = vector.shape_cast %113 : vector<1x1152x128xf32> to vector<1152x128xf32>
    %cst_169 = arith.constant dense<0.000000e+00> : vector<256x128xf32>
    %115 = tpu.matmul %112, %114, %cst_169 {dimension_numbers = #tpu.dot_dimension_numbers<[1], [0], [0], [1], [0, 0, 1, 1], [], []>} : vector<256x1152xf32>, vector<1152x128xf32>, vector<256x128xf32> -> vector<256x128xf32>
    %c2_170 = arith.constant 2 : index
    %c0_171 = arith.constant 0 : index
    %c0_172 = arith.constant 0 : index
    %116 = vector.load %arg3[%c2_170, %c0_171, %c0_172] : memref<4x1x128xf32, #tpu.memory_space<vmem>>, vector<1x1x128xf32>
    %117 = vector.shape_cast %116 : vector<1x1x128xf32> to vector<1x128xf32>
    %118 = vector.broadcast %117 : vector<1x128xf32> to vector<256x128xf32>
    %119 = arith.addf %115, %118 : vector<256x128xf32>
    %cst_173 = arith.constant 0.000000e+00 : f32
    %120 = vector.broadcast %cst_173 : f32 to vector<256x128xf32>
    %121 = arith.maximumf %119, %120 : vector<256x128xf32>
    %122 = vector.shape_cast %121 : vector<256x128xf32> to vector<16x16x128xf32>
    %c0_174 = arith.constant 0 : index
    %c0_175 = arith.constant 0 : index
    %c0_176 = arith.constant 0 : index
    %c0_177 = arith.constant 0 : index
    %123 = vector.load %arg5[%c0_174, %c0_175, %c0_176, %c0_177] : memref<1x16x16x128xf32, #tpu.memory_space<vmem>>, vector<1x16x16x128xf32>
    %124 = vector.shape_cast %123 : vector<1x16x16x128xf32> to vector<16x16x128xf32>
    %125 = vector.shape_cast %122 : vector<16x16x128xf32> to vector<1x16x16x128xf32>
    tpu.vector_store %arg5[%c0_174, %c0_175, %c0_176, %c0_177], %125 {strides = array<i32>} : memref<1x16x16x128xf32, #tpu.memory_space<vmem>>, vector<1x16x16x128xf32>,
    %126 = vector.shape_cast %121 : vector<256x128xf32> to vector<16x16x128xf32>
    %c1_178 = arith.constant 1 : index
    %c1_179 = arith.constant 1 : index
    %c0_180 = arith.constant 0 : index
    %127 = vector.load %arg7[%c1_178, %c1_179, %c0_180] : memref<18x18x128xf32, #tpu.memory_space<vmem>>, vector<16x16x128xf32>
    tpu.vector_store %arg7[%c1_178, %c1_179, %c0_180], %126 {strides = array<i32>} : memref<18x18x128xf32, #tpu.memory_space<vmem>>, vector<16x16x128xf32>,
    %c0_181 = arith.constant 0 : index
    %c0_182 = arith.constant 0 : index
    %c0_183 = arith.constant 0 : index
    %128 = vector.load %arg7[%c0_181, %c0_182, %c0_183] : memref<18x18x128xf32, #tpu.memory_space<vmem>>, vector<16x16x128xf32>
    %129 = vector.shape_cast %128 : vector<16x16x128xf32> to vector<256x128xf32>
    %c0_184 = arith.constant 0 : index
    %c0_185 = arith.constant 0 : index
    %130 = vector.load %arg8[%c0_184, %c0_185] : memref<256x1152xf32, #tpu.memory_space<vmem>>, vector<256x128xf32>
    tpu.vector_store %arg8[%c0_184, %c0_185], %129 {strides = array<i32>} : memref<256x1152xf32, #tpu.memory_space<vmem>>, vector<256x128xf32>,
    %c0_186 = arith.constant 0 : index
    %c1_187 = arith.constant 1 : index
    %c0_188 = arith.constant 0 : index
    %131 = vector.load %arg7[%c0_186, %c1_187, %c0_188] : memref<18x18x128xf32, #tpu.memory_space<vmem>>, vector<16x16x128xf32>
    %132 = vector.shape_cast %131 : vector<16x16x128xf32> to vector<256x128xf32>
    %c0_189 = arith.constant 0 : index
    %c128_190 = arith.constant 128 : index
    %133 = vector.load %arg8[%c0_189, %c128_190] : memref<256x1152xf32, #tpu.memory_space<vmem>>, vector<256x128xf32>
    tpu.vector_store %arg8[%c0_189, %c128_190], %132 {strides = array<i32>} : memref<256x1152xf32, #tpu.memory_space<vmem>>, vector<256x128xf32>,
    %c0_191 = arith.constant 0 : index
    %c2_192 = arith.constant 2 : index
    %c0_193 = arith.constant 0 : index
    %134 = vector.load %arg7[%c0_191, %c2_192, %c0_193] : memref<18x18x128xf32, #tpu.memory_space<vmem>>, vector<16x16x128xf32>
    %135 = vector.shape_cast %134 : vector<16x16x128xf32> to vector<256x128xf32>
    %c0_194 = arith.constant 0 : index
    %c256_195 = arith.constant 256 : index
    %136 = vector.load %arg8[%c0_194, %c256_195] : memref<256x1152xf32, #tpu.memory_space<vmem>>, vector<256x128xf32>
    tpu.vector_store %arg8[%c0_194, %c256_195], %135 {strides = array<i32>} : memref<256x1152xf32, #tpu.memory_space<vmem>>, vector<256x128xf32>,
    %c1_196 = arith.constant 1 : index
    %c0_197 = arith.constant 0 : index
    %c0_198 = arith.constant 0 : index
    %137 = vector.load %arg7[%c1_196, %c0_197, %c0_198] : memref<18x18x128xf32, #tpu.memory_space<vmem>>, vector<16x16x128xf32>
    %138 = vector.shape_cast %137 : vector<16x16x128xf32> to vector<256x128xf32>
    %c0_199 = arith.constant 0 : index
    %c384_200 = arith.constant 384 : index
    %139 = vector.load %arg8[%c0_199, %c384_200] : memref<256x1152xf32, #tpu.memory_space<vmem>>, vector<256x128xf32>
    tpu.vector_store %arg8[%c0_199, %c384_200], %138 {strides = array<i32>} : memref<256x1152xf32, #tpu.memory_space<vmem>>, vector<256x128xf32>,
    %c1_201 = arith.constant 1 : index
    %c1_202 = arith.constant 1 : index
    %c0_203 = arith.constant 0 : index
    %140 = vector.load %arg7[%c1_201, %c1_202, %c0_203] : memref<18x18x128xf32, #tpu.memory_space<vmem>>, vector<16x16x128xf32>
    %141 = vector.shape_cast %140 : vector<16x16x128xf32> to vector<256x128xf32>
    %c0_204 = arith.constant 0 : index
    %c512_205 = arith.constant 512 : index
    %142 = vector.load %arg8[%c0_204, %c512_205] : memref<256x1152xf32, #tpu.memory_space<vmem>>, vector<256x128xf32>
    tpu.vector_store %arg8[%c0_204, %c512_205], %141 {strides = array<i32>} : memref<256x1152xf32, #tpu.memory_space<vmem>>, vector<256x128xf32>,
    %c1_206 = arith.constant 1 : index
    %c2_207 = arith.constant 2 : index
    %c0_208 = arith.constant 0 : index
    %143 = vector.load %arg7[%c1_206, %c2_207, %c0_208] : memref<18x18x128xf32, #tpu.memory_space<vmem>>, vector<16x16x128xf32>
    %144 = vector.shape_cast %143 : vector<16x16x128xf32> to vector<256x128xf32>
    %c0_209 = arith.constant 0 : index
    %c640_210 = arith.constant 640 : index
    %145 = vector.load %arg8[%c0_209, %c640_210] : memref<256x1152xf32, #tpu.memory_space<vmem>>, vector<256x128xf32>
    tpu.vector_store %arg8[%c0_209, %c640_210], %144 {strides = array<i32>} : memref<256x1152xf32, #tpu.memory_space<vmem>>, vector<256x128xf32>,
    %c2_211 = arith.constant 2 : index
    %c0_212 = arith.constant 0 : index
    %c0_213 = arith.constant 0 : index
    %146 = vector.load %arg7[%c2_211, %c0_212, %c0_213] : memref<18x18x128xf32, #tpu.memory_space<vmem>>, vector<16x16x128xf32>
    %147 = vector.shape_cast %146 : vector<16x16x128xf32> to vector<256x128xf32>
    %c0_214 = arith.constant 0 : index
    %c768_215 = arith.constant 768 : index
    %148 = vector.load %arg8[%c0_214, %c768_215] : memref<256x1152xf32, #tpu.memory_space<vmem>>, vector<256x128xf32>
    tpu.vector_store %arg8[%c0_214, %c768_215], %147 {strides = array<i32>} : memref<256x1152xf32, #tpu.memory_space<vmem>>, vector<256x128xf32>,
    %c2_216 = arith.constant 2 : index
    %c1_217 = arith.constant 1 : index
    %c0_218 = arith.constant 0 : index
    %149 = vector.load %arg7[%c2_216, %c1_217, %c0_218] : memref<18x18x128xf32, #tpu.memory_space<vmem>>, vector<16x16x128xf32>
    %150 = vector.shape_cast %149 : vector<16x16x128xf32> to vector<256x128xf32>
    %c0_219 = arith.constant 0 : index
    %c896_220 = arith.constant 896 : index
    %151 = vector.load %arg8[%c0_219, %c896_220] : memref<256x1152xf32, #tpu.memory_space<vmem>>, vector<256x128xf32>
    tpu.vector_store %arg8[%c0_219, %c896_220], %150 {strides = array<i32>} : memref<256x1152xf32, #tpu.memory_space<vmem>>, vector<256x128xf32>,
    %c2_221 = arith.constant 2 : index
    %c2_222 = arith.constant 2 : index
    %c0_223 = arith.constant 0 : index
    %152 = vector.load %arg7[%c2_221, %c2_222, %c0_223] : memref<18x18x128xf32, #tpu.memory_space<vmem>>, vector<16x16x128xf32>
    %153 = vector.shape_cast %152 : vector<16x16x128xf32> to vector<256x128xf32>
    %c0_224 = arith.constant 0 : index
    %c1024_225 = arith.constant 1024 : index
    %154 = vector.load %arg8[%c0_224, %c1024_225] : memref<256x1152xf32, #tpu.memory_space<vmem>>, vector<256x128xf32>
    tpu.vector_store %arg8[%c0_224, %c1024_225], %153 {strides = array<i32>} : memref<256x1152xf32, #tpu.memory_space<vmem>>, vector<256x128xf32>,
    %c0_226 = arith.constant 0 : index
    %c0_227 = arith.constant 0 : index
    %155 = vector.load %arg8[%c0_226, %c0_227] : memref<256x1152xf32, #tpu.memory_space<vmem>>, vector<256x1152xf32>
    %c3 = arith.constant 3 : index
    %c0_228 = arith.constant 0 : index
    %c0_229 = arith.constant 0 : index
    %156 = vector.load %arg2[%c3, %c0_228, %c0_229] : memref<4x1152x128xf32, #tpu.memory_space<vmem>>, vector<1x1152x128xf32>
    %157 = vector.shape_cast %156 : vector<1x1152x128xf32> to vector<1152x128xf32>
    %cst_230 = arith.constant dense<0.000000e+00> : vector<256x128xf32>
    %158 = tpu.matmul %155, %157, %cst_230 {dimension_numbers = #tpu.dot_dimension_numbers<[1], [0], [0], [1], [0, 0, 1, 1], [], []>} : vector<256x1152xf32>, vector<1152x128xf32>, vector<256x128xf32> -> vector<256x128xf32>
    %c3_231 = arith.constant 3 : index
    %c0_232 = arith.constant 0 : index
    %c0_233 = arith.constant 0 : index
    %159 = vector.load %arg3[%c3_231, %c0_232, %c0_233] : memref<4x1x128xf32, #tpu.memory_space<vmem>>, vector<1x1x128xf32>
    %160 = vector.shape_cast %159 : vector<1x1x128xf32> to vector<1x128xf32>
    %161 = vector.broadcast %160 : vector<1x128xf32> to vector<256x128xf32>
    %162 = arith.addf %158, %161 : vector<256x128xf32>
    %cst_234 = arith.constant 0.000000e+00 : f32
    %163 = vector.broadcast %cst_234 : f32 to vector<256x128xf32>
    %164 = arith.maximumf %162, %163 : vector<256x128xf32>
    %165 = vector.shape_cast %164 : vector<256x128xf32> to vector<16x16x128xf32>
    %c0_235 = arith.constant 0 : index
    %c0_236 = arith.constant 0 : index
    %c0_237 = arith.constant 0 : index
    %c0_238 = arith.constant 0 : index
    %166 = vector.load %arg4[%c0_235, %c0_236, %c0_237, %c0_238] : memref<1x16x16x128xf32, #tpu.memory_space<vmem>>, vector<1x16x16x128xf32>
    %167 = vector.shape_cast %166 : vector<1x16x16x128xf32> to vector<16x16x128xf32>
    %168 = vector.shape_cast %165 : vector<16x16x128xf32> to vector<1x16x16x128xf32>
    tpu.vector_store %arg4[%c0_235, %c0_236, %c0_237, %c0_238], %168 {strides = array<i32>} : memref<1x16x16x128xf32, #tpu.memory_space<vmem>>, vector<1x16x16x128xf32>,
    return
  }
  func.func @transform_0(%arg0: i32) -> (i32, i32, i32, i32) {
    %c0_i32 = arith.constant 0 : i32
    %c0_i32_0 = arith.constant 0 : i32
    %c0_i32_1 = arith.constant 0 : i32
    %c0_i32_2 = arith.constant 0 : i32
    return %arg0, %c0_i32, %c0_i32_0, %c0_i32_1 : i32, i32, i32, i32
  }
  func.func @transform_1(%arg0: i32) -> (i32, i32, i32) {
    %c0_i32 = arith.constant 0 : i32
    %c0_i32_0 = arith.constant 0 : i32
    %c0_i32_1 = arith.constant 0 : i32
    %c0_i32_2 = arith.constant 0 : i32
    return %c0_i32, %c0_i32_0, %c0_i32_1 : i32, i32, i32
  }
  func.func @transform_2(%arg0: i32) -> (i32, i32, i32) {
    %c0_i32 = arith.constant 0 : i32
    %c0_i32_0 = arith.constant 0 : i32
    %c0_i32_1 = arith.constant 0 : i32
    %c0_i32_2 = arith.constant 0 : i32
    return %c0_i32, %c0_i32_0, %c0_i32_1 : i32, i32, i32
  }
  func.func @transform_3(%arg0: i32) -> (i32, i32, i32, i32) {
    %c0_i32 = arith.constant 0 : i32
    %c0_i32_0 = arith.constant 0 : i32
    %c0_i32_1 = arith.constant 0 : i32
    %c0_i32_2 = arith.constant 0 : i32
    return %arg0, %c0_i32, %c0_i32_0, %c0_i32_1 : i32, i32, i32, i32
  }
  func.func @transform_4(%arg0: i32) -> (i32, i32, i32, i32) {
    %c0_i32 = arith.constant 0 : i32
    %c0_i32_0 = arith.constant 0 : i32
    %c0_i32_1 = arith.constant 0 : i32
    %c0_i32_2 = arith.constant 0 : i32
    return %arg0, %c0_i32, %c0_i32_0, %c0_i32_1 : i32, i32, i32, i32
  }
}

</mosaic_0001>

<bundles_post_ra>
// kernel: base_model_forward.1
= control target key start
LH: loop header
LB: loop body
LE: loop exit
PB: predicated region body
PF: predicated region fallthrough
CT: control target
= control target key end

     0   :  { %s12169_s15 = smov 0   ;;  %s16555_s0 = inlined_call_operand.vmem [shape: f32[2,16,16,128], index: 0, kind: input, shape index: {}]   ;;  %s16556_s1 = inlined_call_operand.vmem [shape: f32[4,1152,128], index: 1, kind: input, shape index: {}]   ;;  %s16557_s2 = inlined_call_operand.vmem [shape: f32[4,1,128], index: 2, kind: input, shape index: {}]   ;;  %s16558_s3 = inlined_call_operand.vmem [shape: f32[2,16,16,128], index: 3, kind: output, shape index: {0}]   ;;  %s16559_s4 = inlined_call_operand.vmem [shape: f32[2,16,16,128], index: 4, kind: output, shape index: {1}]  }
   0x1 LB: > { %s9329_s16 = sadd.s32 4294967295, %s12140_s15   ;;  %p9333_p0 = scmp.ge.s32.totalorder %s12140_s15, 1  ;;  %s12140_s15 = sphi %s12169_s15, %s15_s15  }
   0x2   : > { %p165_p1 = scmp.lt.s32.totalorder %s12140_s15, 3 }
   0x4   : > { %p166_p2 = pnand %p9333_p0, %p165_p1 }
   0x6   : > { %169 = sbr.rel (%p166_p2) target bundleno = 2619 (0xa3b), region = 32 }
   0xd   : > { %v12180_v0 = vld [vmem:[%s16556_s1] sm:$0xff]  ;;  %v12185_v1 = vld [vmem:[%s16556_s1 + $0x8] sm:$0xff]  ;;  %v12190_v2 = vld [vmem:[%s16556_s1 + $0x10] sm:$0xff]  ;;  %p12194_p3 = scmp.lt.s32.totalorder %s9329_s16, 1  ;;  %v16560_v3 = vmov 0.0|0.0   ;;  %v12143_v6 = vmov 0.0  }
   0xe   : > { %10296 = vmatprep.subr.bf16.mxu0 %v16560_v3  ;;  %v10297_v4 = vpack.c.bf16 %v12185_v1, %v12180_v0  ;;  %v12204_v5 = vld [vmem:[%s16556_s1 + $0x18] sm:$0xff]  ;;  %211 = vst [vmem:[#allocation2] sm:$0xff] %v12143_v6  ;;  %212 = vst [vmem:[#allocation2 + $0x8] sm:$0xff] %v12143_v6  ;;  %v1253_v8 = vld [vmem:[%s16556_s1 + $0x20] sm:$0xff] }
   0xf   : > { %213 = vst [vmem:[#allocation2 + $0x10] sm:$0x3] %v12143_v6  ;;  %214 = vst [vmem:[#allocation2 + $0x18] sm:$0xff] %v12143_v6  ;;  %s16701_s16 = smov (!%p12194_p3, %s9329_s16), 1  ;;  %v10300_v7 = vpack.c.bf16 %v12204_v5, %v12190_v2  ;;  %v1254_v9 = vld [vmem:[%s16556_s1 + $0x28] sm:$0xff]  ;;  %v1255_v11 = vld [vmem:[%s16556_s1 + $0x30] sm:$0xff] }
  0x10   : > { %215 = vst [vmem:[#allocation2 + $0x20] sm:$0xff] %v12143_v6  ;;  %216 = vst [vmem:[#allocation2 + $0x28] sm:$0x3] %v12143_v6  ;;  %10298 = vmatpush1.bf16.msra.mxu0 %v10297_v4  ;;  %s12330_s30 = sshll.u32 %s16701_s16, 8  ;;  %v10303_v10 = vpack.c.bf16 %v1254_v9, %v1253_v8  ;;  %v1256_v12 = vld [vmem:[%s16556_s1 + $0x38] sm:$0xff]  ;;  %v1257_v15 = vld [vmem:[%s16556_s1 + $0x40] sm:$0xff] }
  0x11   : > { %217 = vst [vmem:[#allocation2 + $0x30] sm:$0xff] %v12143_v6  ;;  %218 = vst [vmem:[#allocation2 + $0x38] sm:$0xff] %v12143_v6  ;;  %10299 = vmatprep.subr.bf16.mxu0 %v16560_v3  ;;  %s12343_s11 = scalar_lea.vmem %s16555_s0, %s12330_s30  ;;  %v10306_v14 = vpack.c.bf16 %v1256_v12, %v1255_v11  ;;  %v1258_v16 = vld [vmem:[%s16556_s1 + $0x48] sm:$0xff]  ;;  %v1259_v24 = vld [vmem:[%s16556_s1 + $0x50] sm:$0xff]  ;;  %s15665_s25 = scalar_lea.vmem %s16559_s4, %s12330_s30 }
  0x12   : > { %219 = vst [vmem:[#allocation2 + $0x40] sm:$0x3] %v12143_v6  ;;  %220 = vst [vmem:[#allocation2 + $0x48] sm:$0xff] %v12143_v6  ;;  %v12353_v17 = vld [vmem:[%s12343_s11] sm:$0xff]  ;;  %v12357_v18 = vld [vmem:[%s12343_s11 + $0x8] sm:$0xff]  ;;  %v10309_v22 = vpack.c.bf16 %v1258_v16, %v1257_v15  ;;  %s16456_s13 = scalar_lea.vmem %s16558_s3, %s12330_s30 }
  0x13   : > { %221 = vst [vmem:[#allocation2 + $0x50] sm:$0xff] %v12143_v6  ;;  %222 = vst [vmem:[#allocation2 + $0x58] sm:$0x3] %v12143_v6  ;;  %v12360_v19 = vld [vmem:[%s12343_s11 + $0x10] sm:$0xff]  ;;  %v12365_v20 = vld [vmem:[%s12343_s11 + $0x18] sm:$0xff] }
  0x14   : > { %223 = vst [vmem:[#allocation2 + $0x60] sm:$0xff] %v12143_v6  ;;  %224 = vst [vmem:[#allocation2 + $0x68] sm:$0xff] %v12143_v6  ;;  %10301 = vmatpush1.bf16.msra.mxu0 %v10300_v7  ;;  %v12368_v21 = vld [vmem:[%s12343_s11 + $0x20] sm:$0xff]  ;;  %v12373_v23 = vld [vmem:[%s12343_s11 + $0x28] sm:$0xff] }
  0x15   : > { %225 = vst [vmem:[#allocation2 + $0x70] sm:$0x3] %v12143_v6  ;;  %226 = vst [vmem:[#allocation2 + $0x78] sm:$0xff] %v12143_v6  ;;  %10302 = vmatprep.subr.bf16.mxu0 %v16560_v3  ;;  %v448_v13 = vld [vmem:[#allocation2 + $0x1] sm:$0xff]  ;;  %v1260_v25 = vld [vmem:[%s16556_s1 + $0x58] sm:$0xff] }
  0x16   : > { %227 = vst [vmem:[#allocation2 + $0x80] sm:$0xff] %v12143_v6  ;;  %228 = vst [vmem:[#allocation2 + $0x88] sm:$0x3] %v12143_v6  ;;  %1464 = vmatprep.mubr.f32.mxu0 %v448_v13  ;;  %v12384_v26 = vld [vmem:[%s12343_s11 + $0x30] sm:$0xff]  ;;  %v12388_v27 = vld [vmem:[%s12343_s11 + $0x38] sm:$0xff]  ;;  %v10312_v31 = vpack.c.bf16 %v1260_v25, %v1259_v24 }
  0x17   : > { %229 = vst [vmem:[#allocation2 + $0x90] sm:$0xff] %v12143_v6  ;;  %230 = vst [vmem:[#allocation2 + $0x98] sm:$0xff] %v12143_v6  ;;  %v12391_v28 = vld [vmem:[%s12343_s11 + $0x40] sm:$0xff]  ;;  %v12396_v29 = vld [vmem:[%s12343_s11 + $0x48] sm:$0xff] }
  0x18   : > { %231 = vst [vmem:[#allocation2 + $0xa0] sm:$0x3] %v12143_v6  ;;  %232 = vst [vmem:[#allocation2 + $0xa8] sm:$0xff] %v12143_v6  ;;  %10304 = vmatpush1.bf16.msra.mxu0 %v10303_v10  ;;  %v12399_v30 = vld [vmem:[%s12343_s11 + $0x50] sm:$0xff]  ;;  %v12404_v32 = vld [vmem:[%s12343_s11 + $0x58] sm:$0xff] }
  0x19   : > { %233 = vst [vmem:[#allocation2 + $0xb0] sm:$0xff] %v12143_v6  ;;  %234 = vst [vmem:[#allocation2 + $0xb8] sm:$0x3] %v12143_v6  ;;  %10305 = vmatprep.subr.bf16.mxu0 %v16560_v3  ;;  %v1261_v33 = vld [vmem:[%s16556_s1 + $0x60] sm:$0xff]  ;;  %v1262_v34 = vld [vmem:[%s16556_s1 + $0x68] sm:$0xff] }
  0x1a   : > { %235 = vst [vmem:[#allocation2 + $0xc0] sm:$0xff] %v12143_v6  ;;  %236 = vst [vmem:[#allocation2 + $0xc8] sm:$0xff] %v12143_v6  ;;  %v12415_v35 = vld [vmem:[%s12343_s11 + $0x60] sm:$0xff]  ;;  %v12419_v36 = vld [vmem:[%s12343_s11 + $0x68] sm:$0xff]  ;;  %v10315_v37 = vpack.c.bf16 %v1262_v34, %v1261_v33 }
  0x1b   : > { %237 = vst [vmem:[#allocation2 + $0xd0] sm:$0x3] %v12143_v6  ;;  %238 = vst [vmem:[#allocation2 + $0xd8] sm:$0xff] %v12143_v6  ;;  %v12423_v38 = vld [vmem:[%s12343_s11 + $0x70] sm:$0xff]  ;;  %v1264_v40 = vld [vmem:[%s16556_s1 + $0x78] sm:$0xff] }
  0x1c   : > { %239 = vst [vmem:[#allocation2 + $0xe0] sm:$0xff] %v12143_v6  ;;  %240 = vst [vmem:[#allocation2 + $0xe8] sm:$0x3] %v12143_v6  ;;  %10307 = vmatpush1.bf16.msra.mxu0 %v10306_v14  ;;  %v1263_v39 = vld [vmem:[%s16556_s1 + $0x70] sm:$0xff]  ;;  %v12434_v41 = vld [vmem:[%s12343_s11 + $0x78] sm:$0xff] }
  0x1d   : > { %241 = vst [vmem:[#allocation2 + $0xf0] sm:$0xff] %v12143_v6  ;;  %242 = vst [vmem:[#allocation2 + $0xf8] sm:$0xff] %v12143_v6  ;;  %10308 = vmatprep.subr.bf16.mxu0 %v16560_v3  ;;  %v12438_v42 = vld [vmem:[%s12343_s11 + $0x80] sm:$0xff]  ;;  %v10318_v43 = vpack.c.bf16 %v1264_v40, %v1263_v39  ;;  %v12442_v44 = vld [vmem:[%s12343_s11 + $0x88] sm:$0xff] }
  0x1e   : > { %243 = vst [vmem:[#allocation2 + $0x100] sm:$0x3] %v12143_v6  ;;  %244 = vst [vmem:[#allocation2 + $0x108] sm:$0xff] %v12143_v6  ;;  %v1265_v45 = vld [vmem:[%s16556_s1 + $0x80] sm:$0xff]  ;;  %v1266_v46 = vld [vmem:[%s16556_s1 + $0x88] sm:$0xff] }
  0x1f   : > { %245 = vst [vmem:[#allocation2 + $0x110] sm:$0xff] %v12143_v6  ;;  %246 = vst [vmem:[#allocation2 + $0x118] sm:$0x3] %v12143_v6  ;;  %v12453_v47 = vld [vmem:[%s12343_s11 + $0x90] sm:$0xff]  ;;  %v12457_v48 = vld [vmem:[%s12343_s11 + $0x98] sm:$0xff]  ;;  %v10321_v50 = vpack.c.bf16 %v1266_v46, %v1265_v45 }
  0x20   : > { %247 = vst [vmem:[#allocation2 + $0x120] sm:$0xff] %v12143_v6  ;;  %248 = vst [vmem:[#allocation2 + $0x128] sm:$0xff] %v12143_v6  ;;  %10310 = vmatpush1.bf16.msra.mxu0 %v10309_v22  ;;  %v12460_v49 = vld [vmem:[%s12343_s11 + $0xa0] sm:$0xff]  ;;  %v12465_v51 = vld [vmem:[%s12343_s11 + $0xa8] sm:$0xff] }
  0x21   : > { %249 = vst [vmem:[#allocation2 + $0x130] sm:$0x3] %v12143_v6  ;;  %250 = vst [vmem:[#allocation2 + $0x138] sm:$0xff] %v12143_v6  ;;  %10311 = vmatprep.subr.bf16.mxu0 %v16560_v3  ;;  %v12468_v52 = vld [vmem:[%s12343_s11 + $0xb0] sm:$0xff]  ;;  %v1268_v54 = vld [vmem:[%s16556_s1 + $0x98] sm:$0xff] }
  0x22   : > { %251 = vst [vmem:[#allocation2 + $0x140] sm:$0xff] %v12143_v6  ;;  %252 = vst [vmem:[#allocation2 + $0x148] sm:$0x3] %v12143_v6  ;;  %v1267_v53 = vld [vmem:[%s16556_s1 + $0x90] sm:$0xff]  ;;  %v12480_v55 = vld [vmem:[%s12343_s11 + $0xb8] sm:$0xff] }
  0x23   : > { %253 = vst [vmem:[#allocation2 + $0x150] sm:$0xff] %v12143_v6  ;;  %254 = vst [vmem:[#allocation2 + $0x158] sm:$0xff] %v12143_v6  ;;  %v12484_v56 = vld [vmem:[%s12343_s11 + $0xc0] sm:$0xff]  ;;  %v10324_v57 = vpack.c.bf16 %v1268_v54, %v1267_v53  ;;  %v1270_v59 = vld [vmem:[%s16556_s1 + $0xa8] sm:$0xff] }
  0x24   : > { %255 = vst [vmem:[#allocation2 + $0x160] sm:$0x3] %v12143_v6  ;;  %256 = vst [vmem:[#allocation2 + $0x168] sm:$0xff] %v12143_v6  ;;  %10313 = vmatpush1.bf16.msra.mxu0 %v10312_v31  ;;  %v1269_v58 = vld [vmem:[%s16556_s1 + $0xa0] sm:$0xff]  ;;  %v12495_v60 = vld [vmem:[%s12343_s11 + $0xc8] sm:$0xff] }
  0x25   : > { %257 = vst [vmem:[#allocation2 + $0x170] sm:$0xff] %v12143_v6  ;;  %258 = vst [vmem:[#allocation2 + $0x178] sm:$0x3] %v12143_v6  ;;  %10314 = vmatprep.subr.bf16.mxu0 %v16560_v3  ;;  %v10327_v61 = vpack.c.bf16 %v1270_v59, %v1269_v58  ;;  %v1271_v62 = vld [vmem:[%s16556_s1 + $0xb0] sm:$0xff]  ;;  %v1272_v63 = vld [vmem:[%s16556_s1 + $0xb8] sm:$0xff] }
  0x26   : > { %259 = vst [vmem:[#allocation2 + $0x180] sm:$0xff] %v12143_v6  ;;  %260 = vst [vmem:[#allocation2 + $0x188] sm:$0xff] %v12143_v6  ;;  %v12506_v0 = vld [vmem:[%s12343_s11 + $0xd0] sm:$0xff]  ;;  %v10330_v1 = vpack.c.bf16 %v1272_v63, %v1271_v62  ;;  %v1273_v2 = vld [vmem:[%s16556_s1 + $0xc0] sm:$0xff] }
  0x27   : > { %261 = vst [vmem:[#allocation2 + $0x190] sm:$0x3] %v12143_v6  ;;  %262 = vst [vmem:[#allocation2 + $0x198] sm:$0xff] %v12143_v6  ;;  %v1274_v4 = vld [vmem:[%s16556_s1 + $0xc8] sm:$0xff]  ;;  %v12517_v5 = vld [vmem:[%s12343_s11 + $0xd8] sm:$0xff] }
  0x28   : > { %263 = vst [vmem:[#allocation2 + $0x1a0] sm:$0xff] %v12143_v6  ;;  %264 = vst [vmem:[#allocation2 + $0x1a8] sm:$0x3] %v12143_v6  ;;  %10316 = vmatpush1.bf16.msra.mxu0 %v10315_v37  ;;  %v10333_v7 = vpack.c.bf16 %v1274_v4, %v1273_v2  ;;  %v1275_v8 = vld [vmem:[%s16556_s1 + $0xd0] sm:$0xff]  ;;  %v1276_v9 = vld [vmem:[%s16556_s1 + $0xd8] sm:$0xff] }
  0x29   : > { %265 = vst [vmem:[#allocation3] sm:$0xff] %v12143_v6  ;;  %266 = vst [vmem:[#allocation3 + $0x8] sm:$0xff] %v12143_v6  ;;  %10317 = vmatprep.subr.bf16.mxu0 %v16560_v3  ;;  %v12528_v10 = vld [vmem:[%s12343_s11 + $0xe0] sm:$0xff]  ;;  %v10336_v11 = vpack.c.bf16 %v1276_v9, %v1275_v8  ;;  %v1278_v13 = vld [vmem:[%s16556_s1 + $0xe8] sm:$0xff] }
  0x2a   : > { %267 = vst [vmem:[#allocation3 + $0x10] sm:$0x3] %v12143_v6  ;;  %268 = vst [vmem:[#allocation3 + $0x18] sm:$0xff] %v12143_v6  ;;  %v1277_v12 = vld [vmem:[%s16556_s1 + $0xe0] sm:$0xff]  ;;  %v12539_v14 = vld [vmem:[%s12343_s11 + $0xe8] sm:$0xff] }
  0x2b   : > { %269 = vst [vmem:[#allocation3 + $0x20] sm:$0xff] %v12143_v6  ;;  %270 = vst [vmem:[#allocation3 + $0x28] sm:$0x3] %v12143_v6  ;;  %v10339_v15 = vpack.c.bf16 %v1278_v13, %v1277_v12  ;;  %v1279_v16 = vld [vmem:[%s16556_s1 + $0xf0] sm:$0xff]  ;;  %v1280_v22 = vld [vmem:[%s16556_s1 + $0xf8] sm:$0xff] }
  0x2c   : > { %271 = vst [vmem:[#allocation3 + $0x30] sm:$0xff] %v12143_v6  ;;  %272 = vst [vmem:[#allocation3 + $0x38] sm:$0xff] %v12143_v6  ;;  %10319 = vmatpush1.bf16.msra.mxu0 %v10318_v43  ;;  %v10342_v24 = vpack.c.bf16 %v1280_v22, %v1279_v16  ;;  %v1281_v25 = vld [vmem:[%s16556_s1 + $0x100] sm:$0xff]  ;;  %v1282_v31 = vld [vmem:[%s16556_s1 + $0x108] sm:$0xff] }
  0x2d   : > { %273 = vst [vmem:[#allocation3 + $0x40] sm:$0x3] %v12143_v6  ;;  %274 = vst [vmem:[#allocation3 + $0x48] sm:$0xff] %v12143_v6  ;;  %10320 = vmatprep.subr.bf16.mxu0 %v16560_v3  ;;  %v10345_v33 = vpack.c.bf16 %v1282_v31, %v1281_v25  ;;  %v449_v34 = vld [vmem:[#allocation2 + $0x9] sm:$0xff]  ;;  %v1284_v39 = vld [vmem:[%s16556_s1 + $0x118] sm:$0xff] }
  0x2e   : > { %275 = vst [vmem:[#allocation3 + $0x50] sm:$0xff] %v12143_v6  ;;  %276 = vst [vmem:[#allocation3 + $0x58] sm:$0x3] %v12143_v6  ;;  %v1283_v37 = vld [vmem:[%s16556_s1 + $0x110] sm:$0xff]  ;;  %v1285_v43 = vld [vmem:[%s16556_s1 + $0x120] sm:$0xff] }
  0x2f   : > { %277 = vst [vmem:[#allocation3 + $0x60] sm:$0xff] %v12143_v6  ;;  %278 = vst [vmem:[#allocation3 + $0x68] sm:$0xff] %v12143_v6  ;;  %v10348_v40 = vpack.c.bf16 %v1284_v39, %v1283_v37  ;;  %v1286_v45 = vld [vmem:[%s16556_s1 + $0x128] sm:$0xff]  ;;  %v1287_v53 = vld [vmem:[%s16556_s1 + $0x130] sm:$0xff] }
  0x30   : > { %279 = vst [vmem:[#allocation3 + $0x70] sm:$0x3] %v12143_v6  ;;  %280 = vst [vmem:[#allocation3 + $0x78] sm:$0xff] %v12143_v6  ;;  %10322 = vmatpush1.bf16.msra.mxu0 %v10321_v50  ;;  %v10351_v50 = vpack.c.bf16 %v1286_v45, %v1285_v43  ;;  %v1288_v54 = vld [vmem:[%s16556_s1 + $0x138] sm:$0xff]  ;;  %v1290_v58 = vld [vmem:[%s16556_s1 + $0x148] sm:$0xff] }
  0x31   : > { %281 = vst [vmem:[#allocation3 + $0x80] sm:$0xff] %v12143_v6  ;;  %282 = vst [vmem:[#allocation3 + $0x88] sm:$0x3] %v12143_v6  ;;  %10323 = vmatprep.subr.bf16.mxu0 %v16560_v3  ;;  %v1291_v62 = vld [vmem:[%s16556_s1 + $0x150] sm:$0xff]  ;;  %v1292_v63 = vld [vmem:[%s16556_s1 + $0x158] sm:$0xff] }
  0x32   : > { %283 = vst [vmem:[#allocation3 + $0x90] sm:$0xff] %v12143_v6  ;;  %284 = vst [vmem:[#allocation3 + $0x98] sm:$0xff] %v12143_v6  ;;  %v1293_v2 = vld [vmem:[%s16556_s1 + $0x160] sm:$0xff]  ;;  %v1294_v4 = vld [vmem:[%s16556_s1 + $0x168] sm:$0xff] }
  0x33   : > { %285 = vst [vmem:[#allocation3 + $0xa0] sm:$0x3] %v12143_v6  ;;  %286 = vst [vmem:[#allocation3 + $0xa8] sm:$0xff] %v12143_v6  ;;  %v1295_v8 = vld [vmem:[%s16556_s1 + $0x170] sm:$0xff]  ;;  %v1296_v9 = vld [vmem:[%s16556_s1 + $0x178] sm:$0xff] }
  0x34   : > { %287 = vst [vmem:[#allocation3 + $0xb0] sm:$0xff] %v12143_v6  ;;  %288 = vst [vmem:[#allocation3 + $0xb8] sm:$0x3] %v12143_v6  ;;  %10325 = vmatpush1.bf16.msra.mxu0 %v10324_v57  ;;  %v1289_v57 = vld [vmem:[%s16556_s1 + $0x140] sm:$0xff]  ;;  %v1298_v13 = vld [vmem:[%s16556_s1 + $0x188] sm:$0xff] }
  0x35   : > { %289 = vst [vmem:[#allocation3 + $0xc0] sm:$0xff] %v12143_v6  ;;  %290 = vst [vmem:[#allocation3 + $0xc8] sm:$0xff] %v12143_v6  ;;  %10326 = vmatprep.subr.bf16.mxu0 %v16560_v3  ;;  %v1297_v12 = vld [vmem:[%s16556_s1 + $0x180] sm:$0xff]  ;;  %v1299_v16 = vld [vmem:[%s16556_s1 + $0x190] sm:$0xff] }
  0x36   : > { %291 = vst [vmem:[#allocation3 + $0xd0] sm:$0x3] %v12143_v6  ;;  %292 = vst [vmem:[#allocation3 + $0xd8] sm:$0xff] %v12143_v6  ;;  %v1300_v22 = vld [vmem:[%s16556_s1 + $0x198] sm:$0xff]  ;;  %v1301_v25 = vld [vmem:[%s16556_s1 + $0x1a0] sm:$0xff] }
  0x37   : > { %293 = vst [vmem:[#allocation3 + $0xe0] sm:$0xff] %v12143_v6  ;;  %294 = vst [vmem:[#allocation3 + $0xe8] sm:$0x3] %v12143_v6  ;;  %v1302_v31 = vld [vmem:[%s16556_s1 + $0x1a8] sm:$0xff]  ;;  %v1304_v37 = vld [vmem:[%s16556_s1 + $0x1b8] sm:$0xff] }
  0x38   : > { %295 = vst [vmem:[#allocation3 + $0xf0] sm:$0xff] %v12143_v6  ;;  %296 = vst [vmem:[#allocation3 + $0xf8] sm:$0xff] %v12143_v6  ;;  %10328 = vmatpush1.bf16.msra.mxu0 %v10327_v61  ;;  %v1306_v43 = vld [vmem:[%s16556_s1 + $0x1c8] sm:$0xff] }
  0x39   : > { %297 = vst [vmem:[#allocation3 + $0x100] sm:$0x3] %v12143_v6  ;;  %298 = vst [vmem:[#allocation3 + $0x108] sm:$0xff] %v12143_v6  ;;  %10329 = vmatprep.subr.bf16.mxu0 %v16560_v3 }
  0x3a   : > { %299 = vst [vmem:[#allocation3 + $0x110] sm:$0xff] %v12143_v6  ;;  %300 = vst [vmem:[#allocation3 + $0x118] sm:$0x3] %v12143_v6 }
  0x3b   : > { %301 = vst [vmem:[#allocation3 + $0x120] sm:$0xff] %v12143_v6  ;;  %302 = vst [vmem:[#allocation3 + $0x128] sm:$0xff] %v12143_v6 }
  0x3c   : > { %303 = vst [vmem:[#allocation3 + $0x130] sm:$0x3] %v12143_v6  ;;  %304 = vst [vmem:[#allocation3 + $0x138] sm:$0xff] %v12143_v6  ;;  %10331 = vmatpush1.bf16.msra.mxu0 %v10330_v1  ;;  %v10360_v1 = vpack.c.bf16 %v1292_v63, %v1291_v62  ;;  %v1312_v62 = vld [vmem:[%s16556_s1 + $0x1f8] sm:$0xff] }
  0x3d   : > { %305 = vst [vmem:[#allocation3 + $0x140] sm:$0xff] %v12143_v6  ;;  %306 = vst [vmem:[#allocation3 + $0x148] sm:$0x3] %v12143_v6  ;;  %10332 = vmatprep.subr.bf16.mxu0 %v16560_v3 }
  0x3e   : > { %307 = vst [vmem:[#allocation3 + $0x150] sm:$0xff] %v12143_v6  ;;  %308 = vst [vmem:[#allocation3 + $0x158] sm:$0xff] %v12143_v6 }
  0x3f   : > { %309 = vst [vmem:[#allocation3 + $0x160] sm:$0x3] %v12143_v6  ;;  %310 = vst [vmem:[#allocation3 + $0x168] sm:$0xff] %v12143_v6 }
  0x40   : > { %311 = vst [vmem:[#allocation3 + $0x170] sm:$0xff] %v12143_v6  ;;  %312 = vst [vmem:[#allocation3 + $0x178] sm:$0x3] %v12143_v6  ;;  %10334 = vmatpush1.bf16.msra.mxu0 %v10333_v7 }
  0x41   : > { %313 = vst [vmem:[#allocation3 + $0x180] sm:$0xff] %v12143_v6  ;;  %314 = vst [vmem:[#allocation3 + $0x188] sm:$0xff] %v12143_v6  ;;  %10335 = vmatprep.subr.bf16.mxu0 %v16560_v3 }
  0x42   : > { %315 = vst [vmem:[#allocation3 + $0x190] sm:$0x3] %v12143_v6  ;;  %316 = vst [vmem:[#allocation3 + $0x198] sm:$0xff] %v12143_v6 }
  0x43   : > { %317 = vst [vmem:[#allocation3 + $0x1a0] sm:$0xff] %v12143_v6  ;;  %318 = vst [vmem:[#allocation3 + $0x1a8] sm:$0x3] %v12143_v6 }
  0x44   : > { %352 = vst [vmem:[#allocation2 + $0x19] sm:$0xff] %v12353_v17  ;;  %353 = vst [vmem:[#allocation2 + $0x21] sm:$0xff] %v12357_v18  ;;  %10337 = vmatpush1.bf16.msra.mxu0 %v10336_v11 }
  0x45   : > { %354 = vst [vmem:[#allocation2 + $0x31] sm:$0xff] %v12360_v19  ;;  %355 = vst [vmem:[#allocation2 + $0x39] sm:$0xff] %v12365_v20  ;;  %10338 = vmatprep.subr.bf16.mxu0 %v16560_v3 }
  0x46   : > { %356 = vst [vmem:[#allocation2 + $0x49] sm:$0xff] %v12368_v21  ;;  %357 = vst [vmem:[#allocation2 + $0x51] sm:$0xff] %v12373_v23 }
  0x47   : > { %358 = vst [vmem:[#allocation2 + $0x61] sm:$0xff] %v12384_v26  ;;  %359 = vst [vmem:[#allocation2 + $0x69] sm:$0xff] %v12388_v27 }
  0x48   : > { %360 = vst [vmem:[#allocation2 + $0x79] sm:$0xff] %v12391_v28  ;;  %361 = vst [vmem:[#allocation2 + $0x81] sm:$0xff] %v12396_v29  ;;  %10340 = vmatpush1.bf16.msra.mxu0 %v10339_v15 }
  0x49   : > { %362 = vst [vmem:[#allocation2 + $0x91] sm:$0xff] %v12399_v30  ;;  %363 = vst [vmem:[#allocation2 + $0x99] sm:$0xff] %v12404_v32  ;;  %10341 = vmatprep.subr.bf16.mxu0 %v16560_v3 }
  0x4a   : > { %364 = vst [vmem:[#allocation2 + $0xa9] sm:$0xff] %v12415_v35  ;;  %365 = vst [vmem:[#allocation2 + $0xb1] sm:$0xff] %v12419_v36 }
  0x4b   : > { %366 = vst [vmem:[#allocation2 + $0xc1] sm:$0xff] %v12423_v38  ;;  %367 = vst [vmem:[#allocation2 + $0xc9] sm:$0xff] %v12434_v41  ;;  %v12573_v46 = vld [vmem:[#allocation2 + $0x18] sm:$0xff] }
  0x4c   : > { %368 = vst [vmem:[#allocation2 + $0xd9] sm:$0xff] %v12438_v42  ;;  %369 = vst [vmem:[#allocation2 + $0xe1] sm:$0xff] %v12442_v44  ;;  %10343 = vmatpush1.bf16.msra.mxu0 %v10342_v24  ;;  %v12595_v59 = vld [vmem:[#allocation2 + $0x30] sm:$0xff] }
  0x4d   : > { %370 = vst [vmem:[#allocation2 + $0xf1] sm:$0xff] %v12453_v47  ;;  %371 = vst [vmem:[#allocation2 + $0xf9] sm:$0xff] %v12457_v48  ;;  %10344 = vmatprep.subr.bf16.mxu0 %v16560_v3  ;;  %v12597_v61 = vld [vmem:[#allocation2 + $0x32] sm:$0xff]  ;;  %v12620_v7 = vld [vmem:[#allocation2 + $0x48] sm:$0xff] }
  0x4e   : > { %372 = vst [vmem:[#allocation2 + $0x109] sm:$0xff] %v12460_v49  ;;  %373 = vst [vmem:[#allocation2 + $0x111] sm:$0xff] %v12465_v51  ;;  %10008 = vmatprep.mubr.f32.mxu1 %v12597_v61  ;;  %v12631_v11 = vld [vmem:[#allocation2 + $0x50] sm:$0xff]  ;;  %v12642_v15 = vld [vmem:[#allocation2 + $0x60] sm:$0xff] }
  0x4f   : > { %374 = vst [vmem:[#allocation2 + $0x121] sm:$0xff] %v12468_v52  ;;  %375 = vst [vmem:[#allocation2 + $0x129] sm:$0xff] %v12480_v55  ;;  %1465 = vmatmul.mubr.f32.vlgmr.msra.gmra.mrb[0].mxu0 %v12143_v6  ;;  %v12653_v24 = vld [vmem:[#allocation2 + $0x68] sm:$0xff]  ;;  %v12675_v39 = vld [vmem:[#allocation2 + $0x80] sm:$0xff] }
  0x50   : > { %376 = vst [vmem:[#allocation2 + $0x139] sm:$0xff] %v12484_v56  ;;  %377 = vst [vmem:[#allocation2 + $0x141] sm:$0xff] %v12495_v60  ;;  %10346 = vmatpush1.bf16.msra.mxu0 %v10345_v33  ;;  %1469 = vmatprep.mubr.f32.mxu0 %v449_v34  ;;  %v12664_v33 = vld [vmem:[#allocation2 + $0x78] sm:$0xff]  ;;  %v1303_v34 = vld [vmem:[%s16556_s1 + $0x1b0] sm:$0xff] }
  0x51   : > { %378 = vst [vmem:[#allocation2 + $0x151] sm:$0xff] %v12506_v0  ;;  %379 = vst [vmem:[#allocation2 + $0x159] sm:$0xff] %v12517_v5  ;;  %10347 = vmatprep.subr.bf16.mxu0 %v16560_v3  ;;  %v12686_v45 = vld [vmem:[#allocation2 + $0x90] sm:$0xff] }
  0x52   : > { %380 = vst [vmem:[#allocation2 + $0x169] sm:$0xff] %v12528_v10  ;;  %381 = vst [vmem:[#allocation2 + $0x171] sm:$0xff] %v12539_v14  ;;  %v12719_v63 = vld [vmem:[#allocation2 + $0xb0] sm:$0xff] }
  0x53   : > { %1470 = vmatmul.mubr.f32.gmra.mrb[2].mxu0 %v12143_v6  ;;  %v12584_v6 = vld [vmem:[#allocation2 + $0x20] sm:$0xff] }
  0x54   : > { %1474 = vmatprep.mubr.f32.mxu0 %v12353_v17  ;;  %10349 = vmatpush1.bf16.msra.mxu0 %v10348_v40  ;;  %v10354_v17 = vpack.c.bf16 %v1288_v54, %v1287_v53  ;;  %v1305_v40 = vld [vmem:[%s16556_s1 + $0x1c0] sm:$0xff]  ;;  %v1308_v53 = vld [vmem:[%s16556_s1 + $0x1d8] sm:$0xff] }
  0x55   : > { %10350 = vmatprep.subr.bf16.mxu0 %v16560_v3  ;;  %v12697_v54 = vld [vmem:[#allocation2 + $0x98] sm:$0xff] }
  0x57   : > { %1475 = vmatmul.mubr.f32.gmra.mrb[4].mxu0 %v12573_v46 }
  0x58   : > { %1479 = vmatprep.mubr.f32.mxu0 %v12357_v18  ;;  %10352 = vmatpush1.bf16.msra.mxu0 %v10351_v50  ;;  %v10357_v18 = vpack.c.bf16 %v1290_v58, %v1289_v57  ;;  %v1307_v50 = vld [vmem:[%s16556_s1 + $0x1d0] sm:$0xff]  ;;  %v1310_v57 = vld [vmem:[%s16556_s1 + $0x1e8] sm:$0xff] }
  0x59   : > { %10353 = vmatprep.subr.bf16.mxu0 %v16560_v3  ;;  %v12708_v58 = vld [vmem:[#allocation2 + $0xa8] sm:$0xff] }
  0x5b   : > { %1480 = vmatmul.mubr.f32.gmra.mrb[6].mxu0 %v12584_v6 }
  0x5c   : > { %1484 = vmatprep.mubr.f32.mxu0 %v12360_v19  ;;  %10355 = vmatpush1.bf16.msra.mxu0 %v10354_v17  ;;  %v12609_v19 = vld [vmem:[#allocation2 + $0x38] sm:$0xff]  ;;  %v1309_v17 = vld [vmem:[%s16556_s1 + $0x1e0] sm:$0xff] }
  0x5d   : > { %10356 = vmatprep.subr.bf16.mxu0 %v16560_v3 }
  0x5f   : > { %1485 = vmatmul.mubr.f32.gmra.mrb[8].mxu0 %v12595_v59 }
  0x60   : > { %1489 = vmatprep.mubr.f32.mxu0 %v12365_v20  ;;  %10358 = vmatpush1.bf16.msra.mxu0 %v10357_v18  ;;  %v10363_v20 = vpack.c.bf16 %v1294_v4, %v1293_v2  ;;  %v1311_v18 = vld [vmem:[%s16556_s1 + $0x1f0] sm:$0xff]  ;;  %v12733_v2 = vld [vmem:[#allocation2 + $0xd8] sm:$0xff] }
  0x61   : > { %10359 = vmatprep.subr.bf16.mxu0 %v16560_v3  ;;  %v12741_v4 = vld [vmem:[#allocation2 + $0xf0] sm:$0xff] }
  0x63   : > { %1490 = vmatmul.mubr.f32.gmra.mrb[10].mxu0 %v12609_v19 }
  0x64   : > { %1494 = vmatprep.mubr.f32.mxu0 %v12368_v21  ;;  %10361 = vmatpush1.bf16.msra.mxu0 %v10360_v1  ;;  %v10366_v21 = vpack.c.bf16 %v1296_v9, %v1295_v8  ;;  %v12724_v1 = vld [vmem:[#allocation2 + $0xc0] sm:$0xff]  ;;  %v1314_v8 = vld [vmem:[%s16556_s1 + $0x208] sm:$0xff] }
  0x65   : > { %10362 = vmatprep.subr.bf16.mxu0 %v16560_v3 }
  0x67   : > { %1495 = vmatmul.mubr.f32.gmra.mrb[12].mxu0 %v12620_v7 }
  0x68   : > { %1499 = vmatprep.mubr.f32.mxu0 %v12373_v23  ;;  %10364 = vmatpush1.bf16.msra.mxu0 %v10363_v20  ;;  %v10369_v23 = vpack.c.bf16 %v1298_v13, %v1297_v12  ;;  %v12784_v20 = vld [vmem:[%s12343_s11 + $0xf8] sm:$0xff]  ;;  %v513_v12 = vld [vmem:[#allocation2 + $0xa] sm:$0xff] }
  0x69   : > { %10365 = vmatprep.subr.bf16.mxu0 %v16560_v3  ;;  %383 = vst [vmem:[#allocation2 + $0x189] sm:$0xff] %v12784_v20 }
  0x6b   : > { %1500 = vmatmul.mubr.f32.gmra.mrb[14].mxu0 %v12631_v11 }
  0x6c   : > { %1504 = vmatprep.mubr.f32.mxu0 %v12384_v26  ;;  %10367 = vmatpush1.bf16.msra.mxu0 %v10366_v21  ;;  %v10372_v26 = vpack.c.bf16 %v1300_v22, %v1299_v16  ;;  %v1316_v21 = vld [vmem:[%s16556_s1 + $0x218] sm:$0xff] }
  0x6d   : > { %10368 = vmatprep.subr.bf16.mxu0 %v16560_v3  ;;  %v12818_v16 = vld [vmem:[#allocation2 + $0x1a] sm:$0xff] }
  0x6f   : > { %1505 = vmatmul.mubr.f32.gmra.mrb[16].mxu0 %v12642_v15 }
  0x70   : > { %1509 = vmatprep.mubr.f32.mxu0 %v12388_v27  ;;  %10370 = vmatpush1.bf16.msra.mxu0 %v10369_v23  ;;  %v10375_v27 = vpack.c.bf16 %v1302_v31, %v1301_v25  ;;  %v1318_v23 = vld [vmem:[%s16556_s1 + $0x228] sm:$0xff]  ;;  %v1321_v31 = vld [vmem:[%s16556_s1 + $0x240] sm:$0xff] }
  0x71   : > { %10371 = vmatprep.subr.bf16.mxu0 %v16560_v3  ;;  %v12829_v25 = vld [vmem:[#allocation2 + $0x22] sm:$0xff] }
  0x73   : > { %1510 = vmatmul.mubr.f32.gmra.mrb[18].mxu0 %v12653_v24 }
  0x74   : > { %1514 = vmatprep.mubr.f32.mxu0 %v12391_v28  ;;  %10373 = vmatpush1.bf16.msra.mxu0 %v10372_v26  ;;  %v10378_v28 = vpack.c.bf16 %v1304_v37, %v1303_v34  ;;  %v1320_v26 = vld [vmem:[%s16556_s1 + $0x238] sm:$0xff]  ;;  %v1323_v34 = vld [vmem:[%s16556_s1 + $0x250] sm:$0xff] }
  0x75   : > { %10374 = vmatprep.subr.bf16.mxu0 %v16560_v3  ;;  %v1324_v37 = vld [vmem:[%s16556_s1 + $0x258] sm:$0xff] }
  0x77   : > { %1515 = vmatmul.mubr.f32.gmra.mrb[20].mxu0 %v12664_v33 }
  0x78   : > { %1519 = vmatprep.mubr.f32.mxu0 %v12396_v29  ;;  %10376 = vmatpush1.bf16.msra.mxu0 %v10375_v27  ;;  %v10381_v29 = vpack.c.bf16 %v1306_v43, %v1305_v40  ;;  %v1322_v27 = vld [vmem:[%s16556_s1 + $0x248] sm:$0xff]  ;;  %v1325_v40 = vld [vmem:[%s16556_s1 + $0x260] sm:$0xff] }
  0x79   : > { %10377 = vmatprep.subr.bf16.mxu0 %v16560_v3  ;;  %v1326_v43 = vld [vmem:[%s16556_s1 + $0x268] sm:$0xff] }
  0x7b   : > { %1520 = vmatmul.mubr.f32.gmra.mrb[22].mxu0 %v12675_v39 }
  0x7c   : > { %1524 = vmatprep.mubr.f32.mxu0 %v12399_v30  ;;  %10379 = vmatpush1.bf16.msra.mxu0 %v10378_v28  ;;  %v10384_v30 = vpack.c.bf16 %v1308_v53, %v1307_v50  ;;  %v12849_v28 = vld [vmem:[#allocation2 + $0x3a] sm:$0xff]  ;;  %v1327_v50 = vld [vmem:[%s16556_s1 + $0x270] sm:$0xff] }
  0x7d   : > { %10380 = vmatprep.subr.bf16.mxu0 %v16560_v3  ;;  %v1328_v53 = vld [vmem:[%s16556_s1 + $0x278] sm:$0xff] }
  0x7f   : > { %1525 = vmatmul.mubr.f32.gmra.mrb[24].mxu0 %v12686_v45 }
  0x80   : > { %1529 = vmatprep.mubr.f32.mxu0 %v12404_v32  ;;  %10382 = vmatpush1.bf16.msra.mxu0 %v10381_v29  ;;  %v10387_v32 = vpack.c.bf16 %v1310_v57, %v1309_v17  ;;  %v12860_v29 = vld [vmem:[#allocation2 + $0x4a] sm:$0xff]  ;;  %v1329_v17 = vld [vmem:[%s16556_s1 + $0x280] sm:$0xff] }
  0x81   : > { %10383 = vmatprep.subr.bf16.mxu0 %v16560_v3  ;;  %v1330_v57 = vld [vmem:[%s16556_s1 + $0x288] sm:$0xff] }
  0x83   : > { %1530 = vmatmul.mubr.f32.gmra.mrb[26].mxu0 %v12697_v54 }
  0x84   : > { %1534 = vmatprep.mubr.f32.mxu0 %v12415_v35  ;;  %10385 = vmatpush1.bf16.msra.mxu0 %v10384_v30  ;;  %v10390_v35 = vpack.c.bf16 %v1312_v62, %v1311_v18  ;;  %v12871_v30 = vld [vmem:[#allocation2 + $0x52] sm:$0xff] }
  0x85   : > { %10386 = vmatprep.subr.bf16.mxu0 %v16560_v3  ;;  %v1331_v18 = vld [vmem:[%s16556_s1 + $0x290] sm:$0xff]  ;;  %v1332_v62 = vld [vmem:[%s16556_s1 + $0x298] sm:$0xff] }
  0x87   : > { %1535 = vmatmul.mubr.f32.gmra.mrb[28].mxu0 %v12708_v58 }
  0x88   : > { %1539 = vmatprep.mubr.f32.mxu0 %v12419_v36  ;;  %10388 = vmatpush1.bf16.msra.mxu0 %v10387_v32  ;;  %v12729_v36 = vld [vmem:[#allocation2 + $0xc8] sm:$0xff] }
  0x89   : > { %10389 = vmatprep.subr.bf16.mxu0 %v16560_v3  ;;  %v12882_v32 = vld [vmem:[#allocation2 + $0x62] sm:$0xff] }
  0x8b   : > { %1540 = vmatmul.mubr.f32.gmra.mrb[30].mxu0 %v12719_v63 }
  0x8c   : > { %1544 = vmatprep.mubr.f32.mxu0 %v12423_v38  ;;  %10391 = vmatpush1.bf16.msra.mxu0 %v10390_v35  ;;  %v12737_v38 = vld [vmem:[#allocation2 + $0xe0] sm:$0xff]  ;;  %v12893_v35 = vld [vmem:[#allocation2 + $0x6a] sm:$0xff] }
  0x8d   : > { %10392 = vmatprep.subr.bf16.mxu0 %v16560_v3 }
  0x8f   : > { %1545 = vmatmul.mubr.f32.gmra.mrb[32].mxu0 %v12724_v1 }
  0x90   : > { %1549 = vmatprep.mubr.f32.mxu0 %v12434_v41  ;;  %v12745_v41 = vld [vmem:[#allocation2 + $0xf8] sm:$0xff] }
  0x93   : > { %1550 = vmatmul.mubr.f32.gmra.mrb[34].mxu0 %v12729_v36 }
  0x94   : > { %1554 = vmatprep.mubr.f32.mxu0 %v12438_v42  ;;  %v12749_v42 = vld [vmem:[#allocation2 + $0x108] sm:$0xff] }
  0x97   : > { %1555 = vmatmul.mubr.f32.gmra.mrb[36].mxu0 %v12733_v2 }
  0x98   : > { %1559 = vmatprep.mubr.f32.mxu0 %v12442_v44  ;;  %v12753_v44 = vld [vmem:[#allocation2 + $0x110] sm:$0xff] }
  0x9b   : > { %1560 = vmatmul.mubr.f32.gmra.mrb[38].mxu0 %v12737_v38 }
  0x9c   : > { %1564 = vmatprep.mubr.f32.mxu0 %v12453_v47  ;;  %v12757_v47 = vld [vmem:[#allocation2 + $0x120] sm:$0xff] }
  0x9f   : > { %1565 = vmatmul.mubr.f32.gmra.mrb[40].mxu0 %v12741_v4 }
  0xa0   : > { %1569 = vmatprep.mubr.f32.mxu0 %v12457_v48  ;;  %v12761_v48 = vld [vmem:[#allocation2 + $0x128] sm:$0xff] }
  0xa3   : > { %1570 = vmatmul.mubr.f32.gmra.mrb[42].mxu0 %v12745_v41 }
  0xa4   : > { %1574 = vmatprep.mubr.f32.mxu0 %v12460_v49  ;;  %v12765_v49 = vld [vmem:[#allocation2 + $0x138] sm:$0xff] }
  0xa7   : > { %1575 = vmatmul.mubr.f32.gmra.mrb[44].mxu0 %v12749_v42 }
  0xa8   : > { %1579 = vmatprep.mubr.f32.mxu0 %v12465_v51  ;;  %v12769_v51 = vld [vmem:[#allocation2 + $0x140] sm:$0xff] }
  0xab   : > { %1580 = vmatmul.mubr.f32.gmra.mrb[46].mxu0 %v12753_v44 }
  0xac   : > { %1584 = vmatprep.mubr.f32.mxu0 %v12468_v52  ;;  %v12773_v52 = vld [vmem:[#allocation2 + $0x150] sm:$0xff] }
  0xaf   : > { %1585 = vmatmul.mubr.f32.gmra.mrb[48].mxu0 %v12757_v47 }
  0xb0   : > { %1589 = vmatprep.mubr.f32.mxu0 %v12480_v55  ;;  %v12776_v55 = vld [vmem:[%s12343_s11 + $0xf0] sm:$0xff] }
  0xb1   : > { %382 = vst [vmem:[#allocation2 + $0x181] sm:$0xff] %v12776_v55 }
  0xb3   : > { %1590 = vmatmul.mubr.f32.gmra.mrb[50].mxu0 %v12761_v48 }
  0xb4   : > { %1594 = vmatprep.mubr.f32.mxu0 %v12484_v56  ;;  %v12781_v56 = vld [vmem:[#allocation2 + $0x158] sm:$0xff] }
  0xb7   : > { %1595 = vmatmul.mubr.f32.gmra.mrb[52].mxu0 %v12765_v49 }
  0xb8   : > { %1599 = vmatprep.mubr.f32.mxu0 %v12495_v60  ;;  %v12789_v60 = vld [vmem:[#allocation2 + $0x168] sm:$0xff] }
  0xbb   : > { %1600 = vmatmul.mubr.f32.gmra.mrb[54].mxu0 %v12769_v51 }
  0xbc   : > { %1604 = vmatprep.mubr.f32.mxu0 %v12506_v0  ;;  %v12793_v0 = vld [vmem:[#allocation2 + $0x170] sm:$0xff] }
  0xbf   : > { %1605 = vmatmul.mubr.f32.gmra.mrb[56].mxu0 %v12773_v52 }
  0xc0   : > { %1609 = vmatprep.mubr.f32.mxu0 %v12517_v5  ;;  %v1313_v5 = vld [vmem:[%s16556_s1 + $0x200] sm:$0xff] }
  0xc1   : > { %v10393_v9 = vpack.c.bf16 %v1314_v8, %v1313_v5  ;;  %v1333_v5 = vld [vmem:[%s16556_s1 + $0x2a0] sm:$0xff]  ;;  %v1334_v8 = vld [vmem:[%s16556_s1 + $0x2a8] sm:$0xff] }
  0xc3   : > { %1610 = vmatmul.mubr.f32.gmra.mrb[58].mxu0 %v12781_v56 }
  0xc4   : > { %1614 = vmatprep.mubr.f32.mxu0 %v12528_v10  ;;  %v512_v10 = vld [vmem:[#allocation2 + $0x2] sm:$0xff] }
  0xc7   : > { %1615 = vmatmul.mubr.f32.gmra.mrb[60].mxu0 %v12789_v60 }
  0xc8   : > { %1619 = vmatprep.mubr.f32.mxu0 %v12539_v14  ;;  %v1315_v14 = vld [vmem:[%s16556_s1 + $0x210] sm:$0xff] }
  0xc9   : > { %v10396_v13 = vpack.c.bf16 %v1316_v21, %v1315_v14  ;;  %v1336_v14 = vld [vmem:[%s16556_s1 + $0x2b8] sm:$0xff]  ;;  %v12915_v21 = vld [vmem:[#allocation2 + $0x82] sm:$0xff] }
  0xcb   : > { %1620 = vmatmul.mubr.f32.gmra.mrb[62].mxu0 %v12793_v0 }
  0xcc   : > { %1689 = vmatprep.mubr.f32.mxu0 %v12573_v46  ;;  %v1317_v46 = vld [vmem:[%s16556_s1 + $0x220] sm:$0xff] }
  0xcd   : > { %v10399_v22 = vpack.c.bf16 %v1318_v23, %v1317_v46  ;;  %v12926_v46 = vld [vmem:[#allocation2 + $0x92] sm:$0xff] }
  0xce   : > { %v1339_v23 = vld [vmem:[%s16556_s1 + $0x2d0] sm:$0xff] }
  0xcf   : > { %1690 = vmatmul.mubr.f32.vlgmr.msra.gmra.mrb[0].mxu0 %v512_v10  ;;  %v12904_v10 = vld [vmem:[#allocation2 + $0x7a] sm:$0xff] }
  0xd0   : > { %10394 = vmatpush1.bf16.msra.mxu0 %v10393_v9  ;;  %1694 = vmatprep.mubr.f32.mxu0 %v12584_v6  ;;  %v1319_v6 = vld [vmem:[%s16556_s1 + $0x230] sm:$0xff] }
  0xd1   : > { %10395 = vmatprep.subr.bf16.mxu0 %v16560_v3  ;;  %v1335_v9 = vld [vmem:[%s16556_s1 + $0x2b0] sm:$0xff] }
  0xd3   : > { %1695 = vmatmul.mubr.f32.gmra.mrb[2].mxu0 %v513_v12  ;;  %v1337_v12 = vld [vmem:[%s16556_s1 + $0x2c0] sm:$0xff] }
  0xd4   : > { %1699 = vmatprep.mubr.f32.mxu0 %v12595_v59  ;;  %10397 = vmatpush1.bf16.msra.mxu0 %v10396_v13  ;;  %v10402_v59 = vpack.c.bf16 %v1320_v26, %v1319_v6  ;;  %v1338_v13 = vld [vmem:[%s16556_s1 + $0x2c8] sm:$0xff]  ;;  %v12937_v6 = vld [vmem:[#allocation2 + $0x9a] sm:$0xff] }
  0xd5   : > { %10398 = vmatprep.subr.bf16.mxu0 %v16560_v3  ;;  %v1341_v26 = vld [vmem:[%s16556_s1 + $0x2e0] sm:$0xff] }
  0xd7   : > { %1700 = vmatmul.mubr.f32.gmra.mrb[4].mxu0 %v12818_v16 }
  0xd8   : > { %1704 = vmatprep.mubr.f32.mxu0 %v12609_v19  ;;  %10400 = vmatpush1.bf16.msra.mxu0 %v10399_v22  ;;  %v10405_v19 = vpack.c.bf16 %v1322_v27, %v1321_v31  ;;  %v1340_v22 = vld [vmem:[%s16556_s1 + $0x2d8] sm:$0xff]  ;;  %v12948_v31 = vld [vmem:[#allocation2 + $0xaa] sm:$0xff] }
  0xd9   : > { %10401 = vmatprep.subr.bf16.mxu0 %v16560_v3  ;;  %v1343_v27 = vld [vmem:[%s16556_s1 + $0x2f0] sm:$0xff] }
  0xdb   : > { %1705 = vmatmul.mubr.f32.gmra.mrb[6].mxu0 %v12829_v25 }
  0xdc   : > { %1709 = vmatprep.mubr.f32.mxu0 %v12620_v7  ;;  %10403 = vmatpush1.bf16.msra.mxu0 %v10402_v59  ;;  %v10408_v7 = vpack.c.bf16 %v1324_v37, %v1323_v34  ;;  %v1342_v59 = vld [vmem:[%s16556_s1 + $0x2e8] sm:$0xff]  ;;  %v12959_v34 = vld [vmem:[#allocation2 + $0xb2] sm:$0xff] }
  0xdd   : > { %10404 = vmatprep.subr.bf16.mxu0 %v16560_v3  ;;  %v12964_v37 = vld [vmem:[#allocation2 + $0xc2] sm:$0xff] }
  0xdf   : > { %1710 = vmatmul.mubr.f32.gmra.mrb[8].mxu0 %v12597_v61 }
  0xe0   : > { %1714 = vmatprep.mubr.f32.mxu0 %v12631_v11  ;;  %10406 = vmatpush1.bf16.msra.mxu0 %v10405_v19  ;;  %v10411_v11 = vpack.c.bf16 %v1326_v43, %v1325_v40  ;;  %v1344_v19 = vld [vmem:[%s16556_s1 + $0x2f8] sm:$0xff] }
  0xe1   : > { %10407 = vmatprep.subr.bf16.mxu0 %v16560_v3  ;;  %v12981_v40 = vld [vmem:[#allocation2 + $0xf2] sm:$0xff] }
  0xe3   : > { %1715 = vmatmul.mubr.f32.gmra.mrb[10].mxu0 %v12849_v28 }
  0xe4   : > { %1719 = vmatprep.mubr.f32.mxu0 %v12642_v15  ;;  %10409 = vmatpush1.bf16.msra.mxu0 %v10408_v7  ;;  %v10414_v15 = vpack.c.bf16 %v1328_v53, %v1327_v50  ;;  %v12973_v7 = vld [vmem:[#allocation2 + $0xda] sm:$0xff] }
  0xe5   : > { %10410 = vmatprep.subr.bf16.mxu0 %v16560_v3  ;;  %v13017_v53 = vld [vmem:[#allocation2 + $0x13a] sm:$0xff] }
  0xe7   : > { %1720 = vmatmul.mubr.f32.gmra.mrb[12].mxu0 %v12860_v29 }
  0xe8   : > { %1724 = vmatprep.mubr.f32.mxu0 %v12653_v24  ;;  %10412 = vmatpush1.bf16.msra.mxu0 %v10411_v11  ;;  %v10417_v24 = vpack.c.bf16 %v1330_v57, %v1329_v17  ;;  %v1380_v11 = vld [vmem:[%s16556_s1 + $0x418] sm:$0xff]  ;;  %v13027_v57 = vld [vmem:[#allocation2 + $0x142] sm:$0xff] }
  0xe9   : > { %10413 = vmatprep.subr.bf16.mxu0 %v16560_v3 }
  0xeb   : > { %1725 = vmatmul.mubr.f32.gmra.mrb[14].mxu0 %v12871_v30 }
  0xec   : > { %1729 = vmatprep.mubr.f32.mxu0 %v12664_v33  ;;  %10415 = vmatpush1.bf16.msra.mxu0 %v10414_v15  ;;  %v10420_v33 = vpack.c.bf16 %v1332_v62, %v1331_v18  ;;  %v1382_v15 = vld [vmem:[%s16556_s1 + $0x428] sm:$0xff]  ;;  %v13037_v62 = vld [vmem:[#allocation2 + $0x152] sm:$0xff] }
  0xed   : > { %10416 = vmatprep.subr.bf16.mxu0 %v16560_v3 }
  0xef   : > { %1730 = vmatmul.mubr.f32.gmra.mrb[16].mxu0 %v12882_v32 }
  0xf0   : > { %1734 = vmatprep.mubr.f32.mxu0 %v12675_v39  ;;  %10418 = vmatpush1.bf16.msra.mxu0 %v10417_v24  ;;  %v10423_v39 = vpack.c.bf16 %v1334_v8, %v1333_v5  ;;  %v1384_v24 = vld [vmem:[%s16556_s1 + $0x438] sm:$0xff] }
  0xf1   : > { %10419 = vmatprep.subr.bf16.mxu0 %v16560_v3  ;;  %v13047_v8 = vld [vmem:[#allocation2 + $0x15a] sm:$0xff] }
  0xf3   : > { %1735 = vmatmul.mubr.f32.gmra.mrb[18].mxu0 %v12893_v35 }
  0xf4   : > { %1739 = vmatprep.mubr.f32.mxu0 %v12686_v45  ;;  %10421 = vmatpush1.bf16.msra.mxu0 %v10420_v33  ;;  %v10426_v45 = vpack.c.bf16 %v1336_v14, %v1335_v9  ;;  %v1386_v33 = vld [vmem:[%s16556_s1 + $0x448] sm:$0xff]  ;;  %v13055_v9 = vld [vmem:[#allocation2 + $0x180] sm:$0xff] }
  0xf5   : > { %10422 = vmatprep.subr.bf16.mxu0 %v16560_v3 }
  0xf7   : > { %1740 = vmatmul.mubr.f32.gmra.mrb[20].mxu0 %v12904_v10 }
  0xf8   : > { %1744 = vmatprep.mubr.f32.mxu0 %v12697_v54  ;;  %10424 = vmatpush1.bf16.msra.mxu0 %v10423_v39  ;;  %v10429_v54 = vpack.c.bf16 %v1338_v13, %v1337_v12  ;;  %v1388_v39 = vld [vmem:[%s16556_s1 + $0x458] sm:$0xff]  ;;  %v1390_v12 = vld [vmem:[%s16556_s1 + $0x468] sm:$0xff] }
  0xf9   : > { %10425 = vmatprep.subr.bf16.mxu0 %v16560_v3  ;;  %v13067_v13 = vld [vmem:[#allocation2 + $0x188] sm:$0xff] }
  0xfb   : > { %1745 = vmatmul.mubr.f32.gmra.mrb[22].mxu0 %v12915_v21 }
  0xfc   : > { %1749 = vmatprep.mubr.f32.mxu0 %v12708_v58  ;;  %10427 = vmatpush1.bf16.msra.mxu0 %v10426_v45  ;;  %v10432_v58 = vpack.c.bf16 %v1340_v22, %v1339_v23  ;;  %v1389_v45 = vld [vmem:[%s16556_s1 + $0x460] sm:$0xff]  ;;  %v13071_v23 = vld [vmem:[#allocation2 + $0x172] sm:$0xff] }
  0xfd   : > { %10428 = vmatprep.subr.bf16.mxu0 %v16560_v3  ;;  %v1391_v22 = vld [vmem:[%s16556_s1 + $0x470] sm:$0xff] }
  0xff   : > { %1750 = vmatmul.mubr.f32.gmra.mrb[24].mxu0 %v12926_v46 }
 0x100   : > { %1754 = vmatprep.mubr.f32.mxu0 %v12719_v63  ;;  %10430 = vmatpush1.bf16.msra.mxu0 %v10429_v54  ;;  %v10435_v63 = vpack.c.bf16 %v1342_v59, %v1341_v26  ;;  %v10512_v54 = vpack.c.bf16 %v1390_v12, %v1389_v45  ;;  %v1345_v26 = vld [vmem:[%s16556_s1 + $0x300] sm:$0xff]  ;;  %v1346_v59 = vld [vmem:[%s16556_s1 + $0x308] sm:$0xff] }
 0x101   : > { %10431 = vmatprep.subr.bf16.mxu0 %v16560_v3  ;;  %v12104_v45 = vld [vmem:[#allocation2 + $0x61] sm:$0xff] }
 0x102   : > { %v1361_v12 = vld [vmem:[%s16556_s1 + $0x380] sm:$0xff] }
 0x103   : > { %1755 = vmatmul.mubr.f32.gmra.mrb[26].mxu0 %v12937_v6 }
 0x104   : > { %1759 = vmatprep.mubr.f32.mxu0 %v12724_v1  ;;  %10433 = vmatpush1.bf16.msra.mxu0 %v10432_v58  ;;  %v10438_v1 = vpack.c.bf16 %v1344_v19, %v1343_v27  ;;  %v1392_v58 = vld [vmem:[%s16556_s1 + $0x478] sm:$0xff]  ;;  %v10441_v27 = vpack.c.bf16 %v1346_v59, %v1345_v26  ;;  %v1347_v19 = vld [vmem:[%s16556_s1 + $0x310] sm:$0xff] }
 0x105   : > { %10434 = vmatprep.subr.bf16.mxu0 %v16560_v3  ;;  %v1364_v26 = vld [vmem:[%s16556_s1 + $0x398] sm:$0xff] }
 0x106   : > { %v12106_v59 = vld [vmem:[#allocation2 + $0x79] sm:$0xff] }
 0x107   : > { %1760 = vmatmul.mubr.f32.gmra.mrb[28].mxu0 %v12948_v31 }
 0x108   : > { %1764 = vmatprep.mubr.f32.mxu0 %v12729_v36  ;;  %10436 = vmatpush1.bf16.msra.mxu0 %v10435_v63  ;;  %v12969_v36 = vld [vmem:[#allocation2 + $0xca] sm:$0xff]  ;;  %v10516_v63 = vpack.c.bf16 %v1392_v58, %v1391_v22 }
 0x109   : > { %10437 = vmatprep.subr.bf16.mxu0 %v16560_v3  ;;  %v12105_v22 = vld [vmem:[#allocation2 + $0x69] sm:$0xff] }
 0x10a   : > { %v1363_v58 = vld [vmem:[%s16556_s1 + $0x390] sm:$0xff] }
 0x10b   : > { %1765 = vmatmul.mubr.f32.gmra.mrb[30].mxu0 %v12959_v34 }
 0x10c   : > { %1769 = vmatprep.mubr.f32.mxu0 %v12733_v2  ;;  %10439 = vmatpush1.bf16.msra.mxu0 %v10438_v1  ;;  %v12977_v2 = vld [vmem:[#allocation2 + $0xe2] sm:$0xff]  ;;  %v1348_v1 = vld [vmem:[%s16556_s1 + $0x318] sm:$0xff] }
 0x10d   : > { %10440 = vmatprep.subr.bf16.mxu0 %v16560_v3 }
 0x10f   : > { %1770 = vmatmul.mubr.f32.gmra.mrb[32].mxu0 %v12964_v37 }
 0x110   : > { %1774 = vmatprep.mubr.f32.mxu0 %v12737_v38  ;;  %v12985_v38 = vld [vmem:[#allocation2 + $0xfa] sm:$0xff] }
 0x113   : > { %1775 = vmatmul.mubr.f32.gmra.mrb[34].mxu0 %v12969_v36 }
 0x114   : > { %1779 = vmatprep.mubr.f32.mxu0 %v12741_v4  ;;  %v12989_v4 = vld [vmem:[#allocation2 + $0x10a] sm:$0xff] }
 0x117   : > { %1780 = vmatmul.mubr.f32.gmra.mrb[36].mxu0 %v12973_v7 }
 0x118   : > { %1784 = vmatprep.mubr.f32.mxu0 %v12745_v41  ;;  %v12993_v41 = vld [vmem:[#allocation2 + $0x112] sm:$0xff] }
 0x11b   : > { %1785 = vmatmul.mubr.f32.gmra.mrb[38].mxu0 %v12977_v2 }
 0x11c   : > { %1789 = vmatprep.mubr.f32.mxu0 %v12749_v42  ;;  %v12997_v42 = vld [vmem:[#allocation2 + $0x122] sm:$0xff] }
 0x11f   : > { %1790 = vmatmul.mubr.f32.gmra.mrb[40].mxu0 %v12981_v40 }
 0x120   : > { %1794 = vmatprep.mubr.f32.mxu0 %v12753_v44  ;;  %v1377_v44 = vld [vmem:[%s16556_s1 + $0x400] sm:$0xff] }
 0x123   : > { %1795 = vmatmul.mubr.f32.gmra.mrb[42].mxu0 %v12985_v38 }
 0x124   : > { %1799 = vmatprep.mubr.f32.mxu0 %v12757_v47  ;;  %v1378_v47 = vld [vmem:[%s16556_s1 + $0x408] sm:$0xff] }
 0x125   : > { %v10488_v43 = vpack.c.bf16 %v1378_v47, %v1377_v44  ;;  %v12098_v44 = vld [vmem:[#allocation2 + $0x19] sm:$0xff] }
 0x126   : > { %v1349_v47 = vld [vmem:[%s16556_s1 + $0x320] sm:$0xff] }
 0x127   : > { %1800 = vmatmul.mubr.f32.gmra.mrb[44].mxu0 %v12989_v4  ;;  %10489 = vmatprep.subr.bf16.mxu1 %v10488_v43 }
 0x128   : > { %1804 = vmatprep.mubr.f32.mxu0 %v12761_v48  ;;  %v13007_v48 = vld [vmem:[#allocation2 + $0x12a] sm:$0xff]  ;;  %10491 = vmatpush3.bf16.msra.mxu1 %v10488_v43 }
 0x129   : > { %v1350_v43 = vld [vmem:[%s16556_s1 + $0x328] sm:$0xff] }
 0x12b   : > { %1805 = vmatmul.mubr.f32.gmra.mrb[46].mxu0 %v12993_v41 }
 0x12c   : > { %1809 = vmatprep.mubr.f32.mxu0 %v12765_v49  ;;  %v1379_v49 = vld [vmem:[%s16556_s1 + $0x410] sm:$0xff] }
 0x12d   : > { %v10492_v50 = vpack.c.bf16 %v1380_v11, %v1379_v49  ;;  %v12099_v49 = vld [vmem:[#allocation2 + $0x21] sm:$0xff]  ;;  %v1351_v11 = vld [vmem:[%s16556_s1 + $0x330] sm:$0xff] }
 0x12f   : > { %1810 = vmatmul.mubr.f32.gmra.mrb[48].mxu0 %v12997_v42  ;;  %10493 = vmatprep.subr.bf16.mxu1 %v10492_v50 }
 0x130   : > { %1814 = vmatprep.mubr.f32.mxu0 %v12769_v51  ;;  %10495 = vmatpush3.bf16.msra.mxu1 %v10492_v50  ;;  %v1381_v51 = vld [vmem:[%s16556_s1 + $0x420] sm:$0xff]  ;;  %v1352_v50 = vld [vmem:[%s16556_s1 + $0x338] sm:$0xff] }
 0x131   : > { %v10496_v17 = vpack.c.bf16 %v1382_v15, %v1381_v51  ;;  %v12100_v51 = vld [vmem:[#allocation2 + $0x31] sm:$0xff]  ;;  %v1353_v15 = vld [vmem:[%s16556_s1 + $0x340] sm:$0xff] }
 0x133   : > { %1815 = vmatmul.mubr.f32.gmra.mrb[50].mxu0 %v13007_v48  ;;  %10497 = vmatprep.subr.bf16.mxu1 %v10496_v17 }
 0x134   : > { %1819 = vmatprep.mubr.f32.mxu0 %v12773_v52  ;;  %10499 = vmatpush3.bf16.msra.mxu1 %v10496_v17  ;;  %v1383_v52 = vld [vmem:[%s16556_s1 + $0x430] sm:$0xff]  ;;  %v1354_v17 = vld [vmem:[%s16556_s1 + $0x348] sm:$0xff] }
 0x135   : > { %v10500_v18 = vpack.c.bf16 %v1384_v24, %v1383_v52  ;;  %v12101_v52 = vld [vmem:[#allocation2 + $0x39] sm:$0xff]  ;;  %v1355_v24 = vld [vmem:[%s16556_s1 + $0x350] sm:$0xff] }
 0x137   : > { %1820 = vmatmul.mubr.f32.gmra.mrb[52].mxu0 %v13017_v53  ;;  %10501 = vmatprep.subr.bf16.mxu1 %v10500_v18 }
 0x138   : > { %1824 = vmatprep.mubr.f32.mxu0 %v12781_v56  ;;  %10503 = vmatpush3.bf16.msra.mxu1 %v10500_v18  ;;  %v1385_v56 = vld [vmem:[%s16556_s1 + $0x440] sm:$0xff]  ;;  %v1356_v18 = vld [vmem:[%s16556_s1 + $0x358] sm:$0xff] }
 0x139   : > { %v10504_v5 = vpack.c.bf16 %v1386_v33, %v1385_v56  ;;  %v12102_v56 = vld [vmem:[#allocation2 + $0x49] sm:$0xff]  ;;  %v1357_v33 = vld [vmem:[%s16556_s1 + $0x360] sm:$0xff] }
 0x13b   : > { %1825 = vmatmul.mubr.f32.gmra.mrb[54].mxu0 %v13027_v57  ;;  %10505 = vmatprep.subr.bf16.mxu1 %v10504_v5 }
 0x13c   : > { %1829 = vmatprep.mubr.f32.mxu0 %v12789_v60  ;;  %10507 = vmatpush3.bf16.msra.mxu1 %v10504_v5  ;;  %v1387_v60 = vld [vmem:[%s16556_s1 + $0x450] sm:$0xff]  ;;  %v1358_v5 = vld [vmem:[%s16556_s1 + $0x368] sm:$0xff] }
 0x13d   : > { %v10508_v14 = vpack.c.bf16 %v1388_v39, %v1387_v60  ;;  %v12103_v60 = vld [vmem:[#allocation2 + $0x51] sm:$0xff] }
 0x13e   : > { %v1359_v39 = vld [vmem:[%s16556_s1 + $0x370] sm:$0xff] }
 0x13f   : > { %1830 = vmatmul.mubr.f32.gmra.mrb[56].mxu0 %v13037_v62  ;;  %10509 = vmatprep.subr.bf16.mxu1 %v10508_v14 }
 0x140   : > { %1834 = vmatprep.mubr.f32.mxu0 %v12793_v0  ;;  %v13059_v0 = vld [vmem:[#allocation2 + $0x16a] sm:$0xff]  ;;  %10511 = vmatpush3.bf16.msra.mxu1 %v10508_v14  ;;  %v1360_v14 = vld [vmem:[%s16556_s1 + $0x378] sm:$0xff] }
 0x141   : > { %10513 = vmatprep.subr.bf16.mxu1 %v10512_v54 }
 0x143   : > { %1835 = vmatmul.mubr.f32.gmra.mrb[58].mxu0 %v13047_v8 }
 0x144   : > { %1839 = vmatprep.mubr.f32.mxu0 %v13055_v9  ;;  %10515 = vmatpush3.bf16.msra.mxu1 %v10512_v54  ;;  %v1362_v54 = vld [vmem:[%s16556_s1 + $0x388] sm:$0xff] }
 0x145   : > { %10517 = vmatprep.subr.bf16.mxu1 %v10516_v63 }
 0x147   : > { %1840 = vmatmul.mubr.f32.gmra.mrb[60].mxu0 %v13059_v0 }
 0x148   : > { %1844 = vmatprep.mubr.f32.mxu0 %v13067_v13  ;;  %10519 = vmatpush3.bf16.msra.mxu1 %v10516_v63  ;;  %v1365_v63 = vld [vmem:[%s16556_s1 + $0x3a0] sm:$0xff] }
 0x149   : > { %10520 = vmatprep.subr.bf16.mxu1 %v16560_v3 }
 0x14b   : > { %1845 = vmatmul.mubr.f32.gmra.mrb[62].mxu0 %v13071_v23  ;;  %10009 = vmatmul.mubr.f32.vlgmr.msra.gmra.mrb[0].mxu1 %v12849_v28 }
 0x14c   : > { %1914 = vmatprep.mubr.f32.mxu0 %v12818_v16  ;;  %v10444_v16 = vpack.c.bf16 %v1348_v1, %v1347_v19  ;;  %10011 = vmatprep.mubr.f32.mxu1 %v12860_v29  ;;  %v12107_v19 = vld [vmem:[#allocation2 + $0x81] sm:$0xff]  ;;  %v1367_v1 = vld [vmem:[%s16556_s1 + $0x3b0] sm:$0xff] }
 0x14f   : > { %1915 = vmatmul.mubr.f32.vlgmr.msra.gmra.mrb[0].mxu0 %v12098_v44  ;;  %10012 = vmatmul.mubr.f32.gmra.mrb[2].mxu1 %v12871_v30  ;;  %v1368_v44 = vld [vmem:[%s16556_s1 + $0x3b8] sm:$0xff] }
 0x150   : > { %10442 = vmatpush1.bf16.msra.mxu0 %v10441_v27  ;;  %1919 = vmatprep.mubr.f32.mxu0 %v12829_v25  ;;  %v10447_v25 = vpack.c.bf16 %v1350_v43, %v1349_v47  ;;  %v1366_v27 = vld [vmem:[%s16556_s1 + $0x3a8] sm:$0xff]  ;;  %v1369_v47 = vld [vmem:[%s16556_s1 + $0x3c0] sm:$0xff] }
 0x151   : > { %10443 = vmatprep.subr.bf16.mxu0 %v16560_v3  ;;  %10014 = vmatprep.mubr.f32.mxu1 %v12882_v32  ;;  %v1370_v43 = vld [vmem:[%s16556_s1 + $0x3c8] sm:$0xff] }
 0x153   : > { %1920 = vmatmul.mubr.f32.gmra.mrb[2].mxu0 %v12099_v49  ;;  %10015 = vmatmul.mubr.f32.gmra.mrb[4].mxu1 %v12893_v35  ;;  %v12109_v49 = vld [vmem:[#allocation2 + $0x99] sm:$0xff] }
 0x154   : > { %1924 = vmatprep.mubr.f32.mxu0 %v12597_v61  ;;  %10445 = vmatpush1.bf16.msra.mxu0 %v10444_v16  ;;  %v10450_v61 = vpack.c.bf16 %v1352_v50, %v1351_v11  ;;  %v12108_v16 = vld [vmem:[#allocation2 + $0x91] sm:$0xff]  ;;  %v12110_v50 = vld [vmem:[#allocation2 + $0xa9] sm:$0xff] }
 0x155   : > { %10446 = vmatprep.subr.bf16.mxu0 %v16560_v3  ;;  %10017 = vmatprep.mubr.f32.mxu1 %v12904_v10  ;;  %v1372_v11 = vld [vmem:[%s16556_s1 + $0x3d8] sm:$0xff] }
 0x157   : > { %1925 = vmatmul.mubr.f32.gmra.mrb[4].mxu0 %v12100_v51  ;;  %10018 = vmatmul.mubr.f32.gmra.mrb[6].mxu1 %v12915_v21  ;;  %v1373_v51 = vld [vmem:[%s16556_s1 + $0x3e0] sm:$0xff] }
 0x158   : > { %1929 = vmatprep.mubr.f32.mxu0 %v12849_v28  ;;  %10448 = vmatpush1.bf16.msra.mxu0 %v10447_v25  ;;  %v10453_v28 = vpack.c.bf16 %v1354_v17, %v1353_v15  ;;  %v1371_v25 = vld [vmem:[%s16556_s1 + $0x3d0] sm:$0xff]  ;;  %v734_v17 = vld [vmem:[#allocation2 + $0x182] sm:$0xff] }
 0x159   : > { %10449 = vmatprep.subr.bf16.mxu0 %v16560_v3  ;;  %10020 = vmatprep.mubr.f32.mxu1 %v12926_v46  ;;  %v12111_v15 = vld [vmem:[#allocation2 + $0xb1] sm:$0xff] }
 0x15b   : > { %1930 = vmatmul.mubr.f32.gmra.mrb[6].mxu0 %v12101_v52  ;;  %10021 = vmatmul.mubr.f32.gmra.mrb[8].mxu1 %v12937_v6  ;;  %v1375_v52 = vld [vmem:[%s16556_s1 + $0x3f0] sm:$0xff] }
 0x15c   : > { %1934 = vmatprep.mubr.f32.mxu0 %v12860_v29  ;;  %10451 = vmatpush1.bf16.msra.mxu0 %v10450_v61  ;;  %v10456_v29 = vpack.c.bf16 %v1356_v18, %v1355_v24  ;;  %v1374_v61 = vld [vmem:[%s16556_s1 + $0x3e8] sm:$0xff] }
 0x15d   : > { %10452 = vmatprep.subr.bf16.mxu0 %v16560_v3  ;;  %10023 = vmatprep.mubr.f32.mxu1 %v12948_v31  ;;  %v735_v24 = vld [vmem:[#allocation2 + $0x18a] sm:$0xff]  ;;  %v12112_v18 = vld [vmem:[#allocation2 + $0xc1] sm:$0xff] }
 0x15f   : > { %1935 = vmatmul.mubr.f32.gmra.mrb[8].mxu0 %v12102_v56  ;;  %10024 = vmatmul.mubr.f32.gmra.mrb[10].mxu1 %v12959_v34  ;;  %v12113_v56 = vld [vmem:[#allocation2 + $0xc9] sm:$0xff] }
 0x160   : > { %1939 = vmatprep.mubr.f32.mxu0 %v12871_v30  ;;  %10454 = vmatpush1.bf16.msra.mxu0 %v10453_v28  ;;  %v10459_v30 = vpack.c.bf16 %v1358_v5, %v1357_v33  ;;  %v1376_v28 = vld [vmem:[%s16556_s1 + $0x3f8] sm:$0xff]  ;;  %v12115_v33 = vld [vmem:[#allocation2 + $0xe1] sm:$0xff] }
 0x161   : > { %10455 = vmatprep.subr.bf16.mxu0 %v16560_v3  ;;  %10026 = vmatprep.mubr.f32.mxu1 %v12964_v37  ;;  %v12116_v5 = vld [vmem:[#allocation2 + $0xf1] sm:$0xff] }
 0x163   : > { %1940 = vmatmul.mubr.f32.gmra.mrb[10].mxu0 %v12103_v60  ;;  %10027 = vmatmul.mubr.f32.gmra.mrb[12].mxu1 %v12969_v36  ;;  %v12118_v60 = vld [vmem:[#allocation2 + $0x109] sm:$0xff] }
 0x164   : > { %1944 = vmatprep.mubr.f32.mxu0 %v12882_v32  ;;  %10457 = vmatpush1.bf16.msra.mxu0 %v10456_v29  ;;  %v10462_v32 = vpack.c.bf16 %v1360_v14, %v1359_v39  ;;  %v12114_v29 = vld [vmem:[#allocation2 + $0xd9] sm:$0xff] }
 0x165   : > { %10458 = vmatprep.subr.bf16.mxu0 %v16560_v3  ;;  %10029 = vmatprep.mubr.f32.mxu1 %v12973_v7  ;;  %v9344_v14 = vld [vmem:[%s16556_s1 + $0x498] sm:$0xff] }
 0x167   : > { %1945 = vmatmul.mubr.f32.gmra.mrb[12].mxu0 %v12104_v45  ;;  %10030 = vmatmul.mubr.f32.gmra.mrb[14].mxu1 %v12977_v2 }
 0x168   : > { %1949 = vmatprep.mubr.f32.mxu0 %v12893_v35  ;;  %10460 = vmatpush1.bf16.msra.mxu0 %v10459_v30  ;;  %v10465_v35 = vpack.c.bf16 %v1362_v54, %v1361_v12  ;;  %v833_v30 = vld [vmem:[#allocation2 + $0x31] sm:$0xff]  ;;  %v9346_v12 = vld [vmem:[%s16556_s1 + $0x4a8] sm:$0xff] }
 0x169   : > { %10461 = vmatprep.subr.bf16.mxu0 %v16560_v3  ;;  %10032 = vmatprep.mubr.f32.mxu1 %v12981_v40  ;;  %v770_v54 = vld [vmem:[#allocation2 + $0x38] sm:$0xff] }
 0x16b   : > { %1950 = vmatmul.mubr.f32.gmra.mrb[14].mxu0 %v12105_v22  ;;  %10033 = vmatmul.mubr.f32.gmra.mrb[16].mxu1 %v12985_v38  ;;  %v835_v22 = vld [vmem:[#allocation2 + $0x49] sm:$0xff] }
 0x16c   : > { %1954 = vmatprep.mubr.f32.mxu0 %v12904_v10  ;;  %10463 = vmatpush1.bf16.msra.mxu0 %v10462_v32  ;;  %v10468_v10 = vpack.c.bf16 %v1364_v26, %v1363_v58  ;;  %v9345_v32 = vld [vmem:[%s16556_s1 + $0x4a0] sm:$0xff]  ;;  %v9347_v58 = vld [vmem:[%s16556_s1 + $0x4b0] sm:$0xff]  ;;  %v9348_v26 = vld [vmem:[%s16556_s1 + $0x4b8] sm:$0xff] }
 0x16d   : > { %10464 = vmatprep.subr.bf16.mxu0 %v16560_v3  ;;  %10035 = vmatprep.mubr.f32.mxu1 %v12989_v4 }
 0x16f   : > { %1955 = vmatmul.mubr.f32.gmra.mrb[16].mxu0 %v12106_v59  ;;  %10036 = vmatmul.mubr.f32.gmra.mrb[18].mxu1 %v12993_v41  ;;  %v9469_v59 = vld [vmem:[%s16556_s1 + $0x880] sm:$0xff] }
 0x170   : > { %1959 = vmatprep.mubr.f32.mxu0 %v12915_v21  ;;  %10466 = vmatpush1.bf16.msra.mxu0 %v10465_v35  ;;  %v10471_v21 = vpack.c.bf16 %v1366_v27, %v1365_v63  ;;  %v10527_v35 = vpack.c.bf16 %v9346_v12, %v9345_v32  ;;  %v9470_v63 = vld [vmem:[%s16556_s1 + $0x888] sm:$0xff]  ;;  %v836_v27 = vld [vmem:[#allocation2 + $0x51] sm:$0xff] }
 0x171   : > { %10467 = vmatprep.subr.bf16.mxu0 %v16560_v3  ;;  %10038 = vmatprep.mubr.f32.mxu1 %v12997_v42  ;;  %v846_v32 = vld [vmem:[#allocation2 + $0xc9] sm:$0xff] }
 0x173   : > { %1960 = vmatmul.mubr.f32.gmra.mrb[18].mxu0 %v12107_v19  ;;  %10039 = vmatmul.mubr.f32.gmra.mrb[20].mxu1 %v13007_v48  ;;  %v10712_v19 = vpack.c.bf16 %v9470_v63, %v9469_v59  ;;  %v849_v59 = vld [vmem:[#allocation2 + $0xf1] sm:$0xff]  ;;  %v850_v63 = vld [vmem:[#allocation2 + $0xf9] sm:$0xff] }
 0x174   : > { %1964 = vmatprep.mubr.f32.mxu0 %v12926_v46  ;;  %10469 = vmatpush1.bf16.msra.mxu0 %v10468_v10  ;;  %v10474_v46 = vpack.c.bf16 %v1368_v44, %v1367_v1  ;;  %v771_v10 = vld [vmem:[#allocation2 + $0x48] sm:$0xff]  ;;  %v9349_v1 = vld [vmem:[%s16556_s1 + $0x4c0] sm:$0xff] }
 0x175   : > { %10470 = vmatprep.subr.bf16.mxu0 %v16560_v3  ;;  %10041 = vmatprep.mubr.f32.mxu1 %v13017_v53  ;;  %v9350_v44 = vld [vmem:[%s16556_s1 + $0x4c8] sm:$0xff] }
 0x177   : > { %1965 = vmatmul.mubr.f32.gmra.mrb[20].mxu0 %v12108_v16  ;;  %10042 = vmatmul.mubr.f32.gmra.mrb[22].mxu1 %v13027_v57  ;;  %v772_v16 = vld [vmem:[#allocation2 + $0x50] sm:$0xff] }
 0x178   : > { %1969 = vmatprep.mubr.f32.mxu0 %v12937_v6  ;;  %10472 = vmatpush1.bf16.msra.mxu0 %v10471_v21  ;;  %v10477_v6 = vpack.c.bf16 %v1370_v43, %v1369_v47  ;;  %v10530_v21 = vpack.c.bf16 %v9348_v26, %v9347_v58  ;;  %v10533_v47 = vpack.c.bf16 %v9350_v44, %v9349_v1  ;;  %v9351_v43 = vld [vmem:[%s16556_s1 + $0x4d0] sm:$0xff]  ;;  %v848_v58 = vld [vmem:[#allocation2 + $0xe1] sm:$0xff] }
 0x179   : > { %10473 = vmatprep.subr.bf16.mxu0 %v16560_v3  ;;  %10044 = vmatprep.mubr.f32.mxu1 %v13037_v62  ;;  %v784_v26 = vld [vmem:[#allocation2 + $0xe0] sm:$0xff]  ;;  %v852_v1 = vld [vmem:[#allocation2 + $0x111] sm:$0xff] }
 0x17a   : > { %v788_v44 = vld [vmem:[#allocation2 + $0x110] sm:$0xff] }
 0x17b   : > { %1970 = vmatmul.mubr.f32.gmra.mrb[22].mxu0 %v12109_v49  ;;  %10045 = vmatmul.mubr.f32.gmra.mrb[24].mxu1 %v13047_v8  ;;  %v9352_v49 = vld [vmem:[%s16556_s1 + $0x4d8] sm:$0xff] }
 0x17c   : > { %1974 = vmatprep.mubr.f32.mxu0 %v12948_v31  ;;  %10475 = vmatpush1.bf16.msra.mxu0 %v10474_v46  ;;  %v10480_v31 = vpack.c.bf16 %v1372_v11, %v1371_v25  ;;  %v837_v46 = vld [vmem:[#allocation2 + $0x61] sm:$0xff]  ;;  %v838_v25 = vld [vmem:[#allocation2 + $0x69] sm:$0xff]  ;;  %v10536_v11 = vpack.c.bf16 %v9352_v49, %v9351_v43 }
 0x17d   : > { %10476 = vmatprep.subr.bf16.mxu0 %v16560_v3  ;;  %10047 = vmatprep.mubr.f32.mxu1 %v13059_v0  ;;  %v789_v49 = vld [vmem:[#allocation2 + $0x120] sm:$0xff] }
 0x17f   : > { %1975 = vmatmul.mubr.f32.gmra.mrb[24].mxu0 %v12110_v50  ;;  %10048 = vmatmul.mubr.f32.gmra.mrb[26].mxu1 %v13071_v23  ;;  %v9353_v50 = vld [vmem:[%s16556_s1 + $0x4e0] sm:$0xff] }
 0x180   : > { %1979 = vmatprep.mubr.f32.mxu0 %v12959_v34  ;;  %10478 = vmatpush1.bf16.msra.mxu0 %v10477_v6  ;;  %v10483_v34 = vpack.c.bf16 %v1374_v61, %v1373_v51  ;;  %v773_v6 = vld [vmem:[#allocation2 + $0x60] sm:$0xff]  ;;  %v774_v51 = vld [vmem:[#allocation2 + $0x68] sm:$0xff] }
 0x181   : > { %10479 = vmatprep.subr.bf16.mxu0 %v16560_v3  ;;  %10050 = vmatprep.mubr.f32.mxu1 %v734_v17  ;;  %v839_v61 = vld [vmem:[#allocation2 + $0x79] sm:$0xff] }
 0x183   : > { %1980 = vmatmul.mubr.f32.gmra.mrb[26].mxu0 %v12111_v15  ;;  %10051 = vmatmul.mubr.f32.gmra.mrb[28].mxu1 %v735_v24 }
 0x184   : > { %1984 = vmatprep.mubr.f32.mxu0 %v12964_v37  ;;  %10481 = vmatpush1.bf16.msra.mxu0 %v10480_v31  ;;  %v10486_v37 = vpack.c.bf16 %v1376_v28, %v1375_v52  ;;  %v9354_v31 = vld [vmem:[%s16556_s1 + $0x4e8] sm:$0xff]  ;;  %v775_v52 = vld [vmem:[#allocation2 + $0x78] sm:$0xff] }
 0x185   : > { %10482 = vmatprep.subr.bf16.mxu0 %v16560_v3  ;;  %v10539_v15 = vpack.c.bf16 %v9354_v31, %v9353_v50  ;;  %v840_v28 = vld [vmem:[#allocation2 + $0x81] sm:$0xff]  ;;  %v9471_v50 = vld [vmem:[%s16556_s1 + $0x890] sm:$0xff]  ;;  %v9472_v31 = vld [vmem:[%s16556_s1 + $0x898] sm:$0xff] }
 0x187   : > { %1985 = vmatmul.mubr.f32.gmra.mrb[28].mxu0 %v12112_v18  ;;  %v9357_v18 = vld [vmem:[%s16556_s1 + $0x500] sm:$0xff] }
 0x188   : > { %1989 = vmatprep.mubr.f32.mxu0 %v12969_v36  ;;  %10484 = vmatpush1.bf16.msra.mxu0 %v10483_v34  ;;  %v12117_v36 = vld [vmem:[#allocation2 + $0xf9] sm:$0xff]  ;;  %v9355_v34 = vld [vmem:[%s16556_s1 + $0x4f0] sm:$0xff] }
 0x189   : > { %10485 = vmatprep.subr.bf16.mxu0 %v16560_v3 }
 0x18b   : > { %1990 = vmatmul.mubr.f32.gmra.mrb[30].mxu0 %v12113_v56  ;;  %v776_v56 = vld [vmem:[#allocation2 + $0x80] sm:$0xff] }
 0x18c   : > { %1994 = vmatprep.mubr.f32.mxu0 %v12973_v7  ;;  %10487 = vmatpush1.bf16.msra.mxu0 %v10486_v37  ;;  %v12119_v7 = vld [vmem:[#allocation2 + $0x111] sm:$0xff]  ;;  %v9358_v37 = vld [vmem:[%s16556_s1 + $0x508] sm:$0xff] }
 0x18d   : > { %10713 = vmatprep.subr.bf16.mxu0 %v10712_v19 }
 0x18f   : > { %1995 = vmatmul.mubr.f32.gmra.mrb[32].mxu0 %v12114_v29  ;;  %v841_v29 = vld [vmem:[#allocation2 + $0x91] sm:$0xff] }
 0x190   : > { %1999 = vmatprep.mubr.f32.mxu0 %v12977_v2  ;;  %v12120_v2 = vld [vmem:[#allocation2 + $0x121] sm:$0xff] }
 0x193   : > { %2000 = vmatmul.mubr.f32.gmra.mrb[34].mxu0 %v12115_v33  ;;  %v10545_v33 = vpack.c.bf16 %v9358_v37, %v9357_v18  ;;  %v9474_v18 = vld [vmem:[%s16556_s1 + $0x8a8] sm:$0xff]  ;;  %v791_v37 = vld [vmem:[#allocation2 + $0x138] sm:$0xff] }
 0x194   : > { %2004 = vmatprep.mubr.f32.mxu0 %v12981_v40  ;;  %v12121_v40 = vld [vmem:[#allocation2 + $0x129] sm:$0xff] }
 0x197   : > { %2005 = vmatmul.mubr.f32.gmra.mrb[36].mxu0 %v12116_v5  ;;  %v9359_v5 = vld [vmem:[%s16556_s1 + $0x510] sm:$0xff] }
 0x198   : > { %2009 = vmatprep.mubr.f32.mxu0 %v12985_v38  ;;  %v12122_v38 = vld [vmem:[#allocation2 + $0x139] sm:$0xff] }
 0x19b   : > { %2010 = vmatmul.mubr.f32.gmra.mrb[38].mxu0 %v12117_v36  ;;  %v9360_v36 = vld [vmem:[%s16556_s1 + $0x518] sm:$0xff] }
 0x19c   : > { %2014 = vmatprep.mubr.f32.mxu0 %v12989_v4  ;;  %v12123_v4 = vld [vmem:[#allocation2 + $0x141] sm:$0xff] }
 0x19f   : > { %2015 = vmatmul.mubr.f32.gmra.mrb[40].mxu0 %v12118_v60  ;;  %v777_v60 = vld [vmem:[#allocation2 + $0x90] sm:$0xff] }
 0x1a0   : > { %2019 = vmatprep.mubr.f32.mxu0 %v12993_v41  ;;  %v12124_v41 = vld [vmem:[#allocation2 + $0x151] sm:$0xff] }
 0x1a3   : > { %2020 = vmatmul.mubr.f32.gmra.mrb[42].mxu0 %v12119_v7  ;;  %v842_v7 = vld [vmem:[#allocation2 + $0x99] sm:$0xff] }
 0x1a4   : > { %2024 = vmatprep.mubr.f32.mxu0 %v12997_v42  ;;  %v12125_v42 = vld [vmem:[#allocation2 + $0x159] sm:$0xff] }
 0x1a7   : > { %2025 = vmatmul.mubr.f32.gmra.mrb[44].mxu0 %v12120_v2  ;;  %v10548_v2 = vpack.c.bf16 %v9360_v36, %v9359_v5  ;;  %v2655_v5 = vld [vmem:[#allocation3 + $0x9] sm:$0xff]  ;;  %v9475_v36 = vld [vmem:[%s16556_s1 + $0x8b0] sm:$0xff] }
 0x1a8   : > { %2029 = vmatprep.mubr.f32.mxu0 %v13007_v48  ;;  %v12126_v48 = vld [vmem:[#allocation2 + $0x169] sm:$0xff] }
 0x1ab   : > { %2030 = vmatmul.mubr.f32.gmra.mrb[46].mxu0 %v12121_v40  ;;  %v9361_v40 = vld [vmem:[%s16556_s1 + $0x520] sm:$0xff] }
 0x1ac   : > { %2034 = vmatprep.mubr.f32.mxu0 %v13017_v53  ;;  %v12127_v53 = vld [vmem:[#allocation2 + $0x171] sm:$0xff] }
 0x1af   : > { %2035 = vmatmul.mubr.f32.gmra.mrb[48].mxu0 %v12122_v38  ;;  %v9362_v38 = vld [vmem:[%s16556_s1 + $0x528] sm:$0xff] }
 0x1b0   : > { %2039 = vmatprep.mubr.f32.mxu0 %v13027_v57  ;;  %v927_v57 = vld [vmem:[#allocation2 + $0x19a] sm:$0xff] }
 0x1b1   : > { %10053 = vmatprep.mubr.f32.mxu1 %v927_v57  ;;  %v779_v57 = vld [vmem:[#allocation2 + $0xa8] sm:$0xff] }
 0x1b3   : > { %2040 = vmatmul.mubr.f32.gmra.mrb[50].mxu0 %v12123_v4  ;;  %v778_v4 = vld [vmem:[#allocation2 + $0x98] sm:$0xff] }
 0x1b4   : > { %2044 = vmatprep.mubr.f32.mxu0 %v13037_v62  ;;  %v928_v62 = vld [vmem:[#allocation2 + $0x1a2] sm:$0xff] }
 0x1b5   : > { %10054 = vmatmul.mubr.f32.gmra.mrb[30].mxu1 %v928_v62  ;;  %v844_v62 = vld [vmem:[#allocation2 + $0xb1] sm:$0xff] }
 0x1b7   : > { %2045 = vmatmul.mubr.f32.gmra.mrb[52].mxu0 %v12124_v41  ;;  %v843_v41 = vld [vmem:[#allocation2 + $0xa9] sm:$0xff] }
 0x1b8   : > { %2049 = vmatprep.mubr.f32.mxu0 %v13047_v8  ;;  %v9341_v8 = vld [vmem:[%s16556_s1 + $0x480] sm:$0xff] }
 0x1bb   : > { %2050 = vmatmul.mubr.f32.gmra.mrb[54].mxu0 %v12125_v42  ;;  %v10551_v42 = vpack.c.bf16 %v9362_v38, %v9361_v40  ;;  %v857_v40 = vld [vmem:[#allocation2 + $0x151] sm:$0xff] }
 0x1bc   : > { %2054 = vmatprep.mubr.f32.mxu0 %v13059_v0  ;;  %v9342_v0 = vld [vmem:[%s16556_s1 + $0x488] sm:$0xff] }
 0x1bd   : > { %v10521_v39 = vpack.c.bf16 %v9342_v0, %v9341_v8  ;;  %v9365_v8 = vld [vmem:[%s16556_s1 + $0x540] sm:$0xff]  ;;  %v9366_v0 = vld [vmem:[%s16556_s1 + $0x548] sm:$0xff] }
 0x1bf   : > { %2055 = vmatmul.mubr.f32.gmra.mrb[56].mxu0 %v12126_v48  ;;  %10522 = vmatpush1.bf16.msra.mxu1 %v10521_v39  ;;  %v9363_v48 = vld [vmem:[%s16556_s1 + $0x530] sm:$0xff]  ;;  %v10557_v39 = vpack.c.bf16 %v9366_v0, %v9365_v8 }
 0x1c0   : > { %2059 = vmatprep.mubr.f32.mxu0 %v13071_v23  ;;  %v9343_v23 = vld [vmem:[%s16556_s1 + $0x490] sm:$0xff]  ;;  %10523 = vmatprep.subr.bf16.mxu1 %v16560_v3 }
 0x1c1   : > { %v10524_v45 = vpack.c.bf16 %v9344_v14, %v9343_v23  ;;  %v780_v23 = vld [vmem:[#allocation2 + $0xb0] sm:$0xff] }
 0x1c2   : > { %v9367_v14 = vld [vmem:[%s16556_s1 + $0x550] sm:$0xff] }
 0x1c3   : > { %2060 = vmatmul.mubr.f32.gmra.mrb[58].mxu0 %v12127_v53  ;;  %10525 = vmatpush1.bf16.msra.mxu1 %v10524_v45  ;;  %v9364_v53 = vld [vmem:[%s16556_s1 + $0x538] sm:$0xff]  ;;  %v781_v45 = vld [vmem:[#allocation2 + $0xc0] sm:$0xff]  ;;  %v9479_v0 = vld [vmem:[%s16556_s1 + $0x8d0] sm:$0xff] }
 0x1c4   : > { %2064 = vmatprep.mubr.f32.mxu0 %v734_v17  ;;  %10526 = vmatprep.subr.bf16.mxu1 %v16560_v3  ;;  %v9356_v17 = vld [vmem:[%s16556_s1 + $0x4f8] sm:$0xff] }
 0x1c7   : > { %2065 = vmatmul.mubr.f32.gmra.mrb[60].mxu0 %v12776_v55  ;;  %v769_v55 = vld [vmem:[#allocation2 + $0x30] sm:$0xff]  ;;  %10528 = vmatpush1.bf16.msra.mxu1 %v10527_v35  ;;  %v783_v35 = vld [vmem:[#allocation2 + $0xd8] sm:$0xff] }
 0x1c8   : > { %2069 = vmatprep.mubr.f32.mxu0 %v735_v24  ;;  %10529 = vmatprep.subr.bf16.mxu1 %v16560_v3  ;;  %v10542_v24 = vpack.c.bf16 %v9356_v17, %v9355_v34  ;;  %v855_v34 = vld [vmem:[#allocation2 + $0x139] sm:$0xff] }
 0x1cb   : > { %2070 = vmatmul.mubr.f32.gmra.mrb[62].mxu0 %v12784_v20  ;;  %v834_v20 = vld [vmem:[#allocation2 + $0x39] sm:$0xff]  ;;  %10531 = vmatpush1.bf16.msra.mxu1 %v10530_v21  ;;  %v787_v21 = vld [vmem:[#allocation2 + $0x108] sm:$0xff] }
 0x1cc   : > { %2139 = vmatprep.mubr.f32.mxu0 %v833_v30  ;;  %10532 = vmatprep.subr.bf16.mxu1 %v16560_v3  ;;  %v10554_v30 = vpack.c.bf16 %v9364_v53, %v9363_v48  ;;  %v793_v48 = vld [vmem:[#allocation2 + $0x150] sm:$0xff] }
 0x1cf   : > { %2140 = vmatmul.mubr.f32.vlgmr.msra.gmra.mrb[0].mxu0 %v769_v55  ;;  %10534 = vmatpush1.bf16.msra.mxu1 %v10533_v47  ;;  %v845_v55 = vld [vmem:[#allocation2 + $0xc1] sm:$0xff] }
 0x1d0   : > { %2144 = vmatprep.mubr.f32.mxu0 %v834_v20  ;;  %10715 = vmatpush3.bf16.msra.mxu0 %v10712_v19  ;;  %v9368_v20 = vld [vmem:[%s16556_s1 + $0x558] sm:$0xff]  ;;  %v851_v19 = vld [vmem:[#allocation2 + $0x109] sm:$0xff] }
 0x1d1   : > { %10535 = vmatprep.subr.bf16.mxu1 %v16560_v3  ;;  %v10560_v12 = vpack.c.bf16 %v9368_v20, %v9367_v14  ;;  %v9370_v47 = vld [vmem:[%s16556_s1 + $0x568] sm:$0xff] }
 0x1d2   : > { %v859_v14 = vld [vmem:[#allocation2 + $0x169] sm:$0xff] }
 0x1d3   : > { %2145 = vmatmul.mubr.f32.gmra.mrb[2].mxu0 %v770_v54  ;;  %10537 = vmatpush1.bf16.msra.mxu1 %v10536_v11  ;;  %v782_v54 = vld [vmem:[#allocation2 + $0xc8] sm:$0xff]  ;;  %v9372_v11 = vld [vmem:[%s16556_s1 + $0x578] sm:$0xff] }
 0x1d4   : > { %2149 = vmatprep.mubr.f32.mxu0 %v835_v22  ;;  %10538 = vmatprep.subr.bf16.mxu1 %v16560_v3  ;;  %v847_v22 = vld [vmem:[#allocation2 + $0xd9] sm:$0xff] }
 0x1d7   : > { %2150 = vmatmul.mubr.f32.gmra.mrb[4].mxu0 %v771_v10  ;;  %10540 = vmatpush1.bf16.msra.mxu1 %v10539_v15  ;;  %v785_v10 = vld [vmem:[#allocation2 + $0xf0] sm:$0xff]  ;;  %v10716_v15 = vpack.c.bf16 %v9472_v31, %v9471_v50 }
 0x1d8   : > { %2154 = vmatprep.mubr.f32.mxu0 %v836_v27  ;;  %10541 = vmatprep.subr.bf16.mxu1 %v16560_v3  ;;  %v786_v27 = vld [vmem:[#allocation2 + $0xf8] sm:$0xff]  ;;  %v9379_v50 = vld [vmem:[%s16556_s1 + $0x5b0] sm:$0xff] }
 0x1d9   : > { %10717 = vmatprep.subr.bf16.mxu0 %v10716_v15 }
 0x1da   : > { %10719 = vmatpush3.bf16.msra.mxu0 %v10716_v15  ;;  %v9382_v15 = vld [vmem:[%s16556_s1 + $0x5c8] sm:$0xff] }
 0x1db   : > { %2155 = vmatmul.mubr.f32.gmra.mrb[6].mxu0 %v772_v16  ;;  %10543 = vmatpush1.bf16.msra.mxu1 %v10542_v24  ;;  %v853_v16 = vld [vmem:[#allocation2 + $0x121] sm:$0xff] }
 0x1dc   : > { %2159 = vmatprep.mubr.f32.mxu0 %v837_v46  ;;  %10544 = vmatprep.subr.bf16.mxu1 %v16560_v3  ;;  %v9369_v46 = vld [vmem:[%s16556_s1 + $0x560] sm:$0xff] }
 0x1dd   : > { %v10563_v43 = vpack.c.bf16 %v9370_v47, %v9369_v46  ;;  %v9473_v24 = vld [vmem:[%s16556_s1 + $0x8a0] sm:$0xff]  ;;  %v9378_v46 = vld [vmem:[%s16556_s1 + $0x5a8] sm:$0xff] }
 0x1df   : > { %2160 = vmatmul.mubr.f32.gmra.mrb[8].mxu0 %v773_v6  ;;  %10546 = vmatpush1.bf16.msra.mxu1 %v10545_v33  ;;  %v854_v6 = vld [vmem:[#allocation2 + $0x129] sm:$0xff]  ;;  %v13385_v33 = vld [vmem:[#allocation2] sm:$0xff] }
 0x1e0   : > { %2164 = vmatprep.mubr.f32.mxu0 %v838_v25  ;;  %10547 = vmatprep.subr.bf16.mxu1 %v16560_v3  ;;  %v9371_v25 = vld [vmem:[%s16556_s1 + $0x570] sm:$0xff] }
 0x1e3   : > { %2165 = vmatmul.mubr.f32.gmra.mrb[10].mxu0 %v774_v51  ;;  %10549 = vmatpush1.bf16.msra.mxu1 %v10548_v2  ;;  %v10566_v51 = vpack.c.bf16 %v9372_v11, %v9371_v25  ;;  %v864_v11 = vld [vmem:[#allocation2 + $0x1a1] sm:$0xff] }
 0x1e4   : > { %2169 = vmatprep.mubr.f32.mxu0 %v839_v61  ;;  %10550 = vmatprep.subr.bf16.mxu1 %v16560_v3  ;;  %v790_v61 = vld [vmem:[#allocation2 + $0x128] sm:$0xff] }
 0x1e7   : > { %2170 = vmatmul.mubr.f32.gmra.mrb[12].mxu0 %v775_v52  ;;  %10552 = vmatpush1.bf16.msra.mxu1 %v10551_v42  ;;  %v2654_v52 = vld [vmem:[#allocation3 + $0x1] sm:$0xff]  ;;  %v9478_v42 = vld [vmem:[%s16556_s1 + $0x8c8] sm:$0xff] }
 0x1e8   : > { %2174 = vmatprep.mubr.f32.mxu0 %v840_v28  ;;  %10553 = vmatprep.subr.bf16.mxu1 %v16560_v3 }
 0x1e9   : > { %3672 = vmatprep.mubr.f32.mxu1 %v2654_v52 }
 0x1eb   : > { %2175 = vmatmul.mubr.f32.gmra.mrb[14].mxu0 %v776_v56  ;;  %10555 = vmatpush1.bf16.msra.mxu1 %v10554_v30  ;;  %v10720_v56 = vpack.c.bf16 %v9474_v18, %v9473_v24  ;;  %v9374_v30 = vld [vmem:[%s16556_s1 + $0x588] sm:$0xff]  ;;  %v9383_v18 = vld [vmem:[%s16556_s1 + $0x5d0] sm:$0xff] }
 0x1ec   : > { %2179 = vmatprep.mubr.f32.mxu0 %v841_v29  ;;  %10556 = vmatprep.subr.bf16.mxu1 %v16560_v3  ;;  %v856_v29 = vld [vmem:[#allocation2 + $0x141] sm:$0xff] }
 0x1ed   : > { %10721 = vmatprep.subr.bf16.mxu0 %v10720_v56 }
 0x1ee   : > { %10723 = vmatpush3.bf16.msra.mxu0 %v10720_v56 }
 0x1ef   : > { %2180 = vmatmul.mubr.f32.gmra.mrb[16].mxu0 %v777_v60  ;;  %10558 = vmatpush1.bf16.msra.mxu1 %v10557_v39  ;;  %v9476_v60 = vld [vmem:[%s16556_s1 + $0x8b8] sm:$0xff] }
 0x1f0   : > { %2184 = vmatprep.mubr.f32.mxu0 %v842_v7  ;;  %10559 = vmatprep.subr.bf16.mxu1 %v16560_v3  ;;  %v792_v7 = vld [vmem:[#allocation2 + $0x140] sm:$0xff]  ;;  %v10724_v2 = vpack.c.bf16 %v9476_v60, %v9475_v36  ;;  %v9386_v36 = vld [vmem:[%s16556_s1 + $0x5e8] sm:$0xff] }
 0x1f2   : > { %10725 = vmatprep.subr.bf16.mxu0 %v10724_v2 }
 0x1f3   : > { %2185 = vmatmul.mubr.f32.gmra.mrb[18].mxu0 %v778_v4  ;;  %10561 = vmatpush1.bf16.msra.mxu1 %v10560_v12  ;;  %v9482_v12 = vld [vmem:[%s16556_s1 + $0x8e8] sm:$0xff] }
 0x1f4   : > { %2189 = vmatprep.mubr.f32.mxu0 %v843_v41  ;;  %10562 = vmatprep.subr.bf16.mxu1 %v16560_v3  ;;  %v9477_v41 = vld [vmem:[%s16556_s1 + $0x8c0] sm:$0xff] }
 0x1f5   : > { %10727 = vmatpush3.bf16.msra.mxu0 %v10724_v2  ;;  %v10728_v53 = vpack.c.bf16 %v9478_v42, %v9477_v41  ;;  %v9388_v41 = vld [vmem:[%s16556_s1 + $0x5f8] sm:$0xff] }
 0x1f7   : > { %2190 = vmatmul.mubr.f32.gmra.mrb[20].mxu0 %v779_v57  ;;  %10564 = vmatpush1.bf16.msra.mxu1 %v10563_v43  ;;  %v858_v57 = vld [vmem:[#allocation2 + $0x159] sm:$0xff]  ;;  %v12130_v43 = vld [vmem:[#allocation2 + $0x189] sm:$0xff] }
 0x1f8   : > { %2194 = vmatprep.mubr.f32.mxu0 %v844_v62  ;;  %10565 = vmatprep.subr.bf16.mxu1 %v16560_v3  ;;  %v9373_v62 = vld [vmem:[%s16556_s1 + $0x580] sm:$0xff] }
 0x1f9   : > { %v10569_v8 = vpack.c.bf16 %v9374_v30, %v9373_v62  ;;  %10729 = vmatprep.subr.bf16.mxu0 %v10728_v53  ;;  %v9390_v62 = vld [vmem:[%s16556_s1 + $0x608] sm:$0xff] }
 0x1fa   : > { %10731 = vmatpush3.bf16.msra.mxu0 %v10728_v53 }
 0x1fb   : > { %2195 = vmatmul.mubr.f32.gmra.mrb[22].mxu0 %v780_v23  ;;  %10567 = vmatpush1.bf16.msra.mxu1 %v10566_v51  ;;  %v9480_v23 = vld [vmem:[%s16556_s1 + $0x8d8] sm:$0xff] }
 0x1fc   : > { %2199 = vmatprep.mubr.f32.mxu0 %v845_v55  ;;  %10568 = vmatprep.subr.bf16.mxu1 %v16560_v3  ;;  %v794_v55 = vld [vmem:[#allocation2 + $0x158] sm:$0xff]  ;;  %v10732_v39 = vpack.c.bf16 %v9480_v23, %v9479_v0  ;;  %v9391_v23 = vld [vmem:[%s16556_s1 + $0x610] sm:$0xff] }
 0x1fe   : > { %3673 = vmatmul.mubr.f32.vlgmr.msra.gmra.mrb[32].mxu1 %v13385_v33  ;;  %10733 = vmatprep.subr.bf16.mxu0 %v10732_v39 }
 0x1ff   : > { %2200 = vmatmul.mubr.f32.gmra.mrb[24].mxu0 %v781_v45  ;;  %3677 = vmatprep.mubr.f32.mxu1 %v2655_v5  ;;  %v9385_v5 = vld [vmem:[%s16556_s1 + $0x5e0] sm:$0xff] }
 0x200   : > { %2204 = vmatprep.mubr.f32.mxu0 %v846_v32  ;;  %10570 = vmatpush1.bf16.msra.mxu1 %v10569_v8  ;;  %v9481_v32 = vld [vmem:[%s16556_s1 + $0x8e0] sm:$0xff]  ;;  %v10587_v60 = vpack.c.bf16 %v9386_v36, %v9385_v5  ;;  %v9403_v5 = vld [vmem:[%s16556_s1 + $0x670] sm:$0xff]  ;;  %v9404_v36 = vld [vmem:[%s16556_s1 + $0x678] sm:$0xff] }
 0x201   : > { %10571 = vmatprep.subr.bf16.mxu1 %v16560_v3  ;;  %10735 = vmatpush3.bf16.msra.mxu0 %v10732_v39 }
 0x202   : > { %3678 = vmatmul.mubr.f32.gmra.mrb[34].mxu1 %v13385_v33 }
 0x203   : > { %2205 = vmatmul.mubr.f32.gmra.mrb[26].mxu0 %v782_v54  ;;  %v795_v54 = vld [vmem:[#allocation2 + $0x168] sm:$0xff] }
 0x204   : > { %2209 = vmatprep.mubr.f32.mxu0 %v847_v22  ;;  %v10736_v22 = vpack.c.bf16 %v9482_v12, %v9481_v32  ;;  %v9393_v12 = vld [vmem:[%s16556_s1 + $0x620] sm:$0xff] }
 0x206   : > { %10737 = vmatprep.subr.bf16.mxu0 %v10736_v22 }
 0x207   : > { %2210 = vmatmul.mubr.f32.gmra.mrb[28].mxu0 %v783_v35  ;;  %v860_v35 = vld [vmem:[#allocation2 + $0x171] sm:$0xff] }
 0x208   : > { %2214 = vmatprep.mubr.f32.mxu0 %v848_v58  ;;  %v9375_v58 = vld [vmem:[%s16556_s1 + $0x590] sm:$0xff]  ;;  %10739 = vmatpush3.bf16.msra.mxu0 %v10736_v22 }
 0x20b   : > { %2215 = vmatmul.mubr.f32.gmra.mrb[30].mxu0 %v784_v26  ;;  %v9376_v26 = vld [vmem:[%s16556_s1 + $0x598] sm:$0xff] }
 0x20c   : > { %2219 = vmatprep.mubr.f32.mxu0 %v849_v59  ;;  %v10572_v59 = vpack.c.bf16 %v9376_v26, %v9375_v58  ;;  %v9395_v26 = vld [vmem:[%s16556_s1 + $0x630] sm:$0xff] }
 0x20e   : > { %10573 = vmatpush1.bf16.msra.mxu1 %v10572_v59  ;;  %v9396_v59 = vld [vmem:[%s16556_s1 + $0x638] sm:$0xff] }
 0x20f   : > { %2220 = vmatmul.mubr.f32.gmra.mrb[32].mxu0 %v785_v10  ;;  %v9483_v10 = vld [vmem:[%s16556_s1 + $0x8f0] sm:$0xff]  ;;  %10574 = vmatprep.subr.bf16.mxu1 %v16560_v3 }
 0x210   : > { %2224 = vmatprep.mubr.f32.mxu0 %v850_v63  ;;  %v9484_v63 = vld [vmem:[%s16556_s1 + $0x8f8] sm:$0xff] }
 0x213   : > { %2225 = vmatmul.mubr.f32.gmra.mrb[34].mxu0 %v786_v27  ;;  %v796_v27 = vld [vmem:[#allocation2 + $0x170] sm:$0xff] }
 0x214   : > { %2229 = vmatprep.mubr.f32.mxu0 %v851_v19  ;;  %v10740_v19 = vpack.c.bf16 %v9484_v63, %v9483_v10  ;;  %v10602_v10 = vpack.c.bf16 %v9396_v59, %v9395_v26 }
 0x216   : > { %10741 = vmatprep.subr.bf16.mxu0 %v10740_v19 }
 0x217   : > { %2230 = vmatmul.mubr.f32.gmra.mrb[36].mxu0 %v787_v21 }
 0x218   : > { %2234 = vmatprep.mubr.f32.mxu0 %v852_v1  ;;  %10743 = vmatpush3.bf16.msra.mxu0 %v10740_v19  ;;  %v9397_v19 = vld [vmem:[%s16556_s1 + $0x640] sm:$0xff] }
 0x21b   : > { %2235 = vmatmul.mubr.f32.gmra.mrb[38].mxu0 %v788_v44  ;;  %v12129_v44 = vld [vmem:[#allocation2 + $0x181] sm:$0xff] }
 0x21c   : > { %2239 = vmatprep.mubr.f32.mxu0 %v853_v16  ;;  %v9377_v16 = vld [vmem:[%s16556_s1 + $0x5a0] sm:$0xff] }
 0x21d   : > { %v10575_v47 = vpack.c.bf16 %v9378_v46, %v9377_v16 }
 0x21e   : > { %v13374_v17 = vpop.f32.mrb[0].mxu1 }
 0x21f   : > { %2240 = vmatmul.mubr.f32.gmra.mrb[40].mxu0 %v789_v49  ;;  %v13377_v28 = vpop.f32.mrb[1].mxu1  ;;  %10576 = vmatpush1.bf16.msra.mxu1 %v10575_v47  ;;  %v863_v49 = vld [vmem:[#allocation2 + $0x199] sm:$0xff] }
 0x220   : > { %2244 = vmatprep.mubr.f32.mxu0 %v854_v6  ;;  %10577 = vmatprep.subr.bf16.mxu1 %v16560_v3 }
 0x222   : > { %v13395_v38 = vpop.f32.mrb[2].mxu1 }
 0x223   : > { %2245 = vmatmul.mubr.f32.gmra.mrb[42].mxu0 %v790_v61  ;;  %v13397_v4 = vpop.f32.mrb[3].mxu1  ;;  %v9381_v61 = vld [vmem:[%s16556_s1 + $0x5c0] sm:$0xff] }
 0x224   : > { %2249 = vmatprep.mubr.f32.mxu0 %v855_v34  ;;  %v10581_v34 = vpack.c.bf16 %v9382_v15, %v9381_v61  ;;  %v9402_v61 = vld [vmem:[%s16556_s1 + $0x668] sm:$0xff] }
 0x226   : > { %v13418_v20 = vpop.f32.mrb[4].mxu1 }
 0x227   : > { %2250 = vmatmul.mubr.f32.gmra.mrb[44].mxu0 %v791_v37  ;;  %v13420_v45 = vpop.f32.mrb[5].mxu1  ;;  %v9384_v37 = vld [vmem:[%s16556_s1 + $0x5d8] sm:$0xff] }
 0x228   : > { %2254 = vmatprep.mubr.f32.mxu0 %v856_v29  ;;  %v10584_v56 = vpack.c.bf16 %v9384_v37, %v9383_v18 }
 0x22a   : > { %v13441_v21 = vpop.f32.mrb[6].mxu1 }
 0x22b   : > { %2255 = vmatmul.mubr.f32.gmra.mrb[46].mxu0 %v792_v7  ;;  %v13443_v1 = vpop.f32.mrb[7].mxu1 }
 0x22c   : > { %2259 = vmatprep.mubr.f32.mxu0 %v857_v40  ;;  %v9387_v40 = vld [vmem:[%s16556_s1 + $0x5f0] sm:$0xff] }
 0x22d   : > { %v10590_v42 = vpack.c.bf16 %v9388_v41, %v9387_v40 }
 0x22e   : > { %v13453_v6 = vpop.f32.mrb[8].mxu1 }
 0x22f   : > { %2260 = vmatmul.mubr.f32.gmra.mrb[48].mxu0 %v793_v48  ;;  %v13456_v25 = vpop.f32.mrb[9].mxu1 }
 0x230   : > { %2264 = vmatprep.mubr.f32.mxu0 %v858_v57  ;;  %v9389_v57 = vld [vmem:[%s16556_s1 + $0x600] sm:$0xff] }
 0x231   : > { %v10593_v30 = vpack.c.bf16 %v9390_v62, %v9389_v57 }
 0x233   : > { %2265 = vmatmul.mubr.f32.gmra.mrb[50].mxu0 %v794_v55  ;;  %v9392_v55 = vld [vmem:[%s16556_s1 + $0x618] sm:$0xff] }
 0x234   : > { %2269 = vmatprep.mubr.f32.mxu0 %v859_v14  ;;  %v10596_v39 = vpack.c.bf16 %v9392_v55, %v9391_v23 }
 0x237   : > { %2270 = vmatmul.mubr.f32.gmra.mrb[52].mxu0 %v795_v54  ;;  %v9394_v54 = vld [vmem:[%s16556_s1 + $0x628] sm:$0xff] }
 0x238   : > { %2274 = vmatprep.mubr.f32.mxu0 %v860_v35  ;;  %v10599_v22 = vpack.c.bf16 %v9394_v54, %v9393_v12 }
 0x23b   : > { %2275 = vmatmul.mubr.f32.gmra.mrb[54].mxu0 %v796_v27 }
 0x23c   : > { %2279 = vmatprep.mubr.f32.mxu0 %v12129_v44  ;;  %v9398_v44 = vld [vmem:[%s16556_s1 + $0x648] sm:$0xff] }
 0x23d   : > { %v10605_v16 = vpack.c.bf16 %v9398_v44, %v9397_v19 }
 0x23f   : > { %2280 = vmatmul.mubr.f32.gmra.mrb[56].mxu0 %v13055_v9  ;;  %v9380_v9 = vld [vmem:[%s16556_s1 + $0x5b8] sm:$0xff] }
 0x240   : > { %2284 = vmatprep.mubr.f32.mxu0 %v12130_v43  ;;  %v10578_v31 = vpack.c.bf16 %v9380_v9, %v9379_v50  ;;  %v9399_v43 = vld [vmem:[%s16556_s1 + $0x650] sm:$0xff] }
 0x242   : > { %10579 = vmatpush1.bf16.msra.mxu1 %v10578_v31  ;;  %v9401_v31 = vld [vmem:[%s16556_s1 + $0x660] sm:$0xff] }
 0x243   : > { %2285 = vmatmul.mubr.f32.gmra.mrb[58].mxu0 %v13067_v13  ;;  %10580 = vmatprep.subr.bf16.mxu1 %v16560_v3  ;;  %v13466_v13 = vpop.f32.mrb[10].mxu1  ;;  %v10611_v15 = vpack.c.bf16 %v9402_v61, %v9401_v31 }
 0x244   : > { %2289 = vmatprep.mubr.f32.mxu0 %v863_v49  ;;  %v13469_v51 = vpop.f32.mrb[11].mxu1  ;;  %v9400_v49 = vld [vmem:[%s16556_s1 + $0x658] sm:$0xff] }
 0x245   : > { %v13478_v52 = vpop.f32.mrb[12].mxu1 }
 0x246   : > { %10582 = vmatpush1.bf16.msra.mxu1 %v10581_v34  ;;  %v13480_v24 = vpop.f32.mrb[13].mxu1  ;;  %v13590_v34 = vld [vmem:[%s16557_s2] ss:$0 sm:$0xff] }
 0x247   : > { %2290 = vmatmul.mubr.f32.gmra.mrb[60].mxu0 %v13385_v33  ;;  %10583 = vmatprep.subr.bf16.mxu1 %v16560_v3  ;;  %v13489_v29 = vpop.f32.mrb[14].mxu1 }
 0x248   : > { %2294 = vmatprep.mubr.f32.mxu0 %v864_v11  ;;  %v10608_v11 = vpack.c.bf16 %v9400_v49, %v9399_v43 }
 0x24a   : > { %10585 = vmatpush1.bf16.msra.mxu1 %v10584_v56 }
 0x24b   : > { %2295 = vmatmul.mubr.f32.gmra.mrb[62].mxu0 %v13385_v33  ;;  %10586 = vmatprep.subr.bf16.mxu1 %v16560_v3  ;;  %v13491_v33 = vpop.f32.mrb[15].mxu1 }
 0x24c   : > { %v13500_v7 = vpop.f32.mrb[16].mxu1 }
 0x24d   : > { %v13502_v2 = vpop.f32.mrb[17].mxu1 }
 0x24e   : > { %10588 = vmatpush1.bf16.msra.mxu1 %v10587_v60  ;;  %v13511_v48 = vpop.f32.mrb[18].mxu1  ;;  %v10614_v60 = vpack.c.bf16 %v9404_v36, %v9403_v5 }
 0x24f   : > { %10589 = vmatprep.subr.bf16.mxu1 %v16560_v3  ;;  %v13513_v53 = vpop.f32.mrb[19].mxu1 }
 0x250   : > { %v13522_v8 = vpop.f32.mrb[20].mxu1 }
 0x251   : > { %v13524_v0 = vpop.f32.mrb[21].mxu1 }
 0x252   : > { %10591 = vmatpush1.bf16.msra.mxu1 %v10590_v42  ;;  %v13533_v14 = vpop.f32.mrb[22].mxu1 }
 0x253   : > { %10592 = vmatprep.subr.bf16.mxu1 %v16560_v3  ;;  %v13535_v32 = vpop.f32.mrb[23].mxu1 }
 0x254   : > { %v13544_v35 = vpop.f32.mrb[24].mxu1 }
 0x255   : > { %v13546_v58 = vpop.f32.mrb[25].mxu1 }
 0x256   : > { %10594 = vmatpush1.bf16.msra.mxu1 %v10593_v30  ;;  %v13555_v63 = vpop.f32.mrb[26].mxu1 }
 0x257   : > { %10595 = vmatprep.subr.bf16.mxu1 %v16560_v3  ;;  %v13557_v27 = vpop.f32.mrb[27].mxu1 }
 0x258   : > { %v13566_v46 = vpop.f32.mrb[28].mxu1 }
 0x259   : > { %v13568_v47 = vpop.f32.mrb[29].mxu1 }
 0x25a   : > { %10597 = vmatpush1.bf16.msra.mxu1 %v10596_v39 }
 0x25b   : > { %10598 = vmatprep.subr.bf16.mxu1 %v16560_v3 }
 0x25e   : > { %10600 = vmatpush1.bf16.msra.mxu1 %v10599_v22 }
 0x25f   : > { %10601 = vmatprep.subr.bf16.mxu1 %v16560_v3 }
 0x262   : > { %10603 = vmatpush1.bf16.msra.mxu1 %v10602_v10 }
 0x263   : > { %10604 = vmatprep.subr.bf16.mxu1 %v16560_v3 }
 0x266   : > { %10606 = vmatpush1.bf16.msra.mxu1 %v10605_v16 }
 0x267   : > { %10607 = vmatprep.subr.bf16.mxu1 %v16560_v3 }
 0x26a   : > { %10609 = vmatpush1.bf16.msra.mxu1 %v10608_v11 }
 0x26b   : > { %10610 = vmatprep.subr.bf16.mxu1 %v16560_v3 }
 0x26e   : > { %10612 = vmatpush1.bf16.msra.mxu1 %v10611_v15 }
 0x26f   : > { %10613 = vmatprep.subr.bf16.mxu1 %v16560_v3 }
 0x272   : > { %10615 = vmatpush1.bf16.msra.mxu1 %v10614_v60 }
 0x273   : > { %10616 = vmatprep.subr.bf16.mxu1 %v16560_v3 }
 0x288   : > { %v13577_v50 = vpop.f32.mrb[30].mxu1 }
 0x289   : > { %v13579_v9 = vpop.f32.mrb[31].mxu1 }
 0x2a2   : > { %v2141_v18 = vpop.f32.mrb[0].mxu0 }
 0x2a3   : > { %v11192_v37 = vadd.f32 %v13590_v34, %v2141_v18  ;;  %v2143_v56 = vpop.f32.mrb[1].mxu0 }
 0x2a5   : > { %v2367_v40 = vadd.f32 %v11192_v37, %v13377_v28 }
 0x2a6   : > { %v2146_v41 = vpop.f32.mrb[2].mxu0 }
 0x2a7   : > { %v2525_v42 = vmax.f32 %v2367_v40, 0.0  ;;  %v11193_v57 = vadd.f32 %v13590_v34, %v2146_v41  ;;  %v2148_v62 = vpop.f32.mrb[3].mxu0 }
 0x2a9   : > { %2558 = vst [vmem:[#allocation3 + $0x19] sm:$0xff] %v2525_v42  ;;  %v2372_v30 = vadd.f32 %v11193_v57, %v13374_v17  ;;  %3682 = vmatprep.mubr.f32.mxu1 %v2525_v42 }
 0x2aa   : > { %v2151_v23 = vpop.f32.mrb[4].mxu0 }
 0x2ab   : > { %v2526_v55 = vmax.f32 %v2372_v30, 0.0  ;;  %v11194_v39 = vadd.f32 %v13590_v34, %v2151_v23  ;;  %v2153_v12 = vpop.f32.mrb[5].mxu0 }
 0x2ad   : > { %2559 = vst [vmem:[#allocation3 + $0x21] sm:$0xff] %v2526_v55  ;;  %v2377_v28 = vadd.f32 %v11194_v39, %v13397_v4 }
 0x2ae   : > { %v2156_v54 = vpop.f32.mrb[6].mxu0 }
 0x2af   : > { %v2527_v22 = vmax.f32 %v2377_v28, 0.0  ;;  %v11195_v26 = vadd.f32 %v13590_v34, %v2156_v54  ;;  %v2158_v59 = vpop.f32.mrb[7].mxu0 }
 0x2b0   : > { %v13607_v10 = vld [vmem:[#allocation3 + $0x18] sm:$0xff] }
 0x2b1   : > { %2560 = vst [vmem:[#allocation3 + $0x31] sm:$0xff] %v2527_v22  ;;  %v2382_v19 = vadd.f32 %v11195_v26, %v13395_v38  ;;  %3683 = vmatmul.mubr.f32.gmra.mrb[36].mxu1 %v13607_v10 }
 0x2b2   : > { %v2161_v17 = vpop.f32.mrb[8].mxu0  ;;  %3687 = vmatprep.mubr.f32.mxu1 %v2526_v55 }
 0x2b3   : > { %v2528_v44 = vmax.f32 %v2382_v19, 0.0  ;;  %v11196_v16 = vadd.f32 %v13590_v34, %v2161_v17  ;;  %v2163_v43 = vpop.f32.mrb[9].mxu0 }
 0x2b4   : > { %v13612_v49 = vld [vmem:[#allocation3 + $0x20] sm:$0xff] }
 0x2b5   : > { %2561 = vst [vmem:[#allocation3 + $0x39] sm:$0xff] %v2528_v44  ;;  %v2387_v4 = vadd.f32 %v11196_v16, %v13420_v45  ;;  %3688 = vmatmul.mubr.f32.gmra.mrb[38].mxu1 %v13612_v49 }
 0x2b6   : > { %v2166_v11 = vpop.f32.mrb[10].mxu0  ;;  %3692 = vmatprep.mubr.f32.mxu1 %v2527_v22 }
 0x2b7   : > { %v2529_v31 = vmax.f32 %v2387_v4, 0.0  ;;  %v11197_v38 = vadd.f32 %v13590_v34, %v2166_v11  ;;  %v2168_v61 = vpop.f32.mrb[11].mxu0 }
 0x2b8   : > { %v13617_v15 = vld [vmem:[#allocation3 + $0x30] sm:$0xff] }
 0x2b9   : > { %2562 = vst [vmem:[#allocation3 + $0x49] sm:$0xff] %v2529_v31  ;;  %v2392_v18 = vadd.f32 %v11197_v38, %v13418_v20  ;;  %3693 = vmatmul.mubr.f32.gmra.mrb[40].mxu1 %v13617_v15 }
 0x2ba   : > { %v2171_v37 = vpop.f32.mrb[12].mxu0  ;;  %3697 = vmatprep.mubr.f32.mxu1 %v2528_v44 }
 0x2bb   : > { %v2530_v56 = vmax.f32 %v2392_v18, 0.0  ;;  %v11198_v45 = vadd.f32 %v13590_v34, %v2171_v37  ;;  %v2173_v5 = vpop.f32.mrb[13].mxu0 }
 0x2bc   : > { %v13622_v36 = vld [vmem:[#allocation3 + $0x32] sm:$0xff]  ;;  %v13626_v40 = vld [vmem:[#allocation3 + $0x3a] sm:$0xff] }
 0x2bd   : > { %v13624_v60 = vld [vmem:[#allocation3 + $0x38] sm:$0xff]  ;;  %2563 = vst [vmem:[#allocation3 + $0x51] sm:$0xff] %v2530_v56  ;;  %v2397_v41 = vadd.f32 %v11198_v45, %v13443_v1  ;;  %10088 = vmatprep.mubr.f32.mxu0 %v13622_v36 }
 0x2be   : > { %3698 = vmatmul.mubr.f32.gmra.mrb[42].mxu1 %v13624_v60  ;;  %v2176_v20 = vpop.f32.mrb[14].mxu0  ;;  %10089 = vmatmul.mubr.f32.vlgmr.msra.gmra.mrb[64].mxu0 %v13626_v40 }
 0x2bf   : > { %3702 = vmatprep.mubr.f32.mxu1 %v2529_v31  ;;  %v2531_v42 = vmax.f32 %v2397_v41, 0.0  ;;  %v11199_v57 = vadd.f32 %v13590_v34, %v2176_v20  ;;  %v2178_v62 = vpop.f32.mrb[15].mxu0 }
 0x2c0   : > { %v13633_v30 = vld [vmem:[#allocation3 + $0x48] sm:$0xff] }
 0x2c1   : > { %2564 = vst [vmem:[#allocation3 + $0x61] sm:$0xff] %v2531_v42  ;;  %v2402_v23 = vadd.f32 %v11199_v57, %v13441_v21 }
 0x2c2   : > { %3703 = vmatmul.mubr.f32.gmra.mrb[44].mxu1 %v13633_v30  ;;  %v2181_v1 = vpop.f32.mrb[16].mxu0 }
 0x2c3   : > { %3707 = vmatprep.mubr.f32.mxu1 %v2530_v56  ;;  %v2532_v55 = vmax.f32 %v2402_v23, 0.0  ;;  %v11200_v39 = vadd.f32 %v13590_v34, %v2181_v1  ;;  %v2183_v12 = vpop.f32.mrb[17].mxu0 }
 0x2c4   : > { %v13638_v28 = vld [vmem:[#allocation3 + $0x4a] sm:$0xff]  ;;  %v13642_v22 = vld [vmem:[#allocation3 + $0x52] sm:$0xff] }
 0x2c5   : > { %v13640_v54 = vld [vmem:[#allocation3 + $0x50] sm:$0xff]  ;;  %2565 = vst [vmem:[#allocation3 + $0x69] sm:$0xff] %v2532_v55  ;;  %v2407_v26 = vadd.f32 %v11200_v39, %v13456_v25  ;;  %10091 = vmatprep.mubr.f32.mxu0 %v13638_v28 }
 0x2c6   : > { %3708 = vmatmul.mubr.f32.gmra.mrb[46].mxu1 %v13640_v54  ;;  %v2186_v21 = vpop.f32.mrb[18].mxu0  ;;  %10092 = vmatmul.mubr.f32.gmra.mrb[66].mxu0 %v13642_v22 }
 0x2c7   : > { %3712 = vmatprep.mubr.f32.mxu1 %v2531_v42  ;;  %v2533_v59 = vmax.f32 %v2407_v26, 0.0  ;;  %v11201_v19 = vadd.f32 %v13590_v34, %v2186_v21  ;;  %v2188_v17 = vpop.f32.mrb[19].mxu0 }
 0x2c8   : > { %v13649_v44 = vld [vmem:[#allocation3 + $0x60] sm:$0xff] }
 0x2c9   : > { %2566 = vst [vmem:[#allocation3 + $0x79] sm:$0xff] %v2533_v59  ;;  %v2412_v16 = vadd.f32 %v11201_v19, %v13453_v6 }
 0x2ca   : > { %3713 = vmatmul.mubr.f32.gmra.mrb[48].mxu1 %v13649_v44  ;;  %v2191_v25 = vpop.f32.mrb[20].mxu0 }
 0x2cb   : > { %3717 = vmatprep.mubr.f32.mxu1 %v2532_v55  ;;  %v2534_v43 = vmax.f32 %v2412_v16, 0.0  ;;  %v11202_v4 = vadd.f32 %v13590_v34, %v2191_v25  ;;  %v2193_v11 = vpop.f32.mrb[21].mxu0 }
 0x2cc   : > { %v13654_v31 = vld [vmem:[#allocation3 + $0x62] sm:$0xff]  ;;  %v13658_v61 = vld [vmem:[#allocation3 + $0x6a] sm:$0xff] }
 0x2cd   : > { %v13656_v38 = vld [vmem:[#allocation3 + $0x68] sm:$0xff]  ;;  %2567 = vst [vmem:[#allocation3 + $0x81] sm:$0xff] %v2534_v43  ;;  %v2417_v18 = vadd.f32 %v11202_v4, %v13469_v51  ;;  %10094 = vmatprep.mubr.f32.mxu0 %v13654_v31 }
 0x2ce   : > { %3718 = vmatmul.mubr.f32.gmra.mrb[50].mxu1 %v13656_v38  ;;  %v2196_v6 = vpop.f32.mrb[22].mxu0  ;;  %10095 = vmatmul.mubr.f32.gmra.mrb[68].mxu0 %v13658_v61 }
 0x2cf   : > { %3722 = vmatprep.mubr.f32.mxu1 %v2533_v59  ;;  %v2535_v37 = vmax.f32 %v2417_v18, 0.0  ;;  %v11203_v56 = vadd.f32 %v13590_v34, %v2196_v6  ;;  %v2198_v45 = vpop.f32.mrb[23].mxu0 }
 0x2d0   : > { %v13665_v5 = vld [vmem:[#allocation3 + $0x78] sm:$0xff] }
 0x2d1   : > { %2568 = vst [vmem:[#allocation3 + $0x91] sm:$0xff] %v2535_v37  ;;  %v2422_v41 = vadd.f32 %v11203_v56, %v13466_v13 }
 0x2d2   : > { %3723 = vmatmul.mubr.f32.gmra.mrb[52].mxu1 %v13665_v5  ;;  %v2201_v51 = vpop.f32.mrb[24].mxu0 }
 0x2d3   : > { %3727 = vmatprep.mubr.f32.mxu1 %v2534_v43  ;;  %v2536_v20 = vmax.f32 %v2422_v41, 0.0  ;;  %v11204_v42 = vadd.f32 %v13590_v34, %v2201_v51  ;;  %v2203_v57 = vpop.f32.mrb[25].mxu0 }
 0x2d4   : > { %v13670_v62 = vld [vmem:[#allocation3 + $0x7a] sm:$0xff]  ;;  %v13674_v1 = vld [vmem:[#allocation3 + $0x82] sm:$0xff] }
 0x2d5   : > { %v13672_v23 = vld [vmem:[#allocation3 + $0x80] sm:$0xff]  ;;  %2569 = vst [vmem:[#allocation3 + $0x99] sm:$0xff] %v2536_v20  ;;  %v2427_v55 = vadd.f32 %v11204_v42, %v13480_v24  ;;  %10097 = vmatprep.mubr.f32.mxu0 %v13670_v62 }
 0x2d6   : > { %3728 = vmatmul.mubr.f32.gmra.mrb[54].mxu1 %v13672_v23  ;;  %v2206_v13 = vpop.f32.mrb[26].mxu0  ;;  %10098 = vmatmul.mubr.f32.gmra.mrb[70].mxu0 %v13674_v1 }
 0x2d7   : > { %3732 = vmatprep.mubr.f32.mxu1 %v2535_v37  ;;  %v2537_v39 = vmax.f32 %v2427_v55, 0.0  ;;  %v11205_v12 = vadd.f32 %v13590_v34, %v2206_v13  ;;  %v2208_v26 = vpop.f32.mrb[27].mxu0 }
 0x2d8   : > { %v13681_v21 = vld [vmem:[#allocation3 + $0x90] sm:$0xff] }
 0x2d9   : > { %2570 = vst [vmem:[#allocation3 + $0xa9] sm:$0xff] %v2537_v39  ;;  %v2432_v59 = vadd.f32 %v11205_v12, %v13478_v52 }
 0x2da   : > { %3733 = vmatmul.mubr.f32.gmra.mrb[56].mxu1 %v13681_v21  ;;  %v2211_v24 = vpop.f32.mrb[28].mxu0 }
 0x2db   : > { %3737 = vmatprep.mubr.f32.mxu1 %v2536_v20  ;;  %v2538_v19 = vmax.f32 %v2432_v59, 0.0  ;;  %v11206_v17 = vadd.f32 %v13590_v34, %v2211_v24  ;;  %v2213_v16 = vpop.f32.mrb[29].mxu0 }
 0x2dc   : > { %v13686_v25 = vld [vmem:[#allocation3 + $0x92] sm:$0xff]  ;;  %v13690_v4 = vld [vmem:[#allocation3 + $0x9a] sm:$0xff] }
 0x2dd   : > { %v13688_v43 = vld [vmem:[#allocation3 + $0x98] sm:$0xff]  ;;  %2571 = vst [vmem:[#allocation3 + $0xb1] sm:$0xff] %v2538_v19  ;;  %v2437_v11 = vadd.f32 %v11206_v17, %v13491_v33  ;;  %10100 = vmatprep.mubr.f32.mxu0 %v13686_v25 }
 0x2de   : > { %3738 = vmatmul.mubr.f32.gmra.mrb[58].mxu1 %v13688_v43  ;;  %v2216_v52 = vpop.f32.mrb[30].mxu0  ;;  %10101 = vmatmul.mubr.f32.gmra.mrb[72].mxu0 %v13690_v4 }
 0x2df   : > { %3742 = vmatprep.mubr.f32.mxu1 %v2537_v39  ;;  %v2539_v18 = vmax.f32 %v2437_v11, 0.0  ;;  %v11207_v6 = vadd.f32 %v13590_v34, %v2216_v52  ;;  %v2218_v37 = vpop.f32.mrb[31].mxu0 }
 0x2e0   : > { %v13697_v56 = vld [vmem:[#allocation3 + $0xa8] sm:$0xff] }
 0x2e1   : > { %2572 = vst [vmem:[#allocation3 + $0xc1] sm:$0xff] %v2539_v18  ;;  %v2442_v45 = vadd.f32 %v11207_v6, %v13489_v29 }
 0x2e2   : > { %3743 = vmatmul.mubr.f32.gmra.mrb[60].mxu1 %v13697_v56  ;;  %v2221_v33 = vpop.f32.mrb[32].mxu0 }
 0x2e3   : > { %3747 = vmatprep.mubr.f32.mxu1 %v2538_v19  ;;  %v2540_v41 = vmax.f32 %v2442_v45, 0.0  ;;  %v11208_v51 = vadd.f32 %v13590_v34, %v2221_v33  ;;  %v2223_v20 = vpop.f32.mrb[33].mxu0 }
 0x2e4   : > { %v13702_v42 = vld [vmem:[#allocation3 + $0xaa] sm:$0xff]  ;;  %v13706_v55 = vld [vmem:[#allocation3 + $0xb2] sm:$0xff] }
 0x2e5   : > { %v13704_v57 = vld [vmem:[#allocation3 + $0xb0] sm:$0xff]  ;;  %2573 = vst [vmem:[#allocation3 + $0xc9] sm:$0xff] %v2540_v41  ;;  %v2447_v13 = vadd.f32 %v11208_v51, %v13502_v2  ;;  %10103 = vmatprep.mubr.f32.mxu0 %v13702_v42 }
 0x2e6   : > { %3748 = vmatmul.mubr.f32.gmra.mrb[62].mxu1 %v13704_v57  ;;  %v2226_v29 = vpop.f32.mrb[34].mxu0  ;;  %10104 = vmatmul.mubr.f32.gmra.mrb[74].mxu0 %v13706_v55 }
 0x2e7   : > { %3752 = vmatprep.mubr.f32.mxu1 %v2539_v18  ;;  %v2541_v39 = vmax.f32 %v2447_v13, 0.0  ;;  %v11209_v12 = vadd.f32 %v13590_v34, %v2226_v29  ;;  %v2228_v26 = vpop.f32.mrb[35].mxu0 }
 0x2e8   : > { %v13713_v59 = vld [vmem:[#allocation3 + $0xc0] sm:$0xff] }
 0x2e9   : > { %2574 = vst [vmem:[#allocation3 + $0xd9] sm:$0xff] %v2541_v39  ;;  %v2452_v24 = vadd.f32 %v11209_v12, %v13500_v7 }
 0x2ea   : > { %3753 = vmatmul.mubr.f32.gmra.mrb[64].mxu1 %v13713_v59  ;;  %v2231_v2 = vpop.f32.mrb[36].mxu0 }
 0x2eb   : > { %3757 = vmatprep.mubr.f32.mxu1 %v2540_v41  ;;  %v2542_v19 = vmax.f32 %v2452_v24, 0.0  ;;  %v11210_v17 = vadd.f32 %v13590_v34, %v2231_v2  ;;  %v2233_v16 = vpop.f32.mrb[37].mxu0 }
 0x2ec   : > { %v13718_v11 = vld [vmem:[#allocation3 + $0xc2] sm:$0xff]  ;;  %v13722_v18 = vld [vmem:[#allocation3 + $0xca] sm:$0xff] }
 0x2ed   : > { %v13720_v52 = vld [vmem:[#allocation3 + $0xc8] sm:$0xff]  ;;  %2575 = vst [vmem:[#allocation3 + $0xe1] sm:$0xff] %v2542_v19  ;;  %v2457_v6 = vadd.f32 %v11210_v17, %v13513_v53  ;;  %10106 = vmatprep.mubr.f32.mxu0 %v13718_v11 }
 0x2ee   : > { %3758 = vmatmul.mubr.f32.gmra.mrb[66].mxu1 %v13720_v52  ;;  %v2236_v7 = vpop.f32.mrb[38].mxu0  ;;  %10107 = vmatmul.mubr.f32.gmra.mrb[76].mxu0 %v13722_v18 }
 0x2ef   : > { %3762 = vmatprep.mubr.f32.mxu1 %v2541_v39  ;;  %v2543_v37 = vmax.f32 %v2457_v6, 0.0  ;;  %v11211_v45 = vadd.f32 %v13590_v34, %v2236_v7  ;;  %v2238_v33 = vpop.f32.mrb[39].mxu0 }
 0x2f0   : > { %v13729_v41 = vld [vmem:[#allocation3 + $0xd8] sm:$0xff] }
 0x2f1   : > { %2576 = vst [vmem:[#allocation3 + $0xf1] sm:$0xff] %v2543_v37  ;;  %v2462_v51 = vadd.f32 %v11211_v45, %v13511_v48 }
 0x2f2   : > { %3763 = vmatmul.mubr.f32.gmra.mrb[68].mxu1 %v13729_v41  ;;  %v2241_v53 = vpop.f32.mrb[40].mxu0 }
 0x2f3   : > { %3767 = vmatprep.mubr.f32.mxu1 %v2542_v19  ;;  %v2544_v20 = vmax.f32 %v2462_v51, 0.0  ;;  %v11212_v13 = vadd.f32 %v13590_v34, %v2241_v53  ;;  %v2243_v29 = vpop.f32.mrb[41].mxu0 }
 0x2f4   : > { %v13734_v12 = vld [vmem:[#allocation3 + $0xda] sm:$0xff]  ;;  %v13738_v26 = vld [vmem:[#allocation3 + $0xe2] sm:$0xff] }
 0x2f5   : > { %v13736_v39 = vld [vmem:[#allocation3 + $0xe0] sm:$0xff]  ;;  %2577 = vst [vmem:[#allocation3 + $0xf9] sm:$0xff] %v2544_v20  ;;  %v2467_v24 = vadd.f32 %v11212_v13, %v13524_v0  ;;  %10109 = vmatprep.mubr.f32.mxu0 %v13734_v12 }
 0x2f6   : > { %3768 = vmatmul.mubr.f32.gmra.mrb[70].mxu1 %v13736_v39  ;;  %v2246_v48 = vpop.f32.mrb[42].mxu0  ;;  %10110 = vmatmul.mubr.f32.gmra.mrb[78].mxu0 %v13738_v26 }
 0x2f7   : > { %3772 = vmatprep.mubr.f32.mxu1 %v2543_v37  ;;  %v2545_v2 = vmax.f32 %v2467_v24, 0.0  ;;  %v11213_v19 = vadd.f32 %v13590_v34, %v2246_v48  ;;  %v2248_v17 = vpop.f32.mrb[43].mxu0 }
 0x2f8   : > { %v13745_v16 = vld [vmem:[#allocation3 + $0xf0] sm:$0xff] }
 0x2f9   : > { %2578 = vst [vmem:[#allocation3 + $0x109] sm:$0xff] %v2545_v2  ;;  %v2472_v6 = vadd.f32 %v11213_v19, %v13522_v8 }
 0x2fa   : > { %3773 = vmatmul.mubr.f32.gmra.mrb[72].mxu1 %v13745_v16  ;;  %v2251_v0 = vpop.f32.mrb[44].mxu0 }
 0x2fb   : > { %3777 = vmatprep.mubr.f32.mxu1 %v2544_v20  ;;  %v2546_v7 = vmax.f32 %v2472_v6, 0.0  ;;  %v11214_v45 = vadd.f32 %v13590_v34, %v2251_v0  ;;  %v2253_v33 = vpop.f32.mrb[45].mxu0 }
 0x2fc   : > { %v13750_v51 = vld [vmem:[#allocation3 + $0xf2] sm:$0xff]  ;;  %v13754_v53 = vld [vmem:[#allocation3 + $0xfa] sm:$0xff] }
 0x2fd   : > { %v13752_v37 = vld [vmem:[#allocation3 + $0xf8] sm:$0xff]  ;;  %2579 = vst [vmem:[#allocation3 + $0x111] sm:$0xff] %v2546_v7  ;;  %v2477_v13 = vadd.f32 %v11214_v45, %v13535_v32  ;;  %10112 = vmatprep.mubr.f32.mxu0 %v13750_v51 }
 0x2fe   : > { %3778 = vmatmul.mubr.f32.gmra.mrb[74].mxu1 %v13752_v37  ;;  %v2256_v8 = vpop.f32.mrb[46].mxu0  ;;  %10113 = vmatmul.mubr.f32.gmra.mrb[80].mxu0 %v13754_v53 }
 0x2ff   : > { %3782 = vmatprep.mubr.f32.mxu1 %v2545_v2  ;;  %v2547_v20 = vmax.f32 %v2477_v13, 0.0  ;;  %v11215_v29 = vadd.f32 %v13590_v34, %v2256_v8  ;;  %v2258_v24 = vpop.f32.mrb[47].mxu0 }
 0x300   : > { %v13761_v48 = vld [vmem:[#allocation3 + $0x108] sm:$0xff] }
 0x301   : > { %2580 = vst [vmem:[#allocation3 + $0x121] sm:$0xff] %v2547_v20  ;;  %v2482_v19 = vadd.f32 %v11215_v29, %v13533_v14 }
 0x302   : > { %3783 = vmatmul.mubr.f32.gmra.mrb[76].mxu1 %v13761_v48  ;;  %v2261_v32 = vpop.f32.mrb[48].mxu0 }
 0x303   : > { %3787 = vmatprep.mubr.f32.mxu1 %v2546_v7  ;;  %v2548_v17 = vmax.f32 %v2482_v19, 0.0  ;;  %v11216_v6 = vadd.f32 %v13590_v34, %v2261_v32  ;;  %v2263_v0 = vpop.f32.mrb[49].mxu0 }
 0x304   : > { %v13766_v45 = vld [vmem:[#allocation3 + $0x10a] sm:$0xff]  ;;  %v13770_v33 = vld [vmem:[#allocation3 + $0x112] sm:$0xff] }
 0x305   : > { %v13768_v2 = vld [vmem:[#allocation3 + $0x110] sm:$0xff]  ;;  %2581 = vst [vmem:[#allocation3 + $0x129] sm:$0xff] %v2548_v17  ;;  %v2487_v13 = vadd.f32 %v11216_v6, %v13546_v58  ;;  %10115 = vmatprep.mubr.f32.mxu0 %v13766_v45 }
 0x306   : > { %3788 = vmatmul.mubr.f32.gmra.mrb[78].mxu1 %v13768_v2  ;;  %v2266_v14 = vpop.f32.mrb[50].mxu0  ;;  %10116 = vmatmul.mubr.f32.gmra.mrb[82].mxu0 %v13770_v33 }
 0x307   : > { %3792 = vmatprep.mubr.f32.mxu1 %v2547_v20  ;;  %v2549_v7 = vmax.f32 %v2487_v13, 0.0  ;;  %v11217_v8 = vadd.f32 %v13590_v34, %v2266_v14  ;;  %v2268_v29 = vpop.f32.mrb[51].mxu0 }
 0x308   : > { %v13777_v24 = vld [vmem:[#allocation3 + $0x120] sm:$0xff] }
 0x309   : > { %2582 = vst [vmem:[#allocation3 + $0x139] sm:$0xff] %v2549_v7  ;;  %v2492_v19 = vadd.f32 %v11217_v8, %v13544_v35 }
 0x30a   : > { %3793 = vmatmul.mubr.f32.gmra.mrb[80].mxu1 %v13777_v24  ;;  %v2271_v58 = vpop.f32.mrb[52].mxu0 }
 0x30b   : > { %3797 = vmatprep.mubr.f32.mxu1 %v2548_v17  ;;  %v2550_v32 = vmax.f32 %v2492_v19, 0.0  ;;  %v11218_v6 = vadd.f32 %v13590_v34, %v2271_v58  ;;  %v2273_v0 = vpop.f32.mrb[53].mxu0 }
 0x30c   : > { %v13782_v3 = vld [vmem:[#allocation3 + $0x122] sm:$0xff]  ;;  %v13786_v13 = vld [vmem:[#allocation3 + $0x12a] sm:$0xff] }
 0x30d   : > { %v13784_v20 = vld [vmem:[#allocation3 + $0x128] sm:$0xff]  ;;  %16607 = vst [vmem:[#allocation5_spill] sm:$0xff] %v13786_v13  ;;  %2583 = vst [vmem:[#allocation3 + $0x141] sm:$0xff] %v2550_v32  ;;  %v2497_v14 = vadd.f32 %v11218_v6, %v13557_v27  ;;  %10118 = vmatprep.mubr.f32.mxu0 %v13782_v3 }
 0x30e   : > { %3798 = vmatmul.mubr.f32.gmra.mrb[82].mxu1 %v13784_v20  ;;  %v2276_v35 = vpop.f32.mrb[54].mxu0  ;;  %10119 = vmatmul.mubr.f32.gmra.mrb[84].mxu0 %v13786_v13 }
 0x30f   : > { %3802 = vmatprep.mubr.f32.mxu1 %v2549_v7  ;;  %v13792_v17 = vmax.f32 %v2497_v14, 0.0  ;;  %v11219_v8 = vadd.f32 %v13590_v34, %v2276_v35  ;;  %v2278_v29 = vpop.f32.mrb[55].mxu0 }
 0x310   : > { %v13795_v19 = vld [vmem:[#allocation3 + $0x138] sm:$0xff] }
 0x311   : > { %16608 = vst [vmem:[#allocation6_spill] sm:$0xff] %v13792_v17  ;;  %2584 = vst [vmem:[#allocation3 + $0x151] sm:$0xff] %v13792_v17  ;;  %v2502_v58 = vadd.f32 %v11219_v8, %v13555_v63 }
 0x312   : > { %3803 = vmatmul.mubr.f32.gmra.mrb[84].mxu1 %v13795_v19  ;;  %v2281_v27 = vpop.f32.mrb[56].mxu0 }
 0x313   : > { %3807 = vmatprep.mubr.f32.mxu1 %v2550_v32  ;;  %v13800_v6 = vmax.f32 %v2502_v58, 0.0  ;;  %v11220_v0 = vadd.f32 %v13590_v34, %v2281_v27  ;;  %v2283_v7 = vpop.f32.mrb[57].mxu0 }
 0x314   : > { %v13803_v14 = vld [vmem:[#allocation3 + $0x13a] sm:$0xff]  ;;  %v13807_v35 = vld [vmem:[#allocation3 + $0x142] sm:$0xff] }
 0x315   : > { %16609 = vst [vmem:[#allocation7_spill] sm:$0xff] %v13800_v6  ;;  %v13805_v13 = vld [vmem:[#allocation3 + $0x140] sm:$0xff]  ;;  %16610 = vst [vmem:[#allocation8_spill] sm:$0xff] %v13807_v35  ;;  %v2507_v29 = vadd.f32 %v11220_v0, %v13568_v47  ;;  %10121 = vmatprep.mubr.f32.mxu0 %v13803_v14 }
 0x316   : > { %2585 = vst [vmem:[#allocation3 + $0x159] sm:$0xff] %v13800_v6  ;;  %3808 = vmatmul.mubr.f32.gmra.mrb[86].mxu1 %v13805_v13  ;;  %v2286_v63 = vpop.f32.mrb[58].mxu0  ;;  %10122 = vmatmul.mubr.f32.gmra.mrb[86].mxu0 %v13807_v35 }
 0x317   : > { %3812 = vmatprep.mubr.f32.mxu1 %v13792_v17  ;;  %v13815_v32 = vmax.f32 %v2507_v29, 0.0  ;;  %v11221_v8 = vadd.f32 %v13590_v34, %v2286_v63  ;;  %v2288_v58 = vpop.f32.mrb[59].mxu0 }
 0x318   : > { %v13818_v27 = vld [vmem:[#allocation3 + $0x150] sm:$0xff] }
 0x319   : > { %16611 = vst [vmem:[#allocation9_spill] sm:$0xff] %v13815_v32  ;;  %2586 = vst [vmem:[#allocation3 + $0x169] sm:$0xff] %v13815_v32  ;;  %v2512_v47 = vadd.f32 %v11221_v8, %v13566_v46 }
 0x31a   : > { %3813 = vmatmul.mubr.f32.gmra.mrb[88].mxu1 %v13818_v27  ;;  %v2291_v0 = vpop.f32.mrb[60].mxu0 }
 0x31b   : > { %3817 = vmatprep.mubr.f32.mxu1 %v13800_v6  ;;  %v13824_v7 = vmax.f32 %v2512_v47, 0.0  ;;  %v11222_v17 = vadd.f32 %v13590_v34, %v2291_v0  ;;  %v2293_v29 = vpop.f32.mrb[61].mxu0 }
 0x31d   : > { %16612 = vst [vmem:[#allocation10_spill] sm:$0xff] %v13824_v7  ;;  %v13827_v35 = vld [vmem:[#allocation3 + $0x152] sm:$0xff]  ;;  %v13831_v58 = vld [vmem:[#allocation3 + $0x15a] sm:$0xff]  ;;  %2587 = vst [vmem:[#allocation3 + $0x171] sm:$0xff] %v13824_v7  ;;  %v13835_v46 = vadd.f32 %v11222_v17, %v13579_v9 }
 0x31e   : > { %v13829_v63 = vld [vmem:[#allocation3 + $0x158] sm:$0xff]  ;;  %10124 = vmatprep.mubr.f32.mxu0 %v13827_v35  ;;  %v2296_v8 = vpop.f32.mrb[62].mxu0 }
 0x31f   : > { %16613 = vst [vmem:[#allocation11_spill] sm:$0xff] %v13835_v46  ;;  %3818 = vmatmul.mubr.f32.gmra.mrb[90].mxu1 %v13829_v63  ;;  %10125 = vmatmul.mubr.f32.gmra.mrb[88].mxu0 %v13831_v58  ;;  %v16569_v47 = vmax.f32 %v13835_v46, 0.0  ;;  %v11223_v0 = vadd.f32 %v13590_v34, %v2296_v8  ;;  %v2298_v29 = vpop.f32.mrb[63].mxu0  ;;  %v9406_v34 = vld [vmem:[%s16556_s1 + $0x688] sm:$0xff]  ;;  %v9407_v46 = vld [vmem:[%s16556_s1 + $0x690] sm:$0xff] }
 0x320   : > { %3822 = vmatprep.mubr.f32.mxu1 %v13815_v32  ;;  %v13843_v6 = vld [vmem:[#allocation3 + $0x168] sm:$0xff]  ;;  %v9405_v32 = vld [vmem:[%s16556_s1 + $0x680] sm:$0xff] }
 0x321   : > { %2588 = vst [vmem:[#allocation3 + $0x181] sm:$0xff] %v16569_v47  ;;  %v13848_v9 = vadd.f32 %v11223_v0, %v13577_v50  ;;  %v2718_v0 = vld [vmem:[#allocation3 + $0x2] sm:$0xff]  ;;  %v10617_v47 = vpack.c.bf16 %v9406_v34, %v9405_v32 }
 0x323   : > { %16614 = vst [vmem:[#allocation12_spill] sm:$0xff] %v13848_v9  ;;  %3823 = vmatmul.mubr.f32.gmra.mrb[92].mxu1 %v13843_v6  ;;  %v16572_v17 = vmax.f32 %v13848_v9, 0.0  ;;  %v16617_v9 = vmov 0.0|0.0  }
 0x324   : > { %3827 = vmatprep.mubr.f32.mxu1 %v13824_v7  ;;  %v13859_v8 = vld [vmem:[#allocation3 + $0x16a] sm:$0xff]  ;;  %v13863_v50 = vld [vmem:[#allocation3 + $0x172] sm:$0xff] }
 0x325   : > { %16615 = vst [vmem:[#allocation13_spill] sm:$0xff] %v13859_v8  ;;  %v13861_v29 = vld [vmem:[#allocation3 + $0x170] sm:$0xff]  ;;  %16616 = vst [vmem:[#allocation14_spill] sm:$0xff] %v13863_v50  ;;  %10127 = vmatprep.mubr.f32.mxu0 %v13859_v8  ;;  %v9408_v7 = vld [vmem:[%s16556_s1 + $0x698] sm:$0xff] }
 0x326   : > { %2589 = vst [vmem:[#allocation3 + $0x189] sm:$0xff] %v16572_v17  ;;  %10128 = vmatmul.mubr.f32.gmra.mrb[90].mxu0 %v13863_v50  ;;  %v2719_v17 = vld [vmem:[#allocation3 + $0xa] sm:$0xff]  ;;  %v10620_v50 = vpack.c.bf16 %v9408_v7, %v9407_v46  ;;  %v9410_v8 = vld [vmem:[%s16556_s1 + $0x6a8] sm:$0xff]  ;;  %v9411_v46 = vld [vmem:[%s16556_s1 + $0x6b0] sm:$0xff] }
 0x327   : > { %3828 = vmatmul.mubr.f32.gmra.mrb[94].mxu1 %v13861_v29  ;;  %v13892_v7 = vld [vmem:[#allocation3 + $0x1a] sm:$0xff] }
 0x328   : > { %3897 = vmatprep.mubr.f32.mxu1 %v13607_v10  ;;  %v9409_v10 = vld [vmem:[%s16556_s1 + $0x6a0] sm:$0xff] }
 0x32b   : > { %3898 = vmatmul.mubr.f32.vlgmr.msra.gmra.mrb[32].mxu1 %v2718_v0  ;;  %v9415_v0 = vld [vmem:[%s16556_s1 + $0x6d0] sm:$0xff] }
 0x32c   : > { %3902 = vmatprep.mubr.f32.mxu1 %v13612_v49  ;;  %10618 = vmatpush1.bf16.msra.mxu1 %v10617_v47  ;;  %v10623_v49 = vpack.c.bf16 %v9410_v8, %v9409_v10  ;;  %v9412_v47 = vld [vmem:[%s16556_s1 + $0x6b8] sm:$0xff]  ;;  %v9413_v8 = vld [vmem:[%s16556_s1 + $0x6c0] sm:$0xff] }
 0x32d   : > { %10619 = vmatprep.subr.bf16.mxu1 %v16617_v9  ;;  %v13882_v32 = vld [vmem:[#allocation3 + $0x182] sm:$0xff]  ;;  %v13884_v34 = vld [vmem:[#allocation3 + $0x18a] sm:$0xff] }
 0x32e   : > { %10130 = vmatprep.mubr.f32.mxu0 %v13882_v32  ;;  %v9416_v10 = vld [vmem:[%s16556_s1 + $0x6d8] sm:$0xff] }
 0x32f   : > { %3903 = vmatmul.mubr.f32.gmra.mrb[34].mxu1 %v2719_v17  ;;  %10131 = vmatmul.mubr.f32.gmra.mrb[92].mxu0 %v13884_v34  ;;  %v13903_v17 = vld [vmem:[#allocation3 + $0x22] sm:$0xff] }
 0x330   : > { %3907 = vmatprep.mubr.f32.mxu1 %v13617_v15  ;;  %10621 = vmatpush1.bf16.msra.mxu1 %v10620_v50  ;;  %v10626_v15 = vpack.c.bf16 %v9412_v47, %v9411_v46  ;;  %v9414_v50 = vld [vmem:[%s16556_s1 + $0x6c8] sm:$0xff]  ;;  %v9420_v47 = vld [vmem:[%s16556_s1 + $0x6f8] sm:$0xff] }
 0x331   : > { %10622 = vmatprep.subr.bf16.mxu1 %v16617_v9  ;;  %v9418_v46 = vld [vmem:[%s16556_s1 + $0x6e8] sm:$0xff] }
 0x333   : > { %3908 = vmatmul.mubr.f32.gmra.mrb[36].mxu1 %v13892_v7 }
 0x334   : > { %3912 = vmatprep.mubr.f32.mxu1 %v13624_v60  ;;  %10624 = vmatpush1.bf16.msra.mxu1 %v10623_v49  ;;  %v10629_v60 = vpack.c.bf16 %v9414_v50, %v9413_v8  ;;  %v10632_v49 = vpack.c.bf16 %v9416_v10, %v9415_v0  ;;  %v9424_v8 = vld [vmem:[%s16556_s1 + $0x718] sm:$0xff]  ;;  %v9426_v50 = vld [vmem:[%s16556_s1 + $0x728] sm:$0xff] }
 0x335   : > { %10625 = vmatprep.subr.bf16.mxu1 %v16617_v9  ;;  %v9430_v0 = vld [vmem:[%s16556_s1 + $0x748] sm:$0xff]  ;;  %v9432_v10 = vld [vmem:[%s16556_s1 + $0x758] sm:$0xff] }
 0x337   : > { %3913 = vmatmul.mubr.f32.gmra.mrb[38].mxu1 %v13903_v17 }
 0x338   : > { %3917 = vmatprep.mubr.f32.mxu1 %v13633_v30  ;;  %10627 = vmatpush1.bf16.msra.mxu1 %v10626_v15  ;;  %v9417_v30 = vld [vmem:[%s16556_s1 + $0x6e0] sm:$0xff]  ;;  %v9422_v15 = vld [vmem:[%s16556_s1 + $0x708] sm:$0xff] }
 0x339   : > { %10628 = vmatprep.subr.bf16.mxu1 %v16617_v9 }
 0x33b   : > { %3918 = vmatmul.mubr.f32.gmra.mrb[40].mxu1 %v13622_v36  ;;  %v10635_v36 = vpack.c.bf16 %v9418_v46, %v9417_v30  ;;  %v9436_v30 = vld [vmem:[%s16556_s1 + $0x778] sm:$0xff] }
 0x33c   : > { %3922 = vmatprep.mubr.f32.mxu1 %v13640_v54  ;;  %10630 = vmatpush1.bf16.msra.mxu1 %v10629_v60  ;;  %v9419_v54 = vld [vmem:[%s16556_s1 + $0x6f0] sm:$0xff]  ;;  %v9428_v60 = vld [vmem:[%s16556_s1 + $0x738] sm:$0xff] }
 0x33d   : > { %10631 = vmatprep.subr.bf16.mxu1 %v16617_v9  ;;  %v2847_v46 = vld [vmem:[#allocation3 + $0x21] sm:$0xff] }
 0x33f   : > { %3923 = vmatmul.mubr.f32.gmra.mrb[42].mxu1 %v13626_v40  ;;  %v10638_v40 = vpack.c.bf16 %v9420_v47, %v9419_v54  ;;  %v9444_v47 = vld [vmem:[%s16556_s1 + $0x7b8] sm:$0xff] }
 0x340   : > { %3927 = vmatprep.mubr.f32.mxu1 %v13649_v44  ;;  %10633 = vmatpush1.bf16.msra.mxu1 %v10632_v49  ;;  %v9421_v44 = vld [vmem:[%s16556_s1 + $0x700] sm:$0xff]  ;;  %v9434_v49 = vld [vmem:[%s16556_s1 + $0x768] sm:$0xff] }
 0x341   : > { %10634 = vmatprep.subr.bf16.mxu1 %v16617_v9 }
 0x343   : > { %3928 = vmatmul.mubr.f32.gmra.mrb[44].mxu1 %v13638_v28  ;;  %v10641_v28 = vpack.c.bf16 %v9422_v15, %v9421_v44  ;;  %v2913_v15 = vld [vmem:[#allocation3 + $0x3a] sm:$0xff] }
 0x344   : > { %3932 = vmatprep.mubr.f32.mxu1 %v13656_v38  ;;  %10636 = vmatpush1.bf16.msra.mxu1 %v10635_v36  ;;  %v9423_v38 = vld [vmem:[%s16556_s1 + $0x710] sm:$0xff]  ;;  %v2912_v36 = vld [vmem:[#allocation3 + $0x32] sm:$0xff] }
 0x345   : > { %10637 = vmatprep.subr.bf16.mxu1 %v16617_v9 }
 0x347   : > { %3933 = vmatmul.mubr.f32.gmra.mrb[46].mxu1 %v13642_v22  ;;  %v10644_v22 = vpack.c.bf16 %v9424_v8, %v9423_v38  ;;  %v9445_v8 = vld [vmem:[%s16556_s1 + $0x7c0] sm:$0xff] }
 0x348   : > { %3937 = vmatprep.mubr.f32.mxu1 %v13665_v5  ;;  %10639 = vmatpush1.bf16.msra.mxu1 %v10638_v40  ;;  %v9425_v5 = vld [vmem:[%s16556_s1 + $0x720] sm:$0xff] }
 0x349   : > { %10640 = vmatprep.subr.bf16.mxu1 %v16617_v9  ;;  %v14096_v40 = vld [vmem:[#allocation3 + $0x31] sm:$0xff] }
 0x34b   : > { %3938 = vmatmul.mubr.f32.gmra.mrb[48].mxu1 %v13654_v31  ;;  %v10647_v31 = vpack.c.bf16 %v9426_v50, %v9425_v5  ;;  %v14110_v5 = vld [vmem:[#allocation3 + $0x39] sm:$0xff]  ;;  %v2914_v50 = vld [vmem:[#allocation3 + $0x4a] sm:$0xff] }
 0x34c   : > { %3942 = vmatprep.mubr.f32.mxu1 %v13672_v23  ;;  %10642 = vmatpush1.bf16.msra.mxu1 %v10641_v28  ;;  %v9427_v23 = vld [vmem:[%s16556_s1 + $0x730] sm:$0xff] }
 0x34d   : > { %10643 = vmatprep.subr.bf16.mxu1 %v16617_v9 }
 0x34f   : > { %3943 = vmatmul.mubr.f32.gmra.mrb[50].mxu1 %v13658_v61  ;;  %v10650_v61 = vpack.c.bf16 %v9428_v60, %v9427_v23  ;;  %v9447_v23 = vld [vmem:[%s16556_s1 + $0x7d0] sm:$0xff]  ;;  %v9448_v60 = vld [vmem:[%s16556_s1 + $0x7d8] sm:$0xff] }
 0x350   : > { %3947 = vmatprep.mubr.f32.mxu1 %v13681_v21  ;;  %10645 = vmatpush1.bf16.msra.mxu1 %v10644_v22  ;;  %v9429_v21 = vld [vmem:[%s16556_s1 + $0x740] sm:$0xff]  ;;  %v9446_v22 = vld [vmem:[%s16556_s1 + $0x7c8] sm:$0xff] }
 0x351   : > { %10646 = vmatprep.subr.bf16.mxu1 %v16617_v9 }
 0x353   : > { %3948 = vmatmul.mubr.f32.gmra.mrb[52].mxu1 %v13670_v62  ;;  %v10653_v62 = vpack.c.bf16 %v9430_v0, %v9429_v21  ;;  %v2915_v0 = vld [vmem:[#allocation3 + $0x52] sm:$0xff] }
 0x354   : > { %3952 = vmatprep.mubr.f32.mxu1 %v13688_v43  ;;  %10648 = vmatpush1.bf16.msra.mxu1 %v10647_v31  ;;  %v9431_v43 = vld [vmem:[%s16556_s1 + $0x750] sm:$0xff]  ;;  %v10677_v31 = vpack.c.bf16 %v9446_v22, %v9445_v8  ;;  %v9457_v8 = vld [vmem:[%s16556_s1 + $0x820] sm:$0xff]  ;;  %v9458_v22 = vld [vmem:[%s16556_s1 + $0x828] sm:$0xff] }
 0x355   : > { %10649 = vmatprep.subr.bf16.mxu1 %v16617_v9 }
 0x357   : > { %3953 = vmatmul.mubr.f32.gmra.mrb[54].mxu1 %v13674_v1  ;;  %v10656_v1 = vpack.c.bf16 %v9432_v10, %v9431_v43  ;;  %v10680_v43 = vpack.c.bf16 %v9448_v60, %v9447_v23  ;;  %v9449_v10 = vld [vmem:[%s16556_s1 + $0x7e0] sm:$0xff]  ;;  %v10695_v23 = vpack.c.bf16 %v9458_v22, %v9457_v8  ;;  %v9459_v60 = vld [vmem:[%s16556_s1 + $0x830] sm:$0xff]  ;;  %v9466_v22 = vld [vmem:[%s16556_s1 + $0x868] sm:$0xff] }
 0x358   : > { %3957 = vmatprep.mubr.f32.mxu1 %v13697_v56  ;;  %10651 = vmatpush1.bf16.msra.mxu1 %v10650_v61  ;;  %v9433_v56 = vld [vmem:[%s16556_s1 + $0x760] sm:$0xff] }
 0x359   : > { %10652 = vmatprep.subr.bf16.mxu1 %v16617_v9  ;;  %v14120_v61 = vld [vmem:[#allocation3 + $0x49] sm:$0xff] }
 0x35a   : > { %v9465_v8 = vld [vmem:[%s16556_s1 + $0x860] sm:$0xff] }
 0x35b   : > { %3958 = vmatmul.mubr.f32.gmra.mrb[56].mxu1 %v13686_v25  ;;  %v10659_v25 = vpack.c.bf16 %v9434_v49, %v9433_v56  ;;  %v14134_v56 = vld [vmem:[#allocation3 + $0x51] sm:$0xff]  ;;  %v2916_v49 = vld [vmem:[#allocation3 + $0x62] sm:$0xff] }
 0x35c   : > { %3962 = vmatprep.mubr.f32.mxu1 %v13704_v57  ;;  %10654 = vmatpush1.bf16.msra.mxu1 %v10653_v62  ;;  %v9435_v57 = vld [vmem:[%s16556_s1 + $0x770] sm:$0xff] }
 0x35d   : > { %10655 = vmatprep.subr.bf16.mxu1 %v16617_v9 }
 0x35f   : > { %3963 = vmatmul.mubr.f32.gmra.mrb[58].mxu1 %v13690_v4  ;;  %v10662_v4 = vpack.c.bf16 %v9436_v30, %v9435_v57  ;;  %v9451_v57 = vld [vmem:[%s16556_s1 + $0x7f0] sm:$0xff]  ;;  %v9452_v30 = vld [vmem:[%s16556_s1 + $0x7f8] sm:$0xff] }
 0x360   : > { %3967 = vmatprep.mubr.f32.mxu1 %v13713_v59  ;;  %10657 = vmatpush1.bf16.msra.mxu1 %v10656_v1  ;;  %v9450_v1 = vld [vmem:[%s16556_s1 + $0x7e8] sm:$0xff] }
 0x361   : > { %10658 = vmatprep.subr.bf16.mxu1 %v16617_v9 }
 0x363   : > { %3968 = vmatmul.mubr.f32.gmra.mrb[60].mxu1 %v13702_v42  ;;  %v16618_v42 = vld [vmem:[#allocation5_spill] sm:$0xff] }
 0x364   : > { %3972 = vmatprep.mubr.f32.mxu1 %v13720_v52  ;;  %10660 = vmatpush1.bf16.msra.mxu1 %v10659_v25  ;;  %v10683_v25 = vpack.c.bf16 %v9450_v1, %v9449_v10  ;;  %v2921_v1 = vld [vmem:[#allocation3 + $0x9a] sm:$0xff] }
 0x365   : > { %10661 = vmatprep.subr.bf16.mxu1 %v16617_v9 }
 0x367   : > { %3973 = vmatmul.mubr.f32.gmra.mrb[62].mxu1 %v13706_v55 }
 0x368   : > { %3977 = vmatprep.mubr.f32.mxu1 %v13729_v41  ;;  %10663 = vmatpush1.bf16.msra.mxu1 %v10662_v4  ;;  %v14052_v41 = vld [vmem:[#allocation3 + $0x180] sm:$0xff] }
 0x369   : > { %10664 = vmatprep.subr.bf16.mxu1 %v16617_v9  ;;  %v14144_v4 = vld [vmem:[#allocation3 + $0x61] sm:$0xff] }
 0x36b   : > { %3978 = vmatmul.mubr.f32.gmra.mrb[64].mxu1 %v13718_v11  ;;  %v16619_v11 = vld [vmem:[#allocation8_spill] sm:$0xff] }
 0x36c   : > { %3982 = vmatprep.mubr.f32.mxu1 %v13736_v39  ;;  %v16620_v39 = vld [vmem:[#allocation13_spill] sm:$0xff] }
 0x36f   : > { %3983 = vmatmul.mubr.f32.gmra.mrb[66].mxu1 %v13722_v18 }
 0x370   : > { %3987 = vmatprep.mubr.f32.mxu1 %v13745_v16 }
 0x373   : > { %3988 = vmatmul.mubr.f32.gmra.mrb[68].mxu1 %v13734_v12 }
 0x374   : > { %3992 = vmatprep.mubr.f32.mxu1 %v13752_v37  ;;  %v9437_v37 = vld [vmem:[%s16556_s1 + $0x780] sm:$0xff] }
 0x377   : > { %3993 = vmatmul.mubr.f32.gmra.mrb[70].mxu1 %v13738_v26  ;;  %v14058_v26 = vld [vmem:[#allocation3 + $0x188] sm:$0xff] }
 0x378   : > { %3997 = vmatprep.mubr.f32.mxu1 %v13761_v48  ;;  %v9438_v48 = vld [vmem:[%s16556_s1 + $0x788] sm:$0xff] }
 0x37b   : > { %3998 = vmatmul.mubr.f32.gmra.mrb[72].mxu1 %v13750_v51 }
 0x37c   : > { %4002 = vmatprep.mubr.f32.mxu1 %v13768_v2  ;;  %v16621_v2 = vld [vmem:[#allocation14_spill] sm:$0xff] }
 0x37f   : > { %4003 = vmatmul.mubr.f32.gmra.mrb[74].mxu1 %v13754_v53 }
 0x380   : > { %4007 = vmatprep.mubr.f32.mxu1 %v13777_v24  ;;  %v10665_v24 = vpack.c.bf16 %v9438_v48, %v9437_v37  ;;  %v2917_v48 = vld [vmem:[#allocation3 + $0x6a] sm:$0xff] }
 0x383   : > { %4008 = vmatmul.mubr.f32.gmra.mrb[76].mxu1 %v13766_v45 }
 0x384   : > { %4012 = vmatprep.mubr.f32.mxu1 %v13784_v20  ;;  %v9439_v20 = vld [vmem:[%s16556_s1 + $0x790] sm:$0xff] }
 0x387   : > { %4013 = vmatmul.mubr.f32.gmra.mrb[78].mxu1 %v13770_v33 }
 0x388   : > { %4017 = vmatprep.mubr.f32.mxu1 %v13795_v19  ;;  %v2846_v19 = vld [vmem:[#allocation3 + $0x19] sm:$0xff] }
 0x38b   : > { %4018 = vmatmul.mubr.f32.gmra.mrb[80].mxu1 %v13782_v3 }
 0x38c   : > { %4022 = vmatprep.mubr.f32.mxu1 %v13805_v13  ;;  %v9440_v13 = vld [vmem:[%s16556_s1 + $0x798] sm:$0xff] }
 0x38f   : > { %4023 = vmatmul.mubr.f32.gmra.mrb[82].mxu1 %v16618_v42 }
 0x390   : > { %4027 = vmatprep.mubr.f32.mxu1 %v13818_v27 }
 0x391   : > { %v14037_v55 = vpop.f32.mrb[64].mxu0 }
 0x392   : > { %v14040_v59 = vpop.f32.mrb[65].mxu0 }
 0x393   : > { %4028 = vmatmul.mubr.f32.gmra.mrb[84].mxu1 %v13803_v14 }
 0x394   : > { %4032 = vmatprep.mubr.f32.mxu1 %v13829_v63  ;;  %v10668_v63 = vpack.c.bf16 %v9440_v13, %v9439_v20  ;;  %v10686_v20 = vpack.c.bf16 %v9452_v30, %v9451_v57  ;;  %v9453_v13 = vld [vmem:[%s16556_s1 + $0x800] sm:$0xff]  ;;  %v9462_v30 = vld [vmem:[%s16556_s1 + $0x848] sm:$0xff] }
 0x395   : > { %v9461_v57 = vld [vmem:[%s16556_s1 + $0x840] sm:$0xff] }
 0x397   : > { %4033 = vmatmul.mubr.f32.gmra.mrb[86].mxu1 %v16619_v11 }
 0x398   : > { %4037 = vmatprep.mubr.f32.mxu1 %v13843_v6 }
 0x399   : > { %v14045_v52 = vpop.f32.mrb[66].mxu0 }
 0x39a   : > { %v14048_v18 = vpop.f32.mrb[67].mxu0 }
 0x39b   : > { %4038 = vmatmul.mubr.f32.gmra.mrb[88].mxu1 %v13827_v35 }
 0x39c   : > { %4042 = vmatprep.mubr.f32.mxu1 %v13861_v29  ;;  %v9441_v29 = vld [vmem:[%s16556_s1 + $0x7a0] sm:$0xff] }
 0x39f   : > { %4043 = vmatmul.mubr.f32.gmra.mrb[90].mxu1 %v13831_v58 }
 0x3a0   : > { %4047 = vmatprep.mubr.f32.mxu1 %v14052_v41 }
 0x3a1   : > { %v14055_v12 = vpop.f32.mrb[68].mxu0 }
 0x3a2   : > { %v14060_v16 = vpop.f32.mrb[69].mxu0 }
 0x3a3   : > { %4048 = vmatmul.mubr.f32.gmra.mrb[92].mxu1 %v16620_v39 }
 0x3a4   : > { %4052 = vmatprep.mubr.f32.mxu1 %v14058_v26 }
 0x3a7   : > { %4053 = vmatmul.mubr.f32.gmra.mrb[94].mxu1 %v16621_v2 }
 0x3a8   : > { %4122 = vmatprep.mubr.f32.mxu1 %v13892_v7  ;;  %v9442_v7 = vld [vmem:[%s16556_s1 + $0x7a8] sm:$0xff] }
 0x3a9   : > { %v14077_v6 = vpop.f32.mrb[70].mxu0  ;;  %v10671_v54 = vpack.c.bf16 %v9442_v7, %v9441_v29  ;;  %v2918_v29 = vld [vmem:[#allocation3 + $0x7a] sm:$0xff] }
 0x3aa   : > { %v14079_v27 = vpop.f32.mrb[71].mxu0 }
 0x3ab   : > { %4123 = vmatmul.mubr.f32.vlgmr.msra.gmra.mrb[32].mxu1 %v2846_v19  ;;  %v9454_v19 = vld [vmem:[%s16556_s1 + $0x808] sm:$0xff] }
 0x3ac   : > { %4127 = vmatprep.mubr.f32.mxu1 %v13903_v17  ;;  %10666 = vmatpush1.bf16.msra.mxu1 %v10665_v24  ;;  %v9443_v17 = vld [vmem:[%s16556_s1 + $0x7b0] sm:$0xff]  ;;  %v10689_v7 = vpack.c.bf16 %v9454_v19, %v9453_v13  ;;  %v10701_v13 = vpack.c.bf16 %v9462_v30, %v9461_v57  ;;  %v2925_v30 = vld [vmem:[#allocation3 + $0xca] sm:$0xff] }
 0x3ad   : > { %10667 = vmatprep.subr.bf16.mxu1 %v16617_v9  ;;  %v10674_v38 = vpack.c.bf16 %v9444_v47, %v9443_v17  ;;  %v2919_v47 = vld [vmem:[#allocation3 + $0x82] sm:$0xff] }
 0x3ae   : > { %v9463_v19 = vld [vmem:[%s16556_s1 + $0x850] sm:$0xff] }
 0x3af   : > { %4128 = vmatmul.mubr.f32.gmra.mrb[34].mxu1 %v2847_v46  ;;  %v9455_v46 = vld [vmem:[%s16556_s1 + $0x810] sm:$0xff] }
 0x3b0   : > { %4132 = vmatprep.mubr.f32.mxu1 %v2912_v36  ;;  %10669 = vmatpush1.bf16.msra.mxu1 %v10668_v63  ;;  %v14158_v63 = vld [vmem:[#allocation3 + $0x69] sm:$0xff] }
 0x3b1   : > { %10670 = vmatprep.subr.bf16.mxu1 %v16617_v9  ;;  %v14098_v44 = vpop.f32.mrb[72].mxu0  ;;  %v9456_v36 = vld [vmem:[%s16556_s1 + $0x818] sm:$0xff] }
 0x3b2   : > { %v14101_v28 = vpop.f32.mrb[73].mxu0 }
 0x3b3   : > { %4133 = vmatmul.mubr.f32.gmra.mrb[36].mxu1 %v14096_v40 }
 0x3b4   : > { %4137 = vmatprep.mubr.f32.mxu1 %v2913_v15  ;;  %10672 = vmatpush1.bf16.msra.mxu1 %v10671_v54  ;;  %v14168_v54 = vld [vmem:[#allocation3 + $0x79] sm:$0xff] }
 0x3b5   : > { %10673 = vmatprep.subr.bf16.mxu1 %v16617_v9 }
 0x3b7   : > { %4138 = vmatmul.mubr.f32.gmra.mrb[38].mxu1 %v14110_v5 }
 0x3b8   : > { %4142 = vmatprep.mubr.f32.mxu1 %v2914_v50  ;;  %10675 = vmatpush1.bf16.msra.mxu1 %v10674_v38  ;;  %v10692_v38 = vpack.c.bf16 %v9456_v36, %v9455_v46  ;;  %v14182_v50 = vld [vmem:[#allocation3 + $0x81] sm:$0xff]  ;;  %v2923_v36 = vld [vmem:[#allocation3 + $0xb2] sm:$0xff] }
 0x3b9   : > { %10676 = vmatprep.subr.bf16.mxu1 %v16617_v9  ;;  %v14122_v21 = vpop.f32.mrb[74].mxu0 }
 0x3ba   : > { %v14125_v62 = vpop.f32.mrb[75].mxu0 }
 0x3bb   : > { %4143 = vmatmul.mubr.f32.gmra.mrb[40].mxu1 %v14120_v61 }
 0x3bc   : > { %4147 = vmatprep.mubr.f32.mxu1 %v2915_v0  ;;  %10678 = vmatpush1.bf16.msra.mxu1 %v10677_v31  ;;  %v2920_v31 = vld [vmem:[#allocation3 + $0x92] sm:$0xff]  ;;  %v9460_v0 = vld [vmem:[%s16556_s1 + $0x838] sm:$0xff] }
 0x3bd   : > { %10679 = vmatprep.subr.bf16.mxu1 %v16617_v9 }
 0x3bf   : > { %4148 = vmatmul.mubr.f32.gmra.mrb[42].mxu1 %v14134_v56 }
 0x3c0   : > { %4152 = vmatprep.mubr.f32.mxu1 %v2916_v49  ;;  %10681 = vmatpush1.bf16.msra.mxu1 %v10680_v43  ;;  %v14192_v43 = vld [vmem:[#allocation3 + $0x91] sm:$0xff] }
 0x3c1   : > { %10682 = vmatprep.subr.bf16.mxu1 %v16617_v9  ;;  %v14146_v37 = vpop.f32.mrb[76].mxu0 }
 0x3c2   : > { %v14149_v24 = vpop.f32.mrb[77].mxu0 }
 0x3c3   : > { %4153 = vmatmul.mubr.f32.gmra.mrb[44].mxu1 %v14144_v4 }
 0x3c4   : > { %4157 = vmatprep.mubr.f32.mxu1 %v2917_v48  ;;  %10684 = vmatpush1.bf16.msra.mxu1 %v10683_v25  ;;  %v10698_v25 = vpack.c.bf16 %v9460_v0, %v9459_v60  ;;  %v14206_v48 = vld [vmem:[#allocation3 + $0x99] sm:$0xff]  ;;  %v10707_v60 = vpack.c.bf16 %v9466_v22, %v9465_v8  ;;  %v2927_v8 = vld [vmem:[#allocation3 + $0xe2] sm:$0xff] }
 0x3c5   : > { %10685 = vmatprep.subr.bf16.mxu1 %v16617_v9  ;;  %v9467_v0 = vld [vmem:[%s16556_s1 + $0x870] sm:$0xff] }
 0x3c7   : > { %4158 = vmatmul.mubr.f32.gmra.mrb[46].mxu1 %v14158_v63 }
 0x3c8   : > { %4162 = vmatprep.mubr.f32.mxu1 %v2918_v29  ;;  %10687 = vmatpush1.bf16.msra.mxu1 %v10686_v20  ;;  %v2922_v20 = vld [vmem:[#allocation3 + $0xaa] sm:$0xff] }
 0x3c9   : > { %10688 = vmatprep.subr.bf16.mxu1 %v16617_v9  ;;  %v14170_v17 = vpop.f32.mrb[78].mxu0  ;;  %v9464_v29 = vld [vmem:[%s16556_s1 + $0x858] sm:$0xff] }
 0x3ca   : > { %v14173_v15 = vpop.f32.mrb[79].mxu0 }
 0x3cb   : > { %4163 = vmatmul.mubr.f32.gmra.mrb[48].mxu1 %v14168_v54 }
 0x3cc   : > { %4167 = vmatprep.mubr.f32.mxu1 %v2919_v47  ;;  %10690 = vmatpush1.bf16.msra.mxu1 %v10689_v7  ;;  %v14216_v7 = vld [vmem:[#allocation3 + $0xa9] sm:$0xff] }
 0x3cd   : > { %10691 = vmatprep.subr.bf16.mxu1 %v16617_v9 }
 0x3cf   : > { %4168 = vmatmul.mubr.f32.gmra.mrb[50].mxu1 %v14182_v50 }
 0x3d0   : > { %4172 = vmatprep.mubr.f32.mxu1 %v2920_v31  ;;  %10693 = vmatpush1.bf16.msra.mxu1 %v10692_v38  ;;  %v10704_v38 = vpack.c.bf16 %v9464_v29, %v9463_v19  ;;  %v14230_v31 = vld [vmem:[#allocation3 + $0xb1] sm:$0xff]  ;;  %v14248_v19 = vld [vmem:[#allocation3 + $0xc9] sm:$0xff]  ;;  %v2926_v29 = vld [vmem:[#allocation3 + $0xda] sm:$0xff] }
 0x3d1   : > { %10694 = vmatprep.subr.bf16.mxu1 %v16617_v9  ;;  %v14194_v10 = vpop.f32.mrb[80].mxu0 }
 0x3d2   : > { %v14197_v49 = vpop.f32.mrb[81].mxu0 }
 0x3d3   : > { %4173 = vmatmul.mubr.f32.gmra.mrb[52].mxu1 %v14192_v43 }
 0x3d4   : > { %4177 = vmatprep.mubr.f32.mxu1 %v2921_v1  ;;  %10696 = vmatpush1.bf16.msra.mxu1 %v10695_v23  ;;  %v2924_v23 = vld [vmem:[#allocation3 + $0xc2] sm:$0xff] }
 0x3d5   : > { %10697 = vmatprep.subr.bf16.mxu1 %v16617_v9  ;;  %v9468_v1 = vld [vmem:[%s16556_s1 + $0x878] sm:$0xff] }
 0x3d7   : > { %4178 = vmatmul.mubr.f32.gmra.mrb[54].mxu1 %v14206_v48 }
 0x3d8   : > { %4182 = vmatprep.mubr.f32.mxu1 %v2922_v20  ;;  %10699 = vmatpush1.bf16.msra.mxu1 %v10698_v25  ;;  %v14240_v25 = vld [vmem:[#allocation3 + $0xc1] sm:$0xff] }
 0x3d9   : > { %10700 = vmatprep.subr.bf16.mxu1 %v16617_v9  ;;  %v14218_v46 = vpop.f32.mrb[82].mxu0 }
 0x3da   : > { %v14221_v47 = vpop.f32.mrb[83].mxu0 }
 0x3db   : > { %4183 = vmatmul.mubr.f32.gmra.mrb[56].mxu1 %v14216_v7 }
 0x3dc   : > { %4187 = vmatprep.mubr.f32.mxu1 %v2923_v36  ;;  %10702 = vmatpush1.bf16.msra.mxu1 %v10701_v13  ;;  %v10710_v13 = vpack.c.bf16 %v9468_v1, %v9467_v0  ;;  %v14252_v36 = vld [vmem:[#allocation3 + $0xd9] sm:$0xff] }
 0x3dd   : > { %10703 = vmatprep.subr.bf16.mxu1 %v16617_v9 }
 0x3df   : > { %4188 = vmatmul.mubr.f32.gmra.mrb[58].mxu1 %v14230_v31 }
 0x3e0   : > { %4192 = vmatprep.mubr.f32.mxu1 %v2924_v23  ;;  %10705 = vmatpush1.bf16.msra.mxu1 %v10704_v38  ;;  %v14259_v23 = vld [vmem:[#allocation3 + $0xe1] sm:$0xff] }
 0x3e1   : > { %10706 = vmatprep.subr.bf16.mxu1 %v16617_v9  ;;  %v14242_v57 = vpop.f32.mrb[84].mxu0 }
 0x3e2   : > { %v14245_v20 = vpop.f32.mrb[85].mxu0 }
 0x3e3   : > { %4193 = vmatmul.mubr.f32.gmra.mrb[60].mxu1 %v14240_v25 }
 0x3e4   : > { %4197 = vmatprep.mubr.f32.mxu1 %v2925_v30  ;;  %10708 = vmatpush1.bf16.msra.mxu1 %v10707_v60  ;;  %v14263_v60 = vld [vmem:[#allocation3 + $0xf1] sm:$0xff]  ;;  %v14271_v30 = vld [vmem:[#allocation3 + $0xf9] sm:$0xff] }
 0x3e5   : > { %10709 = vmatprep.subr.bf16.mxu1 %v16617_v9 }
 0x3e7   : > { %4198 = vmatmul.mubr.f32.gmra.mrb[62].mxu1 %v14248_v19 }
 0x3e8   : > { %4202 = vmatprep.mubr.f32.mxu1 %v2926_v29  ;;  %10711 = vmatpush1.bf16.msra.mxu1 %v10710_v13  ;;  %v14275_v13 = vld [vmem:[#allocation3 + $0x109] sm:$0xff] }
 0x3e9   : > { %10744 = vmatprep.subr.bf16.mxu1 %v16617_v9  ;;  %v14254_v38 = vpop.f32.mrb[86].mxu0 }
 0x3ea   : > { %v14257_v22 = vpop.f32.mrb[87].mxu0 }
 0x3eb   : > { %4203 = vmatmul.mubr.f32.gmra.mrb[64].mxu1 %v14252_v36 }
 0x3ec   : > { %4207 = vmatprep.mubr.f32.mxu1 %v2927_v8  ;;  %v14283_v8 = vld [vmem:[#allocation3 + $0x111] sm:$0xff] }
 0x3ef   : > { %4208 = vmatmul.mubr.f32.gmra.mrb[66].mxu1 %v14259_v23 }
 0x3f0   : > { %4212 = vmatprep.mubr.f32.mxu1 %v13750_v51 }
 0x3f2   : > { %v14265_v0 = vpop.f32.mrb[88].mxu0 }
 0x3f3   : > { %16622 = vst [vmem:[#allocation5_spill] sm:$0xff] %v14265_v0  ;;  %4213 = vmatmul.mubr.f32.gmra.mrb[68].mxu1 %v14263_v60  ;;  %v14268_v1 = vpop.f32.mrb[89].mxu0 }
 0x3f4   : > { %16623 = vst [vmem:[#allocation8_spill] sm:$0xff] %v14268_v1  ;;  %4217 = vmatprep.mubr.f32.mxu1 %v13754_v53  ;;  %v14287_v53 = vld [vmem:[#allocation3 + $0x121] sm:$0xff] }
 0x3f5   : > { %v3134_v1 = vld [vmem:[#allocation3 + $0x1a2] sm:$0xff] }
 0x3f7   : > { %4218 = vmatmul.mubr.f32.gmra.mrb[70].mxu1 %v14271_v30 }
 0x3f8   : > { %4222 = vmatprep.mubr.f32.mxu1 %v13766_v45 }
 0x3f9   : > { %v14277_v29 = vpop.f32.mrb[90].mxu0 }
 0x3fa   : > { %16624 = vst [vmem:[#allocation13_spill] sm:$0xff] %v14277_v29  ;;  %v14280_v51 = vpop.f32.mrb[91].mxu0  ;;  %v14295_v29 = vld [vmem:[#allocation3 + $0x129] sm:$0xff] }
 0x3fb   : > { %4223 = vmatmul.mubr.f32.gmra.mrb[72].mxu1 %v14275_v13  ;;  %16625 = vst [vmem:[#allocation14_spill] sm:$0xff] %v14280_v51 }
 0x3fc   : > { %4227 = vmatprep.mubr.f32.mxu1 %v13770_v33  ;;  %v14299_v33 = vld [vmem:[#allocation3 + $0x139] sm:$0xff] }
 0x3ff   : > { %4228 = vmatmul.mubr.f32.gmra.mrb[74].mxu1 %v14283_v8 }
 0x400   : > { %4232 = vmatprep.mubr.f32.mxu1 %v13782_v3  ;;  %v14303_v3 = vld [vmem:[#allocation3 + $0x141] sm:$0xff] }
 0x402   : > { %v14289_v0 = vpop.f32.mrb[92].mxu0 }
 0x403   : > { %16626 = vst [vmem:[#allocation15_spill] sm:$0xff] %v14289_v0  ;;  %4233 = vmatmul.mubr.f32.gmra.mrb[76].mxu1 %v14287_v53  ;;  %v14292_v45 = vpop.f32.mrb[93].mxu0  ;;  %v16628_v0 = vld [vmem:[#allocation6_spill] sm:$0xff] }
 0x404   : > { %16627 = vst [vmem:[#allocation16_spill] sm:$0xff] %v14292_v45  ;;  %4237 = vmatprep.mubr.f32.mxu1 %v16618_v42  ;;  %v16629_v42 = vld [vmem:[#allocation7_spill] sm:$0xff]  ;;  %v16631_v45 = vld [vmem:[#allocation10_spill] sm:$0xff] }
 0x407   : > { %4238 = vmatmul.mubr.f32.gmra.mrb[78].mxu1 %v14295_v29 }
 0x408   : > { %4242 = vmatprep.mubr.f32.mxu1 %v13803_v14  ;;  %v16630_v14 = vld [vmem:[#allocation9_spill] sm:$0xff] }
 0x40b   : > { %4243 = vmatmul.mubr.f32.gmra.mrb[80].mxu1 %v14299_v33 }
 0x40c   : > { %4247 = vmatprep.mubr.f32.mxu1 %v16619_v11  ;;  %v16632_v11 = vld [vmem:[#allocation11_spill] sm:$0xff] }
 0x40d   : > { %v16633_v51 = vmax.f32 %v16632_v11, 0.0  ;;  %v9615_v11 = vld [vmem:[%s16556_s1 + $0xd00] sm:$0xff] }
 0x40f   : > { %4248 = vmatmul.mubr.f32.gmra.mrb[82].mxu1 %v14303_v3 }
 0x410   : > { %4252 = vmatprep.mubr.f32.mxu1 %v13827_v35  ;;  %v3133_v35 = vld [vmem:[#allocation3 + $0x19a] sm:$0xff] }
 0x411   : > { %10133 = vmatprep.mubr.f32.mxu0 %v3133_v35 }
 0x412   : > { %10134 = vmatmul.mubr.f32.gmra.mrb[94].mxu0 %v3134_v1 }
 0x413   : > { %4253 = vmatmul.mubr.f32.gmra.mrb[84].mxu1 %v16628_v0 }
 0x414   : > { %4257 = vmatprep.mubr.f32.mxu1 %v13831_v58  ;;  %v9487_v58 = vld [vmem:[%s16556_s1 + $0x900] sm:$0xff] }
 0x417   : > { %4258 = vmatmul.mubr.f32.gmra.mrb[86].mxu1 %v16629_v42  ;;  %v9492_v42 = vld [vmem:[%s16556_s1 + $0x928] sm:$0xff] }
 0x418   : > { %4262 = vmatprep.mubr.f32.mxu1 %v16620_v39  ;;  %v9488_v39 = vld [vmem:[%s16556_s1 + $0x908] sm:$0xff] }
 0x41b   : > { %4263 = vmatmul.mubr.f32.gmra.mrb[88].mxu1 %v16630_v14  ;;  %v2976_v14 = vld [vmem:[#allocation3 + $0x38] sm:$0xff] }
 0x41c   : > { %4267 = vmatprep.mubr.f32.mxu1 %v16621_v2  ;;  %v16634_v2 = vld [vmem:[#allocation12_spill] sm:$0xff] }
 0x41d   : > { %v16635_v0 = vmax.f32 %v16634_v2, 0.0  ;;  %v9494_v2 = vld [vmem:[%s16556_s1 + $0x938] sm:$0xff] }
 0x41f   : > { %4268 = vmatmul.mubr.f32.gmra.mrb[90].mxu1 %v16631_v45  ;;  %v2975_v45 = vld [vmem:[#allocation3 + $0x30] sm:$0xff] }
 0x420   : > { %4272 = vmatprep.mubr.f32.mxu1 %v13882_v32  ;;  %v10745_v32 = vpack.c.bf16 %v9488_v39, %v9487_v58  ;;  %v9493_v39 = vld [vmem:[%s16556_s1 + $0x930] sm:$0xff] }
 0x423   : > { %4273 = vmatmul.mubr.f32.gmra.mrb[92].mxu1 %v16633_v51  ;;  %v9490_v51 = vld [vmem:[%s16556_s1 + $0x918] sm:$0xff] }
 0x424   : > { %4277 = vmatprep.mubr.f32.mxu1 %v13884_v34  ;;  %v9489_v34 = vld [vmem:[%s16556_s1 + $0x910] sm:$0xff] }
 0x425   : > { %v10748_v1 = vpack.c.bf16 %v9490_v51, %v9489_v34  ;;  %v9496_v34 = vld [vmem:[%s16556_s1 + $0x948] sm:$0xff]  ;;  %v2978_v51 = vld [vmem:[#allocation3 + $0x50] sm:$0xff] }
 0x427   : > { %4278 = vmatmul.mubr.f32.gmra.mrb[94].mxu1 %v16635_v0  ;;  %v2977_v0 = vld [vmem:[#allocation3 + $0x48] sm:$0xff] }
 0x428   : > { %4347 = vmatprep.mubr.f32.mxu1 %v14096_v40  ;;  %v9491_v40 = vld [vmem:[%s16556_s1 + $0x920] sm:$0xff] }
 0x429   : > { %v10751_v58 = vpack.c.bf16 %v9492_v42, %v9491_v40  ;;  %v2979_v40 = vld [vmem:[#allocation3 + $0x60] sm:$0xff] }
 0x42b   : > { %4348 = vmatmul.mubr.f32.vlgmr.msra.gmra.mrb[32].mxu1 %v2975_v45 }
 0x42c   : > { %4352 = vmatprep.mubr.f32.mxu1 %v14110_v5  ;;  %10746 = vmatpush1.bf16.msra.mxu1 %v10745_v32  ;;  %v9616_v5 = vld [vmem:[%s16556_s1 + $0xd08] sm:$0xff]  ;;  %v9495_v32 = vld [vmem:[%s16556_s1 + $0x940] sm:$0xff] }
 0x42d   : > { %10747 = vmatprep.subr.bf16.mxu1 %v16617_v9  ;;  %v10936_v35 = vpack.c.bf16 %v9616_v5, %v9615_v11  ;;  %v10757_v45 = vpack.c.bf16 %v9496_v34, %v9495_v32  ;;  %v2980_v11 = vld [vmem:[#allocation3 + $0x68] sm:$0xff]  ;;  %v2983_v34 = vld [vmem:[#allocation3 + $0x90] sm:$0xff] }
 0x42e   : > { %v9506_v32 = vld [vmem:[%s16556_s1 + $0x998] sm:$0xff] }
 0x42f   : > { %4353 = vmatmul.mubr.f32.gmra.mrb[34].mxu1 %v2976_v14  ;;  %10937 = vmatprep.subr.bf16.mxu0 %v10936_v35  ;;  %v9500_v14 = vld [vmem:[%s16556_s1 + $0x968] sm:$0xff] }
 0x430   : > { %4357 = vmatprep.mubr.f32.mxu1 %v14120_v61  ;;  %10749 = vmatpush1.bf16.msra.mxu1 %v10748_v1  ;;  %v10754_v61 = vpack.c.bf16 %v9494_v2, %v9493_v39  ;;  %v9498_v1 = vld [vmem:[%s16556_s1 + $0x958] sm:$0xff]  ;;  %v9504_v2 = vld [vmem:[%s16556_s1 + $0x988] sm:$0xff] }
 0x431   : > { %10750 = vmatprep.subr.bf16.mxu1 %v16617_v9  ;;  %10939 = vmatpush3.bf16.msra.mxu0 %v10936_v35  ;;  %v9502_v35 = vld [vmem:[%s16556_s1 + $0x978] sm:$0xff] }
 0x433   : > { %4358 = vmatmul.mubr.f32.gmra.mrb[36].mxu1 %v2977_v0  ;;  %v2982_v0 = vld [vmem:[#allocation3 + $0x80] sm:$0xff] }
 0x434   : > { %4362 = vmatprep.mubr.f32.mxu1 %v14134_v56  ;;  %10752 = vmatpush1.bf16.msra.mxu1 %v10751_v58  ;;  %v9497_v56 = vld [vmem:[%s16556_s1 + $0x950] sm:$0xff]  ;;  %v2981_v58 = vld [vmem:[#allocation3 + $0x78] sm:$0xff] }
 0x435   : > { %10753 = vmatprep.subr.bf16.mxu1 %v16617_v9  ;;  %v10760_v42 = vpack.c.bf16 %v9498_v1, %v9497_v56  ;;  %v2984_v56 = vld [vmem:[#allocation3 + $0x98] sm:$0xff] }
 0x437   : > { %4363 = vmatmul.mubr.f32.gmra.mrb[38].mxu1 %v2978_v51 }
 0x438   : > { %4367 = vmatprep.mubr.f32.mxu1 %v14144_v4  ;;  %10755 = vmatpush1.bf16.msra.mxu1 %v10754_v61  ;;  %v9499_v4 = vld [vmem:[%s16556_s1 + $0x960] sm:$0xff] }
 0x439   : > { %10756 = vmatprep.subr.bf16.mxu1 %v16617_v9  ;;  %v10763_v5 = vpack.c.bf16 %v9500_v14, %v9499_v4  ;;  %v9512_v14 = vld [vmem:[%s16556_s1 + $0x9c8] sm:$0xff] }
 0x43b   : > { %4368 = vmatmul.mubr.f32.gmra.mrb[40].mxu1 %v2979_v40  ;;  %v9510_v40 = vld [vmem:[%s16556_s1 + $0x9b8] sm:$0xff] }
 0x43c   : > { %4372 = vmatprep.mubr.f32.mxu1 %v14158_v63  ;;  %10758 = vmatpush1.bf16.msra.mxu1 %v10757_v45  ;;  %v9501_v63 = vld [vmem:[%s16556_s1 + $0x970] sm:$0xff]  ;;  %v9508_v45 = vld [vmem:[%s16556_s1 + $0x9a8] sm:$0xff] }
 0x43d   : > { %10759 = vmatprep.subr.bf16.mxu1 %v16617_v9  ;;  %v10766_v39 = vpack.c.bf16 %v9502_v35, %v9501_v63  ;;  %v9514_v63 = vld [vmem:[%s16556_s1 + $0x9d8] sm:$0xff]  ;;  %v2987_v35 = vld [vmem:[#allocation3 + $0xc0] sm:$0xff] }
 0x43f   : > { %4373 = vmatmul.mubr.f32.gmra.mrb[42].mxu1 %v2980_v11  ;;  %v2986_v11 = vld [vmem:[#allocation3 + $0xb0] sm:$0xff] }
 0x440   : > { %4377 = vmatprep.mubr.f32.mxu1 %v14168_v54  ;;  %10761 = vmatpush1.bf16.msra.mxu1 %v10760_v42  ;;  %v9503_v54 = vld [vmem:[%s16556_s1 + $0x980] sm:$0xff]  ;;  %v2985_v42 = vld [vmem:[#allocation3 + $0xa8] sm:$0xff] }
 0x441   : > { %10762 = vmatprep.subr.bf16.mxu1 %v16617_v9  ;;  %v10769_v61 = vpack.c.bf16 %v9504_v2, %v9503_v54  ;;  %v2988_v54 = vld [vmem:[#allocation3 + $0xc8] sm:$0xff] }
 0x443   : > { %4378 = vmatmul.mubr.f32.gmra.mrb[44].mxu1 %v2981_v58 }
 0x444   : > { %4382 = vmatprep.mubr.f32.mxu1 %v14182_v50  ;;  %10764 = vmatpush1.bf16.msra.mxu1 %v10763_v5  ;;  %v9505_v50 = vld [vmem:[%s16556_s1 + $0x990] sm:$0xff] }
 0x445   : > { %10765 = vmatprep.subr.bf16.mxu1 %v16617_v9  ;;  %v10772_v51 = vpack.c.bf16 %v9506_v32, %v9505_v50  ;;  %v2993_v50 = vld [vmem:[#allocation3 + $0x108] sm:$0xff]  ;;  %v2995_v32 = vld [vmem:[#allocation3 + $0x120] sm:$0xff] }
 0x447   : > { %4383 = vmatmul.mubr.f32.gmra.mrb[46].mxu1 %v2982_v0  ;;  %v2990_v0 = vld [vmem:[#allocation3 + $0xe0] sm:$0xff] }
 0x448   : > { %4387 = vmatprep.mubr.f32.mxu1 %v14192_v43  ;;  %10767 = vmatpush1.bf16.msra.mxu1 %v10766_v39  ;;  %v9507_v43 = vld [vmem:[%s16556_s1 + $0x9a0] sm:$0xff]  ;;  %v9516_v39 = vld [vmem:[%s16556_s1 + $0x9e8] sm:$0xff] }
 0x449   : > { %10768 = vmatprep.subr.bf16.mxu1 %v16617_v9  ;;  %v10775_v1 = vpack.c.bf16 %v9508_v45, %v9507_v43  ;;  %v9620_v43 = vld [vmem:[%s16556_s1 + $0xd28] sm:$0xff] }
 0x44a   : > { %v2997_v45 = vld [vmem:[#allocation3 + $0x138] sm:$0xff] }
 0x44b   : > { %4388 = vmatmul.mubr.f32.gmra.mrb[48].mxu1 %v2983_v34  ;;  %v2996_v34 = vld [vmem:[#allocation3 + $0x128] sm:$0xff] }
 0x44c   : > { %4392 = vmatprep.mubr.f32.mxu1 %v14206_v48  ;;  %10770 = vmatpush1.bf16.msra.mxu1 %v10769_v61  ;;  %v9509_v48 = vld [vmem:[%s16556_s1 + $0x9b0] sm:$0xff]  ;;  %v2991_v61 = vld [vmem:[#allocation3 + $0xf0] sm:$0xff] }
 0x44d   : > { %10771 = vmatprep.subr.bf16.mxu1 %v16617_v9  ;;  %v10778_v4 = vpack.c.bf16 %v9510_v40, %v9509_v48  ;;  %v2998_v48 = vld [vmem:[#allocation3 + $0x140] sm:$0xff] }
 0x44f   : > { %4393 = vmatmul.mubr.f32.gmra.mrb[50].mxu1 %v2984_v56 }
 0x450   : > { %4397 = vmatprep.mubr.f32.mxu1 %v14216_v7  ;;  %10773 = vmatpush1.bf16.msra.mxu1 %v10772_v51  ;;  %v9511_v7 = vld [vmem:[%s16556_s1 + $0x9c0] sm:$0xff] }
 0x451   : > { %10774 = vmatprep.subr.bf16.mxu1 %v16617_v9  ;;  %v10781_v5 = vpack.c.bf16 %v9512_v14, %v9511_v7  ;;  %v2999_v7 = vld [vmem:[#allocation3 + $0x150] sm:$0xff] }
 0x453   : > { %4398 = vmatmul.mubr.f32.gmra.mrb[52].mxu1 %v2985_v42  ;;  %v3063_v42 = vld [vmem:[#allocation3 + $0x151] sm:$0xff] }
 0x454   : > { %4402 = vmatprep.mubr.f32.mxu1 %v14230_v31  ;;  %10776 = vmatpush1.bf16.msra.mxu1 %v10775_v1  ;;  %v9513_v31 = vld [vmem:[%s16556_s1 + $0x9d0] sm:$0xff]  ;;  %v9622_v1 = vld [vmem:[%s16556_s1 + $0xd38] sm:$0xff] }
 0x455   : > { %10777 = vmatprep.subr.bf16.mxu1 %v16617_v9  ;;  %v10784_v58 = vpack.c.bf16 %v9514_v63, %v9513_v31  ;;  %v3000_v31 = vld [vmem:[#allocation3 + $0x158] sm:$0xff]  ;;  %v9626_v63 = vld [vmem:[%s16556_s1 + $0xd58] sm:$0xff] }
 0x457   : > { %4403 = vmatmul.mubr.f32.gmra.mrb[54].mxu1 %v2986_v11  ;;  %v3064_v11 = vld [vmem:[#allocation3 + $0x159] sm:$0xff] }
 0x458   : > { %4407 = vmatprep.mubr.f32.mxu1 %v14240_v25  ;;  %10779 = vmatpush1.bf16.msra.mxu1 %v10778_v4  ;;  %v9515_v25 = vld [vmem:[%s16556_s1 + $0x9e0] sm:$0xff]  ;;  %v9624_v4 = vld [vmem:[%s16556_s1 + $0xd48] sm:$0xff] }
 0x459   : > { %10780 = vmatprep.subr.bf16.mxu1 %v16617_v9  ;;  %v10787_v2 = vpack.c.bf16 %v9516_v39, %v9515_v25  ;;  %v9627_v25 = vld [vmem:[%s16556_s1 + $0xd60] sm:$0xff]  ;;  %v9628_v39 = vld [vmem:[%s16556_s1 + $0xd68] sm:$0xff] }
 0x45b   : > { %4408 = vmatmul.mubr.f32.gmra.mrb[56].mxu1 %v2987_v35  ;;  %v3065_v35 = vld [vmem:[#allocation3 + $0x169] sm:$0xff] }
 0x45c   : > { %4412 = vmatprep.mubr.f32.mxu1 %v14248_v19  ;;  %10782 = vmatpush1.bf16.msra.mxu1 %v10781_v5  ;;  %v2989_v19 = vld [vmem:[#allocation3 + $0xd8] sm:$0xff]  ;;  %v9625_v5 = vld [vmem:[%s16556_s1 + $0xd50] sm:$0xff] }
 0x45d   : > { %10783 = vmatprep.subr.bf16.mxu1 %v16617_v9 }
 0x45f   : > { %4413 = vmatmul.mubr.f32.gmra.mrb[58].mxu1 %v2988_v54  ;;  %v3001_v54 = vld [vmem:[#allocation3 + $0x168] sm:$0xff] }
 0x460   : > { %4417 = vmatprep.mubr.f32.mxu1 %v14252_v36  ;;  %10785 = vmatpush1.bf16.msra.mxu1 %v10784_v58  ;;  %v2992_v36 = vld [vmem:[#allocation3 + $0xf8] sm:$0xff]  ;;  %v10956_v58 = vpack.c.bf16 %v9626_v63, %v9625_v5  ;;  %v9531_v5 = vld [vmem:[%s16556_s1 + $0xa60] sm:$0xff] }
 0x461   : > { %10786 = vmatprep.subr.bf16.mxu1 %v16617_v9 }
 0x463   : > { %4418 = vmatmul.mubr.f32.gmra.mrb[60].mxu1 %v2989_v19  ;;  %v3066_v19 = vld [vmem:[#allocation3 + $0x171] sm:$0xff] }
 0x464   : > { %4422 = vmatprep.mubr.f32.mxu1 %v14259_v23  ;;  %10788 = vmatpush1.bf16.msra.mxu1 %v10787_v2  ;;  %v2994_v23 = vld [vmem:[#allocation3 + $0x110] sm:$0xff]  ;;  %v10960_v2 = vpack.c.bf16 %v9628_v39, %v9627_v25 }
 0x465   : > { %10789 = vmatprep.subr.bf16.mxu1 %v16617_v9  ;;  %v9535_v39 = vld [vmem:[%s16556_s1 + $0xa80] sm:$0xff] }
 0x467   : > { %4423 = vmatmul.mubr.f32.gmra.mrb[62].mxu1 %v2990_v0  ;;  %v9629_v0 = vld [vmem:[%s16556_s1 + $0xd70] sm:$0xff] }
 0x468   : > { %4427 = vmatprep.mubr.f32.mxu1 %v14263_v60  ;;  %v9517_v60 = vld [vmem:[%s16556_s1 + $0x9f0] sm:$0xff] }
 0x46b   : > { %4428 = vmatmul.mubr.f32.gmra.mrb[64].mxu1 %v2991_v61  ;;  %v3002_v61 = vld [vmem:[#allocation3 + $0x170] sm:$0xff] }
 0x46c   : > { %4432 = vmatprep.mubr.f32.mxu1 %v14271_v30  ;;  %v9518_v30 = vld [vmem:[%s16556_s1 + $0x9f8] sm:$0xff] }
 0x46f   : > { %4433 = vmatmul.mubr.f32.gmra.mrb[66].mxu1 %v2992_v36  ;;  %v9630_v36 = vld [vmem:[%s16556_s1 + $0xd78] sm:$0xff] }
 0x470   : > { %4437 = vmatprep.mubr.f32.mxu1 %v14275_v13  ;;  %v9617_v13 = vld [vmem:[%s16556_s1 + $0xd10] sm:$0xff] }
 0x473   : > { %4438 = vmatmul.mubr.f32.gmra.mrb[68].mxu1 %v2993_v50  ;;  %v3067_v50 = vld [vmem:[#allocation3 + $0x181] sm:$0xff] }
 0x474   : > { %4442 = vmatprep.mubr.f32.mxu1 %v14283_v8  ;;  %v9618_v8 = vld [vmem:[%s16556_s1 + $0xd18] sm:$0xff] }
 0x475   : > { %v10940_v51 = vpack.c.bf16 %v9618_v8, %v9617_v13  ;;  %v12131_v13 = vld [vmem:[#allocation2] sm:$0xff] }
 0x476   : > { %v4861_v8 = vld [vmem:[#allocation2 + $0x1] sm:$0xff] }
 0x477   : > { %4443 = vmatmul.mubr.f32.gmra.mrb[70].mxu1 %v2994_v23  ;;  %10941 = vmatprep.subr.bf16.mxu0 %v10940_v51  ;;  %v10964_v23 = vpack.c.bf16 %v9630_v36, %v9629_v0  ;;  %v9538_v0 = vld [vmem:[%s16556_s1 + $0xa98] sm:$0xff]  ;;  %v9539_v36 = vld [vmem:[%s16556_s1 + $0xaa0] sm:$0xff] }
 0x478   : > { %4447 = vmatprep.mubr.f32.mxu1 %v14287_v53  ;;  %v10790_v53 = vpack.c.bf16 %v9518_v30, %v9517_v60  ;;  %10943 = vmatpush3.bf16.msra.mxu0 %v10940_v51  ;;  %v3069_v60 = vld [vmem:[#allocation3 + $0x199] sm:$0xff]  ;;  %v3070_v30 = vld [vmem:[#allocation3 + $0x1a1] sm:$0xff] }
 0x479   : > { %v4862_v51 = vld [vmem:[#allocation2 + $0x9] sm:$0xff] }
 0x47a   : > { %10791 = vmatpush1.bf16.msra.mxu1 %v10790_v53  ;;  %v9519_v53 = vld [vmem:[%s16556_s1 + $0xa00] sm:$0xff] }
 0x47b   : > { %4448 = vmatmul.mubr.f32.gmra.mrb[72].mxu1 %v2995_v32  ;;  %10792 = vmatprep.subr.bf16.mxu1 %v16617_v9  ;;  %v3068_v32 = vld [vmem:[#allocation3 + $0x189] sm:$0xff] }
 0x47c   : > { %4452 = vmatprep.mubr.f32.mxu1 %v14295_v29  ;;  %v9619_v29 = vld [vmem:[%s16556_s1 + $0xd20] sm:$0xff] }
 0x47d   : > { %v10944_v56 = vpack.c.bf16 %v9620_v43, %v9619_v29  ;;  %v9522_v29 = vld [vmem:[%s16556_s1 + $0xa18] sm:$0xff] }
 0x47f   : > { %4453 = vmatmul.mubr.f32.gmra.mrb[74].mxu1 %v2996_v34  ;;  %10945 = vmatprep.subr.bf16.mxu0 %v10944_v56 }
 0x480   : > { %4457 = vmatprep.mubr.f32.mxu1 %v14299_v33  ;;  %10947 = vmatpush3.bf16.msra.mxu0 %v10944_v56  ;;  %v9621_v33 = vld [vmem:[%s16556_s1 + $0xd30] sm:$0xff]  ;;  %v9524_v56 = vld [vmem:[%s16556_s1 + $0xa28] sm:$0xff] }
 0x481   : > { %v10948_v40 = vpack.c.bf16 %v9622_v1, %v9621_v33  ;;  %v9525_v1 = vld [vmem:[%s16556_s1 + $0xa30] sm:$0xff] }
 0x483   : > { %4458 = vmatmul.mubr.f32.gmra.mrb[76].mxu1 %v2997_v45  ;;  %10949 = vmatprep.subr.bf16.mxu0 %v10948_v40  ;;  %v9523_v45 = vld [vmem:[%s16556_s1 + $0xa20] sm:$0xff] }
 0x484   : > { %4462 = vmatprep.mubr.f32.mxu1 %v14303_v3  ;;  %10951 = vmatpush3.bf16.msra.mxu0 %v10948_v40  ;;  %v9623_v3 = vld [vmem:[%s16556_s1 + $0xd40] sm:$0xff]  ;;  %v10799_v33 = vpack.c.bf16 %v9524_v56, %v9523_v45 }
 0x485   : > { %v10952_v14 = vpack.c.bf16 %v9624_v4, %v9623_v3  ;;  %v9528_v3 = vld [vmem:[%s16556_s1 + $0xa48] sm:$0xff] }
 0x487   : > { %4463 = vmatmul.mubr.f32.gmra.mrb[78].mxu1 %v2998_v48  ;;  %10953 = vmatprep.subr.bf16.mxu0 %v10952_v14  ;;  %v9526_v48 = vld [vmem:[%s16556_s1 + $0xa38] sm:$0xff] }
 0x488   : > { %4467 = vmatprep.mubr.f32.mxu1 %v3063_v42  ;;  %10955 = vmatpush3.bf16.msra.mxu0 %v10952_v14  ;;  %v10802_v40 = vpack.c.bf16 %v9526_v48, %v9525_v1  ;;  %v9527_v42 = vld [vmem:[%s16556_s1 + $0xa40] sm:$0xff]  ;;  %v9530_v14 = vld [vmem:[%s16556_s1 + $0xa58] sm:$0xff] }
 0x489   : > { %10957 = vmatprep.subr.bf16.mxu0 %v10956_v58  ;;  %v10805_v4 = vpack.c.bf16 %v9528_v3, %v9527_v42  ;;  %v9549_v3 = vld [vmem:[%s16556_s1 + $0xaf0] sm:$0xff] }
 0x48b   : > { %4468 = vmatmul.mubr.f32.gmra.mrb[80].mxu1 %v2999_v7  ;;  %v9529_v7 = vld [vmem:[%s16556_s1 + $0xa50] sm:$0xff] }
 0x48c   : > { %4472 = vmatprep.mubr.f32.mxu1 %v3064_v11  ;;  %10959 = vmatpush3.bf16.msra.mxu0 %v10956_v58  ;;  %v10808_v11 = vpack.c.bf16 %v9530_v14, %v9529_v7  ;;  %v9534_v58 = vld [vmem:[%s16556_s1 + $0xa78] sm:$0xff] }
 0x48d   : > { %10961 = vmatprep.subr.bf16.mxu0 %v10960_v2 }
 0x48f   : > { %4473 = vmatmul.mubr.f32.gmra.mrb[82].mxu1 %v3000_v31  ;;  %v9532_v31 = vld [vmem:[%s16556_s1 + $0xa68] sm:$0xff] }
 0x490   : > { %4477 = vmatprep.mubr.f32.mxu1 %v3065_v35  ;;  %10963 = vmatpush3.bf16.msra.mxu0 %v10960_v2  ;;  %v10811_v63 = vpack.c.bf16 %v9532_v31, %v9531_v5  ;;  %v9533_v35 = vld [vmem:[%s16556_s1 + $0xa70] sm:$0xff] }
 0x491   : > { %10965 = vmatprep.subr.bf16.mxu0 %v10964_v23  ;;  %v10814_v25 = vpack.c.bf16 %v9534_v58, %v9533_v35 }
 0x493   : > { %4478 = vmatmul.mubr.f32.gmra.mrb[84].mxu1 %v3001_v54  ;;  %v9536_v54 = vld [vmem:[%s16556_s1 + $0xa88] sm:$0xff] }
 0x494   : > { %4482 = vmatprep.mubr.f32.mxu1 %v3066_v19  ;;  %10967 = vmatpush3.bf16.msra.mxu0 %v10964_v23  ;;  %v10817_v2 = vpack.c.bf16 %v9536_v54, %v9535_v39  ;;  %v9537_v19 = vld [vmem:[%s16556_s1 + $0xa90] sm:$0xff] }
 0x495   : > { %10968 = vmatprep.subr.bf16.mxu0 %v16617_v9 }
 0x497   : > { %4483 = vmatmul.mubr.f32.gmra.mrb[86].mxu1 %v3002_v61  ;;  %v10820_v61 = vpack.c.bf16 %v9538_v0, %v9537_v19 }
 0x498   : > { %4487 = vmatprep.mubr.f32.mxu1 %v3067_v50  ;;  %v9540_v50 = vld [vmem:[%s16556_s1 + $0xaa8] sm:$0xff] }
 0x499   : > { %v10823_v23 = vpack.c.bf16 %v9540_v50, %v9539_v36 }
 0x49b   : > { %4488 = vmatmul.mubr.f32.gmra.mrb[88].mxu1 %v14052_v41  ;;  %v9520_v41 = vld [vmem:[%s16556_s1 + $0xa08] sm:$0xff] }
 0x49c   : > { %4492 = vmatprep.mubr.f32.mxu1 %v3068_v32  ;;  %v10793_v34 = vpack.c.bf16 %v9520_v41, %v9519_v53  ;;  %v9541_v32 = vld [vmem:[%s16556_s1 + $0xab0] sm:$0xff] }
 0x49d   : > { %v9545_v41 = vld [vmem:[%s16556_s1 + $0xad0] sm:$0xff] }
 0x49f   : > { %4493 = vmatmul.mubr.f32.gmra.mrb[90].mxu1 %v14058_v26  ;;  %v9521_v26 = vld [vmem:[%s16556_s1 + $0xa10] sm:$0xff] }
 0x4a0   : > { %4497 = vmatprep.mubr.f32.mxu1 %v3069_v60  ;;  %v10796_v43 = vpack.c.bf16 %v9522_v29, %v9521_v26  ;;  %v9542_v60 = vld [vmem:[%s16556_s1 + $0xab8] sm:$0xff]  ;;  %v9547_v29 = vld [vmem:[%s16556_s1 + $0xae0] sm:$0xff] }
 0x4a3   : > { %4498 = vmatmul.mubr.f32.gmra.mrb[92].mxu1 %v12131_v13 }
 0x4a4   : > { %4502 = vmatprep.mubr.f32.mxu1 %v3070_v30  ;;  %v10826_v30 = vpack.c.bf16 %v9542_v60, %v9541_v32 }
 0x4a7   : > { %4503 = vmatmul.mubr.f32.gmra.mrb[94].mxu1 %v12131_v13 }
 0x4a8   : > { %5878 = vmatprep.mubr.f32.mxu1 %v4861_v8  ;;  %v9544_v8 = vld [vmem:[%s16556_s1 + $0xac8] sm:$0xff] }
 0x4ab   : > { %5879 = vmatmul.mubr.f32.vlgmr.msra.gmra.mrb[96].mxu1 %v12131_v13 }
 0x4ac   : > { %10794 = vmatpush1.bf16.msra.mxu1 %v10793_v34  ;;  %5883 = vmatprep.mubr.f32.mxu1 %v4862_v51  ;;  %v9546_v34 = vld [vmem:[%s16556_s1 + $0xad8] sm:$0xff] }
 0x4ad   : > { %10795 = vmatprep.subr.bf16.mxu1 %v16617_v9  ;;  %v10832_v51 = vpack.c.bf16 %v9546_v34, %v9545_v41 }
 0x4af   : > { %5884 = vmatmul.mubr.f32.gmra.mrb[98].mxu1 %v12131_v13  ;;  %v9543_v13 = vld [vmem:[%s16556_s1 + $0xac0] sm:$0xff] }
 0x4b0   : > { %10797 = vmatpush1.bf16.msra.mxu1 %v10796_v43  ;;  %v10829_v53 = vpack.c.bf16 %v9544_v8, %v9543_v13  ;;  %v9548_v43 = vld [vmem:[%s16556_s1 + $0xae8] sm:$0xff] }
 0x4b1   : > { %10798 = vmatprep.subr.bf16.mxu1 %v16617_v9  ;;  %v10835_v45 = vpack.c.bf16 %v9548_v43, %v9547_v29 }
 0x4b4   : > { %10800 = vmatpush1.bf16.msra.mxu1 %v10799_v33  ;;  %v14618_v33 = vld [vmem:[%s16557_s2 + $0x1] ss:$0 sm:$0xff] }
 0x4b5   : > { %10801 = vmatprep.subr.bf16.mxu1 %v16617_v9 }
 0x4b8   : > { %10803 = vmatpush1.bf16.msra.mxu1 %v10802_v40 }
 0x4b9   : > { %10804 = vmatprep.subr.bf16.mxu1 %v16617_v9 }
 0x4bc   : > { %10806 = vmatpush1.bf16.msra.mxu1 %v10805_v4  ;;  %v9550_v4 = vld [vmem:[%s16556_s1 + $0xaf8] sm:$0xff] }
 0x4bd   : > { %10807 = vmatprep.subr.bf16.mxu1 %v16617_v9  ;;  %v10838_v14 = vpack.c.bf16 %v9550_v4, %v9549_v3 }
 0x4c0   : > { %10809 = vmatpush1.bf16.msra.mxu1 %v10808_v11 }
 0x4c1   : > { %10810 = vmatprep.subr.bf16.mxu1 %v16617_v9 }
 0x4c4   : > { %10812 = vmatpush1.bf16.msra.mxu1 %v10811_v63 }
 0x4c5   : > { %10813 = vmatprep.subr.bf16.mxu1 %v16617_v9 }
 0x4c8   : > { %10815 = vmatpush1.bf16.msra.mxu1 %v10814_v25 }
 0x4c9   : > { %10816 = vmatprep.subr.bf16.mxu1 %v16617_v9 }
 0x4cc   : > { %10818 = vmatpush1.bf16.msra.mxu1 %v10817_v2 }
 0x4cd   : > { %10819 = vmatprep.subr.bf16.mxu1 %v16617_v9 }
 0x4d0   : > { %10821 = vmatpush1.bf16.msra.mxu1 %v10820_v61 }
 0x4d1   : > { %10822 = vmatprep.subr.bf16.mxu1 %v16617_v9 }
 0x4d4   : > { %10824 = vmatpush1.bf16.msra.mxu1 %v10823_v23 }
 0x4d5   : > { %10825 = vmatprep.subr.bf16.mxu1 %v16617_v9 }
 0x4d8   : > { %10827 = vmatpush1.bf16.msra.mxu1 %v10826_v30 }
 0x4d9   : > { %10828 = vmatprep.subr.bf16.mxu1 %v16617_v9 }
 0x4dc   : > { %10830 = vmatpush1.bf16.msra.mxu1 %v10829_v53 }
 0x4dd   : > { %10831 = vmatprep.subr.bf16.mxu1 %v16617_v9 }
 0x4e0   : > { %10833 = vmatpush1.bf16.msra.mxu1 %v10832_v51 }
 0x4e1   : > { %10834 = vmatprep.subr.bf16.mxu1 %v16617_v9 }
 0x4e4   : > { %10836 = vmatpush1.bf16.msra.mxu1 %v10835_v45 }
 0x4e5   : > { %v14605_v26 = vpop.f32.mrb[94].mxu0  ;;  %10837 = vmatprep.subr.bf16.mxu1 %v16617_v9 }
 0x4e6   : > { %v14613_v56 = vpop.f32.mrb[95].mxu0 }
 0x4e8   : > { %10839 = vmatpush1.bf16.msra.mxu1 %v10838_v14 }
 0x4e9   : > { %10840 = vmatprep.subr.bf16.mxu1 %v16617_v9 }
 0x4fe   : > { %v4349_v1 = vpop.f32.mrb[32].mxu1 }
 0x4ff   : > { %v11224_v48 = vadd.f32 %v14618_v33, %v4349_v1  ;;  %v4351_v40 = vpop.f32.mrb[33].mxu1 }
 0x501   : > { %v4575_v42 = vadd.f32 %v11224_v48, %v14040_v59 }
 0x502   : > { %v4354_v7 = vpop.f32.mrb[34].mxu1 }
 0x503   : > { %v4733_v11 = vmax.f32 %v4575_v42, 0.0  ;;  %v11225_v5 = vadd.f32 %v14618_v33, %v4354_v7  ;;  %v4356_v31 = vpop.f32.mrb[35].mxu1 }
 0x505   : > { %4765 = vst [vmem:[#allocation2 + $0x19] sm:$0xff] %v4733_v11  ;;  %v4580_v63 = vadd.f32 %v11225_v5, %v14037_v55  ;;  %5888 = vmatprep.mubr.f32.mxu1 %v4733_v11 }
 0x506   : > { %v4359_v59 = vpop.f32.mrb[36].mxu1 }
 0x507   : > { %v4734_v35 = vmax.f32 %v4580_v63, 0.0  ;;  %v11226_v58 = vadd.f32 %v14618_v33, %v4359_v59  ;;  %v4361_v25 = vpop.f32.mrb[37].mxu1 }
 0x509   : > { %4766 = vst [vmem:[#allocation2 + $0x21] sm:$0xff] %v4734_v35  ;;  %v4585_v39 = vadd.f32 %v11226_v58, %v14048_v18 }
 0x50a   : > { %v4364_v54 = vpop.f32.mrb[38].mxu1 }
 0x50b   : > { %v4735_v2 = vmax.f32 %v4585_v39, 0.0  ;;  %v11227_v19 = vadd.f32 %v14618_v33, %v4364_v54  ;;  %v4366_v0 = vpop.f32.mrb[39].mxu1 }
 0x50c   : > { %v14635_v61 = vld [vmem:[#allocation2 + $0x18] sm:$0xff] }
 0x50d   : > { %4767 = vst [vmem:[#allocation2 + $0x31] sm:$0xff] %v4735_v2  ;;  %v4590_v55 = vadd.f32 %v11227_v19, %v14045_v52  ;;  %5889 = vmatmul.mubr.f32.gmra.mrb[100].mxu1 %v14635_v61 }
 0x50e   : > { %v4369_v36 = vpop.f32.mrb[40].mxu1  ;;  %5893 = vmatprep.mubr.f32.mxu1 %v4734_v35 }
 0x50f   : > { %v4736_v50 = vmax.f32 %v4590_v55, 0.0  ;;  %v11228_v23 = vadd.f32 %v14618_v33, %v4369_v36  ;;  %v4371_v32 = vpop.f32.mrb[41].mxu1 }
 0x510   : > { %v14640_v60 = vld [vmem:[#allocation2 + $0x20] sm:$0xff] }
 0x511   : > { %4768 = vst [vmem:[#allocation2 + $0x39] sm:$0xff] %v4736_v50  ;;  %v4595_v18 = vadd.f32 %v11228_v23, %v14060_v16  ;;  %5894 = vmatmul.mubr.f32.gmra.mrb[102].mxu1 %v14640_v60 }
 0x512   : > { %v4374_v30 = vpop.f32.mrb[42].mxu1  ;;  %5898 = vmatprep.mubr.f32.mxu1 %v4735_v2 }
 0x513   : > { %v4737_v13 = vmax.f32 %v4595_v18, 0.0  ;;  %v11229_v52 = vadd.f32 %v14618_v33, %v4374_v30  ;;  %v4376_v8 = vpop.f32.mrb[43].mxu1 }
 0x514   : > { %v14645_v53 = vld [vmem:[#allocation2 + $0x30] sm:$0xff] }
 0x515   : > { %4769 = vst [vmem:[#allocation2 + $0x49] sm:$0xff] %v4737_v13  ;;  %v4600_v41 = vadd.f32 %v11229_v52, %v14055_v12  ;;  %5899 = vmatmul.mubr.f32.gmra.mrb[104].mxu1 %v14645_v53 }
 0x516   : > { %v4379_v34 = vpop.f32.mrb[44].mxu1  ;;  %5903 = vmatprep.mubr.f32.mxu1 %v4736_v50 }
 0x517   : > { %v4738_v51 = vmax.f32 %v4600_v41, 0.0  ;;  %v11230_v16 = vadd.f32 %v14618_v33, %v4379_v34  ;;  %v4381_v29 = vpop.f32.mrb[45].mxu1 }
 0x518   : > { %v14650_v43 = vld [vmem:[#allocation2 + $0x32] sm:$0xff]  ;;  %v14654_v1 = vld [vmem:[#allocation2 + $0x3a] sm:$0xff] }
 0x519   : > { %v14652_v45 = vld [vmem:[#allocation2 + $0x38] sm:$0xff]  ;;  %4770 = vst [vmem:[#allocation2 + $0x51] sm:$0xff] %v4738_v51  ;;  %v4605_v48 = vadd.f32 %v11230_v16, %v14079_v27  ;;  %10168 = vmatprep.mubr.f32.mxu0 %v14650_v43 }
 0x51a   : > { %5904 = vmatmul.mubr.f32.gmra.mrb[106].mxu1 %v14652_v45  ;;  %v4384_v12 = vpop.f32.mrb[46].mxu1  ;;  %10169 = vmatmul.mubr.f32.vlgmr.msra.gmra.mrb[96].mxu0 %v14654_v1 }
 0x51b   : > { %5908 = vmatprep.mubr.f32.mxu1 %v4737_v13  ;;  %v4739_v40 = vmax.f32 %v4605_v48, 0.0  ;;  %v11231_v42 = vadd.f32 %v14618_v33, %v4384_v12  ;;  %v4386_v3 = vpop.f32.mrb[47].mxu1 }
 0x51c   : > { %v14661_v4 = vld [vmem:[#allocation2 + $0x48] sm:$0xff] }
 0x51d   : > { %4771 = vst [vmem:[#allocation2 + $0x61] sm:$0xff] %v4739_v40  ;;  %v4610_v7 = vadd.f32 %v11231_v42, %v14077_v6 }
 0x51e   : > { %5909 = vmatmul.mubr.f32.gmra.mrb[108].mxu1 %v14661_v4  ;;  %v4389_v27 = vpop.f32.mrb[48].mxu1 }
 0x51f   : > { %5913 = vmatprep.mubr.f32.mxu1 %v4738_v51  ;;  %v4740_v14 = vmax.f32 %v4610_v7, 0.0  ;;  %v11232_v11 = vadd.f32 %v14618_v33, %v4389_v27  ;;  %v4391_v5 = vpop.f32.mrb[49].mxu1 }
 0x520   : > { %v14666_v31 = vld [vmem:[#allocation2 + $0x4a] sm:$0xff]  ;;  %v14670_v59 = vld [vmem:[#allocation2 + $0x52] sm:$0xff] }
 0x521   : > { %v14668_v63 = vld [vmem:[#allocation2 + $0x50] sm:$0xff]  ;;  %4772 = vst [vmem:[#allocation2 + $0x69] sm:$0xff] %v4740_v14  ;;  %v4615_v35 = vadd.f32 %v11232_v11, %v14101_v28  ;;  %10171 = vmatprep.mubr.f32.mxu0 %v14666_v31 }
 0x522   : > { %5914 = vmatmul.mubr.f32.gmra.mrb[110].mxu1 %v14668_v63  ;;  %v4394_v6 = vpop.f32.mrb[50].mxu1  ;;  %10172 = vmatmul.mubr.f32.gmra.mrb[98].mxu0 %v14670_v59 }
 0x523   : > { %5918 = vmatprep.mubr.f32.mxu1 %v4739_v40  ;;  %v4741_v58 = vmax.f32 %v4615_v35, 0.0  ;;  %v11233_v25 = vadd.f32 %v14618_v33, %v4394_v6  ;;  %v4396_v39 = vpop.f32.mrb[51].mxu1 }
 0x524   : > { %v14677_v54 = vld [vmem:[#allocation2 + $0x60] sm:$0xff] }
 0x525   : > { %4773 = vst [vmem:[#allocation2 + $0x79] sm:$0xff] %v4741_v58  ;;  %v4620_v2 = vadd.f32 %v11233_v25, %v14098_v44 }
 0x526   : > { %5919 = vmatmul.mubr.f32.gmra.mrb[112].mxu1 %v14677_v54  ;;  %v4399_v28 = vpop.f32.mrb[52].mxu1 }
 0x527   : > { %5923 = vmatprep.mubr.f32.mxu1 %v4740_v14  ;;  %v4742_v19 = vmax.f32 %v4620_v2, 0.0  ;;  %v11234_v0 = vadd.f32 %v14618_v33, %v4399_v28  ;;  %v4401_v55 = vpop.f32.mrb[53].mxu1 }
 0x528   : > { %v14682_v36 = vld [vmem:[#allocation2 + $0x62] sm:$0xff]  ;;  %v14686_v23 = vld [vmem:[#allocation2 + $0x6a] sm:$0xff] }
 0x529   : > { %v14684_v50 = vld [vmem:[#allocation2 + $0x68] sm:$0xff]  ;;  %4774 = vst [vmem:[#allocation2 + $0x81] sm:$0xff] %v4742_v19  ;;  %v4625_v32 = vadd.f32 %v11234_v0, %v14125_v62  ;;  %10174 = vmatprep.mubr.f32.mxu0 %v14682_v36 }
 0x52a   : > { %5924 = vmatmul.mubr.f32.gmra.mrb[114].mxu1 %v14684_v50  ;;  %v4404_v44 = vpop.f32.mrb[54].mxu1  ;;  %10175 = vmatmul.mubr.f32.gmra.mrb[100].mxu0 %v14686_v23 }
 0x52b   : > { %5928 = vmatprep.mubr.f32.mxu1 %v4741_v58  ;;  %v4743_v18 = vmax.f32 %v4625_v32, 0.0  ;;  %v11235_v30 = vadd.f32 %v14618_v33, %v4404_v44  ;;  %v4406_v13 = vpop.f32.mrb[55].mxu1 }
 0x52c   : > { %v14693_v52 = vld [vmem:[#allocation2 + $0x78] sm:$0xff] }
 0x52d   : > { %4775 = vst [vmem:[#allocation2 + $0x91] sm:$0xff] %v4743_v18  ;;  %v4630_v8 = vadd.f32 %v11235_v30, %v14122_v21 }
 0x52e   : > { %5929 = vmatmul.mubr.f32.gmra.mrb[116].mxu1 %v14693_v52  ;;  %v4409_v62 = vpop.f32.mrb[56].mxu1 }
 0x52f   : > { %5933 = vmatprep.mubr.f32.mxu1 %v4742_v19  ;;  %v4744_v41 = vmax.f32 %v4630_v8, 0.0  ;;  %v11236_v34 = vadd.f32 %v14618_v33, %v4409_v62  ;;  %v4411_v51 = vpop.f32.mrb[57].mxu1 }
 0x530   : > { %v14698_v16 = vld [vmem:[#allocation2 + $0x7a] sm:$0xff]  ;;  %v14702_v48 = vld [vmem:[#allocation2 + $0x82] sm:$0xff] }
 0x531   : > { %v14700_v29 = vld [vmem:[#allocation2 + $0x80] sm:$0xff]  ;;  %4776 = vst [vmem:[#allocation2 + $0x99] sm:$0xff] %v4744_v41  ;;  %v4635_v12 = vadd.f32 %v11236_v34, %v14149_v24  ;;  %10177 = vmatprep.mubr.f32.mxu0 %v14698_v16 }
 0x532   : > { %5934 = vmatmul.mubr.f32.gmra.mrb[118].mxu1 %v14700_v29  ;;  %v4414_v21 = vpop.f32.mrb[58].mxu1  ;;  %10178 = vmatmul.mubr.f32.gmra.mrb[102].mxu0 %v14702_v48 }
 0x533   : > { %5938 = vmatprep.mubr.f32.mxu1 %v4743_v18  ;;  %v4745_v40 = vmax.f32 %v4635_v12, 0.0  ;;  %v11237_v42 = vadd.f32 %v14618_v33, %v4414_v21  ;;  %v4416_v3 = vpop.f32.mrb[59].mxu1 }
 0x534   : > { %v14709_v7 = vld [vmem:[#allocation2 + $0x90] sm:$0xff] }
 0x535   : > { %4777 = vst [vmem:[#allocation2 + $0xa9] sm:$0xff] %v4745_v40  ;;  %v4640_v27 = vadd.f32 %v11237_v42, %v14146_v37 }
 0x536   : > { %5939 = vmatmul.mubr.f32.gmra.mrb[120].mxu1 %v14709_v7  ;;  %v4419_v24 = vpop.f32.mrb[60].mxu1 }
 0x537   : > { %5943 = vmatprep.mubr.f32.mxu1 %v4744_v41  ;;  %v4746_v14 = vmax.f32 %v4640_v27, 0.0  ;;  %v11238_v11 = vadd.f32 %v14618_v33, %v4419_v24  ;;  %v4421_v5 = vpop.f32.mrb[61].mxu1 }
 0x538   : > { %v14714_v35 = vld [vmem:[#allocation2 + $0x92] sm:$0xff]  ;;  %v14718_v58 = vld [vmem:[#allocation2 + $0x9a] sm:$0xff] }
 0x539   : > { %v14716_v6 = vld [vmem:[#allocation2 + $0x98] sm:$0xff]  ;;  %4778 = vst [vmem:[#allocation2 + $0xb1] sm:$0xff] %v4746_v14  ;;  %v4645_v25 = vadd.f32 %v11238_v11, %v14173_v15  ;;  %10180 = vmatprep.mubr.f32.mxu0 %v14714_v35 }
 0x53a   : > { %5944 = vmatmul.mubr.f32.gmra.mrb[122].mxu1 %v14716_v6  ;;  %v4424_v37 = vpop.f32.mrb[62].mxu1  ;;  %10181 = vmatmul.mubr.f32.gmra.mrb[104].mxu0 %v14718_v58 }
 0x53b   : > { %5948 = vmatprep.mubr.f32.mxu1 %v4745_v40  ;;  %v4747_v39 = vmax.f32 %v4645_v25, 0.0  ;;  %v11239_v2 = vadd.f32 %v14618_v33, %v4424_v37  ;;  %v4426_v28 = vpop.f32.mrb[63].mxu1 }
 0x53c   : > { %v14725_v19 = vld [vmem:[#allocation2 + $0xa8] sm:$0xff] }
 0x53d   : > { %4779 = vst [vmem:[#allocation2 + $0xc1] sm:$0xff] %v4747_v39  ;;  %v4650_v0 = vadd.f32 %v11239_v2, %v14170_v17 }
 0x53e   : > { %5949 = vmatmul.mubr.f32.gmra.mrb[124].mxu1 %v14725_v19  ;;  %v4429_v15 = vpop.f32.mrb[64].mxu1 }
 0x53f   : > { %5953 = vmatprep.mubr.f32.mxu1 %v4746_v14  ;;  %v4748_v55 = vmax.f32 %v4650_v0, 0.0  ;;  %v11240_v32 = vadd.f32 %v14618_v33, %v4429_v15  ;;  %v4431_v44 = vpop.f32.mrb[65].mxu1 }
 0x540   : > { %v14730_v18 = vld [vmem:[#allocation2 + $0xaa] sm:$0xff]  ;;  %v14734_v13 = vld [vmem:[#allocation2 + $0xb2] sm:$0xff] }
 0x541   : > { %v14732_v30 = vld [vmem:[#allocation2 + $0xb0] sm:$0xff]  ;;  %4780 = vst [vmem:[#allocation2 + $0xc9] sm:$0xff] %v4748_v55  ;;  %v4655_v8 = vadd.f32 %v11240_v32, %v14197_v49  ;;  %10183 = vmatprep.mubr.f32.mxu0 %v14730_v18 }
 0x542   : > { %5954 = vmatmul.mubr.f32.gmra.mrb[126].mxu1 %v14732_v30  ;;  %v4434_v17 = vpop.f32.mrb[66].mxu1  ;;  %10184 = vmatmul.mubr.f32.gmra.mrb[106].mxu0 %v14734_v13 }
 0x543   : > { %5958 = vmatprep.mubr.f32.mxu1 %v4747_v39  ;;  %v4749_v62 = vmax.f32 %v4655_v8, 0.0  ;;  %v11241_v41 = vadd.f32 %v14618_v33, %v4434_v17  ;;  %v4436_v34 = vpop.f32.mrb[67].mxu1 }
 0x544   : > { %v14741_v51 = vld [vmem:[#allocation2 + $0xc0] sm:$0xff] }
 0x545   : > { %4781 = vst [vmem:[#allocation2 + $0xd9] sm:$0xff] %v4749_v62  ;;  %v4660_v12 = vadd.f32 %v11241_v41, %v14194_v10 }
 0x546   : > { %5959 = vmatmul.mubr.f32.gmra.mrb[128].mxu1 %v14741_v51  ;;  %v4439_v49 = vpop.f32.mrb[68].mxu1 }
 0x547   : > { %5963 = vmatprep.mubr.f32.mxu1 %v4748_v55  ;;  %v4750_v21 = vmax.f32 %v4660_v12, 0.0  ;;  %v11242_v40 = vadd.f32 %v14618_v33, %v4439_v49  ;;  %v4441_v42 = vpop.f32.mrb[69].mxu1 }
 0x548   : > { %v14746_v3 = vld [vmem:[#allocation2 + $0xc2] sm:$0xff]  ;;  %v14750_v24 = vld [vmem:[#allocation2 + $0xca] sm:$0xff] }
 0x549   : > { %v14748_v27 = vld [vmem:[#allocation2 + $0xc8] sm:$0xff]  ;;  %4782 = vst [vmem:[#allocation2 + $0xe1] sm:$0xff] %v4750_v21  ;;  %v4665_v14 = vadd.f32 %v11242_v40, %v14221_v47  ;;  %10186 = vmatprep.mubr.f32.mxu0 %v14746_v3 }
 0x54a   : > { %5964 = vmatmul.mubr.f32.gmra.mrb[130].mxu1 %v14748_v27  ;;  %v4444_v10 = vpop.f32.mrb[70].mxu1  ;;  %10187 = vmatmul.mubr.f32.gmra.mrb[108].mxu0 %v14750_v24 }
 0x54b   : > { %5968 = vmatprep.mubr.f32.mxu1 %v4749_v62  ;;  %v4751_v11 = vmax.f32 %v4665_v14, 0.0  ;;  %v11243_v5 = vadd.f32 %v14618_v33, %v4444_v10  ;;  %v4446_v25 = vpop.f32.mrb[71].mxu1 }
 0x54c   : > { %v14757_v37 = vld [vmem:[#allocation2 + $0xd8] sm:$0xff] }
 0x54d   : > { %4783 = vst [vmem:[#allocation2 + $0xf1] sm:$0xff] %v4751_v11  ;;  %v4670_v39 = vadd.f32 %v11243_v5, %v14218_v46 }
 0x54e   : > { %5969 = vmatmul.mubr.f32.gmra.mrb[132].mxu1 %v14757_v37  ;;  %v4449_v47 = vpop.f32.mrb[72].mxu1 }
 0x54f   : > { %5973 = vmatprep.mubr.f32.mxu1 %v4750_v21  ;;  %v4752_v2 = vmax.f32 %v4670_v39, 0.0  ;;  %v11244_v28 = vadd.f32 %v14618_v33, %v4449_v47  ;;  %v4451_v0 = vpop.f32.mrb[73].mxu1 }
 0x550   : > { %v14762_v15 = vld [vmem:[#allocation2 + $0xda] sm:$0xff]  ;;  %v14766_v32 = vld [vmem:[#allocation2 + $0xe2] sm:$0xff] }
 0x551   : > { %v14764_v55 = vld [vmem:[#allocation2 + $0xe0] sm:$0xff]  ;;  %4784 = vst [vmem:[#allocation2 + $0xf9] sm:$0xff] %v4752_v2  ;;  %v4675_v44 = vadd.f32 %v11244_v28, %v14245_v20  ;;  %10189 = vmatprep.mubr.f32.mxu0 %v14762_v15 }
 0x552   : > { %5974 = vmatmul.mubr.f32.gmra.mrb[134].mxu1 %v14764_v55  ;;  %v4454_v46 = vpop.f32.mrb[74].mxu1  ;;  %10190 = vmatmul.mubr.f32.gmra.mrb[110].mxu0 %v14766_v32 }
 0x553   : > { %5978 = vmatprep.mubr.f32.mxu1 %v4751_v11  ;;  %v4753_v8 = vmax.f32 %v4675_v44, 0.0  ;;  %v11245_v17 = vadd.f32 %v14618_v33, %v4454_v46  ;;  %v4456_v62 = vpop.f32.mrb[75].mxu1 }
 0x554   : > { %v14773_v41 = vld [vmem:[#allocation2 + $0xf0] sm:$0xff] }
 0x555   : > { %4785 = vst [vmem:[#allocation2 + $0x109] sm:$0xff] %v4753_v8  ;;  %v4680_v34 = vadd.f32 %v11245_v17, %v14242_v57  ;;  %v16636_v17 = vld [vmem:[#allocation8_spill] sm:$0xff] }
 0x556   : > { %5979 = vmatmul.mubr.f32.gmra.mrb[136].mxu1 %v14773_v41  ;;  %v4459_v20 = vpop.f32.mrb[76].mxu1 }
 0x557   : > { %5983 = vmatprep.mubr.f32.mxu1 %v4752_v2  ;;  %v4754_v12 = vmax.f32 %v4680_v34, 0.0  ;;  %v11246_v49 = vadd.f32 %v14618_v33, %v4459_v20  ;;  %v4461_v21 = vpop.f32.mrb[77].mxu1 }
 0x558   : > { %v14778_v40 = vld [vmem:[#allocation2 + $0xf2] sm:$0xff]  ;;  %v14782_v14 = vld [vmem:[#allocation2 + $0xfa] sm:$0xff] }
 0x559   : > { %v14780_v42 = vld [vmem:[#allocation2 + $0xf8] sm:$0xff]  ;;  %4786 = vst [vmem:[#allocation2 + $0x111] sm:$0xff] %v4754_v12  ;;  %v4685_v10 = vadd.f32 %v11246_v49, %v14257_v22  ;;  %10192 = vmatprep.mubr.f32.mxu0 %v14778_v40  ;;  %v16637_v21 = vld [vmem:[#allocation5_spill] sm:$0xff] }
 0x55a   : > { %5984 = vmatmul.mubr.f32.gmra.mrb[138].mxu1 %v14780_v42  ;;  %v4464_v57 = vpop.f32.mrb[78].mxu1  ;;  %10193 = vmatmul.mubr.f32.gmra.mrb[112].mxu0 %v14782_v14 }
 0x55b   : > { %5988 = vmatprep.mubr.f32.mxu1 %v4753_v8  ;;  %v4755_v11 = vmax.f32 %v4685_v10, 0.0  ;;  %v11247_v5 = vadd.f32 %v14618_v33, %v4464_v57  ;;  %v4466_v25 = vpop.f32.mrb[79].mxu1 }
 0x55c   : > { %v14789_v39 = vld [vmem:[#allocation2 + $0x108] sm:$0xff] }
 0x55d   : > { %4787 = vst [vmem:[#allocation2 + $0x121] sm:$0xff] %v4755_v11  ;;  %v4690_v47 = vadd.f32 %v11247_v5, %v14254_v38 }
 0x55e   : > { %5989 = vmatmul.mubr.f32.gmra.mrb[140].mxu1 %v14789_v39  ;;  %v4469_v22 = vpop.f32.mrb[80].mxu1 }
 0x55f   : > { %5993 = vmatprep.mubr.f32.mxu1 %v4754_v12  ;;  %v4756_v2 = vmax.f32 %v4690_v47, 0.0  ;;  %v11248_v28 = vadd.f32 %v14618_v33, %v4469_v22  ;;  %v4471_v0 = vpop.f32.mrb[81].mxu1 }
 0x560   : > { %v14794_v44 = vld [vmem:[#allocation2 + $0x10a] sm:$0xff]  ;;  %v14798_v8 = vld [vmem:[#allocation2 + $0x112] sm:$0xff] }
 0x561   : > { %v14796_v46 = vld [vmem:[#allocation2 + $0x110] sm:$0xff]  ;;  %4788 = vst [vmem:[#allocation2 + $0x129] sm:$0xff] %v4756_v2  ;;  %v4695_v62 = vadd.f32 %v11248_v28, %v16636_v17  ;;  %10195 = vmatprep.mubr.f32.mxu0 %v14794_v44  ;;  %v16640_v0 = vld [vmem:[#allocation14_spill] sm:$0xff] }
 0x562   : > { %5994 = vmatmul.mubr.f32.gmra.mrb[142].mxu1 %v14796_v46  ;;  %v4474_v38 = vpop.f32.mrb[82].mxu1  ;;  %10196 = vmatmul.mubr.f32.gmra.mrb[114].mxu0 %v14798_v8 }
 0x563   : > { %5998 = vmatprep.mubr.f32.mxu1 %v4755_v11  ;;  %v4757_v34 = vmax.f32 %v4695_v62, 0.0  ;;  %v11249_v20 = vadd.f32 %v14618_v33, %v4474_v38  ;;  %v4476_v12 = vpop.f32.mrb[83].mxu1 }
 0x564   : > { %v14805_v49 = vld [vmem:[#allocation2 + $0x120] sm:$0xff] }
 0x565   : > { %4789 = vst [vmem:[#allocation2 + $0x139] sm:$0xff] %v4757_v34  ;;  %v4700_v10 = vadd.f32 %v11249_v20, %v16637_v21  ;;  %v16641_v21 = vld [vmem:[#allocation13_spill] sm:$0xff] }
 0x566   : > { %5999 = vmatmul.mubr.f32.gmra.mrb[144].mxu1 %v14805_v49  ;;  %v4479_v57 = vpop.f32.mrb[84].mxu1 }
 0x567   : > { %6003 = vmatprep.mubr.f32.mxu1 %v4756_v2  ;;  %v4758_v5 = vmax.f32 %v4700_v10, 0.0  ;;  %v11250_v25 = vadd.f32 %v14618_v33, %v4479_v57  ;;  %v4481_v47 = vpop.f32.mrb[85].mxu1 }
 0x568   : > { %v14810_v22 = vld [vmem:[#allocation2 + $0x122] sm:$0xff]  ;;  %v14814_v28 = vld [vmem:[#allocation2 + $0x12a] sm:$0xff] }
 0x569   : > { %16638 = vst [vmem:[#allocation6_spill] sm:$0xff] %v14810_v22  ;;  %v14812_v11 = vld [vmem:[#allocation2 + $0x128] sm:$0xff]  ;;  %16639 = vst [vmem:[#allocation7_spill] sm:$0xff] %v14814_v28  ;;  %v4705_v17 = vadd.f32 %v11250_v25, %v16640_v0  ;;  %10198 = vmatprep.mubr.f32.mxu0 %v14810_v22 }
 0x56a   : > { %4790 = vst [vmem:[#allocation2 + $0x141] sm:$0xff] %v4758_v5  ;;  %6004 = vmatmul.mubr.f32.gmra.mrb[146].mxu1 %v14812_v11  ;;  %v4484_v62 = vpop.f32.mrb[86].mxu1  ;;  %10199 = vmatmul.mubr.f32.gmra.mrb[116].mxu0 %v14814_v28 }
 0x56b   : > { %6008 = vmatprep.mubr.f32.mxu1 %v4757_v34  ;;  %v4759_v2 = vmax.f32 %v4705_v17, 0.0  ;;  %v11251_v38 = vadd.f32 %v14618_v33, %v4484_v62  ;;  %v4486_v20 = vpop.f32.mrb[87].mxu1  ;;  %v16644_v62 = vld [vmem:[#allocation16_spill] sm:$0xff] }
 0x56c   : > { %v14821_v12 = vld [vmem:[#allocation2 + $0x138] sm:$0xff] }
 0x56d   : > { %4791 = vst [vmem:[#allocation2 + $0x151] sm:$0xff] %v4759_v2  ;;  %v4710_v10 = vadd.f32 %v11251_v38, %v16641_v21 }
 0x56e   : > { %6009 = vmatmul.mubr.f32.gmra.mrb[148].mxu1 %v14821_v12  ;;  %v4489_v57 = vpop.f32.mrb[88].mxu1 }
 0x56f   : > { %6013 = vmatprep.mubr.f32.mxu1 %v4758_v5  ;;  %v14825_v25 = vmax.f32 %v4710_v10, 0.0  ;;  %v11252_v47 = vadd.f32 %v14618_v33, %v4489_v57  ;;  %v4491_v0 = vpop.f32.mrb[89].mxu1 }
 0x570   : > { %v16646_v0 = vld [vmem:[#allocation15_spill] sm:$0xff] }
 0x571   : > { %16642 = vst [vmem:[#allocation9_spill] sm:$0xff] %v14825_v25  ;;  %v14828_v28 = vld [vmem:[#allocation2 + $0x13a] sm:$0xff]  ;;  %v14832_v17 = vld [vmem:[#allocation2 + $0x142] sm:$0xff]  ;;  %4792 = vst [vmem:[#allocation2 + $0x159] sm:$0xff] %v14825_v25  ;;  %v4715_v20 = vadd.f32 %v11252_v47, %v16644_v62 }
 0x572   : > { %v14830_v34 = vld [vmem:[#allocation2 + $0x140] sm:$0xff]  ;;  %16643 = vst [vmem:[#allocation10_spill] sm:$0xff] %v14832_v17  ;;  %10201 = vmatprep.mubr.f32.mxu0 %v14828_v28  ;;  %v4494_v5 = vpop.f32.mrb[90].mxu1 }
 0x573   : > { %6014 = vmatmul.mubr.f32.gmra.mrb[150].mxu1 %v14830_v34  ;;  %10202 = vmatmul.mubr.f32.gmra.mrb[118].mxu0 %v14832_v17  ;;  %v14839_v38 = vmax.f32 %v4715_v20, 0.0  ;;  %v11253_v21 = vadd.f32 %v14618_v33, %v4494_v5  ;;  %v4496_v10 = vpop.f32.mrb[91].mxu1 }
 0x574   : > { %6018 = vmatprep.mubr.f32.mxu1 %v4759_v2  ;;  %v14842_v57 = vld [vmem:[#allocation2 + $0x150] sm:$0xff] }
 0x575   : > { %16645 = vst [vmem:[#allocation11_spill] sm:$0xff] %v14839_v38  ;;  %4793 = vst [vmem:[#allocation2 + $0x169] sm:$0xff] %v14839_v38  ;;  %v4720_v22 = vadd.f32 %v11253_v21, %v16646_v0 }
 0x576   : > { %v4499_v47 = vpop.f32.mrb[92].mxu1 }
 0x577   : > { %6019 = vmatmul.mubr.f32.gmra.mrb[152].mxu1 %v14842_v57  ;;  %v14848_v62 = vmax.f32 %v4720_v22, 0.0  ;;  %v11254_v2 = vadd.f32 %v14618_v33, %v4499_v47  ;;  %v4501_v20 = vpop.f32.mrb[93].mxu1 }
 0x578   : > { %6023 = vmatprep.mubr.f32.mxu1 %v14825_v25  ;;  %v14851_v17 = vld [vmem:[#allocation2 + $0x152] sm:$0xff]  ;;  %v14855_v10 = vld [vmem:[#allocation2 + $0x15a] sm:$0xff] }
 0x579   : > { %16647 = vst [vmem:[#allocation12_spill] sm:$0xff] %v14848_v62  ;;  %v14853_v5 = vld [vmem:[#allocation2 + $0x158] sm:$0xff]  ;;  %4794 = vst [vmem:[#allocation2 + $0x171] sm:$0xff] %v14848_v62  ;;  %v14859_v21 = vadd.f32 %v11254_v2, %v14613_v56  ;;  %10204 = vmatprep.mubr.f32.mxu0 %v14851_v17 }
 0x57a   : > { %v4504_v22 = vpop.f32.mrb[94].mxu1  ;;  %10205 = vmatmul.mubr.f32.gmra.mrb[120].mxu0 %v14855_v10 }
 0x57b   : > { %16648 = vst [vmem:[#allocation8_spill] sm:$0xff] %v14859_v21  ;;  %6024 = vmatmul.mubr.f32.gmra.mrb[154].mxu1 %v14853_v5  ;;  %v16586_v0 = vmax.f32 %v14859_v21, 0.0  ;;  %v11255_v47 = vadd.f32 %v14618_v33, %v4504_v22  ;;  %v4506_v20 = vpop.f32.mrb[95].mxu1  ;;  %v9552_v33 = vld [vmem:[%s16556_s1 + $0xb08] sm:$0xff]  ;;  %v9553_v21 = vld [vmem:[%s16556_s1 + $0xb10] sm:$0xff] }
 0x57c   : > { %6028 = vmatprep.mubr.f32.mxu1 %v14839_v38  ;;  %v14867_v25 = vld [vmem:[#allocation2 + $0x168] sm:$0xff]  ;;  %v9551_v38 = vld [vmem:[%s16556_s1 + $0xb00] sm:$0xff] }
 0x57d   : > { %4795 = vst [vmem:[#allocation2 + $0x181] sm:$0xff] %v16586_v0  ;;  %v14872_v56 = vadd.f32 %v11255_v47, %v14605_v26  ;;  %v4925_v47 = vld [vmem:[#allocation2 + $0x2] sm:$0xff]  ;;  %v10841_v0 = vpack.c.bf16 %v9552_v33, %v9551_v38 }
 0x57f   : > { %16649 = vst [vmem:[#allocation5_spill] sm:$0xff] %v14872_v56  ;;  %6029 = vmatmul.mubr.f32.gmra.mrb[156].mxu1 %v14867_v25  ;;  %v16589_v2 = vmax.f32 %v14872_v56, 0.0 }
 0x580   : > { %6033 = vmatprep.mubr.f32.mxu1 %v14848_v62  ;;  %v14883_v22 = vld [vmem:[#allocation2 + $0x16a] sm:$0xff]  ;;  %v14887_v26 = vld [vmem:[#allocation2 + $0x172] sm:$0xff] }
 0x581   : > { %v14885_v20 = vld [vmem:[#allocation2 + $0x170] sm:$0xff]  ;;  %16650 = vst [vmem:[#allocation14_spill] sm:$0xff] %v14887_v26  ;;  %4796 = vst [vmem:[#allocation2 + $0x189] sm:$0xff] %v16589_v2  ;;  %10207 = vmatprep.mubr.f32.mxu0 %v14883_v22  ;;  %v9554_v62 = vld [vmem:[%s16556_s1 + $0xb18] sm:$0xff] }
 0x582   : > { %10208 = vmatmul.mubr.f32.gmra.mrb[122].mxu0 %v14887_v26  ;;  %v4926_v2 = vld [vmem:[#allocation2 + $0xa] sm:$0xff]  ;;  %v10844_v56 = vpack.c.bf16 %v9554_v62, %v9553_v21  ;;  %v14916_v62 = vld [vmem:[#allocation2 + $0x1a] sm:$0xff] }
 0x583   : > { %6034 = vmatmul.mubr.f32.gmra.mrb[158].mxu1 %v14885_v20  ;;  %v9556_v26 = vld [vmem:[%s16556_s1 + $0xb28] sm:$0xff]  ;;  %v9557_v21 = vld [vmem:[%s16556_s1 + $0xb30] sm:$0xff] }
 0x584   : > { %6103 = vmatprep.mubr.f32.mxu1 %v14635_v61  ;;  %v9555_v61 = vld [vmem:[%s16556_s1 + $0xb20] sm:$0xff] }
 0x587   : > { %6104 = vmatmul.mubr.f32.vlgmr.msra.gmra.mrb[96].mxu1 %v4925_v47  ;;  %v9561_v47 = vld [vmem:[%s16556_s1 + $0xb50] sm:$0xff] }
 0x588   : > { %6108 = vmatprep.mubr.f32.mxu1 %v14640_v60  ;;  %10842 = vmatpush1.bf16.msra.mxu1 %v10841_v0  ;;  %v14906_v38 = vld [vmem:[#allocation2 + $0x182] sm:$0xff]  ;;  %v14908_v33 = vld [vmem:[#allocation2 + $0x18a] sm:$0xff]  ;;  %v10847_v60 = vpack.c.bf16 %v9556_v26, %v9555_v61  ;;  %v9558_v0 = vld [vmem:[%s16556_s1 + $0xb38] sm:$0xff] }
 0x589   : > { %10843 = vmatprep.subr.bf16.mxu1 %v16617_v9  ;;  %10210 = vmatprep.mubr.f32.mxu0 %v14906_v38  ;;  %v9560_v26 = vld [vmem:[%s16556_s1 + $0xb48] sm:$0xff]  ;;  %v9562_v61 = vld [vmem:[%s16556_s1 + $0xb58] sm:$0xff] }
 0x58a   : > { %10211 = vmatmul.mubr.f32.gmra.mrb[124].mxu0 %v14908_v33 }
 0x58b   : > { %6109 = vmatmul.mubr.f32.gmra.mrb[98].mxu1 %v4926_v2  ;;  %v9559_v2 = vld [vmem:[%s16556_s1 + $0xb40] sm:$0xff] }
 0x58c   : > { %6113 = vmatprep.mubr.f32.mxu1 %v14645_v53  ;;  %10845 = vmatpush1.bf16.msra.mxu1 %v10844_v56  ;;  %v10850_v53 = vpack.c.bf16 %v9558_v0, %v9557_v21  ;;  %v14927_v56 = vld [vmem:[#allocation2 + $0x22] sm:$0xff]  ;;  %v9566_v0 = vld [vmem:[%s16556_s1 + $0xb78] sm:$0xff] }
 0x58d   : > { %10846 = vmatprep.subr.bf16.mxu1 %v16617_v9  ;;  %v9564_v21 = vld [vmem:[%s16556_s1 + $0xb68] sm:$0xff] }
 0x58f   : > { %6114 = vmatmul.mubr.f32.gmra.mrb[100].mxu1 %v14916_v62 }
 0x590   : > { %6118 = vmatprep.mubr.f32.mxu1 %v14652_v45  ;;  %10848 = vmatpush1.bf16.msra.mxu1 %v10847_v60  ;;  %v10853_v45 = vpack.c.bf16 %v9560_v26, %v9559_v2  ;;  %v10856_v60 = vpack.c.bf16 %v9562_v61, %v9561_v47  ;;  %v9570_v2 = vld [vmem:[%s16556_s1 + $0xb98] sm:$0xff]  ;;  %v9572_v26 = vld [vmem:[%s16556_s1 + $0xba8] sm:$0xff] }
 0x591   : > { %10849 = vmatprep.subr.bf16.mxu1 %v16617_v9  ;;  %v9576_v47 = vld [vmem:[%s16556_s1 + $0xbc8] sm:$0xff]  ;;  %v9578_v61 = vld [vmem:[%s16556_s1 + $0xbd8] sm:$0xff] }
 0x593   : > { %6119 = vmatmul.mubr.f32.gmra.mrb[102].mxu1 %v14927_v56 }
 0x594   : > { %6123 = vmatprep.mubr.f32.mxu1 %v14661_v4  ;;  %10851 = vmatpush1.bf16.msra.mxu1 %v10850_v53  ;;  %v9563_v4 = vld [vmem:[%s16556_s1 + $0xb60] sm:$0xff]  ;;  %v9568_v53 = vld [vmem:[%s16556_s1 + $0xb88] sm:$0xff] }
 0x595   : > { %10852 = vmatprep.subr.bf16.mxu1 %v16617_v9 }
 0x597   : > { %6124 = vmatmul.mubr.f32.gmra.mrb[104].mxu1 %v14650_v43  ;;  %v10859_v43 = vpack.c.bf16 %v9564_v21, %v9563_v4  ;;  %v9582_v4 = vld [vmem:[%s16556_s1 + $0xbf8] sm:$0xff]  ;;  %v9588_v21 = vld [vmem:[%s16556_s1 + $0xc28] sm:$0xff] }
 0x598   : > { %6128 = vmatprep.mubr.f32.mxu1 %v14668_v63  ;;  %10854 = vmatpush1.bf16.msra.mxu1 %v10853_v45  ;;  %v9565_v63 = vld [vmem:[%s16556_s1 + $0xb70] sm:$0xff]  ;;  %v9574_v45 = vld [vmem:[%s16556_s1 + $0xbb8] sm:$0xff] }
 0x599   : > { %10855 = vmatprep.subr.bf16.mxu1 %v16617_v9 }
 0x59b   : > { %6129 = vmatmul.mubr.f32.gmra.mrb[106].mxu1 %v14654_v1  ;;  %v10862_v1 = vpack.c.bf16 %v9566_v0, %v9565_v63  ;;  %v5119_v63 = vld [vmem:[#allocation2 + $0x32] sm:$0xff] }
 0x59c   : > { %6133 = vmatprep.mubr.f32.mxu1 %v14677_v54  ;;  %10857 = vmatpush1.bf16.msra.mxu1 %v10856_v60  ;;  %v9567_v54 = vld [vmem:[%s16556_s1 + $0xb80] sm:$0xff]  ;;  %v9580_v60 = vld [vmem:[%s16556_s1 + $0xbe8] sm:$0xff] }
 0x59d   : > { %10858 = vmatprep.subr.bf16.mxu1 %v16617_v9 }
 0x59f   : > { %6134 = vmatmul.mubr.f32.gmra.mrb[108].mxu1 %v14666_v31  ;;  %v10865_v31 = vpack.c.bf16 %v9568_v53, %v9567_v54  ;;  %v15120_v54 = vld [vmem:[#allocation2 + $0x31] sm:$0xff] }
 0x5a0   : > { %6138 = vmatprep.mubr.f32.mxu1 %v14684_v50  ;;  %10860 = vmatpush1.bf16.msra.mxu1 %v10859_v43  ;;  %v9569_v50 = vld [vmem:[%s16556_s1 + $0xb90] sm:$0xff]  ;;  %v5054_v43 = vld [vmem:[#allocation2 + $0x21] sm:$0xff] }
 0x5a1   : > { %10861 = vmatprep.subr.bf16.mxu1 %v16617_v9 }
 0x5a3   : > { %6139 = vmatmul.mubr.f32.gmra.mrb[110].mxu1 %v14670_v59  ;;  %v10868_v59 = vpack.c.bf16 %v9570_v2, %v9569_v50 }
 0x5a4   : > { %6143 = vmatprep.mubr.f32.mxu1 %v14693_v52  ;;  %10863 = vmatpush1.bf16.msra.mxu1 %v10862_v1  ;;  %v9571_v52 = vld [vmem:[%s16556_s1 + $0xba0] sm:$0xff]  ;;  %v9590_v1 = vld [vmem:[%s16556_s1 + $0xc38] sm:$0xff] }
 0x5a5   : > { %10864 = vmatprep.subr.bf16.mxu1 %v16617_v9 }
 0x5a7   : > { %6144 = vmatmul.mubr.f32.gmra.mrb[112].mxu1 %v14682_v36  ;;  %v10871_v36 = vpack.c.bf16 %v9572_v26, %v9571_v52  ;;  %v9592_v52 = vld [vmem:[%s16556_s1 + $0xc48] sm:$0xff]  ;;  %v15134_v26 = vld [vmem:[#allocation2 + $0x39] sm:$0xff] }
 0x5a8   : > { %6148 = vmatprep.mubr.f32.mxu1 %v14700_v29  ;;  %10866 = vmatpush1.bf16.msra.mxu1 %v10865_v31  ;;  %v9573_v29 = vld [vmem:[%s16556_s1 + $0xbb0] sm:$0xff]  ;;  %v5120_v31 = vld [vmem:[#allocation2 + $0x3a] sm:$0xff] }
 0x5a9   : > { %10867 = vmatprep.subr.bf16.mxu1 %v16617_v9 }
 0x5ab   : > { %6149 = vmatmul.mubr.f32.gmra.mrb[114].mxu1 %v14686_v23  ;;  %v10874_v23 = vpack.c.bf16 %v9574_v45, %v9573_v29  ;;  %v9593_v45 = vld [vmem:[%s16556_s1 + $0xc50] sm:$0xff] }
 0x5ac   : > { %6153 = vmatprep.mubr.f32.mxu1 %v14709_v7  ;;  %10869 = vmatpush1.bf16.msra.mxu1 %v10868_v59  ;;  %v9575_v7 = vld [vmem:[%s16556_s1 + $0xbc0] sm:$0xff] }
 0x5ad   : > { %10870 = vmatprep.subr.bf16.mxu1 %v16617_v9  ;;  %v9591_v59 = vld [vmem:[%s16556_s1 + $0xc40] sm:$0xff] }
 0x5ae   : > { %v10901_v29 = vpack.c.bf16 %v9592_v52, %v9591_v59  ;;  %v9603_v52 = vld [vmem:[%s16556_s1 + $0xca0] sm:$0xff] }
 0x5af   : > { %6154 = vmatmul.mubr.f32.gmra.mrb[116].mxu1 %v14698_v16  ;;  %v10877_v16 = vpack.c.bf16 %v9576_v47, %v9575_v7  ;;  %v15144_v7 = vld [vmem:[#allocation2 + $0x49] sm:$0xff] }
 0x5b0   : > { %6158 = vmatprep.mubr.f32.mxu1 %v14716_v6  ;;  %10872 = vmatpush1.bf16.msra.mxu1 %v10871_v36  ;;  %v9577_v6 = vld [vmem:[%s16556_s1 + $0xbd0] sm:$0xff] }
 0x5b1   : > { %10873 = vmatprep.subr.bf16.mxu1 %v16617_v9  ;;  %v5121_v36 = vld [vmem:[#allocation2 + $0x4a] sm:$0xff] }
 0x5b3   : > { %6159 = vmatmul.mubr.f32.gmra.mrb[118].mxu1 %v14702_v48  ;;  %v10880_v48 = vpack.c.bf16 %v9578_v61, %v9577_v6 }
 0x5b4   : > { %6163 = vmatprep.mubr.f32.mxu1 %v14725_v19  ;;  %10875 = vmatpush1.bf16.msra.mxu1 %v10874_v23  ;;  %v9579_v19 = vld [vmem:[%s16556_s1 + $0xbe0] sm:$0xff]  ;;  %v9594_v23 = vld [vmem:[%s16556_s1 + $0xc58] sm:$0xff] }
 0x5b5   : > { %10876 = vmatprep.subr.bf16.mxu1 %v16617_v9  ;;  %v10904_v61 = vpack.c.bf16 %v9594_v23, %v9593_v45  ;;  %v5127_v45 = vld [vmem:[#allocation2 + $0x92] sm:$0xff] }
 0x5b7   : > { %6164 = vmatmul.mubr.f32.gmra.mrb[120].mxu1 %v14714_v35  ;;  %v10883_v35 = vpack.c.bf16 %v9580_v60, %v9579_v19  ;;  %v9596_v19 = vld [vmem:[%s16556_s1 + $0xc68] sm:$0xff]  ;;  %v15158_v60 = vld [vmem:[#allocation2 + $0x51] sm:$0xff] }
 0x5b8   : > { %6168 = vmatprep.mubr.f32.mxu1 %v14732_v30  ;;  %10878 = vmatpush1.bf16.msra.mxu1 %v10877_v16  ;;  %v9581_v30 = vld [vmem:[%s16556_s1 + $0xbf0] sm:$0xff] }
 0x5b9   : > { %10879 = vmatprep.subr.bf16.mxu1 %v16617_v9  ;;  %v5122_v16 = vld [vmem:[#allocation2 + $0x52] sm:$0xff] }
 0x5bb   : > { %6169 = vmatmul.mubr.f32.gmra.mrb[122].mxu1 %v14718_v58  ;;  %v10886_v58 = vpack.c.bf16 %v9582_v4, %v9581_v30  ;;  %v9597_v4 = vld [vmem:[%s16556_s1 + $0xc70] sm:$0xff] }
 0x5bc   : > { %6173 = vmatprep.mubr.f32.mxu1 %v14741_v51  ;;  %10881 = vmatpush1.bf16.msra.mxu1 %v10880_v48  ;;  %v9595_v48 = vld [vmem:[%s16556_s1 + $0xc60] sm:$0xff] }
 0x5bd   : > { %10882 = vmatprep.subr.bf16.mxu1 %v16617_v9  ;;  %v10907_v30 = vpack.c.bf16 %v9596_v19, %v9595_v48  ;;  %v15216_v48 = vld [vmem:[#allocation2 + $0x91] sm:$0xff] }
 0x5bf   : > { %6174 = vmatmul.mubr.f32.gmra.mrb[124].mxu1 %v14730_v18  ;;  %v16651_v18 = vld [vmem:[#allocation6_spill] sm:$0xff] }
 0x5c0   : > { %6178 = vmatprep.mubr.f32.mxu1 %v14748_v27  ;;  %10884 = vmatpush1.bf16.msra.mxu1 %v10883_v35  ;;  %v16653_v27 = vld [vmem:[#allocation10_spill] sm:$0xff] }
 0x5c1   : > { %10885 = vmatprep.subr.bf16.mxu1 %v16617_v9  ;;  %v5123_v35 = vld [vmem:[#allocation2 + $0x62] sm:$0xff] }
 0x5c3   : > { %6179 = vmatmul.mubr.f32.gmra.mrb[126].mxu1 %v14734_v13  ;;  %v16652_v13 = vld [vmem:[#allocation7_spill] sm:$0xff] }
 0x5c4   : > { %6183 = vmatprep.mubr.f32.mxu1 %v14757_v37  ;;  %10887 = vmatpush1.bf16.msra.mxu1 %v10886_v58  ;;  %v9598_v58 = vld [vmem:[%s16556_s1 + $0xc78] sm:$0xff] }
 0x5c5   : > { %10888 = vmatprep.subr.bf16.mxu1 %v16617_v9 }
 0x5c7   : > { %6184 = vmatmul.mubr.f32.gmra.mrb[128].mxu1 %v14746_v3 }
 0x5c8   : > { %6188 = vmatprep.mubr.f32.mxu1 %v14764_v55 }
 0x5cb   : > { %6189 = vmatmul.mubr.f32.gmra.mrb[130].mxu1 %v14750_v24 }
 0x5cc   : > { %6193 = vmatprep.mubr.f32.mxu1 %v14773_v41  ;;  %v15082_v41 = vld [vmem:[#allocation2 + $0x188] sm:$0xff] }
 0x5cf   : > { %6194 = vmatmul.mubr.f32.gmra.mrb[132].mxu1 %v14762_v15  ;;  %v15076_v15 = vld [vmem:[#allocation2 + $0x180] sm:$0xff] }
 0x5d0   : > { %6198 = vmatprep.mubr.f32.mxu1 %v14780_v42 }
 0x5d3   : > { %6199 = vmatmul.mubr.f32.gmra.mrb[134].mxu1 %v14766_v32 }
 0x5d4   : > { %6203 = vmatprep.mubr.f32.mxu1 %v14789_v39  ;;  %v9583_v39 = vld [vmem:[%s16556_s1 + $0xc00] sm:$0xff] }
 0x5d7   : > { %6204 = vmatmul.mubr.f32.gmra.mrb[136].mxu1 %v14778_v40 }
 0x5d8   : > { %6208 = vmatprep.mubr.f32.mxu1 %v14796_v46  ;;  %v9584_v46 = vld [vmem:[%s16556_s1 + $0xc08] sm:$0xff] }
 0x5db   : > { %6209 = vmatmul.mubr.f32.gmra.mrb[138].mxu1 %v14782_v14 }
 0x5dc   : > { %6213 = vmatprep.mubr.f32.mxu1 %v14805_v49  ;;  %v16654_v49 = vld [vmem:[#allocation14_spill] sm:$0xff] }
 0x5df   : > { %6214 = vmatmul.mubr.f32.gmra.mrb[140].mxu1 %v14794_v44 }
 0x5e0   : > { %6218 = vmatprep.mubr.f32.mxu1 %v14812_v11  ;;  %v10889_v11 = vpack.c.bf16 %v9584_v46, %v9583_v39  ;;  %v15168_v39 = vld [vmem:[#allocation2 + $0x61] sm:$0xff] }
 0x5e3   : > { %6219 = vmatmul.mubr.f32.gmra.mrb[142].mxu1 %v14798_v8 }
 0x5e4   : > { %6223 = vmatprep.mubr.f32.mxu1 %v14821_v12  ;;  %v9585_v12 = vld [vmem:[%s16556_s1 + $0xc10] sm:$0xff] }
 0x5e7   : > { %6224 = vmatmul.mubr.f32.gmra.mrb[144].mxu1 %v16651_v18 }
 0x5e8   : > { %6228 = vmatprep.mubr.f32.mxu1 %v14830_v34  ;;  %v5053_v34 = vld [vmem:[#allocation2 + $0x19] sm:$0xff] }
 0x5eb   : > { %6229 = vmatmul.mubr.f32.gmra.mrb[146].mxu1 %v16652_v13 }
 0x5ec   : > { %6233 = vmatprep.mubr.f32.mxu1 %v14842_v57 }
 0x5ed   : > { %v15061_v51 = vpop.f32.mrb[96].mxu0 }
 0x5ee   : > { %v15064_v3 = vpop.f32.mrb[97].mxu0 }
 0x5ef   : > { %6234 = vmatmul.mubr.f32.gmra.mrb[148].mxu1 %v14828_v28 }
 0x5f0   : > { %6238 = vmatprep.mubr.f32.mxu1 %v14853_v5 }
 0x5f3   : > { %6239 = vmatmul.mubr.f32.gmra.mrb[150].mxu1 %v16653_v27 }
 0x5f4   : > { %6243 = vmatprep.mubr.f32.mxu1 %v14867_v25  ;;  %v9586_v25 = vld [vmem:[%s16556_s1 + $0xc18] sm:$0xff] }
 0x5f5   : > { %v15069_v24 = vpop.f32.mrb[98].mxu0 }
 0x5f6   : > { %v15072_v37 = vpop.f32.mrb[99].mxu0 }
 0x5f7   : > { %6244 = vmatmul.mubr.f32.gmra.mrb[152].mxu1 %v14851_v17 }
 0x5f8   : > { %6248 = vmatprep.mubr.f32.mxu1 %v14885_v20  ;;  %v10892_v20 = vpack.c.bf16 %v9586_v25, %v9585_v12  ;;  %v10910_v25 = vpack.c.bf16 %v9598_v58, %v9597_v4  ;;  %v9607_v58 = vld [vmem:[%s16556_s1 + $0xcc0] sm:$0xff] }
 0x5fb   : > { %6249 = vmatmul.mubr.f32.gmra.mrb[154].mxu1 %v14855_v10 }
 0x5fc   : > { %6253 = vmatprep.mubr.f32.mxu1 %v15076_v15 }
 0x5fd   : > { %v15079_v55 = vpop.f32.mrb[100].mxu0 }
 0x5fe   : > { %v15084_v42 = vpop.f32.mrb[101].mxu0 }
 0x5ff   : > { %6254 = vmatmul.mubr.f32.gmra.mrb[156].mxu1 %v14883_v22 }
 0x600   : > { %6258 = vmatprep.mubr.f32.mxu1 %v15082_v41 }
 0x603   : > { %6259 = vmatmul.mubr.f32.gmra.mrb[158].mxu1 %v16654_v49 }
 0x604   : > { %6328 = vmatprep.mubr.f32.mxu1 %v14916_v62  ;;  %v9587_v62 = vld [vmem:[%s16556_s1 + $0xc20] sm:$0xff] }
 0x605   : > { %v15101_v57 = vpop.f32.mrb[102].mxu0  ;;  %v10895_v0 = vpack.c.bf16 %v9588_v21, %v9587_v62  ;;  %v15182_v62 = vld [vmem:[#allocation2 + $0x69] sm:$0xff]  ;;  %v5125_v21 = vld [vmem:[#allocation2 + $0x7a] sm:$0xff] }
 0x606   : > { %v15103_v5 = vpop.f32.mrb[103].mxu0 }
 0x607   : > { %6329 = vmatmul.mubr.f32.vlgmr.msra.gmra.mrb[96].mxu1 %v5053_v34  ;;  %v9599_v34 = vld [vmem:[%s16556_s1 + $0xc80] sm:$0xff] }
 0x608   : > { %6333 = vmatprep.mubr.f32.mxu1 %v14927_v56  ;;  %10890 = vmatpush1.bf16.msra.mxu1 %v10889_v11  ;;  %v9589_v56 = vld [vmem:[%s16556_s1 + $0xc30] sm:$0xff] }
 0x609   : > { %10891 = vmatprep.subr.bf16.mxu1 %v16617_v9  ;;  %v10898_v2 = vpack.c.bf16 %v9590_v1, %v9589_v56  ;;  %v5124_v11 = vld [vmem:[#allocation2 + $0x6a] sm:$0xff]  ;;  %v15192_v56 = vld [vmem:[#allocation2 + $0x79] sm:$0xff] }
 0x60b   : > { %6334 = vmatmul.mubr.f32.gmra.mrb[98].mxu1 %v5054_v43 }
 0x60c   : > { %6338 = vmatprep.mubr.f32.mxu1 %v5119_v63  ;;  %10893 = vmatpush1.bf16.msra.mxu1 %v10892_v20  ;;  %v9600_v20 = vld [vmem:[%s16556_s1 + $0xc88] sm:$0xff]  ;;  %v9601_v63 = vld [vmem:[%s16556_s1 + $0xc90] sm:$0xff] }
 0x60d   : > { %10894 = vmatprep.subr.bf16.mxu1 %v16617_v9  ;;  %v15122_v53 = vpop.f32.mrb[104].mxu0  ;;  %v10913_v43 = vpack.c.bf16 %v9600_v20, %v9599_v34  ;;  %v5129_v34 = vld [vmem:[#allocation2 + $0xaa] sm:$0xff] }
 0x60e   : > { %v15125_v50 = vpop.f32.mrb[105].mxu0 }
 0x60f   : > { %6339 = vmatmul.mubr.f32.gmra.mrb[100].mxu1 %v15120_v54 }
 0x610   : > { %6343 = vmatprep.mubr.f32.mxu1 %v5120_v31  ;;  %10896 = vmatpush1.bf16.msra.mxu1 %v10895_v0  ;;  %v9602_v0 = vld [vmem:[%s16556_s1 + $0xc98] sm:$0xff]  ;;  %v5126_v31 = vld [vmem:[#allocation2 + $0x82] sm:$0xff] }
 0x611   : > { %10897 = vmatprep.subr.bf16.mxu1 %v16617_v9  ;;  %v10916_v59 = vpack.c.bf16 %v9602_v0, %v9601_v63  ;;  %v15240_v63 = vld [vmem:[#allocation2 + $0xa9] sm:$0xff] }
 0x613   : > { %6344 = vmatmul.mubr.f32.gmra.mrb[102].mxu1 %v15134_v26 }
 0x614   : > { %6348 = vmatprep.mubr.f32.mxu1 %v5121_v36  ;;  %10899 = vmatpush1.bf16.msra.mxu1 %v10898_v2  ;;  %v9604_v36 = vld [vmem:[%s16556_s1 + $0xca8] sm:$0xff] }
 0x615   : > { %10900 = vmatprep.subr.bf16.mxu1 %v16617_v9  ;;  %v15146_v47 = vpop.f32.mrb[106].mxu0  ;;  %v10919_v23 = vpack.c.bf16 %v9604_v36, %v9603_v52  ;;  %v9611_v36 = vld [vmem:[%s16556_s1 + $0xce0] sm:$0xff] }
 0x616   : > { %v15149_v6 = vpop.f32.mrb[107].mxu0 }
 0x617   : > { %6349 = vmatmul.mubr.f32.gmra.mrb[104].mxu1 %v15144_v7 }
 0x618   : > { %6353 = vmatprep.mubr.f32.mxu1 %v5122_v16  ;;  %10902 = vmatpush1.bf16.msra.mxu1 %v10901_v29  ;;  %v15206_v29 = vld [vmem:[#allocation2 + $0x81] sm:$0xff]  ;;  %v9605_v16 = vld [vmem:[%s16556_s1 + $0xcb0] sm:$0xff] }
 0x619   : > { %10903 = vmatprep.subr.bf16.mxu1 %v16617_v9 }
 0x61b   : > { %6354 = vmatmul.mubr.f32.gmra.mrb[106].mxu1 %v15158_v60 }
 0x61c   : > { %6358 = vmatprep.mubr.f32.mxu1 %v5123_v35  ;;  %10905 = vmatpush1.bf16.msra.mxu1 %v10904_v61  ;;  %v9606_v61 = vld [vmem:[%s16556_s1 + $0xcb8] sm:$0xff] }
 0x61d   : > { %10906 = vmatprep.subr.bf16.mxu1 %v16617_v9  ;;  %v15170_v46 = vpop.f32.mrb[108].mxu0  ;;  %v5128_v35 = vld [vmem:[#allocation2 + $0x9a] sm:$0xff]  ;;  %v10922_v4 = vpack.c.bf16 %v9606_v61, %v9605_v16  ;;  %v5131_v16 = vld [vmem:[#allocation2 + $0xc2] sm:$0xff] }
 0x61e   : > { %v15173_v12 = vpop.f32.mrb[109].mxu0 }
 0x61f   : > { %6359 = vmatmul.mubr.f32.gmra.mrb[108].mxu1 %v15168_v39 }
 0x620   : > { %6363 = vmatprep.mubr.f32.mxu1 %v5124_v11  ;;  %10908 = vmatpush1.bf16.msra.mxu1 %v10907_v30  ;;  %v9608_v11 = vld [vmem:[%s16556_s1 + $0xcc8] sm:$0xff] }
 0x621   : > { %10909 = vmatprep.subr.bf16.mxu1 %v16617_v9  ;;  %v10925_v20 = vpack.c.bf16 %v9608_v11, %v9607_v58  ;;  %v15264_v58 = vld [vmem:[#allocation2 + $0xc1] sm:$0xff] }
 0x623   : > { %6364 = vmatmul.mubr.f32.gmra.mrb[110].mxu1 %v15182_v62 }
 0x624   : > { %6368 = vmatprep.mubr.f32.mxu1 %v5125_v21  ;;  %10911 = vmatpush1.bf16.msra.mxu1 %v10910_v25  ;;  %v15230_v25 = vld [vmem:[#allocation2 + $0x99] sm:$0xff]  ;;  %v9609_v21 = vld [vmem:[%s16556_s1 + $0xcd0] sm:$0xff] }
 0x625   : > { %10912 = vmatprep.subr.bf16.mxu1 %v16617_v9  ;;  %v15194_v1 = vpop.f32.mrb[110].mxu0 }
 0x626   : > { %v15197_v2 = vpop.f32.mrb[111].mxu0 }
 0x627   : > { %6369 = vmatmul.mubr.f32.gmra.mrb[112].mxu1 %v15192_v56 }
 0x628   : > { %6373 = vmatprep.mubr.f32.mxu1 %v5126_v31  ;;  %10914 = vmatpush1.bf16.msra.mxu1 %v10913_v43  ;;  %v9610_v43 = vld [vmem:[%s16556_s1 + $0xcd8] sm:$0xff] }
 0x629   : > { %10915 = vmatprep.subr.bf16.mxu1 %v16617_v9  ;;  %v5130_v31 = vld [vmem:[#allocation2 + $0xb2] sm:$0xff]  ;;  %v10928_v52 = vpack.c.bf16 %v9610_v43, %v9609_v21  ;;  %v15272_v43 = vld [vmem:[#allocation2 + $0xc9] sm:$0xff] }
 0x62b   : > { %6374 = vmatmul.mubr.f32.gmra.mrb[114].mxu1 %v15206_v29 }
 0x62c   : > { %6378 = vmatprep.mubr.f32.mxu1 %v5127_v45  ;;  %10917 = vmatpush1.bf16.msra.mxu1 %v10916_v59  ;;  %v9612_v45 = vld [vmem:[%s16556_s1 + $0xce8] sm:$0xff] }
 0x62d   : > { %10918 = vmatprep.subr.bf16.mxu1 %v16617_v9  ;;  %v15218_v19 = vpop.f32.mrb[112].mxu0  ;;  %v10931_v61 = vpack.c.bf16 %v9612_v45, %v9611_v36 }
 0x62e   : > { %v15221_v30 = vpop.f32.mrb[113].mxu0 }
 0x62f   : > { %6379 = vmatmul.mubr.f32.gmra.mrb[116].mxu1 %v15216_v48 }
 0x630   : > { %6383 = vmatprep.mubr.f32.mxu1 %v5128_v35  ;;  %10920 = vmatpush1.bf16.msra.mxu1 %v10919_v23  ;;  %v15254_v23 = vld [vmem:[#allocation2 + $0xb1] sm:$0xff] }
 0x631   : > { %10921 = vmatprep.subr.bf16.mxu1 %v16617_v9  ;;  %v9613_v35 = vld [vmem:[%s16556_s1 + $0xcf0] sm:$0xff] }
 0x633   : > { %6384 = vmatmul.mubr.f32.gmra.mrb[118].mxu1 %v15230_v25 }
 0x634   : > { %6388 = vmatprep.mubr.f32.mxu1 %v5129_v34  ;;  %10923 = vmatpush1.bf16.msra.mxu1 %v10922_v4  ;;  %v9614_v4 = vld [vmem:[%s16556_s1 + $0xcf8] sm:$0xff]  ;;  %v5132_v34 = vld [vmem:[#allocation2 + $0xca] sm:$0xff] }
 0x635   : > { %10924 = vmatprep.subr.bf16.mxu1 %v16617_v9  ;;  %v15242_v0 = vpop.f32.mrb[114].mxu0  ;;  %v10934_v21 = vpack.c.bf16 %v9614_v4, %v9613_v35 }
 0x636   : > { %v15245_v59 = vpop.f32.mrb[115].mxu0 }
 0x637   : > { %6389 = vmatmul.mubr.f32.gmra.mrb[120].mxu1 %v15240_v63 }
 0x638   : > { %6393 = vmatprep.mubr.f32.mxu1 %v5130_v31  ;;  %10926 = vmatpush1.bf16.msra.mxu1 %v10925_v20  ;;  %v5133_v31 = vld [vmem:[#allocation2 + $0xda] sm:$0xff] }
 0x639   : > { %10927 = vmatprep.subr.bf16.mxu1 %v16617_v9 }
 0x63b   : > { %6394 = vmatmul.mubr.f32.gmra.mrb[122].mxu1 %v15254_v23 }
 0x63c   : > { %6398 = vmatprep.mubr.f32.mxu1 %v5131_v16  ;;  %10929 = vmatpush1.bf16.msra.mxu1 %v10928_v52  ;;  %v15275_v52 = vld [vmem:[#allocation2 + $0xd9] sm:$0xff]  ;;  %v15283_v16 = vld [vmem:[#allocation2 + $0xe1] sm:$0xff] }
 0x63d   : > { %10930 = vmatprep.subr.bf16.mxu1 %v16617_v9  ;;  %v15266_v11 = vpop.f32.mrb[116].mxu0 }
 0x63e   : > { %v15269_v20 = vpop.f32.mrb[117].mxu0 }
 0x63f   : > { %6399 = vmatmul.mubr.f32.gmra.mrb[124].mxu1 %v15264_v58 }
 0x640   : > { %6403 = vmatprep.mubr.f32.mxu1 %v5132_v34  ;;  %10932 = vmatpush1.bf16.msra.mxu1 %v10931_v61  ;;  %v15287_v61 = vld [vmem:[#allocation2 + $0xf1] sm:$0xff]  ;;  %v15295_v34 = vld [vmem:[#allocation2 + $0xf9] sm:$0xff] }
 0x641   : > { %10933 = vmatprep.subr.bf16.mxu1 %v16617_v9 }
 0x643   : > { %6404 = vmatmul.mubr.f32.gmra.mrb[126].mxu1 %v15272_v43 }
 0x644   : > { %6408 = vmatprep.mubr.f32.mxu1 %v5133_v31  ;;  %10935 = vmatpush1.bf16.msra.mxu1 %v10934_v21  ;;  %v15307_v31 = vld [vmem:[#allocation2 + $0x111] sm:$0xff] }
 0x646   : > { %v15277_v36 = vpop.f32.mrb[118].mxu0 }
 0x647   : > { %6409 = vmatmul.mubr.f32.gmra.mrb[128].mxu1 %v15275_v52  ;;  %v15280_v45 = vpop.f32.mrb[119].mxu0 }
 0x648   : > { %6413 = vmatprep.mubr.f32.mxu1 %v14766_v32  ;;  %v15299_v32 = vld [vmem:[#allocation2 + $0x109] sm:$0xff] }
 0x64b   : > { %6414 = vmatmul.mubr.f32.gmra.mrb[130].mxu1 %v15283_v16 }
 0x64c   : > { %6418 = vmatprep.mubr.f32.mxu1 %v14778_v40 }
 0x64d   : > { %v15289_v35 = vpop.f32.mrb[120].mxu0 }
 0x64e   : > { %16655 = vst [vmem:[#allocation13_spill] sm:$0xff] %v15289_v35  ;;  %v15292_v4 = vpop.f32.mrb[121].mxu0 }
 0x64f   : > { %6419 = vmatmul.mubr.f32.gmra.mrb[132].mxu1 %v15287_v61  ;;  %16656 = vst [vmem:[#allocation16_spill] sm:$0xff] %v15292_v4  ;;  %v5340_v4 = vld [vmem:[#allocation2 + $0x1a2] sm:$0xff] }
 0x650   : > { %6423 = vmatprep.mubr.f32.mxu1 %v14782_v14  ;;  %v15311_v14 = vld [vmem:[#allocation2 + $0x121] sm:$0xff] }
 0x653   : > { %6424 = vmatmul.mubr.f32.gmra.mrb[134].mxu1 %v15295_v34 }
 0x654   : > { %6428 = vmatprep.mubr.f32.mxu1 %v14794_v44 }
 0x655   : > { %v15301_v21 = vpop.f32.mrb[122].mxu0 }
 0x656   : > { %16657 = vst [vmem:[#allocation15_spill] sm:$0xff] %v15301_v21  ;;  %v15304_v40 = vpop.f32.mrb[123].mxu0  ;;  %v15319_v21 = vld [vmem:[#allocation2 + $0x129] sm:$0xff] }
 0x657   : > { %6429 = vmatmul.mubr.f32.gmra.mrb[136].mxu1 %v15299_v32  ;;  %16658 = vst [vmem:[#allocation6_spill] sm:$0xff] %v15304_v40  ;;  %v5339_v40 = vld [vmem:[#allocation2 + $0x19a] sm:$0xff] }
 0x658   : > { %6433 = vmatprep.mubr.f32.mxu1 %v14798_v8  ;;  %v15323_v8 = vld [vmem:[#allocation2 + $0x139] sm:$0xff]  ;;  %10213 = vmatprep.mubr.f32.mxu0 %v5339_v40  ;;  %v5181_v40 = vld [vmem:[#allocation2 + $0x30] sm:$0xff] }
 0x659   : > { %10214 = vmatmul.mubr.f32.gmra.mrb[126].mxu0 %v5340_v4  ;;  %v9636_v4 = vld [vmem:[%s16556_s1 + $0xd98] sm:$0xff] }
 0x65b   : > { %6434 = vmatmul.mubr.f32.gmra.mrb[138].mxu1 %v15307_v31 }
 0x65c   : > { %6438 = vmatprep.mubr.f32.mxu1 %v16651_v18  ;;  %v15327_v18 = vld [vmem:[#allocation2 + $0x141] sm:$0xff] }
 0x65d   : > { %v15313_v35 = vpop.f32.mrb[124].mxu0 }
 0x65e   : > { %16659 = vst [vmem:[#allocation7_spill] sm:$0xff] %v15313_v35  ;;  %v15316_v44 = vpop.f32.mrb[125].mxu0  ;;  %v15331_v35 = vld [vmem:[#allocation2 + $0x151] sm:$0xff] }
 0x65f   : > { %6439 = vmatmul.mubr.f32.gmra.mrb[140].mxu1 %v15311_v14  ;;  %16660 = vst [vmem:[#allocation10_spill] sm:$0xff] %v15316_v44  ;;  %v16664_v44 = vld [vmem:[#allocation8_spill] sm:$0xff] }
 0x660   : > { %6443 = vmatprep.mubr.f32.mxu1 %v16652_v13  ;;  %v16661_v13 = vld [vmem:[#allocation9_spill] sm:$0xff] }
 0x663   : > { %6444 = vmatmul.mubr.f32.gmra.mrb[142].mxu1 %v15319_v21 }
 0x664   : > { %6448 = vmatprep.mubr.f32.mxu1 %v14828_v28  ;;  %v16662_v28 = vld [vmem:[#allocation11_spill] sm:$0xff] }
 0x667   : > { %6449 = vmatmul.mubr.f32.gmra.mrb[144].mxu1 %v15323_v8 }
 0x668   : > { %6453 = vmatprep.mubr.f32.mxu1 %v16653_v27  ;;  %v16663_v27 = vld [vmem:[#allocation12_spill] sm:$0xff] }
 0x66b   : > { %6454 = vmatmul.mubr.f32.gmra.mrb[146].mxu1 %v15327_v18 }
 0x66c   : > { %6458 = vmatprep.mubr.f32.mxu1 %v14851_v17  ;;  %v16665_v17 = vmax.f32 %v16664_v44, 0.0 }
 0x66f   : > { %6459 = vmatmul.mubr.f32.gmra.mrb[148].mxu1 %v15331_v35 }
 0x670   : > { %6463 = vmatprep.mubr.f32.mxu1 %v14855_v10  ;;  %v16666_v10 = vld [vmem:[#allocation5_spill] sm:$0xff] }
 0x673   : > { %6464 = vmatmul.mubr.f32.gmra.mrb[150].mxu1 %v16661_v13  ;;  %v16667_v13 = vmax.f32 %v16666_v10, 0.0  ;;  %v9639_v10 = vld [vmem:[%s16556_s1 + $0xdb0] sm:$0xff] }
 0x674   : > { %6468 = vmatprep.mubr.f32.mxu1 %v14883_v22  ;;  %v9633_v22 = vld [vmem:[%s16556_s1 + $0xd80] sm:$0xff] }
 0x677   : > { %6469 = vmatmul.mubr.f32.gmra.mrb[152].mxu1 %v16662_v28  ;;  %v9637_v28 = vld [vmem:[%s16556_s1 + $0xda0] sm:$0xff] }
 0x678   : > { %6473 = vmatprep.mubr.f32.mxu1 %v16654_v49  ;;  %v9635_v49 = vld [vmem:[%s16556_s1 + $0xd90] sm:$0xff] }
 0x679   : > { %v10972_v44 = vpack.c.bf16 %v9636_v4, %v9635_v49  ;;  %v5183_v49 = vld [vmem:[#allocation2 + $0x48] sm:$0xff]  ;;  %v9641_v4 = vld [vmem:[%s16556_s1 + $0xdc0] sm:$0xff] }
 0x67b   : > { %6474 = vmatmul.mubr.f32.gmra.mrb[154].mxu1 %v16663_v27  ;;  %v9638_v27 = vld [vmem:[%s16556_s1 + $0xda8] sm:$0xff] }
 0x67c   : > { %6478 = vmatprep.mubr.f32.mxu1 %v14906_v38  ;;  %v9634_v38 = vld [vmem:[%s16556_s1 + $0xd88] sm:$0xff] }
 0x67f   : > { %6479 = vmatmul.mubr.f32.gmra.mrb[156].mxu1 %v16665_v17  ;;  %v10975_v17 = vpack.c.bf16 %v9638_v27, %v9637_v28  ;;  %v9643_v28 = vld [vmem:[%s16556_s1 + $0xdd0] sm:$0xff]  ;;  %v9644_v27 = vld [vmem:[%s16556_s1 + $0xdd8] sm:$0xff] }
 0x680   : > { %6483 = vmatprep.mubr.f32.mxu1 %v14908_v33  ;;  %v10969_v33 = vpack.c.bf16 %v9634_v38, %v9633_v22  ;;  %v9761_v22 = vld [vmem:[%s16556_s1 + $0x1180] sm:$0xff] }
 0x682   : > { %10970 = vmatpush1.bf16.msra.mxu0 %v10969_v33 }
 0x683   : > { %6484 = vmatmul.mubr.f32.gmra.mrb[158].mxu1 %v16667_v13  ;;  %10971 = vmatprep.subr.bf16.mxu0 %v16617_v9  ;;  %v9640_v13 = vld [vmem:[%s16556_s1 + $0xdb8] sm:$0xff] }
 0x684   : > { %6553 = vmatprep.mubr.f32.mxu1 %v15120_v54  ;;  %v5182_v54 = vld [vmem:[#allocation2 + $0x38] sm:$0xff]  ;;  %v10978_v33 = vpack.c.bf16 %v9640_v13, %v9639_v10  ;;  %v9646_v10 = vld [vmem:[%s16556_s1 + $0xde8] sm:$0xff] }
 0x685   : > { %v5186_v13 = vld [vmem:[#allocation2 + $0x68] sm:$0xff] }
 0x686   : > { %10973 = vmatpush1.bf16.msra.mxu0 %v10972_v44 }
 0x687   : > { %6554 = vmatmul.mubr.f32.vlgmr.msra.gmra.mrb[96].mxu1 %v5181_v40  ;;  %10974 = vmatprep.subr.bf16.mxu0 %v16617_v9  ;;  %v9642_v40 = vld [vmem:[%s16556_s1 + $0xdc8] sm:$0xff] }
 0x688   : > { %6558 = vmatprep.mubr.f32.mxu1 %v15134_v26  ;;  %v9762_v26 = vld [vmem:[%s16556_s1 + $0x1188] sm:$0xff]  ;;  %v10981_v44 = vpack.c.bf16 %v9642_v40, %v9641_v4  ;;  %v5188_v4 = vld [vmem:[#allocation2 + $0x80] sm:$0xff] }
 0x689   : > { %v11160_v38 = vpack.c.bf16 %v9762_v26, %v9761_v22  ;;  %v9648_v26 = vld [vmem:[%s16556_s1 + $0xdf8] sm:$0xff] }
 0x68a   : > { %10976 = vmatpush1.bf16.msra.mxu0 %v10975_v17  ;;  %v9645_v17 = vld [vmem:[%s16556_s1 + $0xde0] sm:$0xff] }
 0x68b   : > { %6559 = vmatmul.mubr.f32.gmra.mrb[98].mxu1 %v5182_v54  ;;  %10977 = vmatprep.subr.bf16.mxu0 %v16617_v9  ;;  %v5185_v54 = vld [vmem:[#allocation2 + $0x60] sm:$0xff]  ;;  %v10987_v22 = vpack.c.bf16 %v9646_v10, %v9645_v17  ;;  %v9656_v17 = vld [vmem:[%s16556_s1 + $0xe38] sm:$0xff]  ;;  %v5191_v10 = vld [vmem:[#allocation2 + $0xa8] sm:$0xff] }
 0x68c   : > { %6563 = vmatprep.mubr.f32.mxu1 %v15144_v7  ;;  %11161 = vmatprep.subr.bf16.mxu1 %v11160_v38  ;;  %v5184_v7 = vld [vmem:[#allocation2 + $0x50] sm:$0xff] }
 0x68d   : > { %11163 = vmatpush3.bf16.msra.mxu1 %v11160_v38  ;;  %v5187_v38 = vld [vmem:[#allocation2 + $0x78] sm:$0xff] }
 0x68e   : > { %10979 = vmatpush1.bf16.msra.mxu0 %v10978_v33  ;;  %v9650_v33 = vld [vmem:[%s16556_s1 + $0xe08] sm:$0xff] }
 0x68f   : > { %6564 = vmatmul.mubr.f32.gmra.mrb[100].mxu1 %v5183_v49  ;;  %10980 = vmatprep.subr.bf16.mxu0 %v16617_v9 }
 0x690   : > { %6568 = vmatprep.mubr.f32.mxu1 %v15158_v60  ;;  %v10984_v60 = vpack.c.bf16 %v9644_v27, %v9643_v28  ;;  %v9654_v27 = vld [vmem:[%s16556_s1 + $0xe28] sm:$0xff] }
 0x692   : > { %10982 = vmatpush1.bf16.msra.mxu0 %v10981_v44  ;;  %v5189_v44 = vld [vmem:[#allocation2 + $0x90] sm:$0xff] }
 0x693   : > { %6569 = vmatmul.mubr.f32.gmra.mrb[102].mxu1 %v5184_v7  ;;  %10983 = vmatprep.subr.bf16.mxu0 %v16617_v9  ;;  %v9652_v7 = vld [vmem:[%s16556_s1 + $0xe18] sm:$0xff] }
 0x694   : > { %6573 = vmatprep.mubr.f32.mxu1 %v15168_v39  ;;  %v9647_v39 = vld [vmem:[%s16556_s1 + $0xdf0] sm:$0xff] }
 0x695   : > { %v10990_v49 = vpack.c.bf16 %v9648_v26, %v9647_v39  ;;  %v5192_v39 = vld [vmem:[#allocation2 + $0xb0] sm:$0xff] }
 0x696   : > { %10985 = vmatpush1.bf16.msra.mxu0 %v10984_v60 }
 0x697   : > { %6574 = vmatmul.mubr.f32.gmra.mrb[104].mxu1 %v5185_v54  ;;  %10986 = vmatprep.subr.bf16.mxu0 %v16617_v9  ;;  %v5190_v54 = vld [vmem:[#allocation2 + $0x98] sm:$0xff] }
 0x698   : > { %6578 = vmatprep.mubr.f32.mxu1 %v15182_v62  ;;  %v9649_v62 = vld [vmem:[%s16556_s1 + $0xe00] sm:$0xff] }
 0x699   : > { %v10993_v40 = vpack.c.bf16 %v9650_v33, %v9649_v62  ;;  %v5195_v33 = vld [vmem:[#allocation2 + $0xd8] sm:$0xff] }
 0x69a   : > { %10988 = vmatpush1.bf16.msra.mxu0 %v10987_v22  ;;  %v9658_v22 = vld [vmem:[%s16556_s1 + $0xe48] sm:$0xff] }
 0x69b   : > { %6579 = vmatmul.mubr.f32.gmra.mrb[106].mxu1 %v5186_v13  ;;  %10989 = vmatprep.subr.bf16.mxu0 %v16617_v9 }
 0x69c   : > { %6583 = vmatprep.mubr.f32.mxu1 %v15192_v56  ;;  %v9651_v56 = vld [vmem:[%s16556_s1 + $0xe10] sm:$0xff] }
 0x69d   : > { %v10996_v28 = vpack.c.bf16 %v9652_v7, %v9651_v56  ;;  %v5201_v56 = vld [vmem:[#allocation2 + $0x120] sm:$0xff]  ;;  %v9764_v7 = vld [vmem:[%s16556_s1 + $0x1198] sm:$0xff] }
 0x69e   : > { %10991 = vmatpush1.bf16.msra.mxu0 %v10990_v49  ;;  %v5193_v49 = vld [vmem:[#allocation2 + $0xc0] sm:$0xff] }
 0x69f   : > { %6584 = vmatmul.mubr.f32.gmra.mrb[108].mxu1 %v5187_v38  ;;  %10992 = vmatprep.subr.bf16.mxu0 %v16617_v9  ;;  %v9660_v38 = vld [vmem:[%s16556_s1 + $0xe58] sm:$0xff] }
 0x6a0   : > { %6588 = vmatprep.mubr.f32.mxu1 %v15206_v29  ;;  %v9653_v29 = vld [vmem:[%s16556_s1 + $0xe20] sm:$0xff] }
 0x6a1   : > { %v10999_v60 = vpack.c.bf16 %v9654_v27, %v9653_v29  ;;  %v7099_v29 = vld [vmem:[#allocation3 + $0x1] sm:$0xff]  ;;  %v9765_v27 = vld [vmem:[%s16556_s1 + $0x11a0] sm:$0xff] }
 0x6a2   : > { %10994 = vmatpush1.bf16.msra.mxu0 %v10993_v40  ;;  %v5199_v40 = vld [vmem:[#allocation2 + $0x108] sm:$0xff]  ;;  %8116 = vmatprep.mubr.f32.mxu0 %v7099_v29 }
 0x6a3   : > { %6589 = vmatmul.mubr.f32.gmra.mrb[110].mxu1 %v5188_v4  ;;  %10995 = vmatprep.subr.bf16.mxu0 %v16617_v9  ;;  %v5197_v4 = vld [vmem:[#allocation2 + $0xf0] sm:$0xff] }
 0x6a4   : > { %6593 = vmatprep.mubr.f32.mxu1 %v15216_v48  ;;  %v9655_v48 = vld [vmem:[%s16556_s1 + $0xe30] sm:$0xff] }
 0x6a5   : > { %v11002_v13 = vpack.c.bf16 %v9656_v17, %v9655_v48  ;;  %v15498_v17 = vld [vmem:[#allocation2] sm:$0xff]  ;;  %v5274_v29 = vld [vmem:[#allocation2 + $0x189] sm:$0xff] }
 0x6a6   : > { %10997 = vmatpush1.bf16.msra.mxu0 %v10996_v28 }
 0x6a7   : > { %6594 = vmatmul.mubr.f32.gmra.mrb[112].mxu1 %v5189_v44  ;;  %10998 = vmatprep.subr.bf16.mxu0 %v16617_v9 }
 0x6a8   : > { %6598 = vmatprep.mubr.f32.mxu1 %v15230_v25  ;;  %v9657_v25 = vld [vmem:[%s16556_s1 + $0xe40] sm:$0xff] }
 0x6a9   : > { %v11005_v26 = vpack.c.bf16 %v9658_v22, %v9657_v25  ;;  %v5204_v25 = vld [vmem:[#allocation2 + $0x140] sm:$0xff] }
 0x6aa   : > { %11000 = vmatpush1.bf16.msra.mxu0 %v10999_v60  ;;  %v5203_v60 = vld [vmem:[#allocation2 + $0x138] sm:$0xff] }
 0x6ab   : > { %6599 = vmatmul.mubr.f32.gmra.mrb[114].mxu1 %v5190_v54  ;;  %11001 = vmatprep.subr.bf16.mxu0 %v16617_v9  ;;  %v9766_v54 = vld [vmem:[%s16556_s1 + $0x11a8] sm:$0xff] }
 0x6ac   : > { %6603 = vmatprep.mubr.f32.mxu1 %v15240_v63  ;;  %v9659_v63 = vld [vmem:[%s16556_s1 + $0xe50] sm:$0xff]  ;;  %v11168_v48 = vpack.c.bf16 %v9766_v54, %v9765_v27  ;;  %v5275_v27 = vld [vmem:[#allocation2 + $0x199] sm:$0xff] }
 0x6ad   : > { %v11008_v62 = vpack.c.bf16 %v9660_v38, %v9659_v63  ;;  %v5270_v38 = vld [vmem:[#allocation2 + $0x159] sm:$0xff] }
 0x6ae   : > { %11003 = vmatpush1.bf16.msra.mxu0 %v11002_v13  ;;  %v9768_v13 = vld [vmem:[%s16556_s1 + $0x11b8] sm:$0xff]  ;;  %v9669_v54 = vld [vmem:[%s16556_s1 + $0xea0] sm:$0xff] }
 0x6af   : > { %6604 = vmatmul.mubr.f32.gmra.mrb[116].mxu1 %v5191_v10  ;;  %11004 = vmatprep.subr.bf16.mxu0 %v16617_v9  ;;  %v9767_v10 = vld [vmem:[%s16556_s1 + $0x11b0] sm:$0xff] }
 0x6b0   : > { %6608 = vmatprep.mubr.f32.mxu1 %v15254_v23  ;;  %v5194_v23 = vld [vmem:[#allocation2 + $0xc8] sm:$0xff]  ;;  %v11172_v22 = vpack.c.bf16 %v9768_v13, %v9767_v10  ;;  %v9672_v10 = vld [vmem:[%s16556_s1 + $0xeb8] sm:$0xff] }
 0x6b2   : > { %11006 = vmatpush1.bf16.msra.mxu0 %v11005_v26  ;;  %v5205_v26 = vld [vmem:[#allocation2 + $0x150] sm:$0xff] }
 0x6b3   : > { %6609 = vmatmul.mubr.f32.gmra.mrb[118].mxu1 %v5192_v39  ;;  %11007 = vmatprep.subr.bf16.mxu0 %v16617_v9  ;;  %v9770_v39 = vld [vmem:[%s16556_s1 + $0x11c8] sm:$0xff] }
 0x6b4   : > { %6613 = vmatprep.mubr.f32.mxu1 %v15264_v58  ;;  %v5196_v58 = vld [vmem:[#allocation2 + $0xe0] sm:$0xff] }
 0x6b6   : > { %11009 = vmatpush1.bf16.msra.mxu0 %v11008_v62  ;;  %v9771_v62 = vld [vmem:[%s16556_s1 + $0x11d0] sm:$0xff] }
 0x6b7   : > { %6614 = vmatmul.mubr.f32.gmra.mrb[120].mxu1 %v5193_v49  ;;  %11010 = vmatprep.subr.bf16.mxu0 %v16617_v9  ;;  %v9666_v49 = vld [vmem:[%s16556_s1 + $0xe88] sm:$0xff] }
 0x6b8   : > { %6618 = vmatprep.mubr.f32.mxu1 %v15272_v43  ;;  %v5198_v43 = vld [vmem:[#allocation2 + $0xf8] sm:$0xff] }
 0x6bb   : > { %6619 = vmatmul.mubr.f32.gmra.mrb[122].mxu1 %v5194_v23  ;;  %v5206_v23 = vld [vmem:[#allocation2 + $0x158] sm:$0xff] }
 0x6bc   : > { %6623 = vmatprep.mubr.f32.mxu1 %v15275_v52  ;;  %v5200_v52 = vld [vmem:[#allocation2 + $0x110] sm:$0xff] }
 0x6bf   : > { %6624 = vmatmul.mubr.f32.gmra.mrb[124].mxu1 %v5195_v33 }
 0x6c0   : > { %6628 = vmatprep.mubr.f32.mxu1 %v15283_v16  ;;  %v9661_v16 = vld [vmem:[%s16556_s1 + $0xe60] sm:$0xff] }
 0x6c3   : > { %6629 = vmatmul.mubr.f32.gmra.mrb[126].mxu1 %v5196_v58  ;;  %v9772_v58 = vld [vmem:[%s16556_s1 + $0x11d8] sm:$0xff] }
 0x6c4   : > { %6633 = vmatprep.mubr.f32.mxu1 %v15287_v61  ;;  %v9662_v61 = vld [vmem:[%s16556_s1 + $0xe68] sm:$0xff] }
 0x6c7   : > { %6634 = vmatmul.mubr.f32.gmra.mrb[128].mxu1 %v5197_v4  ;;  %v5271_v4 = vld [vmem:[#allocation2 + $0x169] sm:$0xff] }
 0x6c8   : > { %6638 = vmatprep.mubr.f32.mxu1 %v15295_v34  ;;  %v11011_v34 = vpack.c.bf16 %v9662_v61, %v9661_v16  ;;  %v5207_v16 = vld [vmem:[#allocation2 + $0x168] sm:$0xff] }
 0x6ca   : > { %11012 = vmatpush1.bf16.msra.mxu0 %v11011_v34  ;;  %v5272_v34 = vld [vmem:[#allocation2 + $0x171] sm:$0xff] }
 0x6cb   : > { %6639 = vmatmul.mubr.f32.gmra.mrb[130].mxu1 %v5198_v43  ;;  %11013 = vmatprep.subr.bf16.mxu0 %v16617_v9  ;;  %v11180_v43 = vpack.c.bf16 %v9772_v58, %v9771_v62 }
 0x6cc   : > { %6643 = vmatprep.mubr.f32.mxu1 %v15299_v32  ;;  %v9663_v32 = vld [vmem:[%s16556_s1 + $0xe70] sm:$0xff] }
 0x6cf   : > { %6644 = vmatmul.mubr.f32.gmra.mrb[132].mxu1 %v5199_v40  ;;  %v9773_v40 = vld [vmem:[%s16556_s1 + $0x11e0] sm:$0xff] }
 0x6d0   : > { %6648 = vmatprep.mubr.f32.mxu1 %v15307_v31  ;;  %v9664_v31 = vld [vmem:[%s16556_s1 + $0xe78] sm:$0xff] }
 0x6d1   : > { %v11014_v44 = vpack.c.bf16 %v9664_v31, %v9663_v32  ;;  %v9668_v32 = vld [vmem:[%s16556_s1 + $0xe98] sm:$0xff]  ;;  %v9775_v31 = vld [vmem:[%s16556_s1 + $0x11f0] sm:$0xff] }
 0x6d3   : > { %6649 = vmatmul.mubr.f32.gmra.mrb[134].mxu1 %v5200_v52  ;;  %11015 = vmatpush1.bf16.msra.mxu0 %v11014_v44  ;;  %v9774_v52 = vld [vmem:[%s16556_s1 + $0x11e8] sm:$0xff]  ;;  %v9776_v44 = vld [vmem:[%s16556_s1 + $0x11f8] sm:$0xff] }
 0x6d4   : > { %6653 = vmatprep.mubr.f32.mxu1 %v15311_v14  ;;  %v9763_v14 = vld [vmem:[%s16556_s1 + $0x1190] sm:$0xff]  ;;  %11016 = vmatprep.subr.bf16.mxu0 %v16617_v9  ;;  %v11184_v61 = vpack.c.bf16 %v9774_v52, %v9773_v40  ;;  %v9685_v52 = vld [vmem:[%s16556_s1 + $0xf20] sm:$0xff] }
 0x6d5   : > { %v11164_v28 = vpack.c.bf16 %v9764_v7, %v9763_v14  ;;  %v5208_v14 = vld [vmem:[#allocation2 + $0x170] sm:$0xff] }
 0x6d6   : > { %8117 = vmatmul.mubr.f32.vlgmr.msra.gmra.mrb[128].mxu0 %v15498_v17 }
 0x6d7   : > { %6654 = vmatmul.mubr.f32.gmra.mrb[136].mxu1 %v5201_v56  ;;  %11165 = vmatprep.subr.bf16.mxu1 %v11164_v28  ;;  %v9667_v56 = vld [vmem:[%s16556_s1 + $0xe90] sm:$0xff] }
 0x6d8   : > { %6658 = vmatprep.mubr.f32.mxu1 %v15319_v21  ;;  %v5202_v21 = vld [vmem:[#allocation2 + $0x128] sm:$0xff]  ;;  %11167 = vmatpush3.bf16.msra.mxu1 %v11164_v28  ;;  %v11020_v7 = vpack.c.bf16 %v9668_v32, %v9667_v56  ;;  %v11188_v28 = vpack.c.bf16 %v9776_v44, %v9775_v31  ;;  %v9688_v56 = vld [vmem:[%s16556_s1 + $0xf38] sm:$0xff]  ;;  %v9689_v31 = vld [vmem:[%s16556_s1 + $0xf40] sm:$0xff] }
 0x6d9   : > { %11169 = vmatprep.subr.bf16.mxu1 %v11168_v48  ;;  %v9691_v44 = vld [vmem:[%s16556_s1 + $0xf50] sm:$0xff] }
 0x6db   : > { %6659 = vmatmul.mubr.f32.gmra.mrb[138].mxu1 %v5202_v21  ;;  %v5273_v21 = vld [vmem:[#allocation2 + $0x181] sm:$0xff] }
 0x6dc   : > { %6663 = vmatprep.mubr.f32.mxu1 %v15323_v8  ;;  %v7100_v8 = vld [vmem:[#allocation3 + $0x9] sm:$0xff]  ;;  %11171 = vmatpush3.bf16.msra.mxu1 %v11168_v48 }
 0x6dd   : > { %8121 = vmatprep.mubr.f32.mxu0 %v7100_v8  ;;  %11173 = vmatprep.subr.bf16.mxu1 %v11172_v22  ;;  %v5276_v8 = vld [vmem:[#allocation2 + $0x1a1] sm:$0xff] }
 0x6de   : > { %8122 = vmatmul.mubr.f32.gmra.mrb[130].mxu0 %v15498_v17 }
 0x6df   : > { %6664 = vmatmul.mubr.f32.gmra.mrb[140].mxu1 %v5203_v60  ;;  %v9670_v60 = vld [vmem:[%s16556_s1 + $0xea8] sm:$0xff] }
 0x6e0   : > { %6668 = vmatprep.mubr.f32.mxu1 %v15327_v18  ;;  %11175 = vmatpush3.bf16.msra.mxu1 %v11172_v22  ;;  %v9769_v18 = vld [vmem:[%s16556_s1 + $0x11c0] sm:$0xff]  ;;  %v11023_v48 = vpack.c.bf16 %v9670_v60, %v9669_v54  ;;  %v9694_v54 = vld [vmem:[%s16556_s1 + $0xf68] sm:$0xff] }
 0x6e1   : > { %v11176_v63 = vpack.c.bf16 %v9770_v39, %v9769_v18  ;;  %v9675_v18 = vld [vmem:[%s16556_s1 + $0xed0] sm:$0xff] }
 0x6e3   : > { %6669 = vmatmul.mubr.f32.gmra.mrb[142].mxu1 %v5204_v25  ;;  %11177 = vmatprep.subr.bf16.mxu1 %v11176_v63  ;;  %v9674_v25 = vld [vmem:[%s16556_s1 + $0xec8] sm:$0xff] }
 0x6e4   : > { %6673 = vmatprep.mubr.f32.mxu1 %v15331_v35  ;;  %v9665_v35 = vld [vmem:[%s16556_s1 + $0xe80] sm:$0xff]  ;;  %11179 = vmatpush3.bf16.msra.mxu1 %v11176_v63  ;;  %v9678_v63 = vld [vmem:[%s16556_s1 + $0xee8] sm:$0xff] }
 0x6e5   : > { %v11017_v33 = vpack.c.bf16 %v9666_v49, %v9665_v35  ;;  %11181 = vmatprep.subr.bf16.mxu1 %v11180_v43  ;;  %v9679_v35 = vld [vmem:[%s16556_s1 + $0xef0] sm:$0xff]  ;;  %v9680_v49 = vld [vmem:[%s16556_s1 + $0xef8] sm:$0xff] }
 0x6e6   : > { %v11038_v62 = vpack.c.bf16 %v9680_v49, %v9679_v35 }
 0x6e7   : > { %6674 = vmatmul.mubr.f32.gmra.mrb[144].mxu1 %v5205_v26  ;;  %11018 = vmatpush1.bf16.msra.mxu0 %v11017_v33  ;;  %v9677_v26 = vld [vmem:[%s16556_s1 + $0xee0] sm:$0xff]  ;;  %v9682_v33 = vld [vmem:[%s16556_s1 + $0xf08] sm:$0xff] }
 0x6e8   : > { %6678 = vmatprep.mubr.f32.mxu1 %v5270_v38  ;;  %11019 = vmatprep.subr.bf16.mxu0 %v16617_v9  ;;  %v11035_v38 = vpack.c.bf16 %v9678_v63, %v9677_v26 }
 0x6e9   : > { %11183 = vmatpush3.bf16.msra.mxu1 %v11180_v43  ;;  %v9684_v43 = vld [vmem:[%s16556_s1 + $0xf18] sm:$0xff] }
 0x6ea   : > { %11185 = vmatprep.subr.bf16.mxu1 %v11184_v61 }
 0x6eb   : > { %6679 = vmatmul.mubr.f32.gmra.mrb[146].mxu1 %v5206_v23  ;;  %11021 = vmatpush1.bf16.msra.mxu0 %v11020_v7  ;;  %v9681_v23 = vld [vmem:[%s16556_s1 + $0xf00] sm:$0xff] }
 0x6ec   : > { %6683 = vmatprep.mubr.f32.mxu1 %v5271_v4  ;;  %11022 = vmatprep.subr.bf16.mxu0 %v16617_v9  ;;  %v11041_v58 = vpack.c.bf16 %v9682_v33, %v9681_v23  ;;  %v9683_v4 = vld [vmem:[%s16556_s1 + $0xf10] sm:$0xff] }
 0x6ed   : > { %11187 = vmatpush3.bf16.msra.mxu1 %v11184_v61  ;;  %v11044_v40 = vpack.c.bf16 %v9684_v43, %v9683_v4 }
 0x6ee   : > { %11189 = vmatprep.subr.bf16.mxu1 %v11188_v28 }
 0x6ef   : > { %6684 = vmatmul.mubr.f32.gmra.mrb[148].mxu1 %v5207_v16  ;;  %11024 = vmatpush1.bf16.msra.mxu0 %v11023_v48  ;;  %v9686_v16 = vld [vmem:[%s16556_s1 + $0xf28] sm:$0xff] }
 0x6f0   : > { %6688 = vmatprep.mubr.f32.mxu1 %v5272_v34  ;;  %11025 = vmatprep.subr.bf16.mxu0 %v16617_v9  ;;  %v11047_v61 = vpack.c.bf16 %v9686_v16, %v9685_v52  ;;  %v9687_v34 = vld [vmem:[%s16556_s1 + $0xf30] sm:$0xff] }
 0x6f1   : > { %11191 = vmatpush3.bf16.msra.mxu1 %v11188_v28  ;;  %v11050_v32 = vpack.c.bf16 %v9688_v56, %v9687_v34 }
 0x6f3   : > { %6689 = vmatmul.mubr.f32.gmra.mrb[150].mxu1 %v5208_v14  ;;  %v9690_v14 = vld [vmem:[%s16556_s1 + $0xf48] sm:$0xff] }
 0x6f4   : > { %6693 = vmatprep.mubr.f32.mxu1 %v5273_v21  ;;  %v11053_v7 = vpack.c.bf16 %v9690_v14, %v9689_v31  ;;  %v9692_v21 = vld [vmem:[%s16556_s1 + $0xf58] sm:$0xff] }
 0x6f5   : > { %v11056_v28 = vpack.c.bf16 %v9692_v21, %v9691_v44 }
 0x6f7   : > { %6694 = vmatmul.mubr.f32.gmra.mrb[152].mxu1 %v15076_v15  ;;  %v9671_v15 = vld [vmem:[%s16556_s1 + $0xeb0] sm:$0xff] }
 0x6f8   : > { %6698 = vmatprep.mubr.f32.mxu1 %v5274_v29  ;;  %v11026_v13 = vpack.c.bf16 %v9672_v10, %v9671_v15 }
 0x6fa   : > { %11027 = vmatpush1.bf16.msra.mxu0 %v11026_v13 }
 0x6fb   : > { %6699 = vmatmul.mubr.f32.gmra.mrb[154].mxu1 %v15082_v41  ;;  %11028 = vmatprep.subr.bf16.mxu0 %v16617_v9  ;;  %v9673_v41 = vld [vmem:[%s16556_s1 + $0xec0] sm:$0xff] }
 0x6fc   : > { %6703 = vmatprep.mubr.f32.mxu1 %v5275_v27  ;;  %v11029_v22 = vpack.c.bf16 %v9674_v25, %v9673_v41  ;;  %v9693_v27 = vld [vmem:[%s16556_s1 + $0xf60] sm:$0xff]  ;;  %v9695_v25 = vld [vmem:[%s16556_s1 + $0xf70] sm:$0xff] }
 0x6fd   : > { %v11059_v60 = vpack.c.bf16 %v9694_v54, %v9693_v27 }
 0x6fe   : > { %11030 = vmatpush1.bf16.msra.mxu0 %v11029_v22  ;;  %v9696_v22 = vld [vmem:[%s16556_s1 + $0xf78] sm:$0xff] }
 0x6ff   : > { %6704 = vmatmul.mubr.f32.gmra.mrb[156].mxu1 %v15498_v17  ;;  %11031 = vmatprep.subr.bf16.mxu0 %v16617_v9 }
 0x700   : > { %6708 = vmatprep.mubr.f32.mxu1 %v5276_v8  ;;  %v15650_v8 = vld [vmem:[%s16557_s2 + $0x2] ss:$0 sm:$0xff] }
 0x703   : > { %6709 = vmatmul.mubr.f32.gmra.mrb[158].mxu1 %v15498_v17  ;;  %v9676_v17 = vld [vmem:[%s16556_s1 + $0xed8] sm:$0xff] }
 0x704   : > { %v11032_v39 = vpack.c.bf16 %v9676_v17, %v9675_v18  ;;  %v11062_v17 = vpack.c.bf16 %v9696_v22, %v9695_v25 }
 0x706   : > { %11033 = vmatpush1.bf16.msra.mxu0 %v11032_v39 }
 0x707   : > { %11034 = vmatprep.subr.bf16.mxu0 %v16617_v9 }
 0x70a   : > { %11036 = vmatpush1.bf16.msra.mxu0 %v11035_v38 }
 0x70b   : > { %11037 = vmatprep.subr.bf16.mxu0 %v16617_v9 }
 0x70e   : > { %11039 = vmatpush1.bf16.msra.mxu0 %v11038_v62 }
 0x70f   : > { %11040 = vmatprep.subr.bf16.mxu0 %v16617_v9 }
 0x712   : > { %11042 = vmatpush1.bf16.msra.mxu0 %v11041_v58 }
 0x713   : > { %11043 = vmatprep.subr.bf16.mxu0 %v16617_v9 }
 0x716   : > { %11045 = vmatpush1.bf16.msra.mxu0 %v11044_v40 }
 0x717   : > { %11046 = vmatprep.subr.bf16.mxu0 %v16617_v9 }
 0x71a   : > { %11048 = vmatpush1.bf16.msra.mxu0 %v11047_v61 }
 0x71b   : > { %11049 = vmatprep.subr.bf16.mxu0 %v16617_v9 }
 0x71e   : > { %11051 = vmatpush1.bf16.msra.mxu0 %v11050_v32 }
 0x71f   : > { %11052 = vmatprep.subr.bf16.mxu0 %v16617_v9 }
 0x722   : > { %11054 = vmatpush1.bf16.msra.mxu0 %v11053_v7 }
 0x723   : > { %11055 = vmatprep.subr.bf16.mxu0 %v16617_v9 }
 0x726   : > { %11057 = vmatpush1.bf16.msra.mxu0 %v11056_v28 }
 0x727   : > { %11058 = vmatprep.subr.bf16.mxu0 %v16617_v9 }
 0x72a   : > { %11060 = vmatpush1.bf16.msra.mxu0 %v11059_v60 }
 0x72b   : > { %11061 = vmatprep.subr.bf16.mxu0 %v16617_v9 }
 0x72c   : > { %v15637_v29 = vpop.f32.mrb[126].mxu0 }
 0x72d   : > { %v15645_v48 = vpop.f32.mrb[127].mxu0 }
 0x72e   : > { %11063 = vmatpush1.bf16.msra.mxu0 %v11062_v17 }
 0x72f   : > { %11064 = vmatprep.subr.bf16.mxu0 %v16617_v9 }
 0x75a   : > { %v6555_v15 = vpop.f32.mrb[96].mxu1 }
 0x75b   : > { %v11256_v10 = vadd.f32 %v15650_v8, %v6555_v15  ;;  %v6557_v13 = vpop.f32.mrb[97].mxu1 }
 0x75d   : > { %v6781_v41 = vadd.f32 %v11256_v10, %v15064_v3 }
 0x75e   : > { %v6560_v18 = vpop.f32.mrb[98].mxu1 }
 0x75f   : > { %v6939_v39 = vmax.f32 %v6781_v41, 0.0  ;;  %v11257_v3 = vadd.f32 %v15650_v8, %v6560_v18  ;;  %v6562_v26 = vpop.f32.mrb[99].mxu1 }
 0x761   : > { %6971 = vst [vmem:[%s15665_s25] sm:$0xff] %v6939_v39  ;;  %7003 = vst [vmem:[#allocation3 + $0x19] sm:$0xff] %v6939_v39  ;;  %v6786_v63 = vadd.f32 %v11257_v3, %v15061_v51  ;;  %8126 = vmatprep.mubr.f32.mxu0 %v6939_v39 }
 0x762   : > { %v6565_v38 = vpop.f32.mrb[100].mxu1 }
 0x763   : > { %v6940_v35 = vmax.f32 %v6786_v63, 0.0  ;;  %v11258_v49 = vadd.f32 %v15650_v8, %v6565_v38  ;;  %v6567_v62 = vpop.f32.mrb[101].mxu1 }
 0x765   : > { %6972 = vst [vmem:[%s15665_s25 + $0x8] sm:$0xff] %v6940_v35  ;;  %7004 = vst [vmem:[#allocation3 + $0x21] sm:$0xff] %v6940_v35  ;;  %v6791_v23 = vadd.f32 %v11258_v49, %v15072_v37 }
 0x766   : > { %v6570_v33 = vpop.f32.mrb[102].mxu1 }
 0x767   : > { %v6941_v58 = vmax.f32 %v6791_v23, 0.0  ;;  %v11259_v4 = vadd.f32 %v15650_v8, %v6570_v33  ;;  %v6572_v43 = vpop.f32.mrb[103].mxu1 }
 0x768   : > { %v15675_v40 = vld [vmem:[#allocation3 + $0x18] sm:$0xff] }
 0x769   : > { %6973 = vst [vmem:[%s15665_s25 + $0x10] sm:$0xff] %v6941_v58  ;;  %7005 = vst [vmem:[#allocation3 + $0x31] sm:$0xff] %v6941_v58  ;;  %v6796_v51 = vadd.f32 %v11259_v4, %v15069_v24  ;;  %8127 = vmatmul.mubr.f32.gmra.mrb[132].mxu0 %v15675_v40 }
 0x76a   : > { %v6575_v52 = vpop.f32.mrb[104].mxu1  ;;  %8131 = vmatprep.mubr.f32.mxu0 %v6940_v35 }
 0x76b   : > { %v6942_v16 = vmax.f32 %v6796_v51, 0.0  ;;  %v11260_v37 = vadd.f32 %v15650_v8, %v6575_v52  ;;  %v6577_v61 = vpop.f32.mrb[105].mxu1 }
 0x76c   : > { %v15681_v34 = vld [vmem:[#allocation3 + $0x20] sm:$0xff] }
 0x76d   : > { %6974 = vst [vmem:[%s15665_s25 + $0x18] sm:$0xff] %v6942_v16  ;;  %7006 = vst [vmem:[#allocation3 + $0x39] sm:$0xff] %v6942_v16  ;;  %v6801_v56 = vadd.f32 %v11260_v37, %v15084_v42  ;;  %8132 = vmatmul.mubr.f32.gmra.mrb[134].mxu0 %v15681_v34 }
 0x76e   : > { %v6580_v32 = vpop.f32.mrb[106].mxu1  ;;  %8136 = vmatprep.mubr.f32.mxu0 %v6941_v58 }
 0x76f   : > { %v6943_v24 = vmax.f32 %v6801_v56, 0.0  ;;  %v11261_v31 = vadd.f32 %v15650_v8, %v6580_v32  ;;  %v6582_v14 = vpop.f32.mrb[107].mxu1 }
 0x770   : > { %v15687_v7 = vld [vmem:[#allocation3 + $0x30] sm:$0xff] }
 0x771   : > { %6975 = vst [vmem:[%s15665_s25 + $0x20] sm:$0xff] %v6943_v24  ;;  %7007 = vst [vmem:[#allocation3 + $0x49] sm:$0xff] %v6943_v24  ;;  %v6806_v44 = vadd.f32 %v11261_v31, %v15079_v55  ;;  %8137 = vmatmul.mubr.f32.gmra.mrb[136].mxu0 %v15687_v7 }
 0x772   : > { %v6585_v21 = vpop.f32.mrb[108].mxu1  ;;  %8141 = vmatprep.mubr.f32.mxu0 %v6942_v16 }
 0x773   : > { %v6944_v42 = vmax.f32 %v6806_v44, 0.0  ;;  %v11262_v28 = vadd.f32 %v15650_v8, %v6585_v21  ;;  %v6587_v27 = vpop.f32.mrb[109].mxu1 }
 0x774   : > { %v15693_v54 = vld [vmem:[#allocation3 + $0x32] sm:$0xff]  ;;  %v15697_v15 = vld [vmem:[#allocation3 + $0x3a] sm:$0xff] }
 0x775   : > { %v15695_v60 = vld [vmem:[#allocation3 + $0x38] sm:$0xff]  ;;  %6976 = vst [vmem:[%s15665_s25 + $0x28] sm:$0xff] %v6944_v42  ;;  %7008 = vst [vmem:[#allocation3 + $0x51] sm:$0xff] %v6944_v42  ;;  %v6811_v10 = vadd.f32 %v11262_v28, %v15103_v5  ;;  %10248 = vmatprep.mubr.f32.mxu1 %v15693_v54 }
 0x776   : > { %8142 = vmatmul.mubr.f32.gmra.mrb[138].mxu0 %v15695_v60  ;;  %v6590_v55 = vpop.f32.mrb[110].mxu1  ;;  %10249 = vmatmul.mubr.f32.vlgmr.msra.gmra.mrb[160].mxu1 %v15697_v15 }
 0x777   : > { %8146 = vmatprep.mubr.f32.mxu0 %v6943_v24  ;;  %v6945_v13 = vmax.f32 %v6811_v10, 0.0  ;;  %v11263_v41 = vadd.f32 %v15650_v8, %v6590_v55  ;;  %v6592_v25 = vpop.f32.mrb[111].mxu1 }
 0x778   : > { %v15705_v22 = vld [vmem:[#allocation3 + $0x48] sm:$0xff] }
 0x779   : > { %6977 = vst [vmem:[%s15665_s25 + $0x30] sm:$0xff] %v6945_v13  ;;  %7009 = vst [vmem:[#allocation3 + $0x61] sm:$0xff] %v6945_v13  ;;  %v6816_v18 = vadd.f32 %v11263_v41, %v15101_v57 }
 0x77a   : > { %8147 = vmatmul.mubr.f32.gmra.mrb[140].mxu0 %v15705_v22  ;;  %v6595_v5 = vpop.f32.mrb[112].mxu1 }
 0x77b   : > { %8151 = vmatprep.mubr.f32.mxu0 %v6944_v42  ;;  %v6946_v17 = vmax.f32 %v6816_v18, 0.0  ;;  %v11264_v39 = vadd.f32 %v15650_v8, %v6595_v5  ;;  %v6597_v3 = vpop.f32.mrb[113].mxu1 }
 0x77c   : > { %v15711_v26 = vld [vmem:[#allocation3 + $0x4a] sm:$0xff]  ;;  %v15715_v38 = vld [vmem:[#allocation3 + $0x52] sm:$0xff] }
 0x77d   : > { %v15713_v63 = vld [vmem:[#allocation3 + $0x50] sm:$0xff]  ;;  %6978 = vst [vmem:[%s15665_s25 + $0x38] sm:$0xff] %v6946_v17  ;;  %7010 = vst [vmem:[#allocation3 + $0x69] sm:$0xff] %v6946_v17  ;;  %v6821_v35 = vadd.f32 %v11264_v39, %v15125_v50  ;;  %10251 = vmatprep.mubr.f32.mxu1 %v15711_v26 }
 0x77e   : > { %8152 = vmatmul.mubr.f32.gmra.mrb[142].mxu0 %v15713_v63  ;;  %v6600_v57 = vpop.f32.mrb[114].mxu1  ;;  %10252 = vmatmul.mubr.f32.gmra.mrb[162].mxu1 %v15715_v38 }
 0x77f   : > { %8156 = vmatprep.mubr.f32.mxu0 %v6945_v13  ;;  %v6947_v49 = vmax.f32 %v6821_v35, 0.0  ;;  %v11265_v62 = vadd.f32 %v15650_v8, %v6600_v57  ;;  %v6602_v23 = vpop.f32.mrb[115].mxu1 }
 0x780   : > { %v15723_v33 = vld [vmem:[#allocation3 + $0x60] sm:$0xff] }
 0x781   : > { %6979 = vst [vmem:[%s15665_s25 + $0x40] sm:$0xff] %v6947_v49  ;;  %7011 = vst [vmem:[#allocation3 + $0x79] sm:$0xff] %v6947_v49  ;;  %v6826_v58 = vadd.f32 %v11265_v62, %v15122_v53 }
 0x782   : > { %8157 = vmatmul.mubr.f32.gmra.mrb[144].mxu0 %v15723_v33  ;;  %v6605_v50 = vpop.f32.mrb[116].mxu1 }
 0x783   : > { %8161 = vmatprep.mubr.f32.mxu0 %v6946_v17  ;;  %v6948_v4 = vmax.f32 %v6826_v58, 0.0  ;;  %v11266_v43 = vadd.f32 %v15650_v8, %v6605_v50  ;;  %v6607_v51 = vpop.f32.mrb[117].mxu1 }
 0x784   : > { %v15729_v52 = vld [vmem:[#allocation3 + $0x62] sm:$0xff]  ;;  %v15733_v37 = vld [vmem:[#allocation3 + $0x6a] sm:$0xff] }
 0x785   : > { %v15731_v16 = vld [vmem:[#allocation3 + $0x68] sm:$0xff]  ;;  %6980 = vst [vmem:[%s15665_s25 + $0x48] sm:$0xff] %v6948_v4  ;;  %7012 = vst [vmem:[#allocation3 + $0x81] sm:$0xff] %v6948_v4  ;;  %v6831_v61 = vadd.f32 %v11266_v43, %v15149_v6  ;;  %10254 = vmatprep.mubr.f32.mxu1 %v15729_v52 }
 0x786   : > { %8162 = vmatmul.mubr.f32.gmra.mrb[146].mxu0 %v15731_v16  ;;  %v6610_v53 = vpop.f32.mrb[118].mxu1  ;;  %10255 = vmatmul.mubr.f32.gmra.mrb[164].mxu1 %v15733_v37 }
 0x787   : > { %8166 = vmatprep.mubr.f32.mxu0 %v6947_v49  ;;  %v6949_v56 = vmax.f32 %v6831_v61, 0.0  ;;  %v11267_v32 = vadd.f32 %v15650_v8, %v6610_v53  ;;  %v6612_v24 = vpop.f32.mrb[119].mxu1 }
 0x788   : > { %v15741_v31 = vld [vmem:[#allocation3 + $0x78] sm:$0xff] }
 0x789   : > { %6981 = vst [vmem:[%s15665_s25 + $0x50] sm:$0xff] %v6949_v56  ;;  %7013 = vst [vmem:[#allocation3 + $0x91] sm:$0xff] %v6949_v56  ;;  %v6836_v14 = vadd.f32 %v11267_v32, %v15146_v47 }
 0x78a   : > { %8167 = vmatmul.mubr.f32.gmra.mrb[148].mxu0 %v15741_v31  ;;  %v6615_v6 = vpop.f32.mrb[120].mxu1 }
 0x78b   : > { %8171 = vmatprep.mubr.f32.mxu0 %v6948_v4  ;;  %v6950_v44 = vmax.f32 %v6836_v14, 0.0  ;;  %v11268_v21 = vadd.f32 %v15650_v8, %v6615_v6  ;;  %v6617_v42 = vpop.f32.mrb[121].mxu1 }
 0x78c   : > { %v15747_v28 = vld [vmem:[#allocation3 + $0x7a] sm:$0xff]  ;;  %v15751_v10 = vld [vmem:[#allocation3 + $0x82] sm:$0xff] }
 0x78d   : > { %v15749_v27 = vld [vmem:[#allocation3 + $0x80] sm:$0xff]  ;;  %6982 = vst [vmem:[%s15665_s25 + $0x58] sm:$0xff] %v6950_v44  ;;  %7014 = vst [vmem:[#allocation3 + $0x99] sm:$0xff] %v6950_v44  ;;  %v6841_v55 = vadd.f32 %v11268_v21, %v15173_v12  ;;  %10257 = vmatprep.mubr.f32.mxu1 %v15747_v28 }
 0x78e   : > { %8172 = vmatmul.mubr.f32.gmra.mrb[150].mxu0 %v15749_v27  ;;  %v6620_v47 = vpop.f32.mrb[122].mxu1  ;;  %10258 = vmatmul.mubr.f32.gmra.mrb[166].mxu1 %v15751_v10 }
 0x78f   : > { %8176 = vmatprep.mubr.f32.mxu0 %v6949_v56  ;;  %v6951_v13 = vmax.f32 %v6841_v55, 0.0  ;;  %v11269_v41 = vadd.f32 %v15650_v8, %v6620_v47  ;;  %v6622_v25 = vpop.f32.mrb[123].mxu1 }
 0x790   : > { %v15759_v18 = vld [vmem:[#allocation3 + $0x90] sm:$0xff] }
 0x791   : > { %6983 = vst [vmem:[%s15665_s25 + $0x60] sm:$0xff] %v6951_v13  ;;  %7015 = vst [vmem:[#allocation3 + $0xa9] sm:$0xff] %v6951_v13  ;;  %v6846_v5 = vadd.f32 %v11269_v41, %v15170_v46 }
 0x792   : > { %8177 = vmatmul.mubr.f32.gmra.mrb[152].mxu0 %v15759_v18  ;;  %v6625_v12 = vpop.f32.mrb[124].mxu1 }
 0x793   : > { %8181 = vmatprep.mubr.f32.mxu0 %v6950_v44  ;;  %v6952_v17 = vmax.f32 %v6846_v5, 0.0  ;;  %v11270_v39 = vadd.f32 %v15650_v8, %v6625_v12  ;;  %v6627_v3 = vpop.f32.mrb[125].mxu1 }
 0x794   : > { %v15765_v35 = vld [vmem:[#allocation3 + $0x92] sm:$0xff]  ;;  %v15769_v49 = vld [vmem:[#allocation3 + $0x9a] sm:$0xff] }
 0x795   : > { %v15767_v57 = vld [vmem:[#allocation3 + $0x98] sm:$0xff]  ;;  %6984 = vst [vmem:[%s15665_s25 + $0x68] sm:$0xff] %v6952_v17  ;;  %7016 = vst [vmem:[#allocation3 + $0xb1] sm:$0xff] %v6952_v17  ;;  %v6851_v62 = vadd.f32 %v11270_v39, %v15197_v2  ;;  %10260 = vmatprep.mubr.f32.mxu1 %v15765_v35 }
 0x796   : > { %8182 = vmatmul.mubr.f32.gmra.mrb[154].mxu0 %v15767_v57  ;;  %v6630_v46 = vpop.f32.mrb[126].mxu1  ;;  %10261 = vmatmul.mubr.f32.gmra.mrb[168].mxu1 %v15769_v49 }
 0x797   : > { %8186 = vmatprep.mubr.f32.mxu0 %v6951_v13  ;;  %v6953_v23 = vmax.f32 %v6851_v62, 0.0  ;;  %v11271_v58 = vadd.f32 %v15650_v8, %v6630_v46  ;;  %v6632_v50 = vpop.f32.mrb[127].mxu1 }
 0x798   : > { %v15777_v4 = vld [vmem:[#allocation3 + $0xa8] sm:$0xff] }
 0x799   : > { %6985 = vst [vmem:[%s15665_s25 + $0x70] sm:$0xff] %v6953_v23  ;;  %7017 = vst [vmem:[#allocation3 + $0xc1] sm:$0xff] %v6953_v23  ;;  %v6856_v43 = vadd.f32 %v11271_v58, %v15194_v1 }
 0x79a   : > { %8187 = vmatmul.mubr.f32.gmra.mrb[156].mxu0 %v15777_v4  ;;  %v6635_v2 = vpop.f32.mrb[128].mxu1 }
 0x79b   : > { %8191 = vmatprep.mubr.f32.mxu0 %v6952_v17  ;;  %v6954_v51 = vmax.f32 %v6856_v43, 0.0  ;;  %v11272_v61 = vadd.f32 %v15650_v8, %v6635_v2  ;;  %v6637_v53 = vpop.f32.mrb[129].mxu1 }
 0x79c   : > { %v15783_v56 = vld [vmem:[#allocation3 + $0xaa] sm:$0xff]  ;;  %v15787_v24 = vld [vmem:[#allocation3 + $0xb2] sm:$0xff] }
 0x79d   : > { %v15785_v32 = vld [vmem:[#allocation3 + $0xb0] sm:$0xff]  ;;  %6986 = vst [vmem:[%s15665_s25 + $0x78] sm:$0xff] %v6954_v51  ;;  %7018 = vst [vmem:[#allocation3 + $0xc9] sm:$0xff] %v6954_v51  ;;  %v6861_v14 = vadd.f32 %v11272_v61, %v15221_v30  ;;  %10263 = vmatprep.mubr.f32.mxu1 %v15783_v56 }
 0x79e   : > { %8192 = vmatmul.mubr.f32.gmra.mrb[158].mxu0 %v15785_v32  ;;  %v6640_v1 = vpop.f32.mrb[130].mxu1  ;;  %10264 = vmatmul.mubr.f32.gmra.mrb[170].mxu1 %v15787_v24 }
 0x79f   : > { %8196 = vmatprep.mubr.f32.mxu0 %v6953_v23  ;;  %v6955_v6 = vmax.f32 %v6861_v14, 0.0  ;;  %v11273_v44 = vadd.f32 %v15650_v8, %v6640_v1  ;;  %v6642_v21 = vpop.f32.mrb[131].mxu1 }
 0x7a0   : > { %v15795_v42 = vld [vmem:[#allocation3 + $0xc0] sm:$0xff] }
 0x7a1   : > { %6987 = vst [vmem:[%s15665_s25 + $0x80] sm:$0xff] %v6955_v6  ;;  %7019 = vst [vmem:[#allocation3 + $0xd9] sm:$0xff] %v6955_v6  ;;  %v6866_v55 = vadd.f32 %v11273_v44, %v15218_v19 }
 0x7a2   : > { %8197 = vmatmul.mubr.f32.gmra.mrb[160].mxu0 %v15795_v42  ;;  %v6645_v30 = vpop.f32.mrb[132].mxu1 }
 0x7a3   : > { %8201 = vmatprep.mubr.f32.mxu0 %v6954_v51  ;;  %v6956_v47 = vmax.f32 %v6866_v55, 0.0  ;;  %v11274_v13 = vadd.f32 %v15650_v8, %v6645_v30  ;;  %v6647_v41 = vpop.f32.mrb[133].mxu1 }
 0x7a4   : > { %v15801_v25 = vld [vmem:[#allocation3 + $0xc2] sm:$0xff]  ;;  %v15805_v12 = vld [vmem:[#allocation3 + $0xca] sm:$0xff] }
 0x7a5   : > { %v15803_v5 = vld [vmem:[#allocation3 + $0xc8] sm:$0xff]  ;;  %6988 = vst [vmem:[%s15665_s25 + $0x88] sm:$0xff] %v6956_v47  ;;  %7020 = vst [vmem:[#allocation3 + $0xe1] sm:$0xff] %v6956_v47  ;;  %v6871_v17 = vadd.f32 %v11274_v13, %v15245_v59  ;;  %10266 = vmatprep.mubr.f32.mxu1 %v15801_v25 }
 0x7a6   : > { %8202 = vmatmul.mubr.f32.gmra.mrb[162].mxu0 %v15803_v5  ;;  %v6650_v19 = vpop.f32.mrb[134].mxu1  ;;  %10267 = vmatmul.mubr.f32.gmra.mrb[172].mxu1 %v15805_v12 }
 0x7a7   : > { %8206 = vmatprep.mubr.f32.mxu0 %v6955_v6  ;;  %v6957_v39 = vmax.f32 %v6871_v17, 0.0  ;;  %v11275_v3 = vadd.f32 %v15650_v8, %v6650_v19  ;;  %v6652_v62 = vpop.f32.mrb[135].mxu1 }
 0x7a8   : > { %v15813_v46 = vld [vmem:[#allocation3 + $0xd8] sm:$0xff] }
 0x7a9   : > { %6989 = vst [vmem:[%s15665_s25 + $0x90] sm:$0xff] %v6957_v39  ;;  %7021 = vst [vmem:[#allocation3 + $0xf1] sm:$0xff] %v6957_v39  ;;  %v6876_v23 = vadd.f32 %v11275_v3, %v15242_v0 }
 0x7aa   : > { %8207 = vmatmul.mubr.f32.gmra.mrb[164].mxu0 %v15813_v46  ;;  %v6655_v59 = vpop.f32.mrb[136].mxu1 }
 0x7ab   : > { %8211 = vmatprep.mubr.f32.mxu0 %v6956_v47  ;;  %v6958_v58 = vmax.f32 %v6876_v23, 0.0  ;;  %v11276_v50 = vadd.f32 %v15650_v8, %v6655_v59  ;;  %v6657_v43 = vpop.f32.mrb[137].mxu1 }
 0x7ac   : > { %v15819_v2 = vld [vmem:[#allocation3 + $0xda] sm:$0xff]  ;;  %v15823_v61 = vld [vmem:[#allocation3 + $0xe2] sm:$0xff] }
 0x7ad   : > { %v15821_v51 = vld [vmem:[#allocation3 + $0xe0] sm:$0xff]  ;;  %6990 = vst [vmem:[%s15665_s25 + $0x98] sm:$0xff] %v6958_v58  ;;  %7022 = vst [vmem:[#allocation3 + $0xf9] sm:$0xff] %v6958_v58  ;;  %v6881_v53 = vadd.f32 %v11276_v50, %v15269_v20  ;;  %10269 = vmatprep.mubr.f32.mxu1 %v15819_v2 }
 0x7ae   : > { %8212 = vmatmul.mubr.f32.gmra.mrb[166].mxu0 %v15821_v51  ;;  %v6660_v0 = vpop.f32.mrb[138].mxu1  ;;  %10270 = vmatmul.mubr.f32.gmra.mrb[174].mxu1 %v15823_v61 }
 0x7af   : > { %8216 = vmatprep.mubr.f32.mxu0 %v6957_v39  ;;  %v6959_v14 = vmax.f32 %v6881_v53, 0.0  ;;  %v11277_v1 = vadd.f32 %v15650_v8, %v6660_v0  ;;  %v6662_v6 = vpop.f32.mrb[139].mxu1 }
 0x7b0   : > { %v15831_v44 = vld [vmem:[#allocation3 + $0xf0] sm:$0xff] }
 0x7b1   : > { %6991 = vst [vmem:[%s15665_s25 + $0xa0] sm:$0xff] %v6959_v14  ;;  %7023 = vst [vmem:[#allocation3 + $0x109] sm:$0xff] %v6959_v14  ;;  %v6886_v21 = vadd.f32 %v11277_v1, %v15266_v11  ;;  %v16668_v1 = vld [vmem:[#allocation16_spill] sm:$0xff] }
 0x7b2   : > { %8217 = vmatmul.mubr.f32.gmra.mrb[168].mxu0 %v15831_v44  ;;  %v6665_v20 = vpop.f32.mrb[140].mxu1 }
 0x7b3   : > { %8221 = vmatprep.mubr.f32.mxu0 %v6958_v58  ;;  %v6960_v55 = vmax.f32 %v6886_v21, 0.0  ;;  %v11278_v30 = vadd.f32 %v15650_v8, %v6665_v20  ;;  %v6667_v47 = vpop.f32.mrb[141].mxu1 }
 0x7b4   : > { %v15837_v13 = vld [vmem:[#allocation3 + $0xf2] sm:$0xff]  ;;  %v15841_v17 = vld [vmem:[#allocation3 + $0xfa] sm:$0xff] }
 0x7b5   : > { %v15839_v41 = vld [vmem:[#allocation3 + $0xf8] sm:$0xff]  ;;  %6992 = vst [vmem:[%s15665_s25 + $0xa8] sm:$0xff] %v6960_v55  ;;  %7024 = vst [vmem:[#allocation3 + $0x111] sm:$0xff] %v6960_v55  ;;  %v6891_v19 = vadd.f32 %v11278_v30, %v15280_v45  ;;  %10272 = vmatprep.mubr.f32.mxu1 %v15837_v13  ;;  %v16669_v47 = vld [vmem:[#allocation13_spill] sm:$0xff] }
 0x7b6   : > { %8222 = vmatmul.mubr.f32.gmra.mrb[170].mxu0 %v15839_v41  ;;  %v6670_v11 = vpop.f32.mrb[142].mxu1  ;;  %10273 = vmatmul.mubr.f32.gmra.mrb[176].mxu1 %v15841_v17 }
 0x7b7   : > { %8226 = vmatprep.mubr.f32.mxu0 %v6959_v14  ;;  %v6961_v39 = vmax.f32 %v6891_v19, 0.0  ;;  %v11279_v3 = vadd.f32 %v15650_v8, %v6670_v11  ;;  %v6672_v62 = vpop.f32.mrb[143].mxu1 }
 0x7b8   : > { %v15849_v23 = vld [vmem:[#allocation3 + $0x108] sm:$0xff] }
 0x7b9   : > { %6993 = vst [vmem:[%s15665_s25 + $0xb0] sm:$0xff] %v6961_v39  ;;  %7025 = vst [vmem:[#allocation3 + $0x121] sm:$0xff] %v6961_v39  ;;  %v6896_v59 = vadd.f32 %v11279_v3, %v15277_v36 }
 0x7ba   : > { %8227 = vmatmul.mubr.f32.gmra.mrb[172].mxu0 %v15849_v23  ;;  %v6675_v45 = vpop.f32.mrb[144].mxu1 }
 0x7bb   : > { %8231 = vmatprep.mubr.f32.mxu0 %v6960_v55  ;;  %v6962_v58 = vmax.f32 %v6896_v59, 0.0  ;;  %v11280_v50 = vadd.f32 %v15650_v8, %v6675_v45  ;;  %v6677_v43 = vpop.f32.mrb[145].mxu1 }
 0x7bc   : > { %v15855_v53 = vld [vmem:[#allocation3 + $0x10a] sm:$0xff]  ;;  %v15859_v14 = vld [vmem:[#allocation3 + $0x112] sm:$0xff] }
 0x7bd   : > { %v15857_v0 = vld [vmem:[#allocation3 + $0x110] sm:$0xff]  ;;  %6994 = vst [vmem:[%s15665_s25 + $0xb8] sm:$0xff] %v6962_v58  ;;  %7026 = vst [vmem:[#allocation3 + $0x129] sm:$0xff] %v6962_v58  ;;  %v6901_v6 = vadd.f32 %v11280_v50, %v16668_v1  ;;  %10275 = vmatprep.mubr.f32.mxu1 %v15855_v53  ;;  %v16671_v43 = vld [vmem:[#allocation6_spill] sm:$0xff] }
 0x7be   : > { %8232 = vmatmul.mubr.f32.gmra.mrb[174].mxu0 %v15857_v0  ;;  %v6680_v36 = vpop.f32.mrb[146].mxu1  ;;  %10276 = vmatmul.mubr.f32.gmra.mrb[178].mxu1 %v15859_v14 }
 0x7bf   : > { %8236 = vmatprep.mubr.f32.mxu0 %v6961_v39  ;;  %v6963_v21 = vmax.f32 %v6901_v6, 0.0  ;;  %v11281_v20 = vadd.f32 %v15650_v8, %v6680_v36  ;;  %v6682_v55 = vpop.f32.mrb[147].mxu1 }
 0x7c0   : > { %v15867_v30 = vld [vmem:[#allocation3 + $0x120] sm:$0xff] }
 0x7c1   : > { %6995 = vst [vmem:[%s15665_s25 + $0xc0] sm:$0xff] %v6963_v21  ;;  %7027 = vst [vmem:[#allocation3 + $0x139] sm:$0xff] %v6963_v21  ;;  %v6906_v19 = vadd.f32 %v11281_v20, %v16669_v47  ;;  %v16672_v47 = vld [vmem:[#allocation15_spill] sm:$0xff] }
 0x7c2   : > { %8237 = vmatmul.mubr.f32.gmra.mrb[176].mxu0 %v15867_v30  ;;  %v6685_v11 = vpop.f32.mrb[148].mxu1 }
 0x7c3   : > { %8241 = vmatprep.mubr.f32.mxu0 %v6962_v58  ;;  %v6964_v3 = vmax.f32 %v6906_v19, 0.0  ;;  %v11282_v62 = vadd.f32 %v15650_v8, %v6685_v11  ;;  %v6687_v59 = vpop.f32.mrb[149].mxu1 }
 0x7c4   : > { %v15873_v39 = vld [vmem:[#allocation3 + $0x122] sm:$0xff]  ;;  %v15877_v50 = vld [vmem:[#allocation3 + $0x12a] sm:$0xff] }
 0x7c5   : > { %v15875_v45 = vld [vmem:[#allocation3 + $0x128] sm:$0xff]  ;;  %16670 = vst [vmem:[#allocation14_spill] sm:$0xff] %v15877_v50  ;;  %6996 = vst [vmem:[%s15665_s25 + $0xc8] sm:$0xff] %v6964_v3  ;;  %v6911_v1 = vadd.f32 %v11282_v62, %v16671_v43  ;;  %10278 = vmatprep.mubr.f32.mxu1 %v15873_v39 }
 0x7c6   : > { %7028 = vst [vmem:[#allocation3 + $0x141] sm:$0xff] %v6964_v3  ;;  %8242 = vmatmul.mubr.f32.gmra.mrb[178].mxu0 %v15875_v45  ;;  %v6690_v58 = vpop.f32.mrb[150].mxu1  ;;  %10279 = vmatmul.mubr.f32.gmra.mrb[180].mxu1 %v15877_v50 }
 0x7c7   : > { %8246 = vmatprep.mubr.f32.mxu0 %v6963_v21  ;;  %v6965_v6 = vmax.f32 %v6911_v1, 0.0  ;;  %v11283_v36 = vadd.f32 %v15650_v8, %v6690_v58  ;;  %v6692_v20 = vpop.f32.mrb[151].mxu1 }
 0x7c8   : > { %v15885_v55 = vld [vmem:[#allocation3 + $0x138] sm:$0xff] }
 0x7c9   : > { %6997 = vst [vmem:[%s15665_s25 + $0xd0] sm:$0xff] %v6965_v6  ;;  %7029 = vst [vmem:[#allocation3 + $0x151] sm:$0xff] %v6965_v6  ;;  %v6916_v19 = vadd.f32 %v11283_v36, %v16672_v47  ;;  %v16676_v36 = vld [vmem:[#allocation10_spill] sm:$0xff] }
 0x7ca   : > { %8247 = vmatmul.mubr.f32.gmra.mrb[180].mxu0 %v15885_v55  ;;  %v6695_v11 = vpop.f32.mrb[152].mxu1 }
 0x7cb   : > { %8251 = vmatprep.mubr.f32.mxu0 %v6964_v3  ;;  %v15890_v62 = vmax.f32 %v6916_v19, 0.0  ;;  %v11284_v59 = vadd.f32 %v15650_v8, %v6695_v11  ;;  %v6697_v21 = vpop.f32.mrb[153].mxu1 }
 0x7cd   : > { %16673 = vst [vmem:[#allocation9_spill] sm:$0xff] %v15890_v62  ;;  %v15893_v43 = vld [vmem:[#allocation3 + $0x13a] sm:$0xff]  ;;  %v15897_v58 = vld [vmem:[#allocation3 + $0x142] sm:$0xff]  ;;  %6998 = vst [vmem:[%s15665_s25 + $0xd8] sm:$0xff] %v15890_v62  ;;  %v6921_v20 = vadd.f32 %v11284_v59, %v16676_v36 }
 0x7ce   : > { %16674 = vst [vmem:[#allocation11_spill] sm:$0xff] %v15893_v43  ;;  %v15895_v1 = vld [vmem:[#allocation3 + $0x140] sm:$0xff]  ;;  %16675 = vst [vmem:[#allocation12_spill] sm:$0xff] %v15897_v58  ;;  %10281 = vmatprep.mubr.f32.mxu1 %v15893_v43  ;;  %v6700_v3 = vpop.f32.mrb[154].mxu1 }
 0x7cf   : > { %7030 = vst [vmem:[#allocation3 + $0x159] sm:$0xff] %v15890_v62  ;;  %8252 = vmatmul.mubr.f32.gmra.mrb[182].mxu0 %v15895_v1  ;;  %10282 = vmatmul.mubr.f32.gmra.mrb[182].mxu1 %v15897_v58  ;;  %v15906_v47 = vmax.f32 %v6921_v20, 0.0  ;;  %v11285_v19 = vadd.f32 %v15650_v8, %v6700_v3  ;;  %v6702_v11 = vpop.f32.mrb[155].mxu1  ;;  %v16678_v59 = vld [vmem:[#allocation7_spill] sm:$0xff] }
 0x7d0   : > { %8256 = vmatprep.mubr.f32.mxu0 %v6965_v6  ;;  %v15909_v21 = vld [vmem:[#allocation3 + $0x150] sm:$0xff] }
 0x7d1   : > { %16677 = vst [vmem:[#allocation8_spill] sm:$0xff] %v15906_v47  ;;  %6999 = vst [vmem:[%s15665_s25 + $0xe0] sm:$0xff] %v15906_v47  ;;  %v6926_v36 = vadd.f32 %v11285_v19, %v16678_v59 }
 0x7d2   : > { %7031 = vst [vmem:[#allocation3 + $0x169] sm:$0xff] %v15906_v47  ;;  %v6705_v43 = vpop.f32.mrb[156].mxu1 }
 0x7d3   : > { %8257 = vmatmul.mubr.f32.gmra.mrb[184].mxu0 %v15909_v21  ;;  %v15917_v6 = vmax.f32 %v6926_v36, 0.0  ;;  %v11286_v20 = vadd.f32 %v15650_v8, %v6705_v43  ;;  %v6707_v58 = vpop.f32.mrb[157].mxu1 }
 0x7d4   : > { %8261 = vmatprep.mubr.f32.mxu0 %v15890_v62 }
 0x7d5   : > { %16679 = vst [vmem:[#allocation5_spill] sm:$0xff] %v15917_v6  ;;  %7000 = vst [vmem:[%s15665_s25 + $0xe8] sm:$0xff] %v15917_v6  ;;  %v6931_v19 = vadd.f32 %v11286_v20, %v15645_v48 }
 0x7d6   : > { %v15920_v3 = vld [vmem:[#allocation3 + $0x152] sm:$0xff]  ;;  %v15924_v50 = vld [vmem:[#allocation3 + $0x15a] sm:$0xff]  ;;  %7032 = vst [vmem:[#allocation3 + $0x171] sm:$0xff] %v15917_v6  ;;  %v6710_v59 = vpop.f32.mrb[158].mxu1 }
 0x7d7   : > { %v15922_v11 = vld [vmem:[#allocation3 + $0x158] sm:$0xff]  ;;  %10284 = vmatprep.mubr.f32.mxu1 %v15920_v3  ;;  %v15934_v43 = vmax.f32 %v6931_v19, 0.0  ;;  %v11287_v58 = vadd.f32 %v15650_v8, %v6710_v59  ;;  %v6712_v36 = vpop.f32.mrb[159].mxu1  ;;  %v9697_v19 = vld [vmem:[%s16556_s1 + $0xf80] sm:$0xff] }
 0x7d8   : > { %8262 = vmatmul.mubr.f32.gmra.mrb[186].mxu0 %v15922_v11  ;;  %10285 = vmatmul.mubr.f32.gmra.mrb[184].mxu1 %v15924_v50  ;;  %v9698_v8 = vld [vmem:[%s16556_s1 + $0xf88] sm:$0xff] }
 0x7d9   : > { %8266 = vmatprep.mubr.f32.mxu0 %v15906_v47  ;;  %16680 = vst [vmem:[#allocation16_spill] sm:$0xff] %v15934_v43  ;;  %v15937_v62 = vld [vmem:[#allocation3 + $0x168] sm:$0xff]  ;;  %7001 = vst [vmem:[%s15665_s25 + $0xf0] sm:$0xff] %v15934_v43  ;;  %v6936_v48 = vadd.f32 %v11287_v58, %v15637_v29  ;;  %v11065_v58 = vpack.c.bf16 %v9698_v8, %v9697_v19 }
 0x7da   : > { %7033 = vst [vmem:[#allocation3 + $0x181] sm:$0xff] %v15934_v43  ;;  %v7163_v29 = vld [vmem:[#allocation3 + $0x2] sm:$0xff] }
 0x7db   : > { %v15945_v20 = vmax.f32 %v6936_v48, 0.0  ;;  %v9699_v48 = vld [vmem:[%s16556_s1 + $0xf90] sm:$0xff] }
 0x7dc   : > { %8267 = vmatmul.mubr.f32.gmra.mrb[188].mxu0 %v15937_v62 }
 0x7dd   : > { %8271 = vmatprep.mubr.f32.mxu0 %v15917_v6  ;;  %16681 = vst [vmem:[#allocation13_spill] sm:$0xff] %v15945_v20  ;;  %v15953_v59 = vld [vmem:[#allocation3 + $0x16a] sm:$0xff]  ;;  %v15957_v43 = vld [vmem:[#allocation3 + $0x172] sm:$0xff]  ;;  %7002 = vst [vmem:[%s15665_s25 + $0xf8] sm:$0xff] %v15945_v20 }
 0x7de   : > { %v15955_v36 = vld [vmem:[#allocation3 + $0x170] sm:$0xff]  ;;  %16682 = vst [vmem:[#allocation6_spill] sm:$0xff] %v15957_v43  ;;  %7034 = vst [vmem:[#allocation3 + $0x189] sm:$0xff] %v15945_v20  ;;  %10287 = vmatprep.mubr.f32.mxu1 %v15953_v59  ;;  %v9700_v6 = vld [vmem:[%s16556_s1 + $0xf98] sm:$0xff] }
 0x7df   : > { %10288 = vmatmul.mubr.f32.gmra.mrb[186].mxu1 %v15957_v43  ;;  %v7164_v20 = vld [vmem:[#allocation3 + $0xa] sm:$0xff]  ;;  %v11068_v47 = vpack.c.bf16 %v9700_v6, %v9699_v48  ;;  %v9702_v43 = vld [vmem:[%s16556_s1 + $0xfa8] sm:$0xff]  ;;  %v9707_v48 = vld [vmem:[%s16556_s1 + $0xfd0] sm:$0xff] }
 0x7e0   : > { %8272 = vmatmul.mubr.f32.gmra.mrb[190].mxu0 %v15955_v36  ;;  %v15987_v6 = vld [vmem:[#allocation3 + $0x1a] sm:$0xff] }
 0x7e1   : > { %8341 = vmatprep.mubr.f32.mxu0 %v15675_v40  ;;  %v9701_v40 = vld [vmem:[%s16556_s1 + $0xfa0] sm:$0xff] }
 0x7e4   : > { %8342 = vmatmul.mubr.f32.vlgmr.msra.gmra.mrb[128].mxu0 %v7163_v29  ;;  %v9703_v29 = vld [vmem:[%s16556_s1 + $0xfb0] sm:$0xff] }
 0x7e5   : > { %8346 = vmatprep.mubr.f32.mxu0 %v15681_v34  ;;  %11066 = vmatpush1.bf16.msra.mxu0 %v11065_v58  ;;  %v15977_v19 = vld [vmem:[#allocation3 + $0x182] sm:$0xff]  ;;  %v15979_v8 = vld [vmem:[#allocation3 + $0x18a] sm:$0xff]  ;;  %v11071_v34 = vpack.c.bf16 %v9702_v43, %v9701_v40 }
 0x7e6   : > { %11067 = vmatprep.subr.bf16.mxu0 %v16617_v9  ;;  %10290 = vmatprep.mubr.f32.mxu1 %v15977_v19  ;;  %v9704_v58 = vld [vmem:[%s16556_s1 + $0xfb8] sm:$0xff]  ;;  %v9705_v43 = vld [vmem:[%s16556_s1 + $0xfc0] sm:$0xff] }
 0x7e7   : > { %10291 = vmatmul.mubr.f32.gmra.mrb[188].mxu1 %v15979_v8  ;;  %v9708_v40 = vld [vmem:[%s16556_s1 + $0xfd8] sm:$0xff] }
 0x7e8   : > { %8347 = vmatmul.mubr.f32.gmra.mrb[130].mxu0 %v7164_v20  ;;  %v9706_v20 = vld [vmem:[%s16556_s1 + $0xfc8] sm:$0xff] }
 0x7e9   : > { %8351 = vmatprep.mubr.f32.mxu0 %v15687_v7  ;;  %11069 = vmatpush1.bf16.msra.mxu0 %v11068_v47  ;;  %v11074_v7 = vpack.c.bf16 %v9704_v58, %v9703_v29  ;;  %v15998_v47 = vld [vmem:[#allocation3 + $0x22] sm:$0xff]  ;;  %v9710_v29 = vld [vmem:[%s16556_s1 + $0xfe8] sm:$0xff] }
 0x7ea   : > { %11070 = vmatprep.subr.bf16.mxu0 %v16617_v9  ;;  %v9712_v58 = vld [vmem:[%s16556_s1 + $0xff8] sm:$0xff] }
 0x7ec   : > { %8352 = vmatmul.mubr.f32.gmra.mrb[132].mxu0 %v15987_v6 }
 0x7ed   : > { %8356 = vmatprep.mubr.f32.mxu0 %v15695_v60  ;;  %11072 = vmatpush1.bf16.msra.mxu0 %v11071_v34  ;;  %v11077_v60 = vpack.c.bf16 %v9706_v20, %v9705_v43  ;;  %v11080_v34 = vpack.c.bf16 %v9708_v40, %v9707_v48  ;;  %v9716_v43 = vld [vmem:[%s16556_s1 + $0x1018] sm:$0xff]  ;;  %v9718_v20 = vld [vmem:[%s16556_s1 + $0x1028] sm:$0xff] }
 0x7ee   : > { %11073 = vmatprep.subr.bf16.mxu0 %v16617_v9  ;;  %v9722_v48 = vld [vmem:[%s16556_s1 + $0x1048] sm:$0xff]  ;;  %v9724_v40 = vld [vmem:[%s16556_s1 + $0x1058] sm:$0xff] }
 0x7f0   : > { %8357 = vmatmul.mubr.f32.gmra.mrb[134].mxu0 %v15998_v47 }
 0x7f1   : > { %8361 = vmatprep.mubr.f32.mxu0 %v15705_v22  ;;  %11075 = vmatpush1.bf16.msra.mxu0 %v11074_v7  ;;  %v9709_v22 = vld [vmem:[%s16556_s1 + $0xfe0] sm:$0xff]  ;;  %v9714_v7 = vld [vmem:[%s16556_s1 + $0x1008] sm:$0xff] }
 0x7f2   : > { %11076 = vmatprep.subr.bf16.mxu0 %v16617_v9 }
 0x7f4   : > { %8362 = vmatmul.mubr.f32.gmra.mrb[136].mxu0 %v15693_v54  ;;  %v11083_v54 = vpack.c.bf16 %v9710_v29, %v9709_v22  ;;  %v9728_v22 = vld [vmem:[%s16556_s1 + $0x1078] sm:$0xff] }
 0x7f5   : > { %8366 = vmatprep.mubr.f32.mxu0 %v15713_v63  ;;  %11078 = vmatpush1.bf16.msra.mxu0 %v11077_v60  ;;  %v9711_v63 = vld [vmem:[%s16556_s1 + $0xff0] sm:$0xff]  ;;  %v9720_v60 = vld [vmem:[%s16556_s1 + $0x1038] sm:$0xff] }
 0x7f6   : > { %11079 = vmatprep.subr.bf16.mxu0 %v16617_v9  ;;  %v7292_v29 = vld [vmem:[#allocation3 + $0x21] sm:$0xff] }
 0x7f8   : > { %8367 = vmatmul.mubr.f32.gmra.mrb[138].mxu0 %v15697_v15  ;;  %v11086_v15 = vpack.c.bf16 %v9712_v58, %v9711_v63  ;;  %v9736_v58 = vld [vmem:[%s16556_s1 + $0x10b8] sm:$0xff] }
 0x7f9   : > { %8371 = vmatprep.mubr.f32.mxu0 %v15723_v33  ;;  %11081 = vmatpush1.bf16.msra.mxu0 %v11080_v34  ;;  %v9713_v33 = vld [vmem:[%s16556_s1 + $0x1000] sm:$0xff]  ;;  %v9726_v34 = vld [vmem:[%s16556_s1 + $0x1068] sm:$0xff] }
 0x7fa   : > { %11082 = vmatprep.subr.bf16.mxu0 %v16617_v9 }
 0x7fc   : > { %8372 = vmatmul.mubr.f32.gmra.mrb[140].mxu0 %v15711_v26  ;;  %v11089_v26 = vpack.c.bf16 %v9714_v7, %v9713_v33  ;;  %v7358_v7 = vld [vmem:[#allocation3 + $0x3a] sm:$0xff] }
 0x7fd   : > { %8376 = vmatprep.mubr.f32.mxu0 %v15731_v16  ;;  %11084 = vmatpush1.bf16.msra.mxu0 %v11083_v54  ;;  %v9715_v16 = vld [vmem:[%s16556_s1 + $0x1010] sm:$0xff]  ;;  %v7357_v54 = vld [vmem:[#allocation3 + $0x32] sm:$0xff] }
 0x7fe   : > { %11085 = vmatprep.subr.bf16.mxu0 %v16617_v9 }
 0x800   : > { %8377 = vmatmul.mubr.f32.gmra.mrb[142].mxu0 %v15715_v38  ;;  %v11092_v38 = vpack.c.bf16 %v9716_v43, %v9715_v16  ;;  %v9737_v43 = vld [vmem:[%s16556_s1 + $0x10c0] sm:$0xff] }
 0x801   : > { %8381 = vmatprep.mubr.f32.mxu0 %v15741_v31  ;;  %11087 = vmatpush1.bf16.msra.mxu0 %v11086_v15  ;;  %v9717_v31 = vld [vmem:[%s16556_s1 + $0x1020] sm:$0xff] }
 0x802   : > { %11088 = vmatprep.subr.bf16.mxu0 %v16617_v9  ;;  %v16191_v15 = vld [vmem:[#allocation3 + $0x31] sm:$0xff] }
 0x804   : > { %8382 = vmatmul.mubr.f32.gmra.mrb[144].mxu0 %v15729_v52  ;;  %v11095_v52 = vpack.c.bf16 %v9718_v20, %v9717_v31  ;;  %v16205_v31 = vld [vmem:[#allocation3 + $0x39] sm:$0xff]  ;;  %v7359_v20 = vld [vmem:[#allocation3 + $0x4a] sm:$0xff] }
 0x805   : > { %8386 = vmatprep.mubr.f32.mxu0 %v15749_v27  ;;  %11090 = vmatpush1.bf16.msra.mxu0 %v11089_v26  ;;  %v9719_v27 = vld [vmem:[%s16556_s1 + $0x1030] sm:$0xff] }
 0x806   : > { %11091 = vmatprep.subr.bf16.mxu0 %v16617_v9 }
 0x808   : > { %8387 = vmatmul.mubr.f32.gmra.mrb[146].mxu0 %v15733_v37  ;;  %v11098_v37 = vpack.c.bf16 %v9720_v60, %v9719_v27  ;;  %v9739_v27 = vld [vmem:[%s16556_s1 + $0x10d0] sm:$0xff]  ;;  %v9740_v60 = vld [vmem:[%s16556_s1 + $0x10d8] sm:$0xff] }
 0x809   : > { %8391 = vmatprep.mubr.f32.mxu0 %v15759_v18  ;;  %11093 = vmatpush1.bf16.msra.mxu0 %v11092_v38  ;;  %v9721_v18 = vld [vmem:[%s16556_s1 + $0x1040] sm:$0xff]  ;;  %v9738_v38 = vld [vmem:[%s16556_s1 + $0x10c8] sm:$0xff] }
 0x80a   : > { %11094 = vmatprep.subr.bf16.mxu0 %v16617_v9 }
 0x80c   : > { %8392 = vmatmul.mubr.f32.gmra.mrb[148].mxu0 %v15747_v28  ;;  %v11101_v28 = vpack.c.bf16 %v9722_v48, %v9721_v18  ;;  %v7360_v48 = vld [vmem:[#allocation3 + $0x52] sm:$0xff] }
 0x80d   : > { %8396 = vmatprep.mubr.f32.mxu0 %v15767_v57  ;;  %11096 = vmatpush1.bf16.msra.mxu0 %v11095_v52  ;;  %v9723_v57 = vld [vmem:[%s16556_s1 + $0x1050] sm:$0xff]  ;;  %v11125_v52 = vpack.c.bf16 %v9738_v38, %v9737_v43  ;;  %v9749_v43 = vld [vmem:[%s16556_s1 + $0x1120] sm:$0xff]  ;;  %v9750_v38 = vld [vmem:[%s16556_s1 + $0x1128] sm:$0xff] }
 0x80e   : > { %11097 = vmatprep.subr.bf16.mxu0 %v16617_v9 }
 0x810   : > { %8397 = vmatmul.mubr.f32.gmra.mrb[150].mxu0 %v15751_v10  ;;  %v11104_v10 = vpack.c.bf16 %v9724_v40, %v9723_v57  ;;  %v11128_v57 = vpack.c.bf16 %v9740_v60, %v9739_v27  ;;  %v9741_v40 = vld [vmem:[%s16556_s1 + $0x10e0] sm:$0xff]  ;;  %v11143_v27 = vpack.c.bf16 %v9750_v38, %v9749_v43  ;;  %v9751_v60 = vld [vmem:[%s16556_s1 + $0x1130] sm:$0xff]  ;;  %v9758_v38 = vld [vmem:[%s16556_s1 + $0x1168] sm:$0xff] }
 0x811   : > { %8401 = vmatprep.mubr.f32.mxu0 %v15777_v4  ;;  %11099 = vmatpush1.bf16.msra.mxu0 %v11098_v37  ;;  %v9725_v4 = vld [vmem:[%s16556_s1 + $0x1060] sm:$0xff] }
 0x812   : > { %11100 = vmatprep.subr.bf16.mxu0 %v16617_v9  ;;  %v16215_v37 = vld [vmem:[#allocation3 + $0x49] sm:$0xff] }
 0x813   : > { %v9757_v43 = vld [vmem:[%s16556_s1 + $0x1160] sm:$0xff] }
 0x814   : > { %8402 = vmatmul.mubr.f32.gmra.mrb[152].mxu0 %v15765_v35  ;;  %v11107_v35 = vpack.c.bf16 %v9726_v34, %v9725_v4  ;;  %v16229_v4 = vld [vmem:[#allocation3 + $0x51] sm:$0xff]  ;;  %v7361_v34 = vld [vmem:[#allocation3 + $0x62] sm:$0xff] }
 0x815   : > { %8406 = vmatprep.mubr.f32.mxu0 %v15785_v32  ;;  %11102 = vmatpush1.bf16.msra.mxu0 %v11101_v28  ;;  %v9727_v32 = vld [vmem:[%s16556_s1 + $0x1070] sm:$0xff] }
 0x816   : > { %11103 = vmatprep.subr.bf16.mxu0 %v16617_v9 }
 0x818   : > { %8407 = vmatmul.mubr.f32.gmra.mrb[154].mxu0 %v15769_v49  ;;  %v11110_v49 = vpack.c.bf16 %v9728_v22, %v9727_v32  ;;  %v9743_v32 = vld [vmem:[%s16556_s1 + $0x10f0] sm:$0xff]  ;;  %v9744_v22 = vld [vmem:[%s16556_s1 + $0x10f8] sm:$0xff] }
 0x819   : > { %8411 = vmatprep.mubr.f32.mxu0 %v15795_v42  ;;  %11105 = vmatpush1.bf16.msra.mxu0 %v11104_v10  ;;  %v16684_v42 = vld [vmem:[#allocation11_spill] sm:$0xff]  ;;  %v9742_v10 = vld [vmem:[%s16556_s1 + $0x10e8] sm:$0xff] }
 0x81a   : > { %11106 = vmatprep.subr.bf16.mxu0 %v16617_v9 }
 0x81c   : > { %8412 = vmatmul.mubr.f32.gmra.mrb[156].mxu0 %v15783_v56  ;;  %v16683_v56 = vld [vmem:[#allocation14_spill] sm:$0xff] }
 0x81d   : > { %8416 = vmatprep.mubr.f32.mxu0 %v15803_v5  ;;  %11108 = vmatpush1.bf16.msra.mxu0 %v11107_v35  ;;  %v16685_v5 = vld [vmem:[#allocation12_spill] sm:$0xff]  ;;  %v11131_v35 = vpack.c.bf16 %v9742_v10, %v9741_v40  ;;  %v7366_v10 = vld [vmem:[#allocation3 + $0x9a] sm:$0xff] }
 0x81e   : > { %11109 = vmatprep.subr.bf16.mxu0 %v16617_v9 }
 0x820   : > { %8417 = vmatmul.mubr.f32.gmra.mrb[158].mxu0 %v15787_v24 }
 0x821   : > { %8421 = vmatprep.mubr.f32.mxu0 %v15813_v46  ;;  %11111 = vmatpush1.bf16.msra.mxu0 %v11110_v49  ;;  %v16239_v49 = vld [vmem:[#allocation3 + $0x61] sm:$0xff] }
 0x822   : > { %11112 = vmatprep.subr.bf16.mxu0 %v16617_v9 }
 0x824   : > { %8422 = vmatmul.mubr.f32.gmra.mrb[160].mxu0 %v15801_v25 }
 0x825   : > { %8426 = vmatprep.mubr.f32.mxu0 %v15821_v51 }
 0x828   : > { %8427 = vmatmul.mubr.f32.gmra.mrb[162].mxu0 %v15805_v12 }
 0x829   : > { %8431 = vmatprep.mubr.f32.mxu0 %v15831_v44 }
 0x82c   : > { %8432 = vmatmul.mubr.f32.gmra.mrb[164].mxu0 %v15819_v2  ;;  %v16147_v2 = vld [vmem:[#allocation3 + $0x180] sm:$0xff] }
 0x82d   : > { %8436 = vmatprep.mubr.f32.mxu0 %v15839_v41  ;;  %v9729_v41 = vld [vmem:[%s16556_s1 + $0x1080] sm:$0xff] }
 0x830   : > { %8437 = vmatmul.mubr.f32.gmra.mrb[166].mxu0 %v15823_v61  ;;  %v16153_v61 = vld [vmem:[#allocation3 + $0x188] sm:$0xff] }
 0x831   : > { %8441 = vmatprep.mubr.f32.mxu0 %v15849_v23  ;;  %v9730_v23 = vld [vmem:[%s16556_s1 + $0x1088] sm:$0xff] }
 0x834   : > { %8442 = vmatmul.mubr.f32.gmra.mrb[168].mxu0 %v15837_v13 }
 0x835   : > { %8446 = vmatprep.mubr.f32.mxu0 %v15857_v0  ;;  %v16686_v0 = vld [vmem:[#allocation6_spill] sm:$0xff] }
 0x838   : > { %8447 = vmatmul.mubr.f32.gmra.mrb[170].mxu0 %v15841_v17 }
 0x839   : > { %8451 = vmatprep.mubr.f32.mxu0 %v15867_v30  ;;  %v11113_v30 = vpack.c.bf16 %v9730_v23, %v9729_v41  ;;  %v7362_v23 = vld [vmem:[#allocation3 + $0x6a] sm:$0xff] }
 0x83c   : > { %8452 = vmatmul.mubr.f32.gmra.mrb[172].mxu0 %v15855_v53 }
 0x83d   : > { %8456 = vmatprep.mubr.f32.mxu0 %v15875_v45  ;;  %v9731_v45 = vld [vmem:[%s16556_s1 + $0x1090] sm:$0xff] }
 0x840   : > { %8457 = vmatmul.mubr.f32.gmra.mrb[174].mxu0 %v15859_v14 }
 0x841   : > { %8461 = vmatprep.mubr.f32.mxu0 %v15885_v55  ;;  %v9732_v55 = vld [vmem:[%s16556_s1 + $0x1098] sm:$0xff] }
 0x844   : > { %8462 = vmatmul.mubr.f32.gmra.mrb[176].mxu0 %v15873_v39 }
 0x845   : > { %8466 = vmatprep.mubr.f32.mxu0 %v15895_v1 }
 0x848   : > { %8467 = vmatmul.mubr.f32.gmra.mrb[178].mxu0 %v16683_v56 }
 0x849   : > { %8471 = vmatprep.mubr.f32.mxu0 %v15909_v21  ;;  %v16132_v24 = vpop.f32.mrb[160].mxu1 }
 0x84a   : > { %v16135_v25 = vpop.f32.mrb[161].mxu1 }
 0x84c   : > { %8472 = vmatmul.mubr.f32.gmra.mrb[180].mxu0 %v16684_v42 }
 0x84d   : > { %8476 = vmatprep.mubr.f32.mxu0 %v15922_v11  ;;  %v11116_v11 = vpack.c.bf16 %v9732_v55, %v9731_v45  ;;  %v11134_v45 = vpack.c.bf16 %v9744_v22, %v9743_v32  ;;  %v9745_v55 = vld [vmem:[%s16556_s1 + $0x1100] sm:$0xff]  ;;  %v9754_v22 = vld [vmem:[%s16556_s1 + $0x1148] sm:$0xff] }
 0x84e   : > { %v9753_v32 = vld [vmem:[%s16556_s1 + $0x1140] sm:$0xff] }
 0x850   : > { %8477 = vmatmul.mubr.f32.gmra.mrb[182].mxu0 %v16685_v5 }
 0x851   : > { %8481 = vmatprep.mubr.f32.mxu0 %v15937_v62  ;;  %v16140_v12 = vpop.f32.mrb[162].mxu1  ;;  %v7291_v62 = vld [vmem:[#allocation3 + $0x19] sm:$0xff] }
 0x852   : > { %v16143_v46 = vpop.f32.mrb[163].mxu1 }
 0x854   : > { %8482 = vmatmul.mubr.f32.gmra.mrb[184].mxu0 %v15920_v3 }
 0x855   : > { %8486 = vmatprep.mubr.f32.mxu0 %v15955_v36  ;;  %v9733_v36 = vld [vmem:[%s16556_s1 + $0x10a0] sm:$0xff] }
 0x858   : > { %8487 = vmatmul.mubr.f32.gmra.mrb[186].mxu0 %v15924_v50 }
 0x859   : > { %8491 = vmatprep.mubr.f32.mxu0 %v16147_v2  ;;  %v16150_v51 = vpop.f32.mrb[164].mxu1 }
 0x85a   : > { %v16155_v44 = vpop.f32.mrb[165].mxu1 }
 0x85c   : > { %8492 = vmatmul.mubr.f32.gmra.mrb[188].mxu0 %v15953_v59 }
 0x85d   : > { %8496 = vmatprep.mubr.f32.mxu0 %v16153_v61 }
 0x860   : > { %8497 = vmatmul.mubr.f32.gmra.mrb[190].mxu0 %v16686_v0 }
 0x861   : > { %8566 = vmatprep.mubr.f32.mxu0 %v15987_v6  ;;  %v16172_v1 = vpop.f32.mrb[166].mxu1  ;;  %v9734_v6 = vld [vmem:[%s16556_s1 + $0x10a8] sm:$0xff] }
 0x862   : > { %v16174_v21 = vpop.f32.mrb[167].mxu1  ;;  %v11119_v63 = vpack.c.bf16 %v9734_v6, %v9733_v36  ;;  %v7363_v36 = vld [vmem:[#allocation3 + $0x7a] sm:$0xff] }
 0x864   : > { %8567 = vmatmul.mubr.f32.vlgmr.msra.gmra.mrb[128].mxu0 %v7291_v62  ;;  %v9746_v62 = vld [vmem:[%s16556_s1 + $0x1108] sm:$0xff] }
 0x865   : > { %8571 = vmatprep.mubr.f32.mxu0 %v15998_v47  ;;  %11114 = vmatpush1.bf16.msra.mxu0 %v11113_v30  ;;  %v9735_v47 = vld [vmem:[%s16556_s1 + $0x10b0] sm:$0xff]  ;;  %v11137_v6 = vpack.c.bf16 %v9746_v62, %v9745_v55  ;;  %v11149_v55 = vpack.c.bf16 %v9754_v22, %v9753_v32  ;;  %v7370_v22 = vld [vmem:[#allocation3 + $0xca] sm:$0xff] }
 0x866   : > { %11115 = vmatprep.subr.bf16.mxu0 %v16617_v9  ;;  %v11122_v16 = vpack.c.bf16 %v9736_v58, %v9735_v47  ;;  %v7364_v58 = vld [vmem:[#allocation3 + $0x82] sm:$0xff] }
 0x867   : > { %v9755_v62 = vld [vmem:[%s16556_s1 + $0x1150] sm:$0xff] }
 0x868   : > { %8572 = vmatmul.mubr.f32.gmra.mrb[130].mxu0 %v7292_v29  ;;  %v9747_v29 = vld [vmem:[%s16556_s1 + $0x1110] sm:$0xff] }
 0x869   : > { %8576 = vmatprep.mubr.f32.mxu0 %v7357_v54  ;;  %11117 = vmatpush1.bf16.msra.mxu0 %v11116_v11  ;;  %v16193_v33 = vpop.f32.mrb[168].mxu1  ;;  %v16253_v11 = vld [vmem:[#allocation3 + $0x69] sm:$0xff] }
 0x86a   : > { %11118 = vmatprep.subr.bf16.mxu0 %v16617_v9  ;;  %v16196_v26 = vpop.f32.mrb[169].mxu1  ;;  %v9748_v54 = vld [vmem:[%s16556_s1 + $0x1118] sm:$0xff] }
 0x86c   : > { %8577 = vmatmul.mubr.f32.gmra.mrb[132].mxu0 %v16191_v15 }
 0x86d   : > { %8581 = vmatprep.mubr.f32.mxu0 %v7358_v7  ;;  %11120 = vmatpush1.bf16.msra.mxu0 %v11119_v63  ;;  %v16263_v63 = vld [vmem:[#allocation3 + $0x79] sm:$0xff] }
 0x86e   : > { %11121 = vmatprep.subr.bf16.mxu0 %v16617_v9 }
 0x870   : > { %8582 = vmatmul.mubr.f32.gmra.mrb[134].mxu0 %v16205_v31 }
 0x871   : > { %8586 = vmatprep.mubr.f32.mxu0 %v7359_v20  ;;  %11123 = vmatpush1.bf16.msra.mxu0 %v11122_v16  ;;  %v16217_v18 = vpop.f32.mrb[170].mxu1  ;;  %v11140_v16 = vpack.c.bf16 %v9748_v54, %v9747_v29  ;;  %v16277_v20 = vld [vmem:[#allocation3 + $0x81] sm:$0xff]  ;;  %v7368_v54 = vld [vmem:[#allocation3 + $0xb2] sm:$0xff] }
 0x872   : > { %11124 = vmatprep.subr.bf16.mxu0 %v16617_v9  ;;  %v16220_v28 = vpop.f32.mrb[171].mxu1 }
 0x874   : > { %8587 = vmatmul.mubr.f32.gmra.mrb[136].mxu0 %v16215_v37 }
 0x875   : > { %8591 = vmatprep.mubr.f32.mxu0 %v7360_v48  ;;  %11126 = vmatpush1.bf16.msra.mxu0 %v11125_v52  ;;  %v7365_v52 = vld [vmem:[#allocation3 + $0x92] sm:$0xff]  ;;  %v9752_v48 = vld [vmem:[%s16556_s1 + $0x1138] sm:$0xff] }
 0x876   : > { %11127 = vmatprep.subr.bf16.mxu0 %v16617_v9 }
 0x878   : > { %8592 = vmatmul.mubr.f32.gmra.mrb[138].mxu0 %v16229_v4 }
 0x879   : > { %8596 = vmatprep.mubr.f32.mxu0 %v7361_v34  ;;  %11129 = vmatpush1.bf16.msra.mxu0 %v11128_v57  ;;  %v16241_v41 = vpop.f32.mrb[172].mxu1  ;;  %v16287_v57 = vld [vmem:[#allocation3 + $0x91] sm:$0xff] }
 0x87a   : > { %11130 = vmatprep.subr.bf16.mxu0 %v16617_v9  ;;  %v16244_v30 = vpop.f32.mrb[173].mxu1 }
 0x87c   : > { %8597 = vmatmul.mubr.f32.gmra.mrb[140].mxu0 %v16239_v49 }
 0x87d   : > { %8601 = vmatprep.mubr.f32.mxu0 %v7362_v23  ;;  %11132 = vmatpush1.bf16.msra.mxu0 %v11131_v35  ;;  %v11146_v35 = vpack.c.bf16 %v9752_v48, %v9751_v60  ;;  %v16301_v23 = vld [vmem:[#allocation3 + $0x99] sm:$0xff]  ;;  %v11155_v60 = vpack.c.bf16 %v9758_v38, %v9757_v43  ;;  %v7372_v43 = vld [vmem:[#allocation3 + $0xe2] sm:$0xff] }
 0x87e   : > { %11133 = vmatprep.subr.bf16.mxu0 %v16617_v9  ;;  %v9759_v48 = vld [vmem:[%s16556_s1 + $0x1170] sm:$0xff] }
 0x880   : > { %8602 = vmatmul.mubr.f32.gmra.mrb[142].mxu0 %v16253_v11 }
 0x881   : > { %8606 = vmatprep.mubr.f32.mxu0 %v7363_v36  ;;  %11135 = vmatpush1.bf16.msra.mxu0 %v11134_v45  ;;  %v16265_v47 = vpop.f32.mrb[174].mxu1  ;;  %v7367_v45 = vld [vmem:[#allocation3 + $0xaa] sm:$0xff] }
 0x882   : > { %11136 = vmatprep.subr.bf16.mxu0 %v16617_v9  ;;  %v16268_v7 = vpop.f32.mrb[175].mxu1  ;;  %v9756_v36 = vld [vmem:[%s16556_s1 + $0x1158] sm:$0xff] }
 0x884   : > { %8607 = vmatmul.mubr.f32.gmra.mrb[144].mxu0 %v16263_v63 }
 0x885   : > { %8611 = vmatprep.mubr.f32.mxu0 %v7364_v58  ;;  %11138 = vmatpush1.bf16.msra.mxu0 %v11137_v6  ;;  %v16311_v6 = vld [vmem:[#allocation3 + $0xa9] sm:$0xff] }
 0x886   : > { %11139 = vmatprep.subr.bf16.mxu0 %v16617_v9 }
 0x888   : > { %8612 = vmatmul.mubr.f32.gmra.mrb[146].mxu0 %v16277_v20 }
 0x889   : > { %8616 = vmatprep.mubr.f32.mxu0 %v7365_v52  ;;  %11141 = vmatpush1.bf16.msra.mxu0 %v11140_v16  ;;  %v16289_v40 = vpop.f32.mrb[176].mxu1  ;;  %v11152_v16 = vpack.c.bf16 %v9756_v36, %v9755_v62  ;;  %v16325_v52 = vld [vmem:[#allocation3 + $0xb1] sm:$0xff]  ;;  %v16343_v62 = vld [vmem:[#allocation3 + $0xc9] sm:$0xff]  ;;  %v7371_v36 = vld [vmem:[#allocation3 + $0xda] sm:$0xff] }
 0x88a   : > { %11142 = vmatprep.subr.bf16.mxu0 %v16617_v9  ;;  %v16292_v34 = vpop.f32.mrb[177].mxu1 }
 0x88c   : > { %8617 = vmatmul.mubr.f32.gmra.mrb[148].mxu0 %v16287_v57 }
 0x88d   : > { %8621 = vmatprep.mubr.f32.mxu0 %v7366_v10  ;;  %11144 = vmatpush1.bf16.msra.mxu0 %v11143_v27  ;;  %v7369_v27 = vld [vmem:[#allocation3 + $0xc2] sm:$0xff] }
 0x88e   : > { %11145 = vmatprep.subr.bf16.mxu0 %v16617_v9  ;;  %v9760_v10 = vld [vmem:[%s16556_s1 + $0x1178] sm:$0xff] }
 0x890   : > { %8622 = vmatmul.mubr.f32.gmra.mrb[150].mxu0 %v16301_v23 }
 0x891   : > { %8626 = vmatprep.mubr.f32.mxu0 %v7367_v45  ;;  %11147 = vmatpush1.bf16.msra.mxu0 %v11146_v35  ;;  %v16313_v29 = vpop.f32.mrb[178].mxu1  ;;  %v16335_v35 = vld [vmem:[#allocation3 + $0xc1] sm:$0xff] }
 0x892   : > { %11148 = vmatprep.subr.bf16.mxu0 %v16617_v9  ;;  %v16316_v58 = vpop.f32.mrb[179].mxu1 }
 0x894   : > { %8627 = vmatmul.mubr.f32.gmra.mrb[152].mxu0 %v16311_v6 }
 0x895   : > { %8631 = vmatprep.mubr.f32.mxu0 %v7368_v54  ;;  %11150 = vmatpush1.bf16.msra.mxu0 %v11149_v55  ;;  %v11158_v55 = vpack.c.bf16 %v9760_v10, %v9759_v48  ;;  %v16346_v54 = vld [vmem:[#allocation3 + $0xd9] sm:$0xff] }
 0x896   : > { %11151 = vmatprep.subr.bf16.mxu0 %v16617_v9  ;;  %v16365_v10 = vld [vmem:[#allocation3 + $0xf9] sm:$0xff] }
 0x898   : > { %8632 = vmatmul.mubr.f32.gmra.mrb[154].mxu0 %v16325_v52 }
 0x899   : > { %8636 = vmatprep.mubr.f32.mxu0 %v7369_v27  ;;  %11153 = vmatpush1.bf16.msra.mxu0 %v11152_v16  ;;  %v16337_v32 = vpop.f32.mrb[180].mxu1  ;;  %v16353_v27 = vld [vmem:[#allocation3 + $0xe1] sm:$0xff] }
 0x89a   : > { %11154 = vmatprep.subr.bf16.mxu0 %v16617_v9  ;;  %v16340_v45 = vpop.f32.mrb[181].mxu1 }
 0x89c   : > { %8637 = vmatmul.mubr.f32.gmra.mrb[156].mxu0 %v16335_v35 }
 0x89d   : > { %8641 = vmatprep.mubr.f32.mxu0 %v7370_v22  ;;  %11156 = vmatpush1.bf16.msra.mxu0 %v11155_v60  ;;  %v16369_v22 = vld [vmem:[#allocation3 + $0x109] sm:$0xff] }
 0x89e   : > { %11157 = vmatprep.subr.bf16.mxu0 %v16617_v9  ;;  %v16357_v9 = vld [vmem:[#allocation3 + $0xf1] sm:$0xff] }
 0x8a0   : > { %8642 = vmatmul.mubr.f32.gmra.mrb[158].mxu0 %v16343_v62 }
 0x8a1   : > { %8646 = vmatprep.mubr.f32.mxu0 %v7371_v36  ;;  %11159 = vmatpush1.bf16.msra.mxu0 %v11158_v55  ;;  %v16377_v36 = vld [vmem:[#allocation3 + $0x111] sm:$0xff] }
 0x8a2   : > { %v16348_v16 = vpop.f32.mrb[182].mxu1 }
 0x8a3   : > { %v16351_v38 = vpop.f32.mrb[183].mxu1 }
 0x8a4   : > { %8647 = vmatmul.mubr.f32.gmra.mrb[160].mxu0 %v16346_v54 }
 0x8a5   : > { %8651 = vmatprep.mubr.f32.mxu0 %v7372_v43 }
 0x8a8   : > { %8652 = vmatmul.mubr.f32.gmra.mrb[162].mxu0 %v16353_v27 }
 0x8a9   : > { %8656 = vmatprep.mubr.f32.mxu0 %v15837_v13 }
 0x8ab   : > { %v16359_v60 = vpop.f32.mrb[184].mxu1 }
 0x8ac   : > { %8657 = vmatmul.mubr.f32.gmra.mrb[164].mxu0 %v16357_v9  ;;  %v16362_v48 = vpop.f32.mrb[185].mxu1 }
 0x8ad   : > { %8661 = vmatprep.mubr.f32.mxu0 %v15841_v17  ;;  %v16381_v17 = vld [vmem:[#allocation3 + $0x121] sm:$0xff] }
 0x8b0   : > { %8662 = vmatmul.mubr.f32.gmra.mrb[166].mxu0 %v16365_v10 }
 0x8b1   : > { %8666 = vmatprep.mubr.f32.mxu0 %v15855_v53 }
 0x8b2   : > { %v16371_v55 = vpop.f32.mrb[186].mxu1 }
 0x8b3   : > { %16687 = vst [vmem:[#allocation15_spill] sm:$0xff] %v16371_v55  ;;  %v16374_v13 = vpop.f32.mrb[187].mxu1  ;;  %v16389_v55 = vld [vmem:[#allocation3 + $0x129] sm:$0xff] }
 0x8b4   : > { %8667 = vmatmul.mubr.f32.gmra.mrb[168].mxu0 %v16369_v22  ;;  %16688 = vst [vmem:[#allocation10_spill] sm:$0xff] %v16374_v13  ;;  %v7578_v13 = vld [vmem:[#allocation3 + $0x1a2] sm:$0xff] }
 0x8b5   : > { %8671 = vmatprep.mubr.f32.mxu0 %v15859_v14  ;;  %v16393_v14 = vld [vmem:[#allocation3 + $0x139] sm:$0xff] }
 0x8b8   : > { %8672 = vmatmul.mubr.f32.gmra.mrb[170].mxu0 %v16377_v36 }
 0x8b9   : > { %8676 = vmatprep.mubr.f32.mxu0 %v15873_v39  ;;  %v16397_v39 = vld [vmem:[#allocation3 + $0x141] sm:$0xff] }
 0x8ba   : > { %v16383_v43 = vpop.f32.mrb[188].mxu1 }
 0x8bb   : > { %16689 = vst [vmem:[#allocation7_spill] sm:$0xff] %v16383_v43  ;;  %v16386_v53 = vpop.f32.mrb[189].mxu1  ;;  %v16401_v43 = vld [vmem:[#allocation3 + $0x151] sm:$0xff] }
 0x8bc   : > { %8677 = vmatmul.mubr.f32.gmra.mrb[172].mxu0 %v16381_v17  ;;  %16690 = vst [vmem:[#allocation14_spill] sm:$0xff] %v16386_v53  ;;  %v16694_v53 = vld [vmem:[#allocation16_spill] sm:$0xff] }
 0x8bd   : > { %8681 = vmatprep.mubr.f32.mxu0 %v16683_v56  ;;  %v16691_v56 = vld [vmem:[#allocation9_spill] sm:$0xff] }
 0x8c0   : > { %8682 = vmatmul.mubr.f32.gmra.mrb[174].mxu0 %v16389_v55 }
 0x8c1   : > { %8686 = vmatprep.mubr.f32.mxu0 %v16684_v42  ;;  %v16692_v42 = vld [vmem:[#allocation8_spill] sm:$0xff] }
 0x8c4   : > { %8687 = vmatmul.mubr.f32.gmra.mrb[176].mxu0 %v16393_v14 }
 0x8c5   : > { %8691 = vmatprep.mubr.f32.mxu0 %v16685_v5  ;;  %v16693_v5 = vld [vmem:[#allocation5_spill] sm:$0xff] }
 0x8c8   : > { %8692 = vmatmul.mubr.f32.gmra.mrb[178].mxu0 %v16397_v39 }
 0x8c9   : > { %8696 = vmatprep.mubr.f32.mxu0 %v15920_v3  ;;  %v7577_v3 = vld [vmem:[#allocation3 + $0x19a] sm:$0xff] }
 0x8ca   : > { %10293 = vmatprep.mubr.f32.mxu1 %v7577_v3  ;;  %v7514_v3 = vld [vmem:[#allocation3 + $0x1a1] sm:$0xff] }
 0x8cb   : > { %10294 = vmatmul.mubr.f32.gmra.mrb[190].mxu1 %v7578_v13  ;;  %v7443_v13 = vld [vmem:[#allocation3 + $0x150] sm:$0xff] }
 0x8cc   : > { %8697 = vmatmul.mubr.f32.gmra.mrb[180].mxu0 %v16401_v43 }
 0x8cd   : > { %8701 = vmatprep.mubr.f32.mxu0 %v15924_v50  ;;  %v16695_v50 = vld [vmem:[#allocation13_spill] sm:$0xff] }
 0x8d0   : > { %8702 = vmatmul.mubr.f32.gmra.mrb[182].mxu0 %v16691_v56  ;;  %v7509_v56 = vld [vmem:[#allocation3 + $0x169] sm:$0xff] }
 0x8d1   : > { %8706 = vmatprep.mubr.f32.mxu0 %v15953_v59  ;;  %v7419_v59 = vld [vmem:[#allocation3 + $0x30] sm:$0xff] }
 0x8d4   : > { %8707 = vmatmul.mubr.f32.gmra.mrb[184].mxu0 %v16692_v42  ;;  %v7510_v42 = vld [vmem:[#allocation3 + $0x171] sm:$0xff] }
 0x8d5   : > { %8711 = vmatprep.mubr.f32.mxu0 %v16686_v0  ;;  %v7420_v0 = vld [vmem:[#allocation3 + $0x38] sm:$0xff] }
 0x8d8   : > { %8712 = vmatmul.mubr.f32.gmra.mrb[186].mxu0 %v16693_v5  ;;  %v7511_v5 = vld [vmem:[#allocation3 + $0x181] sm:$0xff] }
 0x8d9   : > { %8716 = vmatprep.mubr.f32.mxu0 %v15977_v19  ;;  %v7421_v19 = vld [vmem:[#allocation3 + $0x48] sm:$0xff] }
 0x8dc   : > { %8717 = vmatmul.mubr.f32.gmra.mrb[188].mxu0 %v16694_v53  ;;  %v7422_v53 = vld [vmem:[#allocation3 + $0x50] sm:$0xff] }
 0x8dd   : > { %8721 = vmatprep.mubr.f32.mxu0 %v15979_v8  ;;  %v7423_v8 = vld [vmem:[#allocation3 + $0x60] sm:$0xff] }
 0x8e0   : > { %8722 = vmatmul.mubr.f32.gmra.mrb[190].mxu0 %v16695_v50  ;;  %v12133_v50 = vld [vmem:[#allocation2] sm:$0xff] }
 0x8e1   : > { %8791 = vmatprep.mubr.f32.mxu0 %v16191_v15  ;;  %v7424_v15 = vld [vmem:[#allocation3 + $0x68] sm:$0xff] }
 0x8e4   : > { %8792 = vmatmul.mubr.f32.vlgmr.msra.gmra.mrb[128].mxu0 %v7419_v59 }
 0x8e5   : > { %8796 = vmatprep.mubr.f32.mxu0 %v16205_v31  ;;  %v7425_v31 = vld [vmem:[#allocation3 + $0x78] sm:$0xff] }
 0x8e8   : > { %8797 = vmatmul.mubr.f32.gmra.mrb[130].mxu0 %v7420_v0 }
 0x8e9   : > { %8801 = vmatprep.mubr.f32.mxu0 %v16215_v37  ;;  %v7426_v37 = vld [vmem:[#allocation3 + $0x80] sm:$0xff] }
 0x8ec   : > { %8802 = vmatmul.mubr.f32.gmra.mrb[132].mxu0 %v7421_v19 }
 0x8ed   : > { %8806 = vmatprep.mubr.f32.mxu0 %v16229_v4  ;;  %v7427_v4 = vld [vmem:[#allocation3 + $0x90] sm:$0xff] }
 0x8f0   : > { %8807 = vmatmul.mubr.f32.gmra.mrb[134].mxu0 %v7422_v53 }
 0x8f1   : > { %8811 = vmatprep.mubr.f32.mxu0 %v16239_v49  ;;  %v7428_v49 = vld [vmem:[#allocation3 + $0x98] sm:$0xff] }
 0x8f4   : > { %8812 = vmatmul.mubr.f32.gmra.mrb[136].mxu0 %v7423_v8 }
 0x8f5   : > { %8816 = vmatprep.mubr.f32.mxu0 %v16253_v11  ;;  %v7429_v11 = vld [vmem:[#allocation3 + $0xa8] sm:$0xff] }
 0x8f8   : > { %8817 = vmatmul.mubr.f32.gmra.mrb[138].mxu0 %v7424_v15 }
 0x8f9   : > { %8821 = vmatprep.mubr.f32.mxu0 %v16263_v63  ;;  %v7430_v63 = vld [vmem:[#allocation3 + $0xb0] sm:$0xff] }
 0x8fc   : > { %8822 = vmatmul.mubr.f32.gmra.mrb[140].mxu0 %v7425_v31 }
 0x8fd   : > { %8826 = vmatprep.mubr.f32.mxu0 %v16277_v20  ;;  %v7431_v20 = vld [vmem:[#allocation3 + $0xc0] sm:$0xff] }
 0x900   : > { %8827 = vmatmul.mubr.f32.gmra.mrb[142].mxu0 %v7426_v37 }
 0x901   : > { %8831 = vmatprep.mubr.f32.mxu0 %v16287_v57  ;;  %v7432_v57 = vld [vmem:[#allocation3 + $0xc8] sm:$0xff] }
 0x904   : > { %8832 = vmatmul.mubr.f32.gmra.mrb[144].mxu0 %v7427_v4 }
 0x905   : > { %8836 = vmatprep.mubr.f32.mxu0 %v16301_v23  ;;  %v7433_v23 = vld [vmem:[#allocation3 + $0xd8] sm:$0xff] }
 0x908   : > { %8837 = vmatmul.mubr.f32.gmra.mrb[146].mxu0 %v7428_v49 }
 0x909   : > { %8841 = vmatprep.mubr.f32.mxu0 %v16311_v6  ;;  %v7434_v6 = vld [vmem:[#allocation3 + $0xe0] sm:$0xff] }
 0x90c   : > { %8842 = vmatmul.mubr.f32.gmra.mrb[148].mxu0 %v7429_v11 }
 0x90d   : > { %8846 = vmatprep.mubr.f32.mxu0 %v16325_v52  ;;  %v7435_v52 = vld [vmem:[#allocation3 + $0xf0] sm:$0xff] }
 0x910   : > { %8847 = vmatmul.mubr.f32.gmra.mrb[150].mxu0 %v7430_v63 }
 0x911   : > { %8851 = vmatprep.mubr.f32.mxu0 %v16335_v35  ;;  %v7436_v35 = vld [vmem:[#allocation3 + $0xf8] sm:$0xff] }
 0x914   : > { %8852 = vmatmul.mubr.f32.gmra.mrb[152].mxu0 %v7431_v20 }
 0x915   : > { %8856 = vmatprep.mubr.f32.mxu0 %v16343_v62  ;;  %v7437_v62 = vld [vmem:[#allocation3 + $0x108] sm:$0xff] }
 0x918   : > { %8857 = vmatmul.mubr.f32.gmra.mrb[154].mxu0 %v7432_v57 }
 0x919   : > { %8861 = vmatprep.mubr.f32.mxu0 %v16346_v54  ;;  %v7438_v54 = vld [vmem:[#allocation3 + $0x110] sm:$0xff] }
 0x91c   : > { %8862 = vmatmul.mubr.f32.gmra.mrb[156].mxu0 %v7433_v23 }
 0x91d   : > { %8866 = vmatprep.mubr.f32.mxu0 %v16353_v27  ;;  %v7439_v27 = vld [vmem:[#allocation3 + $0x120] sm:$0xff] }
 0x920   : > { %8867 = vmatmul.mubr.f32.gmra.mrb[158].mxu0 %v7434_v6 }
 0x921   : > { %8871 = vmatprep.mubr.f32.mxu0 %v16357_v9  ;;  %v7440_v9 = vld [vmem:[#allocation3 + $0x128] sm:$0xff] }
 0x924   : > { %8872 = vmatmul.mubr.f32.gmra.mrb[160].mxu0 %v7435_v52 }
 0x925   : > { %8876 = vmatprep.mubr.f32.mxu0 %v16365_v10  ;;  %v7441_v10 = vld [vmem:[#allocation3 + $0x138] sm:$0xff] }
 0x928   : > { %8877 = vmatmul.mubr.f32.gmra.mrb[162].mxu0 %v7436_v35 }
 0x929   : > { %8881 = vmatprep.mubr.f32.mxu0 %v16369_v22  ;;  %v7442_v22 = vld [vmem:[#allocation3 + $0x140] sm:$0xff] }
 0x92c   : > { %8882 = vmatmul.mubr.f32.gmra.mrb[164].mxu0 %v7437_v62 }
 0x92d   : > { %8886 = vmatprep.mubr.f32.mxu0 %v16377_v36  ;;  %v7508_v36 = vld [vmem:[#allocation3 + $0x159] sm:$0xff] }
 0x930   : > { %8887 = vmatmul.mubr.f32.gmra.mrb[166].mxu0 %v7438_v54 }
 0x931   : > { %8891 = vmatprep.mubr.f32.mxu0 %v16381_v17  ;;  %v7444_v17 = vld [vmem:[#allocation3 + $0x158] sm:$0xff] }
 0x934   : > { %8892 = vmatmul.mubr.f32.gmra.mrb[168].mxu0 %v7439_v27 }
 0x935   : > { %8896 = vmatprep.mubr.f32.mxu0 %v16389_v55  ;;  %v7445_v55 = vld [vmem:[#allocation3 + $0x168] sm:$0xff] }
 0x938   : > { %8897 = vmatmul.mubr.f32.gmra.mrb[170].mxu0 %v7440_v9 }
 0x939   : > { %8901 = vmatprep.mubr.f32.mxu0 %v16393_v14  ;;  %v7446_v14 = vld [vmem:[#allocation3 + $0x170] sm:$0xff] }
 0x93c   : > { %8902 = vmatmul.mubr.f32.gmra.mrb[172].mxu0 %v7441_v10 }
 0x93d   : > { %8906 = vmatprep.mubr.f32.mxu0 %v16397_v39  ;;  %v7512_v39 = vld [vmem:[#allocation3 + $0x189] sm:$0xff] }
 0x940   : > { %8907 = vmatmul.mubr.f32.gmra.mrb[174].mxu0 %v7442_v22 }
 0x941   : > { %8911 = vmatprep.mubr.f32.mxu0 %v16401_v43  ;;  %v7513_v43 = vld [vmem:[#allocation3 + $0x199] sm:$0xff] }
 0x944   : > { %8912 = vmatmul.mubr.f32.gmra.mrb[176].mxu0 %v7443_v13 }
 0x945   : > { %8916 = vmatprep.mubr.f32.mxu0 %v7508_v36 }
 0x948   : > { %8917 = vmatmul.mubr.f32.gmra.mrb[178].mxu0 %v7444_v17 }
 0x949   : > { %8921 = vmatprep.mubr.f32.mxu0 %v7509_v56 }
 0x94c   : > { %8922 = vmatmul.mubr.f32.gmra.mrb[180].mxu0 %v7445_v55 }
 0x94d   : > { %8926 = vmatprep.mubr.f32.mxu0 %v7510_v42 }
 0x950   : > { %8927 = vmatmul.mubr.f32.gmra.mrb[182].mxu0 %v7446_v14 }
 0x951   : > { %8931 = vmatprep.mubr.f32.mxu0 %v7511_v5 }
 0x954   : > { %8932 = vmatmul.mubr.f32.gmra.mrb[184].mxu0 %v16147_v2  ;;  %v16448_v2 = vld [vmem:[%s16557_s2 + $0x3] ss:$0 sm:$0xff] }
 0x955   : > { %8936 = vmatprep.mubr.f32.mxu0 %v7512_v39 }
 0x958   : > { %8937 = vmatmul.mubr.f32.gmra.mrb[186].mxu0 %v16153_v61 }
 0x959   : > { %8941 = vmatprep.mubr.f32.mxu0 %v7513_v43 }
 0x95c   : > { %8942 = vmatmul.mubr.f32.gmra.mrb[188].mxu0 %v12133_v50 }
 0x95d   : > { %8946 = vmatprep.mubr.f32.mxu0 %v7514_v3 }
 0x960   : > { %8947 = vmatmul.mubr.f32.gmra.mrb[190].mxu0 %v12133_v50 }
 0x99e   : > { %v16441_v59 = vpop.f32.mrb[190].mxu1 }
 0x99f   : > { %v16443_v0 = vpop.f32.mrb[191].mxu1 }
 0x9b7   : > { %v8793_v19 = vpop.f32.mrb[128].mxu0 }
 0x9b8   : > { %v11288_v53 = vadd.f32 %v16448_v2, %v8793_v19  ;;  %v8795_v8 = vpop.f32.mrb[129].mxu0 }
 0x9ba   : > { %v9019_v61 = vadd.f32 %v11288_v53, %v16135_v25 }
 0x9bb   : > { %v8798_v15 = vpop.f32.mrb[130].mxu0 }
 0x9bc   : > { %v9177_v31 = vmax.f32 %v9019_v61, 0.0  ;;  %v11289_v37 = vadd.f32 %v16448_v2, %v8798_v15  ;;  %v8800_v4 = vpop.f32.mrb[131].mxu0 }
 0x9be   : > { %9209 = vst [vmem:[%s16456_s13] sm:$0xff] %v9177_v31  ;;  %v9024_v49 = vadd.f32 %v11289_v37, %v16132_v24 }
 0x9bf   : > { %v8803_v11 = vpop.f32.mrb[132].mxu0 }
 0x9c0   : > { %v9178_v63 = vmax.f32 %v9024_v49, 0.0  ;;  %v11290_v25 = vadd.f32 %v16448_v2, %v8803_v11  ;;  %v8805_v20 = vpop.f32.mrb[133].mxu0 }
 0x9c2   : > { %9210 = vst [vmem:[%s16456_s13 + $0x8] sm:$0xff] %v9178_v63  ;;  %v9029_v57 = vadd.f32 %v11290_v25, %v16143_v46 }
 0x9c3   : > { %v8808_v23 = vpop.f32.mrb[134].mxu0 }
 0x9c4   : > { %v9179_v6 = vmax.f32 %v9029_v57, 0.0  ;;  %v11291_v52 = vadd.f32 %v16448_v2, %v8808_v23  ;;  %v8810_v35 = vpop.f32.mrb[135].mxu0 }
 0x9c6   : > { %9211 = vst [vmem:[%s16456_s13 + $0x10] sm:$0xff] %v9179_v6  ;;  %v9034_v62 = vadd.f32 %v11291_v52, %v16140_v12 }
 0x9c7   : > { %v8813_v54 = vpop.f32.mrb[136].mxu0 }
 0x9c8   : > { %v9180_v24 = vmax.f32 %v9034_v62, 0.0  ;;  %v11292_v27 = vadd.f32 %v16448_v2, %v8813_v54  ;;  %v8815_v9 = vpop.f32.mrb[137].mxu0 }
 0x9ca   : > { %9212 = vst [vmem:[%s16456_s13 + $0x18] sm:$0xff] %v9180_v24  ;;  %v9039_v10 = vadd.f32 %v11292_v27, %v16155_v44 }
 0x9cb   : > { %v8818_v22 = vpop.f32.mrb[138].mxu0 }
 0x9cc   : > { %v9181_v46 = vmax.f32 %v9039_v10, 0.0  ;;  %v11293_v13 = vadd.f32 %v16448_v2, %v8818_v22  ;;  %v8820_v36 = vpop.f32.mrb[139].mxu0 }
 0x9ce   : > { %9213 = vst [vmem:[%s16456_s13 + $0x20] sm:$0xff] %v9181_v46  ;;  %v9044_v17 = vadd.f32 %v11293_v13, %v16150_v51 }
 0x9cf   : > { %v8823_v56 = vpop.f32.mrb[140].mxu0 }
 0x9d0   : > { %v9182_v12 = vmax.f32 %v9044_v17, 0.0  ;;  %v11294_v55 = vadd.f32 %v16448_v2, %v8823_v56  ;;  %v8825_v42 = vpop.f32.mrb[141].mxu0 }
 0x9d2   : > { %9214 = vst [vmem:[%s16456_s13 + $0x28] sm:$0xff] %v9182_v12  ;;  %v9049_v14 = vadd.f32 %v11294_v55, %v16174_v21 }
 0x9d3   : > { %v8828_v5 = vpop.f32.mrb[142].mxu0 }
 0x9d4   : > { %v9183_v44 = vmax.f32 %v9049_v14, 0.0  ;;  %v11295_v39 = vadd.f32 %v16448_v2, %v8828_v5  ;;  %v8830_v43 = vpop.f32.mrb[143].mxu0 }
 0x9d6   : > { %9215 = vst [vmem:[%s16456_s13 + $0x30] sm:$0xff] %v9183_v44  ;;  %v9054_v3 = vadd.f32 %v11295_v39, %v16172_v1 }
 0x9d7   : > { %v8833_v50 = vpop.f32.mrb[144].mxu0 }
 0x9d8   : > { %v9184_v51 = vmax.f32 %v9054_v3, 0.0  ;;  %v11296_v19 = vadd.f32 %v16448_v2, %v8833_v50  ;;  %v8835_v53 = vpop.f32.mrb[145].mxu0 }
 0x9da   : > { %9216 = vst [vmem:[%s16456_s13 + $0x38] sm:$0xff] %v9184_v51  ;;  %v9059_v8 = vadd.f32 %v11296_v19, %v16196_v26 }
 0x9db   : > { %v8838_v61 = vpop.f32.mrb[146].mxu0 }
 0x9dc   : > { %v9185_v21 = vmax.f32 %v9059_v8, 0.0  ;;  %v11297_v15 = vadd.f32 %v16448_v2, %v8838_v61  ;;  %v8840_v31 = vpop.f32.mrb[147].mxu0 }
 0x9de   : > { %9217 = vst [vmem:[%s16456_s13 + $0x40] sm:$0xff] %v9185_v21  ;;  %v9064_v37 = vadd.f32 %v11297_v15, %v16193_v33 }
 0x9df   : > { %v8843_v4 = vpop.f32.mrb[148].mxu0 }
 0x9e0   : > { %v9186_v1 = vmax.f32 %v9064_v37, 0.0  ;;  %v11298_v49 = vadd.f32 %v16448_v2, %v8843_v4  ;;  %v8845_v11 = vpop.f32.mrb[149].mxu0 }
 0x9e2   : > { %9218 = vst [vmem:[%s16456_s13 + $0x48] sm:$0xff] %v9186_v1  ;;  %v9069_v63 = vadd.f32 %v11298_v49, %v16220_v28 }
 0x9e3   : > { %v8848_v25 = vpop.f32.mrb[150].mxu0 }
 0x9e4   : > { %v9187_v26 = vmax.f32 %v9069_v63, 0.0  ;;  %v11299_v20 = vadd.f32 %v16448_v2, %v8848_v25  ;;  %v8850_v57 = vpop.f32.mrb[151].mxu0 }
 0x9e6   : > { %9219 = vst [vmem:[%s16456_s13 + $0x50] sm:$0xff] %v9187_v26  ;;  %v9074_v23 = vadd.f32 %v11299_v20, %v16217_v18 }
 0x9e7   : > { %v8853_v6 = vpop.f32.mrb[152].mxu0 }
 0x9e8   : > { %v9188_v33 = vmax.f32 %v9074_v23, 0.0  ;;  %v11300_v52 = vadd.f32 %v16448_v2, %v8853_v6  ;;  %v8855_v35 = vpop.f32.mrb[153].mxu0 }
 0x9ea   : > { %9220 = vst [vmem:[%s16456_s13 + $0x58] sm:$0xff] %v9188_v33  ;;  %v9079_v62 = vadd.f32 %v11300_v52, %v16244_v30 }
 0x9eb   : > { %v8858_v54 = vpop.f32.mrb[154].mxu0 }
 0x9ec   : > { %v9189_v28 = vmax.f32 %v9079_v62, 0.0  ;;  %v11301_v24 = vadd.f32 %v16448_v2, %v8858_v54  ;;  %v8860_v27 = vpop.f32.mrb[155].mxu0 }
 0x9ee   : > { %9221 = vst [vmem:[%s16456_s13 + $0x60] sm:$0xff] %v9189_v28  ;;  %v9084_v9 = vadd.f32 %v11301_v24, %v16241_v41 }
 0x9ef   : > { %v8863_v10 = vpop.f32.mrb[156].mxu0 }
 0x9f0   : > { %v9190_v18 = vmax.f32 %v9084_v9, 0.0  ;;  %v11302_v22 = vadd.f32 %v16448_v2, %v8863_v10  ;;  %v8865_v46 = vpop.f32.mrb[157].mxu0 }
 0x9f2   : > { %9222 = vst [vmem:[%s16456_s13 + $0x68] sm:$0xff] %v9190_v18  ;;  %v9089_v13 = vadd.f32 %v11302_v22, %v16268_v7 }
 0x9f3   : > { %v8868_v36 = vpop.f32.mrb[158].mxu0 }
 0x9f4   : > { %v9191_v30 = vmax.f32 %v9089_v13, 0.0  ;;  %v11303_v17 = vadd.f32 %v16448_v2, %v8868_v36  ;;  %v8870_v56 = vpop.f32.mrb[159].mxu0  ;;  %v16696_v36 = vld [vmem:[#allocation10_spill] sm:$0xff] }
 0x9f6   : > { %9223 = vst [vmem:[%s16456_s13 + $0x70] sm:$0xff] %v9191_v30  ;;  %v9094_v12 = vadd.f32 %v11303_v17, %v16265_v47 }
 0x9f7   : > { %v8873_v55 = vpop.f32.mrb[160].mxu0 }
 0x9f8   : > { %v9192_v41 = vmax.f32 %v9094_v12, 0.0  ;;  %v11304_v42 = vadd.f32 %v16448_v2, %v8873_v55  ;;  %v8875_v14 = vpop.f32.mrb[161].mxu0  ;;  %v16697_v55 = vld [vmem:[#allocation15_spill] sm:$0xff] }
 0x9fa   : > { %9224 = vst [vmem:[%s16456_s13 + $0x78] sm:$0xff] %v9192_v41  ;;  %v9099_v5 = vadd.f32 %v11304_v42, %v16292_v34 }
 0x9fb   : > { %v8878_v44 = vpop.f32.mrb[162].mxu0 }
 0x9fc   : > { %v9193_v7 = vmax.f32 %v9099_v5, 0.0  ;;  %v11305_v39 = vadd.f32 %v16448_v2, %v8878_v44  ;;  %v8880_v43 = vpop.f32.mrb[163].mxu0  ;;  %v16698_v44 = vld [vmem:[#allocation14_spill] sm:$0xff] }
 0x9fe   : > { %9225 = vst [vmem:[%s16456_s13 + $0x80] sm:$0xff] %v9193_v7  ;;  %v9104_v3 = vadd.f32 %v11305_v39, %v16289_v40 }
 0x9ff   : > { %v8883_v50 = vpop.f32.mrb[164].mxu0 }
 0xa00   : > { %v9194_v47 = vmax.f32 %v9104_v3, 0.0  ;;  %v11306_v51 = vadd.f32 %v16448_v2, %v8883_v50  ;;  %v8885_v19 = vpop.f32.mrb[165].mxu0 }
 0xa02   : > { %9226 = vst [vmem:[%s16456_s13 + $0x88] sm:$0xff] %v9194_v47  ;;  %v9109_v53 = vadd.f32 %v11306_v51, %v16316_v58  ;;  %v16699_v47 = vld [vmem:[#allocation7_spill] sm:$0xff] }
 0xa03   : > { %v8888_v8 = vpop.f32.mrb[166].mxu0 }
 0xa04   : > { %v9195_v34 = vmax.f32 %v9109_v53, 0.0  ;;  %v11307_v61 = vadd.f32 %v16448_v2, %v8888_v8  ;;  %v8890_v21 = vpop.f32.mrb[167].mxu0 }
 0xa06   : > { %9227 = vst [vmem:[%s16456_s13 + $0x90] sm:$0xff] %v9195_v34  ;;  %v9114_v15 = vadd.f32 %v11307_v61, %v16313_v29 }
 0xa07   : > { %v8893_v31 = vpop.f32.mrb[168].mxu0 }
 0xa08   : > { %v9196_v40 = vmax.f32 %v9114_v15, 0.0  ;;  %v11308_v37 = vadd.f32 %v16448_v2, %v8893_v31  ;;  %v8895_v4 = vpop.f32.mrb[169].mxu0 }
 0xa0a   : > { %9228 = vst [vmem:[%s16456_s13 + $0x98] sm:$0xff] %v9196_v40  ;;  %v9119_v1 = vadd.f32 %v11308_v37, %v16340_v45 }
 0xa0b   : > { %v8898_v49 = vpop.f32.mrb[170].mxu0 }
 0xa0c   : > { %v9197_v58 = vmax.f32 %v9119_v1, 0.0  ;;  %v11309_v11 = vadd.f32 %v16448_v2, %v8898_v49  ;;  %v8900_v63 = vpop.f32.mrb[171].mxu0 }
 0xa0e   : > { %9229 = vst [vmem:[%s16456_s13 + $0xa0] sm:$0xff] %v9197_v58  ;;  %v9124_v25 = vadd.f32 %v11309_v11, %v16337_v32 }
 0xa0f   : > { %v8903_v26 = vpop.f32.mrb[172].mxu0 }
 0xa10   : > { %v9198_v29 = vmax.f32 %v9124_v25, 0.0  ;;  %v11310_v20 = vadd.f32 %v16448_v2, %v8903_v26  ;;  %v8905_v57 = vpop.f32.mrb[173].mxu0 }
 0xa12   : > { %9230 = vst [vmem:[%s16456_s13 + $0xa8] sm:$0xff] %v9198_v29  ;;  %v9129_v23 = vadd.f32 %v11310_v20, %v16351_v38 }
 0xa13   : > { %v8908_v6 = vpop.f32.mrb[174].mxu0 }
 0xa14   : > { %v9199_v45 = vmax.f32 %v9129_v23, 0.0  ;;  %v11311_v33 = vadd.f32 %v16448_v2, %v8908_v6  ;;  %v8910_v52 = vpop.f32.mrb[175].mxu0 }
 0xa16   : > { %9231 = vst [vmem:[%s16456_s13 + $0xb0] sm:$0xff] %v9199_v45  ;;  %v9134_v35 = vadd.f32 %v11311_v33, %v16348_v16 }
 0xa17   : > { %v8913_v62 = vpop.f32.mrb[176].mxu0 }
 0xa18   : > { %v9200_v32 = vmax.f32 %v9134_v35, 0.0  ;;  %v11312_v54 = vadd.f32 %v16448_v2, %v8913_v62  ;;  %v8915_v28 = vpop.f32.mrb[177].mxu0 }
 0xa1a   : > { %9232 = vst [vmem:[%s16456_s13 + $0xb8] sm:$0xff] %v9200_v32  ;;  %v9139_v24 = vadd.f32 %v11312_v54, %v16362_v48 }
 0xa1b   : > { %v8918_v27 = vpop.f32.mrb[178].mxu0 }
 0xa1c   : > { %v9201_v38 = vmax.f32 %v9139_v24, 0.0  ;;  %v11313_v9 = vadd.f32 %v16448_v2, %v8918_v27  ;;  %v8920_v10 = vpop.f32.mrb[179].mxu0 }
 0xa1e   : > { %9233 = vst [vmem:[%s16456_s13 + $0xc0] sm:$0xff] %v9201_v38  ;;  %v9144_v18 = vadd.f32 %v11313_v9, %v16359_v60 }
 0xa1f   : > { %v8923_v22 = vpop.f32.mrb[180].mxu0 }
 0xa20   : > { %v9202_v16 = vmax.f32 %v9144_v18, 0.0  ;;  %v11314_v46 = vadd.f32 %v16448_v2, %v8923_v22  ;;  %v8925_v13 = vpop.f32.mrb[181].mxu0 }
 0xa22   : > { %9234 = vst [vmem:[%s16456_s13 + $0xc8] sm:$0xff] %v9202_v16  ;;  %v9149_v30 = vadd.f32 %v11314_v46, %v16696_v36 }
 0xa23   : > { %v8928_v17 = vpop.f32.mrb[182].mxu0 }
 0xa24   : > { %v9203_v48 = vmax.f32 %v9149_v30, 0.0  ;;  %v11315_v56 = vadd.f32 %v16448_v2, %v8928_v17  ;;  %v8930_v12 = vpop.f32.mrb[183].mxu0 }
 0xa26   : > { %9235 = vst [vmem:[%s16456_s13 + $0xd0] sm:$0xff] %v9203_v48  ;;  %v9154_v41 = vadd.f32 %v11315_v56, %v16697_v55 }
 0xa27   : > { %v8933_v42 = vpop.f32.mrb[184].mxu0 }
 0xa28   : > { %v9204_v60 = vmax.f32 %v9154_v41, 0.0  ;;  %v11316_v14 = vadd.f32 %v16448_v2, %v8933_v42  ;;  %v8935_v5 = vpop.f32.mrb[185].mxu0 }
 0xa2a   : > { %9236 = vst [vmem:[%s16456_s13 + $0xd8] sm:$0xff] %v9204_v60  ;;  %v9159_v7 = vadd.f32 %v11316_v14, %v16698_v44 }
 0xa2b   : > { %v8938_v39 = vpop.f32.mrb[186].mxu0 }
 0xa2c   : > { %v9205_v43 = vmax.f32 %v9159_v7, 0.0  ;;  %v11317_v3 = vadd.f32 %v16448_v2, %v8938_v39  ;;  %v8940_v50 = vpop.f32.mrb[187].mxu0 }
 0xa2e   : > { %9237 = vst [vmem:[%s16456_s13 + $0xe0] sm:$0xff] %v9205_v43  ;;  %v9164_v51 = vadd.f32 %v11317_v3, %v16699_v47 }
 0xa2f   : > { %v8943_v19 = vpop.f32.mrb[188].mxu0 }
 0xa30   : > { %v9206_v53 = vmax.f32 %v9164_v51, 0.0  ;;  %v11318_v8 = vadd.f32 %v16448_v2, %v8943_v19  ;;  %v8945_v34 = vpop.f32.mrb[189].mxu0 }
 0xa32   : > { %9238 = vst [vmem:[%s16456_s13 + $0xe8] sm:$0xff] %v9206_v53  ;;  %v9169_v61 = vadd.f32 %v11318_v8, %v16443_v0 }
 0xa33   : > { %v8948_v21 = vpop.f32.mrb[190].mxu0 }
 0xa34   : > { %v9207_v15 = vmax.f32 %v9169_v61, 0.0  ;;  %v11319_v31 = vadd.f32 %v16448_v2, %v8948_v21  ;;  %v8950_v40 = vpop.f32.mrb[191].mxu0 }
 0xa36   : > { %9239 = vst [vmem:[%s16456_s13 + $0xf0] sm:$0xff] %v9207_v15  ;;  %v9174_v37 = vadd.f32 %v11319_v31, %v16441_v59 }
 0xa38   : > { %v9208_v4 = vmax.f32 %v9174_v37, 0.0 }
 0xa3a   : > { %9240 = vst [vmem:[%s16456_s13 + $0xf8] sm:$0xff] %v9208_v4 }
 0xa3b PF: > { %s15_s15 = sadd.s32 1, %s12140_s15  }
 0xa3c   : > { %p12_p4 = scmp.ge.s32.totalorder %s15_s15, 4  }
 0xa3e   :  { %14 = sbr.rel (!%p12_p4) target bundleno = 1 (0x1), region = 84 }

</bundles_post_ra>
